<compile_context>
chip_gen: v7x
topology: tpu7x:2x2x1
jax: 0.10.0
libtpu: 0.0.40
codegen_flags: <defaults>
</compile_context>

<pallas_src>
import functools
import math

import jax
import jax.numpy as jnp
import numpy as np
from jax.experimental import pallas as pl
from jax.experimental.pallas import tpu as pltpu


# --------------------------------------------------------------------------- #
# Kernel 1: row-tiled matmul + bias (torch.nn.Linear)
# --------------------------------------------------------------------------- #
def _linear_kernel(x_ref, w_ref, b_ref, o_ref):
    # x: (TM, K), w: (K, Dp), b: (1, Dp) -> o: (TM, Dp)
    o_ref[...] = (
        jnp.dot(x_ref[...], w_ref[...], preferred_element_type=jnp.float32)
        + b_ref[...]
    ).astype(o_ref.dtype)


def _pick_row_tile(m, target=512):
    """Largest divisor of m that is <= target and a multiple of 8 (else m)."""
    if m <= target:
        return m
    for t in range(target, 0, -1):
        if m % t == 0 and t % 8 == 0:
            return t
    return m


def linear_pallas(x2d, w_t, bias, *, row_tile=512):
    """(M, K) @ (K, D) + (D,) as a row-tiled, double-buffered Pallas matmul."""
    M, K = x2d.shape
    D = w_t.shape[1]

    # Lane-dense output: pad feature dim to a multiple of 128 (full-width
    # stores), slice back afterwards.  K is left as-is (== full array dim).
    Dp = ((D + 127) // 128) * 128
    if Dp != D:
        w_t = jnp.pad(w_t, ((0, 0), (0, Dp - D)))
        bias = jnp.pad(bias, (0, Dp - D))
    b2 = bias.reshape(1, Dp)

    TM = _pick_row_tile(M, row_tile)
    grid = (M // TM,)

    out = pl.pallas_call(
        _linear_kernel,
        out_shape=jax.ShapeDtypeStruct((M, Dp), x2d.dtype),
        grid=grid,
        in_specs=[
            pl.BlockSpec((TM, K), lambda i: (i, 0)),   # streamed row tiles
            pl.BlockSpec((K, Dp), lambda i: (0, 0)),   # weight resident
            pl.BlockSpec((1, Dp), lambda i: (0, 0)),   # bias resident
        ],
        out_specs=pl.BlockSpec((TM, Dp), lambda i: (i, 0)),
        compiler_params=pltpu.CompilerParams(
            dimension_semantics=("parallel",),
        ),
        cost_estimate=pl.CostEstimate(
            flops=2 * M * K * Dp,
            transcendentals=0,
            bytes_accessed=4 * (M * K + K * Dp + Dp + M * Dp),
        ),
    )(x2d, w_t, b2)
    return out[:, :D] if Dp != D else out


# --------------------------------------------------------------------------- #
# Kernel 2: fused window attention (QK^T + Earth bias + mask, softmax, @V)
# --------------------------------------------------------------------------- #
def _window_attention_kernel(q_ref, k_ref, v_ref, bias_ref, mask_ref, o_ref,
                             *, scale):
    wb, h, n, dk = q_ref.shape
    q = q_ref[...].astype(jnp.float32).reshape(wb * h, n, dk) * scale
    k = k_ref[...].astype(jnp.float32).reshape(wb * h, n, dk)
    v = v_ref[...].astype(jnp.float32).reshape(wb * h, n, dk)

    s = jnp.einsum("bnd,bmd->bnm", q, k, preferred_element_type=jnp.float32)
    s = s.reshape(wb, h, n, n)
    s = s + bias_ref[...].astype(jnp.float32)
    s = s + mask_ref[...].astype(jnp.float32)[:, None, :, :]

    s_max = jnp.max(s, axis=-1, keepdims=True)
    p = jnp.exp(s - s_max)
    p = p / jnp.sum(p, axis=-1, keepdims=True)

    o = jnp.einsum("bnm,bmd->bnd", p.reshape(wb * h, n, n), v,
                   preferred_element_type=jnp.float32)
    o_ref[...] = o.reshape(wb, h, n, dk).astype(o_ref.dtype)


def window_attention(q, k, v, bias_tw, mask, *, scale, type_of_windows):
    """q,k,v: (B, H, N, dk); bias_tw: (tw, H, N, N); mask: (B, N, N) or None."""
    B, H, N, dk = q.shape
    tw = type_of_windows

    # Windows per grid step: must divide both B (grid) and tw (bias period);
    # capped so the (WB, H, N, N) bias block stays a few MB per double buffer
    # (safe under v7x's smaller VMEM).
    bias_row_bytes = H * N * N * 4
    cap = max(1, min(8, (4 * 1024 * 1024) // max(1, bias_row_bytes)))
    g = math.gcd(B, tw)
    WB = 1
    for t in range(min(g, cap), 0, -1):
        if g % t == 0:
            WB = t
            break
    tw_blocks = tw // WB
    grid = (B // WB,)

    if mask is None:
        mask_arr = jnp.zeros((1, N, N), q.dtype)
        mask_spec = pl.BlockSpec((1, N, N), lambda i: (0, 0, 0))
    else:
        mask_arr = mask.astype(q.dtype)
        mask_spec = pl.BlockSpec((WB, N, N), lambda i: (i, 0, 0))

    kernel = functools.partial(_window_attention_kernel, scale=scale)
    flops = 4 * B * H * N * N * dk + 6 * B * H * N * N
    bytes_accessed = 4 * (4 * B * H * N * dk + tw * H * N * N
                          + int(mask_arr.size))

    return pl.pallas_call(
        kernel,
        out_shape=jax.ShapeDtypeStruct((B, H, N, dk), q.dtype),
        grid=grid,
        in_specs=[
            pl.BlockSpec((WB, H, N, dk), lambda i: (i, 0, 0, 0)),
            pl.BlockSpec((WB, H, N, dk), lambda i: (i, 0, 0, 0)),
            pl.BlockSpec((WB, H, N, dk), lambda i: (i, 0, 0, 0)),
            # Earth bias repeats every type_of_windows windows (reference
            # concat/slice loop == bias index b % type_of_windows).
            pl.BlockSpec((WB, H, N, N), lambda i: (i % tw_blocks, 0, 0, 0)),
            mask_spec,
        ],
        out_specs=pl.BlockSpec((WB, H, N, dk), lambda i: (i, 0, 0, 0)),
        compiler_params=pltpu.CompilerParams(
            dimension_semantics=("parallel",),
        ),
        cost_estimate=pl.CostEstimate(
            flops=flops,
            transcendentals=B * H * N * N,
            bytes_accessed=bytes_accessed,
        ),
    )(q, k, v, bias_tw, mask_arr)


# --------------------------------------------------------------------------- #
# Position index (replicates EarthAttention3D._construct_index, numpy/static)
# --------------------------------------------------------------------------- #
def _construct_position_index(window_size):
    wz, wh, ww = window_size
    coords_zi = np.arange(wz)
    coords_zj = -np.arange(wz) * wz
    coords_hi = np.arange(wh)
    coords_hj = -np.arange(wh) * wh
    coords_w = np.arange(ww)
    coords_1 = np.stack(np.meshgrid(coords_zi, coords_hi, coords_w, indexing="ij"))
    coords_2 = np.stack(np.meshgrid(coords_zj, coords_hj, coords_w, indexing="ij"))
    cf1 = coords_1.reshape(3, -1)
    cf2 = coords_2.reshape(3, -1)
    coords = cf1[:, :, None] - cf2[:, None, :]
    coords = coords.transpose(1, 2, 0).copy()
    coords[:, :, 2] += ww - 1
    coords[:, :, 1] *= 2 * ww - 1
    coords[:, :, 0] *= (2 * ww - 1) * wh * wh
    return coords.sum(-1).reshape(-1).astype(np.int32)


# --------------------------------------------------------------------------- #
# Forward (EarthAttention3D.forward, inference)
# --------------------------------------------------------------------------- #
def earth_attention_3d_forward(cfg, params, x, mask=None):
    """x: (B, N, dim) with N = prod(window_size); mask: (B, N, N) or None."""
    dim = cfg["dim"]
    heads = cfg["heads"]
    wz, wh, ww = cfg["window_size"]
    tw = cfg["type_of_windows"]
    N = wz * wh * ww
    dk = dim // heads
    scale = dk ** (-0.5)
    B = x.shape[0]

    # linear1: QKV projection
    qkv = linear_pallas(x.reshape(B * N, dim), params["w1"].T, params["b1"])
    qkv = qkv.reshape(B, N, 3, heads, dk).transpose(2, 0, 3, 1, 4)
    q, k, v = qkv[0], qkv[1], qkv[2]                    # each (B, heads, N, dk)

    # Earth-specific bias: parameter-sized gather done once in plain JAX,
    # then streamed per window block inside the attention kernel.
    bias = params["earth_specific_bias"][params["position_index"]]   # (N*N, tw, H)
    bias = bias.reshape(N, N, tw, heads).transpose(2, 3, 0, 1)        # (tw, H, N, N)

    attn_out = window_attention(q, k, v, bias, mask,
                                scale=scale, type_of_windows=tw)      # (B, H, N, dk)

    out = attn_out.transpose(0, 2, 1, 3).reshape(B * N, dim)
    out = linear_pallas(out, params["w2"].T, params["b2"])
    # TODO(synk): nn.Dropout omitted (inference identity); training-mode dropout
    # would use pltpu.prng_seed / pltpu.prng_random_bits inside the kernels.
    return out.reshape(B, N, dim)


# --------------------------------------------------------------------------- #
# Pure-JAX reference for correctness
# --------------------------------------------------------------------------- #
def _ref_forward(cfg, params, x, mask):
    dim, heads = cfg["dim"], cfg["heads"]
    wz, wh, ww = cfg["window_size"]
    tw = cfg["type_of_windows"]
    N = wz * wh * ww
    B = x.shape[0]
    dk = dim // heads
    scale = dk ** (-0.5)
    hp = jax.lax.Precision.HIGHEST

    x1 = jnp.einsum("bnd,od->bno", x, params["w1"], precision=hp) + params["b1"]
    qkv = x1.reshape(B, N, 3, heads, dk).transpose(2, 0, 3, 1, 4)
    q, k, v = qkv[0] * scale, qkv[1], qkv[2]
    attn = jnp.einsum("bhnd,bhmd->bhnm", q, k, precision=hp)

    bias = params["earth_specific_bias"][params["position_index"]]
    bias = bias.reshape(N, N, tw, heads).transpose(2, 3, 0, 1)
    attn = attn + bias[jnp.arange(B) % tw]
    if mask is not None:
        attn = attn + mask[:, None, :, :]
    attn = jax.nn.softmax(attn, axis=-1)

    out = jnp.einsum("bhnm,bhmd->bhnd", attn, v, precision=hp)
    out = out.transpose(0, 2, 1, 3).reshape(B, N, dim)
    out = jnp.einsum("bnd,od->bno", out, params["w2"], precision=hp) + params["b2"]
    return out


# --------------------------------------------------------------------------- #
# main
# --------------------------------------------------------------------------- #
if __name__ == "__main__":
    key = jax.random.PRNGKey(0)
    ks = jax.random.split(key, 8)

    dim, heads = 32, 4
    dropout_rate = 0.0
    window_size = (2, 4, 4)
    wz, wh, ww = window_size
    # The reference module hardcodes input_shape = [8, 360, 181].
    input_shape = (8, 360, 181)
    type_of_windows = (input_shape[0] // wz) * (input_shape[1] // wh)

    N = wz * wh * ww            # 32 tokens per window
    B = 32                      # windows in this small test batch

    cfg = {"dim": dim, "heads": heads, "window_size": window_size,
           "type_of_windows": type_of_windows, "dropout_rate": dropout_rate}

    bias_rows = (2 * ww - 1) * wh * wh * wz * wz
    params = {
        "w1": 0.05 * jax.random.normal(ks[0], (3 * dim, dim), jnp.float32),
        "b1": 0.05 * jax.random.normal(ks[1], (3 * dim,), jnp.float32),
        "w2": 0.05 * jax.random.normal(ks[2], (dim, dim), jnp.float32),
        "b2": 0.05 * jax.random.normal(ks[3], (dim,), jnp.float32),
        # trunc_normal_(std=0.02) approximated with a plain normal draw.
        "earth_specific_bias": 0.02 * jax.random.normal(
            ks[4], (bias_rows, type_of_windows, heads), jnp.float32),
        "position_index": jnp.asarray(_construct_position_index(window_size)),
    }

    x = jax.random.normal(ks[5], (B, N, dim), jnp.float32)
    mask = jnp.where(jax.random.bernoulli(ks[6], 0.15, (B, N, N)),
                     -100.0, 0.0).astype(jnp.float32)

    fwd = jax.jit(functools.partial(earth_attention_3d_forward, cfg))
    out = fwd(params, x, mask)
    jax.block_until_ready(out)
    assert out.shape == (B, N, dim), out.shape

    ref = _ref_forward(cfg, params, x, mask)
    max_err = float(jnp.max(jnp.abs(out - ref)))
    assert jnp.allclose(out, ref, atol=2e-3, rtol=2e-3), max_err

    print("KERNEL_OK")
</pallas_src>

<mosaic_0001>
module attributes {stable_mosaic.version = 11 : i64} {
  func.func @_linear_kernel(%arg0: i32, %arg1: memref<512x32xf32, #tpu.memory_space<vmem>>, %arg2: memref<32x128xf32, #tpu.memory_space<vmem>>, %arg3: memref<1x128xf32, #tpu.memory_space<vmem>>, %arg4: memref<512x128xf32, #tpu.memory_space<vmem>>) attributes {dimension_semantics = [#tpu.dimension_semantics<parallel>], iteration_bounds = array<i64: 2>, scalar_prefetch = 0 : i64, scratch_operands = 0 : i64, tpu.core_type = #tpu.core_type<tc>, window_params = [{transform_indices = @transform_0, window_bounds = array<i64: 512, 32>}, {pipeline_mode = #tpu.pipeline_mode<synchronous>, transform_indices = @transform_1, window_bounds = array<i64: 32, 128>}, {pipeline_mode = #tpu.pipeline_mode<synchronous>, transform_indices = @transform_2, window_bounds = array<i64: 1, 128>}, {transform_indices = @transform_3, window_bounds = array<i64: 512, 128>}]} {
    %c0 = arith.constant 0 : index
    %c0_0 = arith.constant 0 : index
    %0 = vector.load %arg1[%c0, %c0_0] : memref<512x32xf32, #tpu.memory_space<vmem>>, vector<512x32xf32>
    %c0_1 = arith.constant 0 : index
    %c0_2 = arith.constant 0 : index
    %1 = vector.load %arg2[%c0_1, %c0_2] : memref<32x128xf32, #tpu.memory_space<vmem>>, vector<32x128xf32>
    %cst = arith.constant dense<0.000000e+00> : vector<512x128xf32>
    %2 = tpu.matmul %0, %1, %cst {dimension_numbers = #tpu.dot_dimension_numbers<[1], [0], [0], [1], [0, 0, 1, 1], [], []>} : vector<512x32xf32>, vector<32x128xf32>, vector<512x128xf32> -> vector<512x128xf32>
    %c0_3 = arith.constant 0 : index
    %c0_4 = arith.constant 0 : index
    %3 = vector.load %arg3[%c0_3, %c0_4] : memref<1x128xf32, #tpu.memory_space<vmem>>, vector<1x128xf32>
    %4 = vector.broadcast %3 : vector<1x128xf32> to vector<512x128xf32>
    %5 = arith.addf %2, %4 : vector<512x128xf32>
    %c0_5 = arith.constant 0 : index
    %c0_6 = arith.constant 0 : index
    %6 = vector.load %arg4[%c0_5, %c0_6] : memref<512x128xf32, #tpu.memory_space<vmem>>, vector<512x128xf32>
    tpu.vector_store %arg4[%c0_5, %c0_6], %5 {strides = array<i32>} : memref<512x128xf32, #tpu.memory_space<vmem>>, vector<512x128xf32>,
    return
  }
  func.func @transform_0(%arg0: i32) -> (i32, i32) {
    %c0_i32 = arith.constant 0 : i32
    %c0_i32_0 = arith.constant 0 : i32
    return %arg0, %c0_i32 : i32, i32
  }
  func.func @transform_1(%arg0: i32) -> (i32, i32) {
    %c0_i32 = arith.constant 0 : i32
    %c0_i32_0 = arith.constant 0 : i32
    %c0_i32_1 = arith.constant 0 : i32
    return %c0_i32, %c0_i32_0 : i32, i32
  }
  func.func @transform_2(%arg0: i32) -> (i32, i32) {
    %c0_i32 = arith.constant 0 : i32
    %c0_i32_0 = arith.constant 0 : i32
    %c0_i32_1 = arith.constant 0 : i32
    return %c0_i32, %c0_i32_0 : i32, i32
  }
  func.func @transform_3(%arg0: i32) -> (i32, i32) {
    %c0_i32 = arith.constant 0 : i32
    %c0_i32_0 = arith.constant 0 : i32
    return %arg0, %c0_i32 : i32, i32
  }
}

module attributes {stable_mosaic.version = 11 : i64} {
  func.func @_window_attention_kernel(%arg0: i32, %arg1: memref<8x4x32x8xf32, #tpu.memory_space<vmem>>, %arg2: memref<8x4x32x8xf32, #tpu.memory_space<vmem>>, %arg3: memref<8x4x32x8xf32, #tpu.memory_space<vmem>>, %arg4: memref<8x4x32x32xf32, #tpu.memory_space<vmem>>, %arg5: memref<8x32x32xf32, #tpu.memory_space<vmem>>, %arg6: memref<8x4x32x8xf32, #tpu.memory_space<vmem>>) attributes {dimension_semantics = [#tpu.dimension_semantics<parallel>], iteration_bounds = array<i64: 4>, scalar_prefetch = 0 : i64, scratch_operands = 0 : i64, tpu.core_type = #tpu.core_type<tc>, window_params = [{transform_indices = @transform_0, window_bounds = array<i64: 8, 4, 32, 8>}, {transform_indices = @transform_1, window_bounds = array<i64: 8, 4, 32, 8>}, {transform_indices = @transform_2, window_bounds = array<i64: 8, 4, 32, 8>}, {transform_indices = @transform_3, window_bounds = array<i64: 8, 4, 32, 32>}, {transform_indices = @transform_4, window_bounds = array<i64: 8, 32, 32>}, {transform_indices = @transform_5, window_bounds = array<i64: 8, 4, 32, 8>}]} {
    %c0 = arith.constant 0 : index
    %c0_0 = arith.constant 0 : index
    %c0_1 = arith.constant 0 : index
    %c0_2 = arith.constant 0 : index
    %0 = vector.load %arg1[%c0, %c0_0, %c0_1, %c0_2] : memref<8x4x32x8xf32, #tpu.memory_space<vmem>>, vector<8x4x32x8xf32>
    %1 = vector.shape_cast %0 : vector<8x4x32x8xf32> to vector<32x32x8xf32>
    %cst = arith.constant 0.353553385 : f32
    %2 = vector.broadcast %cst : f32 to vector<32x32x8xf32>
    %3 = arith.mulf %1, %2 : vector<32x32x8xf32>
    %c0_3 = arith.constant 0 : index
    %c0_4 = arith.constant 0 : index
    %c0_5 = arith.constant 0 : index
    %c0_6 = arith.constant 0 : index
    %4 = vector.load %arg2[%c0_3, %c0_4, %c0_5, %c0_6] : memref<8x4x32x8xf32, #tpu.memory_space<vmem>>, vector<8x4x32x8xf32>
    %5 = vector.shape_cast %4 : vector<8x4x32x8xf32> to vector<32x32x8xf32>
    %c0_7 = arith.constant 0 : index
    %c0_8 = arith.constant 0 : index
    %c0_9 = arith.constant 0 : index
    %c0_10 = arith.constant 0 : index
    %6 = vector.load %arg3[%c0_7, %c0_8, %c0_9, %c0_10] : memref<8x4x32x8xf32, #tpu.memory_space<vmem>>, vector<8x4x32x8xf32>
    %7 = vector.shape_cast %6 : vector<8x4x32x8xf32> to vector<32x32x8xf32>
    "tpu.trace_start"() <{level = 10 : i32, message = "bnd,bmd->bnm"}> : () -> ()
    %cst_11 = arith.constant dense<0.000000e+00> : vector<32x32x32xf32>
    %8 = tpu.matmul %3, %5, %cst_11 {dimension_numbers = #tpu.dot_dimension_numbers<[2], [2], [1], [1], [0, 0, 0, 1, 1, 1], [0], [0]>} : vector<32x32x8xf32>, vector<32x32x8xf32>, vector<32x32x32xf32> -> vector<32x32x32xf32>
    "tpu.trace_stop"() : () -> ()
    %9 = vector.shape_cast %8 : vector<32x32x32xf32> to vector<8x4x32x32xf32>
    %c0_12 = arith.constant 0 : index
    %c0_13 = arith.constant 0 : index
    %c0_14 = arith.constant 0 : index
    %c0_15 = arith.constant 0 : index
    %10 = vector.load %arg4[%c0_12, %c0_13, %c0_14, %c0_15] : memref<8x4x32x32xf32, #tpu.memory_space<vmem>>, vector<8x4x32x32xf32>
    %11 = arith.addf %9, %10 : vector<8x4x32x32xf32>
    %c0_16 = arith.constant 0 : index
    %c0_17 = arith.constant 0 : index
    %c0_18 = arith.constant 0 : index
    %12 = vector.load %arg5[%c0_16, %c0_17, %c0_18] : memref<8x32x32xf32, #tpu.memory_space<vmem>>, vector<8x32x32xf32>
    %13 = vector.shape_cast %12 : vector<8x32x32xf32> to vector<8x1x32x32xf32>
    %14 = vector.broadcast %13 : vector<8x1x32x32xf32> to vector<8x4x32x32xf32>
    %15 = arith.addf %11, %14 : vector<8x4x32x32xf32>
    %cst_19 = arith.constant dense<0xFF800000> : vector<8x4x32xf32>
    %16 = vector.multi_reduction <maximumf>, %15, %cst_19 [3] : vector<8x4x32x32xf32> to vector<8x4x32xf32>
    %17 = vector.shape_cast %16 : vector<8x4x32xf32> to vector<8x4x32x1xf32>
    %18 = vector.broadcast %17 : vector<8x4x32x1xf32> to vector<8x4x32x32xf32>
    %19 = arith.subf %15, %18 : vector<8x4x32x32xf32>
    %20 = math.exp %19 : vector<8x4x32x32xf32>
    %cst_20 = arith.constant dense<0.000000e+00> : vector<8x4x32xf32>
    %21 = vector.multi_reduction <add>, %20, %cst_20 [3] : vector<8x4x32x32xf32> to vector<8x4x32xf32>
    %22 = vector.shape_cast %21 : vector<8x4x32xf32> to vector<8x4x32x1xf32>
    %23 = vector.broadcast %22 : vector<8x4x32x1xf32> to vector<8x4x32x32xf32>
    %24 = arith.divf %20, %23 : vector<8x4x32x32xf32>
    %25 = vector.shape_cast %24 : vector<8x4x32x32xf32> to vector<32x32x32xf32>
    "tpu.trace_start"() <{level = 10 : i32, message = "bnm,bmd->bnd"}> : () -> ()
    %cst_21 = arith.constant dense<0.000000e+00> : vector<32x32x8xf32>
    %26 = tpu.matmul %25, %7, %cst_21 {dimension_numbers = #tpu.dot_dimension_numbers<[2], [1], [1], [2], [0, 0, 0, 1, 1, 2], [0], [0]>} : vector<32x32x32xf32>, vector<32x32x8xf32>, vector<32x32x8xf32> -> vector<32x32x8xf32>
    "tpu.trace_stop"() : () -> ()
    %27 = vector.shape_cast %26 : vector<32x32x8xf32> to vector<8x4x32x8xf32>
    %c0_22 = arith.constant 0 : index
    %c0_23 = arith.constant 0 : index
    %c0_24 = arith.constant 0 : index
    %c0_25 = arith.constant 0 : index
    %28 = vector.load %arg6[%c0_22, %c0_23, %c0_24, %c0_25] : memref<8x4x32x8xf32, #tpu.memory_space<vmem>>, vector<8x4x32x8xf32>
    tpu.vector_store %arg6[%c0_22, %c0_23, %c0_24, %c0_25], %27 {strides = array<i32>} : memref<8x4x32x8xf32, #tpu.memory_space<vmem>>, vector<8x4x32x8xf32>,
    return
  }
  func.func @transform_0(%arg0: i32) -> (i32, i32, i32, i32) {
    %c0_i32 = arith.constant 0 : i32
    %c0_i32_0 = arith.constant 0 : i32
    %c0_i32_1 = arith.constant 0 : i32
    %c0_i32_2 = arith.constant 0 : i32
    return %arg0, %c0_i32, %c0_i32_0, %c0_i32_1 : i32, i32, i32, i32
  }
  func.func @transform_1(%arg0: i32) -> (i32, i32, i32, i32) {
    %c0_i32 = arith.constant 0 : i32
    %c0_i32_0 = arith.constant 0 : i32
    %c0_i32_1 = arith.constant 0 : i32
    %c0_i32_2 = arith.constant 0 : i32
    return %arg0, %c0_i32, %c0_i32_0, %c0_i32_1 : i32, i32, i32, i32
  }
  func.func @transform_2(%arg0: i32) -> (i32, i32, i32, i32) {
    %c0_i32 = arith.constant 0 : i32
    %c0_i32_0 = arith.constant 0 : i32
    %c0_i32_1 = arith.constant 0 : i32
    %c0_i32_2 = arith.constant 0 : i32
    return %arg0, %c0_i32, %c0_i32_0, %c0_i32_1 : i32, i32, i32, i32
  }
  func.func @transform_3(%arg0: i32) -> (i32, i32, i32, i32) {
    %c45_i32 = arith.constant 45 : i32
    %c0_i32 = arith.constant 0 : i32
    %0 = arith.cmpi eq, %c45_i32, %c0_i32 : i32
    %c1_i32 = arith.constant 1 : i32
    %1 = arith.select %0, %c1_i32, %c45_i32 : i32
    %2 = arith.remsi %arg0, %1 : i32
    %c0_i32_0 = arith.constant 0 : i32
    %3 = arith.cmpi ne, %2, %c0_i32_0 : i32
    %c0_i32_1 = arith.constant 0 : i32
    %4 = arith.cmpi slt, %2, %c0_i32_1 : i32
    %c0_i32_2 = arith.constant 0 : i32
    %5 = arith.cmpi slt, %1, %c0_i32_2 : i32
    %6 = arith.xori %4, %5 : i1
    %7 = arith.andi %6, %3 : i1
    %8 = arith.addi %2, %1 : i32
    %9 = arith.select %7, %8, %2 : i32
    %c0_i32_3 = arith.constant 0 : i32
    %c0_i32_4 = arith.constant 0 : i32
    %c0_i32_5 = arith.constant 0 : i32
    %c0_i32_6 = arith.constant 0 : i32
    return %9, %c0_i32_3, %c0_i32_4, %c0_i32_5 : i32, i32, i32, i32
  }
  func.func @transform_4(%arg0: i32) -> (i32, i32, i32) {
    %c0_i32 = arith.constant 0 : i32
    %c0_i32_0 = arith.constant 0 : i32
    %c0_i32_1 = arith.constant 0 : i32
    return %arg0, %c0_i32, %c0_i32_0 : i32, i32, i32
  }
  func.func @transform_5(%arg0: i32) -> (i32, i32, i32, i32) {
    %c0_i32 = arith.constant 0 : i32
    %c0_i32_0 = arith.constant 0 : i32
    %c0_i32_1 = arith.constant 0 : i32
    %c0_i32_2 = arith.constant 0 : i32
    return %arg0, %c0_i32, %c0_i32_0, %c0_i32_1 : i32, i32, i32, i32
  }
}

module attributes {stable_mosaic.version = 11 : i64} {
  func.func @_linear_kernel(%arg0: i32, %arg1: memref<512x32xf32, #tpu.memory_space<vmem>>, %arg2: memref<32x128xf32, #tpu.memory_space<vmem>>, %arg3: memref<1x128xf32, #tpu.memory_space<vmem>>, %arg4: memref<512x128xf32, #tpu.memory_space<vmem>>) attributes {dimension_semantics = [#tpu.dimension_semantics<parallel>], iteration_bounds = array<i64: 2>, scalar_prefetch = 0 : i64, scratch_operands = 0 : i64, tpu.core_type = #tpu.core_type<tc>, window_params = [{transform_indices = @transform_0, window_bounds = array<i64: 512, 32>}, {pipeline_mode = #tpu.pipeline_mode<synchronous>, transform_indices = @transform_1, window_bounds = array<i64: 32, 128>}, {pipeline_mode = #tpu.pipeline_mode<synchronous>, transform_indices = @transform_2, window_bounds = array<i64: 1, 128>}, {transform_indices = @transform_3, window_bounds = array<i64: 512, 128>}]} {
    %c0 = arith.constant 0 : index
    %c0_0 = arith.constant 0 : index
    %0 = vector.load %arg1[%c0, %c0_0] : memref<512x32xf32, #tpu.memory_space<vmem>>, vector<512x32xf32>
    %c0_1 = arith.constant 0 : index
    %c0_2 = arith.constant 0 : index
    %1 = vector.load %arg2[%c0_1, %c0_2] : memref<32x128xf32, #tpu.memory_space<vmem>>, vector<32x128xf32>
    %cst = arith.constant dense<0.000000e+00> : vector<512x128xf32>
    %2 = tpu.matmul %0, %1, %cst {dimension_numbers = #tpu.dot_dimension_numbers<[1], [0], [0], [1], [0, 0, 1, 1], [], []>} : vector<512x32xf32>, vector<32x128xf32>, vector<512x128xf32> -> vector<512x128xf32>
    %c0_3 = arith.constant 0 : index
    %c0_4 = arith.constant 0 : index
    %3 = vector.load %arg3[%c0_3, %c0_4] : memref<1x128xf32, #tpu.memory_space<vmem>>, vector<1x128xf32>
    %4 = vector.broadcast %3 : vector<1x128xf32> to vector<512x128xf32>
    %5 = arith.addf %2, %4 : vector<512x128xf32>
    %c0_5 = arith.constant 0 : index
    %c0_6 = arith.constant 0 : index
    %6 = vector.load %arg4[%c0_5, %c0_6] : memref<512x128xf32, #tpu.memory_space<vmem>>, vector<512x128xf32>
    tpu.vector_store %arg4[%c0_5, %c0_6], %5 {strides = array<i32>} : memref<512x128xf32, #tpu.memory_space<vmem>>, vector<512x128xf32>,
    return
  }
  func.func @transform_0(%arg0: i32) -> (i32, i32) {
    %c0_i32 = arith.constant 0 : i32
    %c0_i32_0 = arith.constant 0 : i32
    return %arg0, %c0_i32 : i32, i32
  }
  func.func @transform_1(%arg0: i32) -> (i32, i32) {
    %c0_i32 = arith.constant 0 : i32
    %c0_i32_0 = arith.constant 0 : i32
    %c0_i32_1 = arith.constant 0 : i32
    return %c0_i32, %c0_i32_0 : i32, i32
  }
  func.func @transform_2(%arg0: i32) -> (i32, i32) {
    %c0_i32 = arith.constant 0 : i32
    %c0_i32_0 = arith.constant 0 : i32
    %c0_i32_1 = arith.constant 0 : i32
    return %c0_i32, %c0_i32_0 : i32, i32
  }
  func.func @transform_3(%arg0: i32) -> (i32, i32) {
    %c0_i32 = arith.constant 0 : i32
    %c0_i32_0 = arith.constant 0 : i32
    return %arg0, %c0_i32 : i32, i32
  }
}

</mosaic_0001>

<bundles_post_ra>
// kernel: earth_attention_3d_forward.3
= control target key start
LH: loop header
LB: loop body
LE: loop exit
PB: predicated region body
PF: predicated region fallthrough
CT: control target
= control target key end

     0   :  { %8 = vsyncpa [#allocation3], 0  ;;  %s1754_s0 = inlined_call_operand.hbm [shape: f32[1024,32], index: 0, kind: input, shape index: {}]   ;;  %s1755_s1 = inlined_call_operand.vmem [shape: f32[32,128], index: 1, kind: input, shape index: {}]   ;;  %s1756_s2 = inlined_call_operand.vmem [shape: f32[1,128], index: 2, kind: input, shape index: {}]   ;;  %s1757_s3 = inlined_call_operand.vmem [shape: f32[1024,128], index: 3, kind: output, shape index: {}]  }
   0x1   :  { %10 = vsyncpa [#allocation3 + $0x1], 0  ;;  %s1370_s12 = smov 0   ;;  %s1372_s13 = smov 0  }
   0x2   :  { %s1374_s14 = smov 0   ;;  %s1376_s15 = smov 0  }
   0x3 LB: > { %s977_s16 = sadd.s32 4294967295, %s1345_s15   ;;  %s1390_s17 = sadd.s32 1, %s1345_s15   ;;  %s1345_s15 = sphi %s1376_s15, %s1764_s15   ;;  %s1341_s14 = sphi %s1374_s14, %s1763_s14   ;;  %s1337_s13 = sphi %s1372_s13, %s1762_s13   ;;  %s1333_s12 = sphi %s1370_s12, %s1761_s12  }
   0x4   : > { %s20_s18 = ssub.s32 %s1345_s15, %s1390_s17  ;;  %s23_s19 = sadd.s32 1, %s1341_s14 }
   0x5   : > { %p21_p0 = scmp.eq.s32.totalorder %s20_s18, 0  ;;  %p30_p1 = scmp.ne.s32.totalorder %s1341_s14, %s1337_s13 }
   0x6   : > { %p31_p2 = scmp.eq.s32.totalorder %s1345_s15, 0  ;;  %p36_p3 = scmp.ne.s32.totalorder %s1337_s13, %s1333_s12 }
   0x7   : > { %s1400_s20 = scalar_select %p21_p0, %s1341_s14, %s23_s19  }
   0x8   : > { %p32_p4 = por %p31_p2, %p30_p1  ;;  %p37_p5 = scmp.eq.s32.totalorder %s977_s16, 0 }
   0x9   : > { %p1246_p6 = scmp.lt.s32.totalorder %s1345_s15, 2  ;;  %s134_s22 = sand.u32 1, %s1341_s14  }
   0xa   : > { %p1405_p7 = por %p37_p5, %p36_p3  ;;  %s981_s23 = sshll.u32 %s134_s22, 9 }
   0xb   : > { %s1055_s24 = sshll.u32 %s1345_s15, 13  ;;  %s138_s28 = scalar_lea.vmem [#allocation2], %s981_s23 }
   0xc   : > { %s1414_s27 = scalar_lea.hbm %s1754_s0, %s1055_s24  ;;  %s145_s29 = sshll.u32 %s138_s28, 4  ;;  %s1416_s29 = int_to_ptr.vmem [resolvable:$true] %s145_s29 }
   0xd   : > { %p1418_p8 = pnand %p1246_p6, %p32_p4  ;;  %s1423_s4 = scalar_lea.sflag [#allocation3], %s134_s22 }
   0xe   : > { %s1281_s5 = scalar_lea.hbm %s1414_s27, 8192  ;;  %s1286_s8 = scalar_lea.hbm %s1754_s0, 16384 }
   0xf   : > { %p1282_p10 = scmp.ne.s32.totalorder %s1414_s27, %s1281_s5  ;;  %p1283_p11 = pneg %p1418_p8 }
  0x10   : > { %p1287_p0 = scmp.lt.u32.totalorder %s1414_s27, %s1754_s0  ;;  %p1288_p1 = scmp.lt.u32.totalorder %s1286_s8, %s1281_s5 }
  0x11   : > { %p1284_p12 = pnand %p1283_p11, %p1282_p10  ;;  %p1290_p3 = scmp.lt.u32.totalorder %s1281_s5, %s1414_s27 }
  0x12   : > { %p1289_p2 = por %p1288_p1, %p1287_p0 }
  0x13   : > { %p1285_p13 = pneg %p1284_p12 }
  0x14   : > { %p1291_p4 = por %p1290_p3, %p1289_p2 }
  0x16   : > { %p1292_p5 = pnand %p1291_p4, %p1285_p13 }
  0x18   : > { %1295 = shalt.err (!%p1292_p5)
}
  0x19   : > { %s1296_s11 = scalar_lea.vmem %s1416_s29, 8192  ;;  %s1347_s12 = smov [#allocation2]  }
  0x1a   : > { %p1297_p6 = scmp.ne.s32.totalorder %s1416_s29, %s1296_s11  ;;  %s1301_s18 = sshll.u32 %s1347_s12, 4  ;;  %s1302_s18 = int_to_ptr.vmem [resolvable:$false] %s1301_s18 }
  0x1b   : > { %s1303_s19 = scalar_lea.vmem %s1302_s18, 16384  ;;  %p1304_p9 = scmp.lt.s32.totalorder %s1416_s29, %s1302_s18 }
  0x1c   : > { %p1299_p10 = pnand %p1297_p6, %p1283_p11  ;;  %p1305_p0 = scmp.lt.s32.totalorder %s1303_s19, %s1296_s11 }
  0x1e   : > { %p1300_p12 = pneg %p1299_p10  ;;  %p1306_p1 = por %p1305_p0, %p1304_p9 }
  0x20   : > { %p1307_p2 = pnand %p1306_p1, %p1300_p12 }
  0x22   : > { %1310 = shalt.err (!%p1307_p2)
}
  0x23   : > { %s1348_s22 = smov 128   ;;  %s1349_s23 = smov 8  }
  0x24   : > { %1245 = dma.hbm_to_vmem [thread:$0]  (!%p1418_p8), %s1414_s27, 8192, %s1416_s29, %s1423_s4, %s1348_s22, %s1348_s22, %s1349_s23  }
  0x25   : > { %p153_p11 = scmp.lt.s32.totalorder %s1345_s15, 3  ;;  %p1760_p13 = scmp.ge.s32.totalorder %s1345_s15, 1 }
  0x27   : > { %p154_p3 = pnand %p1760_p13, %p153_p11 }
  0x28   : > { %s159_s24 = sand.u32 (!%p154_p3), 1, %s1337_s13  }
  0x29   : > { %157 = sbr.rel (%p154_p3) target bundleno = 337 (0x151), region = 32  ;;  %s985_s25 = sshll.u32 (!%p154_p3), %s159_s24, 9 }
  0x2a   : > { %s160_s26 = scalar_lea.sflag (!%p154_p3), [#allocation3], %s159_s24  ;;  %s1455_s28 = scalar_lea.vmem (!%p154_p3), [#allocation2], %s985_s25 }
  0x30   : > { %1328 = dma.done.wait (%p1405_p7), %s160_s26, 8192  }
  0x31   : > { %1330 = vsyncadd (%p1405_p7), %s160_s26, 4294959104  ;;  %vm268_vm0 = vcmask 261120   ;;  %v257_v0 = vld [vmem:[%s1755_s1] sm:$0xff]  ;;  %v258_v1 = vld [vmem:[%s1755_s1 + $0x8] sm:$0xff]  ;;  %s986_s8 = sshll.u32 %s977_s16, 6 }
  0x32   : > { %v259_v2 = vld [vmem:[%s1755_s1 + $0x10] sm:$0xff]  ;;  %v1228_v3 = vpack.c.bf16 %v258_v1, %v257_v0  ;;  %v260_v4 = vld [vmem:[%s1755_s1 + $0x18] sm:$0xff]  ;;  %v193_v5 = vld [vmem:[%s1455_s28] sm:$0xff]  ;;  %p188_p7 = scmp.lt.s32.totalorder %s986_s8, 127 }
  0x33   : > { %v225_v6 = vld [vmem:[%s1455_s28 + $0x100] sm:$0xff]  ;;  %v1232_v7 = vpack.c.bf16 %v260_v4, %v259_v2  ;;  %1132 = vmatprep.mubr.msk.f32.mxu0 %vm268_vm0, %v193_v5  ;;  %v194_v8 = vld [vmem:[%s1455_s28 + $0x8] sm:$0xff]  ;;  %v195_v10 = vld [vmem:[%s1455_s28 + $0x10] sm:$0xff] }
  0x34   : > { %1180 = vmatprep.mubr.msk.f32.mxu1 %vm268_vm0, %v225_v6  ;;  %1229 = vmatprep.subr.bf16.mxu0 %v1228_v3  ;;  %v226_v9 = vld [vmem:[%s1455_s28 + $0x108] sm:$0xff]  ;;  %v227_v11 = vld [vmem:[%s1455_s28 + $0x110] sm:$0xff]  ;;  %v196_v12 = vld [vmem:[%s1455_s28 + $0x18] sm:$0xff]  ;;  %s1766_s8 = smov (!%p188_p7, %s986_s8), 127 }
  0x35   : > { %1236 = vmatprep.subr.bf16.mxu1 %v1228_v3  ;;  %1231 = vmatpush3.bf16.msra.mxu0 %v1228_v3  ;;  %v228_v13 = vld [vmem:[%s1455_s28 + $0x118] sm:$0xff]  ;;  %v197_v14 = vld [vmem:[%s1455_s28 + $0x20] sm:$0xff]  ;;  %v198_v16 = vld [vmem:[%s1455_s28 + $0x28] sm:$0xff]  ;;  %s987_s9 = sshll.u32 %s1766_s8, 3 }
  0x36   : > { %1238 = vmatpush3.bf16.msra.mxu1 %v1228_v3  ;;  %1233 = vmatprep.subr.bf16.mxu0 %v1232_v7  ;;  %v229_v15 = vld [vmem:[%s1455_s28 + $0x120] sm:$0xff]  ;;  %v230_v17 = vld [vmem:[%s1455_s28 + $0x128] sm:$0xff]  ;;  %v199_v18 = vld [vmem:[%s1455_s28 + $0x30] sm:$0xff]  ;;  %s1611_s19 = scalar_lea.vmem %s1757_s3, %s987_s9 }
  0x37   : > { %1237 = vmatprep.subr.bf16.mxu1 %v1232_v7  ;;  %v231_v19 = vld [vmem:[%s1455_s28 + $0x130] sm:$0xff]  ;;  %v200_v20 = vld [vmem:[%s1455_s28 + $0x38] sm:$0xff]  ;;  %v201_v22 = vld [vmem:[%s1455_s28 + $0x40] sm:$0xff] }
  0x38   : > { %v232_v21 = vld [vmem:[%s1455_s28 + $0x138] sm:$0xff]  ;;  %v233_v23 = vld [vmem:[%s1455_s28 + $0x140] sm:$0xff]  ;;  %v202_v24 = vld [vmem:[%s1455_s28 + $0x48] sm:$0xff] }
  0x39   : > { %1235 = vmatpush3.bf16.msra.mxu0 %v1232_v7  ;;  %v234_v25 = vld [vmem:[%s1455_s28 + $0x148] sm:$0xff]  ;;  %v203_v26 = vld [vmem:[%s1455_s28 + $0x50] sm:$0xff]  ;;  %v204_v28 = vld [vmem:[%s1455_s28 + $0x58] sm:$0xff] }
  0x3a   : > { %1239 = vmatpush3.bf16.msra.mxu1 %v1232_v7  ;;  %v235_v27 = vld [vmem:[%s1455_s28 + $0x150] sm:$0xff]  ;;  %v236_v29 = vld [vmem:[%s1455_s28 + $0x158] sm:$0xff]  ;;  %v205_v30 = vld [vmem:[%s1455_s28 + $0x60] sm:$0xff] }
  0x3b   : > { %v237_v31 = vld [vmem:[%s1455_s28 + $0x160] sm:$0xff]  ;;  %v206_v32 = vld [vmem:[%s1455_s28 + $0x68] sm:$0xff]  ;;  %v207_v34 = vld [vmem:[%s1455_s28 + $0x70] sm:$0xff] }
  0x3c   : > { %1133 = vmatmul.mubr.msk.f32.vlgmr.msra.gmra.mrb[0].mxu0 %vm268_vm0, %v194_v8  ;;  %v238_v33 = vld [vmem:[%s1455_s28 + $0x168] sm:$0xff]  ;;  %v239_v35 = vld [vmem:[%s1455_s28 + $0x170] sm:$0xff]  ;;  %v208_v36 = vld [vmem:[%s1455_s28 + $0x78] sm:$0xff] }
  0x3d   : > { %1181 = vmatmul.mubr.msk.f32.vlgmr.msra.gmra.mrb[0].mxu1 %vm268_vm0, %v226_v9  ;;  %1135 = vmatprep.mubr.msk.f32.mxu0 %vm268_vm0, %v195_v10  ;;  %v240_v37 = vld [vmem:[%s1455_s28 + $0x178] sm:$0xff]  ;;  %v209_v38 = vld [vmem:[%s1455_s28 + $0x80] sm:$0xff]  ;;  %v210_v40 = vld [vmem:[%s1455_s28 + $0x88] sm:$0xff] }
  0x3e   : > { %1183 = vmatprep.mubr.msk.f32.mxu1 %vm268_vm0, %v227_v11  ;;  %v241_v39 = vld [vmem:[%s1455_s28 + $0x180] sm:$0xff]  ;;  %v242_v41 = vld [vmem:[%s1455_s28 + $0x188] sm:$0xff]  ;;  %v211_v42 = vld [vmem:[%s1455_s28 + $0x90] sm:$0xff] }
  0x3f   : > { %v243_v43 = vld [vmem:[%s1455_s28 + $0x190] sm:$0xff]  ;;  %v212_v44 = vld [vmem:[%s1455_s28 + $0x98] sm:$0xff]  ;;  %v213_v46 = vld [vmem:[%s1455_s28 + $0xa0] sm:$0xff] }
  0x40   : > { %1136 = vmatmul.mubr.msk.f32.gmra.mrb[2].mxu0 %vm268_vm0, %v196_v12  ;;  %v244_v45 = vld [vmem:[%s1455_s28 + $0x198] sm:$0xff]  ;;  %v245_v47 = vld [vmem:[%s1455_s28 + $0x1a0] sm:$0xff]  ;;  %v214_v48 = vld [vmem:[%s1455_s28 + $0xa8] sm:$0xff] }
  0x41   : > { %1184 = vmatmul.mubr.msk.f32.gmra.mrb[2].mxu1 %vm268_vm0, %v228_v13  ;;  %1138 = vmatprep.mubr.msk.f32.mxu0 %vm268_vm0, %v197_v14  ;;  %v246_v49 = vld [vmem:[%s1455_s28 + $0x1a8] sm:$0xff]  ;;  %v215_v50 = vld [vmem:[%s1455_s28 + $0xb0] sm:$0xff]  ;;  %v216_v52 = vld [vmem:[%s1455_s28 + $0xb8] sm:$0xff] }
  0x42   : > { %1186 = vmatprep.mubr.msk.f32.mxu1 %vm268_vm0, %v229_v15  ;;  %v247_v51 = vld [vmem:[%s1455_s28 + $0x1b0] sm:$0xff]  ;;  %v248_v53 = vld [vmem:[%s1455_s28 + $0x1b8] sm:$0xff]  ;;  %v217_v54 = vld [vmem:[%s1455_s28 + $0xc0] sm:$0xff] }
  0x43   : > { %v249_v55 = vld [vmem:[%s1455_s28 + $0x1c0] sm:$0xff]  ;;  %v218_v56 = vld [vmem:[%s1455_s28 + $0xc8] sm:$0xff]  ;;  %v219_v58 = vld [vmem:[%s1455_s28 + $0xd0] sm:$0xff] }
  0x44   : > { %1139 = vmatmul.mubr.msk.f32.gmra.mrb[4].mxu0 %vm268_vm0, %v198_v16  ;;  %v250_v57 = vld [vmem:[%s1455_s28 + $0x1c8] sm:$0xff]  ;;  %v251_v59 = vld [vmem:[%s1455_s28 + $0x1d0] sm:$0xff]  ;;  %v220_v60 = vld [vmem:[%s1455_s28 + $0xd8] sm:$0xff] }
  0x45   : > { %1187 = vmatmul.mubr.msk.f32.gmra.mrb[4].mxu1 %vm268_vm0, %v230_v17  ;;  %1141 = vmatprep.mubr.msk.f32.mxu0 %vm268_vm0, %v199_v18  ;;  %v252_v61 = vld [vmem:[%s1455_s28 + $0x1d8] sm:$0xff]  ;;  %v221_v62 = vld [vmem:[%s1455_s28 + $0xe0] sm:$0xff]  ;;  %v222_v0 = vld [vmem:[%s1455_s28 + $0xe8] sm:$0xff] }
  0x46   : > { %1189 = vmatprep.mubr.msk.f32.mxu1 %vm268_vm0, %v231_v19  ;;  %v253_v63 = vld [vmem:[%s1455_s28 + $0x1e0] sm:$0xff]  ;;  %v254_v1 = vld [vmem:[%s1455_s28 + $0x1e8] sm:$0xff]  ;;  %v223_v2 = vld [vmem:[%s1455_s28 + $0xf0] sm:$0xff] }
  0x47   : > { %v255_v3 = vld [vmem:[%s1455_s28 + $0x1f0] sm:$0xff]  ;;  %v224_v4 = vld [vmem:[%s1455_s28 + $0xf8] sm:$0xff]  ;;  %v1606_v6 = vld [vmem:[%s1756_s2] ss:$0 sm:$0xff] }
  0x48   : > { %1142 = vmatmul.mubr.msk.f32.gmra.mrb[6].mxu0 %vm268_vm0, %v200_v20  ;;  %v256_v5 = vld [vmem:[%s1455_s28 + $0x1f8] sm:$0xff] }
  0x49   : > { %1190 = vmatmul.mubr.msk.f32.gmra.mrb[6].mxu1 %vm268_vm0, %v232_v21  ;;  %1144 = vmatprep.mubr.msk.f32.mxu0 %vm268_vm0, %v201_v22 }
  0x4a   : > { %1192 = vmatprep.mubr.msk.f32.mxu1 %vm268_vm0, %v233_v23 }
  0x4c   : > { %1145 = vmatmul.mubr.msk.f32.gmra.mrb[8].mxu0 %vm268_vm0, %v202_v24 }
  0x4d   : > { %1193 = vmatmul.mubr.msk.f32.gmra.mrb[8].mxu1 %vm268_vm0, %v234_v25  ;;  %1147 = vmatprep.mubr.msk.f32.mxu0 %vm268_vm0, %v203_v26 }
  0x4e   : > { %1195 = vmatprep.mubr.msk.f32.mxu1 %vm268_vm0, %v235_v27 }
  0x50   : > { %1148 = vmatmul.mubr.msk.f32.gmra.mrb[10].mxu0 %vm268_vm0, %v204_v28 }
  0x51   : > { %1196 = vmatmul.mubr.msk.f32.gmra.mrb[10].mxu1 %vm268_vm0, %v236_v29  ;;  %1150 = vmatprep.mubr.msk.f32.mxu0 %vm268_vm0, %v205_v30 }
  0x52   : > { %1198 = vmatprep.mubr.msk.f32.mxu1 %vm268_vm0, %v237_v31 }
  0x54   : > { %1151 = vmatmul.mubr.msk.f32.gmra.mrb[12].mxu0 %vm268_vm0, %v206_v32 }
  0x55   : > { %1199 = vmatmul.mubr.msk.f32.gmra.mrb[12].mxu1 %vm268_vm0, %v238_v33  ;;  %1153 = vmatprep.mubr.msk.f32.mxu0 %vm268_vm0, %v207_v34 }
  0x56   : > { %1201 = vmatprep.mubr.msk.f32.mxu1 %vm268_vm0, %v239_v35 }
  0x58   : > { %1154 = vmatmul.mubr.msk.f32.gmra.mrb[14].mxu0 %vm268_vm0, %v208_v36 }
  0x59   : > { %1202 = vmatmul.mubr.msk.f32.gmra.mrb[14].mxu1 %vm268_vm0, %v240_v37  ;;  %1156 = vmatprep.mubr.msk.f32.mxu0 %vm268_vm0, %v209_v38 }
  0x5a   : > { %1204 = vmatprep.mubr.msk.f32.mxu1 %vm268_vm0, %v241_v39 }
  0x5c   : > { %1157 = vmatmul.mubr.msk.f32.gmra.mrb[16].mxu0 %vm268_vm0, %v210_v40 }
  0x5d   : > { %1205 = vmatmul.mubr.msk.f32.gmra.mrb[16].mxu1 %vm268_vm0, %v242_v41  ;;  %1159 = vmatprep.mubr.msk.f32.mxu0 %vm268_vm0, %v211_v42 }
  0x5e   : > { %1207 = vmatprep.mubr.msk.f32.mxu1 %vm268_vm0, %v243_v43 }
  0x60   : > { %1160 = vmatmul.mubr.msk.f32.gmra.mrb[18].mxu0 %vm268_vm0, %v212_v44 }
  0x61   : > { %1208 = vmatmul.mubr.msk.f32.gmra.mrb[18].mxu1 %vm268_vm0, %v244_v45  ;;  %1162 = vmatprep.mubr.msk.f32.mxu0 %vm268_vm0, %v213_v46 }
  0x62   : > { %1210 = vmatprep.mubr.msk.f32.mxu1 %vm268_vm0, %v245_v47 }
  0x64   : > { %1163 = vmatmul.mubr.msk.f32.gmra.mrb[20].mxu0 %vm268_vm0, %v214_v48 }
  0x65   : > { %1211 = vmatmul.mubr.msk.f32.gmra.mrb[20].mxu1 %vm268_vm0, %v246_v49  ;;  %1165 = vmatprep.mubr.msk.f32.mxu0 %vm268_vm0, %v215_v50 }
  0x66   : > { %1213 = vmatprep.mubr.msk.f32.mxu1 %vm268_vm0, %v247_v51 }
  0x68   : > { %1166 = vmatmul.mubr.msk.f32.gmra.mrb[22].mxu0 %vm268_vm0, %v216_v52 }
  0x69   : > { %1214 = vmatmul.mubr.msk.f32.gmra.mrb[22].mxu1 %vm268_vm0, %v248_v53  ;;  %1168 = vmatprep.mubr.msk.f32.mxu0 %vm268_vm0, %v217_v54 }
  0x6a   : > { %1216 = vmatprep.mubr.msk.f32.mxu1 %vm268_vm0, %v249_v55 }
  0x6c   : > { %1169 = vmatmul.mubr.msk.f32.gmra.mrb[24].mxu0 %vm268_vm0, %v218_v56 }
  0x6d   : > { %1217 = vmatmul.mubr.msk.f32.gmra.mrb[24].mxu1 %vm268_vm0, %v250_v57  ;;  %1171 = vmatprep.mubr.msk.f32.mxu0 %vm268_vm0, %v219_v58 }
  0x6e   : > { %1219 = vmatprep.mubr.msk.f32.mxu1 %vm268_vm0, %v251_v59 }
  0x70   : > { %1172 = vmatmul.mubr.msk.f32.gmra.mrb[26].mxu0 %vm268_vm0, %v220_v60 }
  0x71   : > { %1220 = vmatmul.mubr.msk.f32.gmra.mrb[26].mxu1 %vm268_vm0, %v252_v61  ;;  %1174 = vmatprep.mubr.msk.f32.mxu0 %vm268_vm0, %v221_v62 }
  0x72   : > { %1222 = vmatprep.mubr.msk.f32.mxu1 %vm268_vm0, %v253_v63 }
  0x74   : > { %1175 = vmatmul.mubr.msk.f32.gmra.mrb[28].mxu0 %vm268_vm0, %v222_v0 }
  0x75   : > { %1223 = vmatmul.mubr.msk.f32.gmra.mrb[28].mxu1 %vm268_vm0, %v254_v1  ;;  %1177 = vmatprep.mubr.msk.f32.mxu0 %vm268_vm0, %v223_v2 }
  0x76   : > { %1225 = vmatprep.mubr.msk.f32.mxu1 %vm268_vm0, %v255_v3 }
  0x78   : > { %1178 = vmatmul.mubr.msk.f32.gmra.mrb[30].mxu0 %vm268_vm0, %v224_v4 }
  0x79   : > { %1226 = vmatmul.mubr.msk.f32.gmra.mrb[30].mxu1 %vm268_vm0, %v256_v5 }
 0x10f   : > { %v1134_v7 = vpop.f32.mrb[0].mxu0 }
 0x110   : > { %v1182_v8 = vpop.f32.mrb[0].mxu1  ;;  %v533_v9 = vadd.f32 %v1134_v7, %v1606_v6  ;;  %v527_v11 = vpop.f32.mrb[1].mxu0 }
 0x111   : > { %v693_v10 = vadd.f32 %v1182_v8, %v1606_v6  ;;  %v687_v12 = vpop.f32.mrb[1].mxu1  ;;  %v528_v13 = vadd.f32 %v1606_v6, %v527_v11 }
 0x112   : > { %v688_v14 = vadd.f32 %v1606_v6, %v687_v12  ;;  %847 = vst [vmem:[%s1611_s19 + $0x8] sm:$0xff] %v533_v9 }
 0x113   : > { %879 = vst [vmem:[%s1611_s19 + $0x108] sm:$0xff] %v693_v10  ;;  %846 = vst [vmem:[%s1611_s19] sm:$0xff] %v528_v13  ;;  %v1137_v15 = vpop.f32.mrb[2].mxu0 }
 0x114   : > { %878 = vst [vmem:[%s1611_s19 + $0x100] sm:$0xff] %v688_v14  ;;  %v1185_v16 = vpop.f32.mrb[2].mxu1  ;;  %v543_v17 = vadd.f32 %v1137_v15, %v1606_v6  ;;  %v537_v19 = vpop.f32.mrb[3].mxu0 }
 0x115   : > { %v703_v18 = vadd.f32 %v1185_v16, %v1606_v6  ;;  %v697_v20 = vpop.f32.mrb[3].mxu1  ;;  %v538_v21 = vadd.f32 %v1606_v6, %v537_v19 }
 0x116   : > { %v698_v22 = vadd.f32 %v1606_v6, %v697_v20  ;;  %849 = vst [vmem:[%s1611_s19 + $0x18] sm:$0xff] %v543_v17 }
 0x117   : > { %881 = vst [vmem:[%s1611_s19 + $0x118] sm:$0xff] %v703_v18  ;;  %848 = vst [vmem:[%s1611_s19 + $0x10] sm:$0xff] %v538_v21  ;;  %v1140_v23 = vpop.f32.mrb[4].mxu0 }
 0x118   : > { %880 = vst [vmem:[%s1611_s19 + $0x110] sm:$0xff] %v698_v22  ;;  %v1188_v24 = vpop.f32.mrb[4].mxu1  ;;  %v553_v25 = vadd.f32 %v1140_v23, %v1606_v6  ;;  %v547_v27 = vpop.f32.mrb[5].mxu0 }
 0x119   : > { %v713_v26 = vadd.f32 %v1188_v24, %v1606_v6  ;;  %v707_v28 = vpop.f32.mrb[5].mxu1  ;;  %v548_v29 = vadd.f32 %v1606_v6, %v547_v27 }
 0x11a   : > { %v708_v30 = vadd.f32 %v1606_v6, %v707_v28  ;;  %851 = vst [vmem:[%s1611_s19 + $0x28] sm:$0xff] %v553_v25 }
 0x11b   : > { %883 = vst [vmem:[%s1611_s19 + $0x128] sm:$0xff] %v713_v26  ;;  %850 = vst [vmem:[%s1611_s19 + $0x20] sm:$0xff] %v548_v29  ;;  %v1143_v31 = vpop.f32.mrb[6].mxu0 }
 0x11c   : > { %882 = vst [vmem:[%s1611_s19 + $0x120] sm:$0xff] %v708_v30  ;;  %v1191_v32 = vpop.f32.mrb[6].mxu1  ;;  %v563_v33 = vadd.f32 %v1143_v31, %v1606_v6  ;;  %v557_v35 = vpop.f32.mrb[7].mxu0 }
 0x11d   : > { %v723_v34 = vadd.f32 %v1191_v32, %v1606_v6  ;;  %v717_v36 = vpop.f32.mrb[7].mxu1  ;;  %v558_v37 = vadd.f32 %v1606_v6, %v557_v35 }
 0x11e   : > { %v718_v38 = vadd.f32 %v1606_v6, %v717_v36  ;;  %853 = vst [vmem:[%s1611_s19 + $0x38] sm:$0xff] %v563_v33 }
 0x11f   : > { %885 = vst [vmem:[%s1611_s19 + $0x138] sm:$0xff] %v723_v34  ;;  %852 = vst [vmem:[%s1611_s19 + $0x30] sm:$0xff] %v558_v37  ;;  %v1146_v39 = vpop.f32.mrb[8].mxu0 }
 0x120   : > { %884 = vst [vmem:[%s1611_s19 + $0x130] sm:$0xff] %v718_v38  ;;  %v1194_v40 = vpop.f32.mrb[8].mxu1  ;;  %v573_v41 = vadd.f32 %v1146_v39, %v1606_v6  ;;  %v567_v43 = vpop.f32.mrb[9].mxu0 }
 0x121   : > { %v733_v42 = vadd.f32 %v1194_v40, %v1606_v6  ;;  %v727_v44 = vpop.f32.mrb[9].mxu1  ;;  %v568_v45 = vadd.f32 %v1606_v6, %v567_v43 }
 0x122   : > { %v728_v46 = vadd.f32 %v1606_v6, %v727_v44  ;;  %855 = vst [vmem:[%s1611_s19 + $0x48] sm:$0xff] %v573_v41 }
 0x123   : > { %887 = vst [vmem:[%s1611_s19 + $0x148] sm:$0xff] %v733_v42  ;;  %854 = vst [vmem:[%s1611_s19 + $0x40] sm:$0xff] %v568_v45  ;;  %v1149_v47 = vpop.f32.mrb[10].mxu0 }
 0x124   : > { %886 = vst [vmem:[%s1611_s19 + $0x140] sm:$0xff] %v728_v46  ;;  %v1197_v48 = vpop.f32.mrb[10].mxu1  ;;  %v583_v49 = vadd.f32 %v1149_v47, %v1606_v6  ;;  %v577_v51 = vpop.f32.mrb[11].mxu0 }
 0x125   : > { %v743_v50 = vadd.f32 %v1197_v48, %v1606_v6  ;;  %v737_v52 = vpop.f32.mrb[11].mxu1  ;;  %v578_v53 = vadd.f32 %v1606_v6, %v577_v51 }
 0x126   : > { %v738_v54 = vadd.f32 %v1606_v6, %v737_v52  ;;  %857 = vst [vmem:[%s1611_s19 + $0x58] sm:$0xff] %v583_v49 }
 0x127   : > { %889 = vst [vmem:[%s1611_s19 + $0x158] sm:$0xff] %v743_v50  ;;  %856 = vst [vmem:[%s1611_s19 + $0x50] sm:$0xff] %v578_v53  ;;  %v1152_v55 = vpop.f32.mrb[12].mxu0 }
 0x128   : > { %888 = vst [vmem:[%s1611_s19 + $0x150] sm:$0xff] %v738_v54  ;;  %v1200_v56 = vpop.f32.mrb[12].mxu1  ;;  %v593_v57 = vadd.f32 %v1152_v55, %v1606_v6  ;;  %v587_v59 = vpop.f32.mrb[13].mxu0 }
 0x129   : > { %v753_v58 = vadd.f32 %v1200_v56, %v1606_v6  ;;  %v747_v60 = vpop.f32.mrb[13].mxu1  ;;  %v588_v61 = vadd.f32 %v1606_v6, %v587_v59 }
 0x12a   : > { %v748_v62 = vadd.f32 %v1606_v6, %v747_v60  ;;  %859 = vst [vmem:[%s1611_s19 + $0x68] sm:$0xff] %v593_v57 }
 0x12b   : > { %891 = vst [vmem:[%s1611_s19 + $0x168] sm:$0xff] %v753_v58  ;;  %858 = vst [vmem:[%s1611_s19 + $0x60] sm:$0xff] %v588_v61  ;;  %v1155_v63 = vpop.f32.mrb[14].mxu0 }
 0x12c   : > { %890 = vst [vmem:[%s1611_s19 + $0x160] sm:$0xff] %v748_v62  ;;  %v1203_v0 = vpop.f32.mrb[14].mxu1  ;;  %v603_v1 = vadd.f32 %v1155_v63, %v1606_v6  ;;  %v597_v3 = vpop.f32.mrb[15].mxu0 }
 0x12d   : > { %v763_v2 = vadd.f32 %v1203_v0, %v1606_v6  ;;  %v757_v4 = vpop.f32.mrb[15].mxu1  ;;  %v598_v5 = vadd.f32 %v1606_v6, %v597_v3 }
 0x12e   : > { %v758_v7 = vadd.f32 %v1606_v6, %v757_v4  ;;  %861 = vst [vmem:[%s1611_s19 + $0x78] sm:$0xff] %v603_v1 }
 0x12f   : > { %893 = vst [vmem:[%s1611_s19 + $0x178] sm:$0xff] %v763_v2  ;;  %860 = vst [vmem:[%s1611_s19 + $0x70] sm:$0xff] %v598_v5  ;;  %v1158_v8 = vpop.f32.mrb[16].mxu0 }
 0x130   : > { %892 = vst [vmem:[%s1611_s19 + $0x170] sm:$0xff] %v758_v7  ;;  %v1206_v9 = vpop.f32.mrb[16].mxu1  ;;  %v613_v10 = vadd.f32 %v1158_v8, %v1606_v6  ;;  %v607_v12 = vpop.f32.mrb[17].mxu0 }
 0x131   : > { %v773_v11 = vadd.f32 %v1206_v9, %v1606_v6  ;;  %v767_v13 = vpop.f32.mrb[17].mxu1  ;;  %v608_v14 = vadd.f32 %v1606_v6, %v607_v12 }
 0x132   : > { %v768_v15 = vadd.f32 %v1606_v6, %v767_v13  ;;  %863 = vst [vmem:[%s1611_s19 + $0x88] sm:$0xff] %v613_v10 }
 0x133   : > { %895 = vst [vmem:[%s1611_s19 + $0x188] sm:$0xff] %v773_v11  ;;  %862 = vst [vmem:[%s1611_s19 + $0x80] sm:$0xff] %v608_v14  ;;  %v1161_v16 = vpop.f32.mrb[18].mxu0 }
 0x134   : > { %894 = vst [vmem:[%s1611_s19 + $0x180] sm:$0xff] %v768_v15  ;;  %v1209_v17 = vpop.f32.mrb[18].mxu1  ;;  %v623_v18 = vadd.f32 %v1161_v16, %v1606_v6  ;;  %v617_v20 = vpop.f32.mrb[19].mxu0 }
 0x135   : > { %v783_v19 = vadd.f32 %v1209_v17, %v1606_v6  ;;  %v777_v21 = vpop.f32.mrb[19].mxu1  ;;  %v618_v22 = vadd.f32 %v1606_v6, %v617_v20 }
 0x136   : > { %v778_v23 = vadd.f32 %v1606_v6, %v777_v21  ;;  %865 = vst [vmem:[%s1611_s19 + $0x98] sm:$0xff] %v623_v18 }
 0x137   : > { %897 = vst [vmem:[%s1611_s19 + $0x198] sm:$0xff] %v783_v19  ;;  %864 = vst [vmem:[%s1611_s19 + $0x90] sm:$0xff] %v618_v22  ;;  %v1164_v24 = vpop.f32.mrb[20].mxu0 }
 0x138   : > { %896 = vst [vmem:[%s1611_s19 + $0x190] sm:$0xff] %v778_v23  ;;  %v1212_v25 = vpop.f32.mrb[20].mxu1  ;;  %v633_v26 = vadd.f32 %v1164_v24, %v1606_v6  ;;  %v627_v28 = vpop.f32.mrb[21].mxu0 }
 0x139   : > { %v793_v27 = vadd.f32 %v1212_v25, %v1606_v6  ;;  %v787_v29 = vpop.f32.mrb[21].mxu1  ;;  %v628_v30 = vadd.f32 %v1606_v6, %v627_v28 }
 0x13a   : > { %v788_v31 = vadd.f32 %v1606_v6, %v787_v29  ;;  %867 = vst [vmem:[%s1611_s19 + $0xa8] sm:$0xff] %v633_v26 }
 0x13b   : > { %899 = vst [vmem:[%s1611_s19 + $0x1a8] sm:$0xff] %v793_v27  ;;  %866 = vst [vmem:[%s1611_s19 + $0xa0] sm:$0xff] %v628_v30  ;;  %v1167_v32 = vpop.f32.mrb[22].mxu0 }
 0x13c   : > { %898 = vst [vmem:[%s1611_s19 + $0x1a0] sm:$0xff] %v788_v31  ;;  %v1215_v33 = vpop.f32.mrb[22].mxu1  ;;  %v643_v34 = vadd.f32 %v1167_v32, %v1606_v6  ;;  %v637_v36 = vpop.f32.mrb[23].mxu0 }
 0x13d   : > { %v803_v35 = vadd.f32 %v1215_v33, %v1606_v6  ;;  %v797_v37 = vpop.f32.mrb[23].mxu1  ;;  %v638_v38 = vadd.f32 %v1606_v6, %v637_v36 }
 0x13e   : > { %v798_v39 = vadd.f32 %v1606_v6, %v797_v37  ;;  %869 = vst [vmem:[%s1611_s19 + $0xb8] sm:$0xff] %v643_v34 }
 0x13f   : > { %901 = vst [vmem:[%s1611_s19 + $0x1b8] sm:$0xff] %v803_v35  ;;  %868 = vst [vmem:[%s1611_s19 + $0xb0] sm:$0xff] %v638_v38  ;;  %v1170_v40 = vpop.f32.mrb[24].mxu0 }
 0x140   : > { %900 = vst [vmem:[%s1611_s19 + $0x1b0] sm:$0xff] %v798_v39  ;;  %v1218_v41 = vpop.f32.mrb[24].mxu1  ;;  %v653_v42 = vadd.f32 %v1170_v40, %v1606_v6  ;;  %v647_v44 = vpop.f32.mrb[25].mxu0 }
 0x141   : > { %v813_v43 = vadd.f32 %v1218_v41, %v1606_v6  ;;  %v807_v45 = vpop.f32.mrb[25].mxu1  ;;  %v648_v46 = vadd.f32 %v1606_v6, %v647_v44 }
 0x142   : > { %v808_v47 = vadd.f32 %v1606_v6, %v807_v45  ;;  %871 = vst [vmem:[%s1611_s19 + $0xc8] sm:$0xff] %v653_v42 }
 0x143   : > { %903 = vst [vmem:[%s1611_s19 + $0x1c8] sm:$0xff] %v813_v43  ;;  %870 = vst [vmem:[%s1611_s19 + $0xc0] sm:$0xff] %v648_v46  ;;  %v1173_v48 = vpop.f32.mrb[26].mxu0 }
 0x144   : > { %902 = vst [vmem:[%s1611_s19 + $0x1c0] sm:$0xff] %v808_v47  ;;  %v1221_v49 = vpop.f32.mrb[26].mxu1  ;;  %v663_v50 = vadd.f32 %v1173_v48, %v1606_v6  ;;  %v657_v52 = vpop.f32.mrb[27].mxu0 }
 0x145   : > { %v823_v51 = vadd.f32 %v1221_v49, %v1606_v6  ;;  %v817_v53 = vpop.f32.mrb[27].mxu1  ;;  %v658_v54 = vadd.f32 %v1606_v6, %v657_v52 }
 0x146   : > { %v818_v55 = vadd.f32 %v1606_v6, %v817_v53  ;;  %873 = vst [vmem:[%s1611_s19 + $0xd8] sm:$0xff] %v663_v50 }
 0x147   : > { %905 = vst [vmem:[%s1611_s19 + $0x1d8] sm:$0xff] %v823_v51  ;;  %872 = vst [vmem:[%s1611_s19 + $0xd0] sm:$0xff] %v658_v54  ;;  %v1176_v56 = vpop.f32.mrb[28].mxu0 }
 0x148   : > { %904 = vst [vmem:[%s1611_s19 + $0x1d0] sm:$0xff] %v818_v55  ;;  %v1224_v57 = vpop.f32.mrb[28].mxu1  ;;  %v673_v58 = vadd.f32 %v1176_v56, %v1606_v6  ;;  %v667_v60 = vpop.f32.mrb[29].mxu0 }
 0x149   : > { %v833_v59 = vadd.f32 %v1224_v57, %v1606_v6  ;;  %v827_v61 = vpop.f32.mrb[29].mxu1  ;;  %v668_v62 = vadd.f32 %v1606_v6, %v667_v60 }
 0x14a   : > { %v828_v63 = vadd.f32 %v1606_v6, %v827_v61  ;;  %875 = vst [vmem:[%s1611_s19 + $0xe8] sm:$0xff] %v673_v58 }
 0x14b   : > { %907 = vst [vmem:[%s1611_s19 + $0x1e8] sm:$0xff] %v833_v59  ;;  %874 = vst [vmem:[%s1611_s19 + $0xe0] sm:$0xff] %v668_v62  ;;  %v1179_v0 = vpop.f32.mrb[30].mxu0 }
 0x14c   : > { %906 = vst [vmem:[%s1611_s19 + $0x1e0] sm:$0xff] %v828_v63  ;;  %v1227_v1 = vpop.f32.mrb[30].mxu1  ;;  %v683_v2 = vadd.f32 %v1179_v0, %v1606_v6  ;;  %v677_v4 = vpop.f32.mrb[31].mxu0 }
 0x14d   : > { %v843_v3 = vadd.f32 %v1227_v1, %v1606_v6  ;;  %v837_v5 = vpop.f32.mrb[31].mxu1  ;;  %v678_v7 = vadd.f32 %v1606_v6, %v677_v4 }
 0x14e   : > { %v838_v8 = vadd.f32 %v1606_v6, %v837_v5  ;;  %877 = vst [vmem:[%s1611_s19 + $0xf8] sm:$0xff] %v683_v2 }
 0x14f   : > { %909 = vst [vmem:[%s1611_s19 + $0x1f8] sm:$0xff] %v843_v3  ;;  %876 = vst [vmem:[%s1611_s19 + $0xf0] sm:$0xff] %v678_v7 }
 0x150   : > { %908 = vst [vmem:[%s1611_s19 + $0x1f0] sm:$0xff] %v838_v8 }
 0x151 PF: > { %p13_p8 = scmp.ge.s32.totalorder %s1390_s17, 4   ;;  %s1761_s12 = smov %s1337_s13 }
 0x152   : > { %s1762_s13 = smov %s1341_s14  ;;  %s1763_s14 = smov %s1400_s20 }
 0x153   : > { %s1764_s15 = smov %s1390_s17  ;;  %15 = sbr.rel (!%p13_p8) target bundleno = 3 (0x3), region = 72 }
 0x15a   :  { %932 = vsyncpa [#allocation3], 1 }
 0x15b   :  { %934 = vsyncpa [#allocation3 + $0x1], 1 }

// kernel: earth_attention_3d_forward.4
= control target key start
LH: loop header
LB: loop body
LE: loop exit
PB: predicated region body
PF: predicated region fallthrough
CT: control target
= control target key end

     0   :  { %10 = vsyncpa [#allocation3], 0  ;;  %s16421_s0 = inlined_call_operand.hbm [shape: f32[32,4,32,8], index: 0, kind: input, shape index: {}]   ;;  %s16422_s1 = inlined_call_operand.hbm [shape: f32[32,4,32,8], index: 1, kind: input, shape index: {}]   ;;  %s16423_s2 = inlined_call_operand.hbm [shape: f32[32,4,32,8], index: 2, kind: input, shape index: {}]   ;;  %s16424_s3 = inlined_call_operand.vmem [shape: f32[360,4,32,32], index: 3, kind: input, shape index: {}]   ;;  %s16425_s4 = inlined_call_operand.vmem [shape: f32[32,32,32], index: 4, kind: input, shape index: {}]   ;;  %s16426_s5 = inlined_call_operand.vmem [shape: f32[32,4,32,8], index: 5, kind: output, shape index: {}]  }
   0x1   :  { %12 = vsyncpa [#allocation3 + $0x1], 0 }
   0x2   :  { %13 = vsyncpa [#allocation5], 0 }
   0x3   :  { %15 = vsyncpa [#allocation5 + $0x1], 0  ;;  %s12878_s18 = smov 0   ;;  %s12880_s19 = smov 0  }
   0x4   :  { %s12882_s20 = smov 0   ;;  %s12884_s21 = smov 0  }
   0x5 LB: > { %s12897_s22 = sadd.s32 4294967295, %s12841_s21   ;;  %s12900_s23 = sadd.s32 1, %s12841_s21   ;;  %s12841_s21 = sphi %s12884_s21, %s17004_s21   ;;  %s12837_s20 = sphi %s12882_s20, %s17003_s20   ;;  %s12833_s19 = sphi %s12880_s19, %s17002_s19   ;;  %s12829_s18 = sphi %s12878_s18, %s17001_s18  }
   0x6   : > { %s25_s24 = ssub.s32 %s12841_s21, %s12900_s23  ;;  %s28_s25 = sadd.s32 1, %s12837_s20 }
   0x7   : > { %p26_p0 = scmp.eq.s32.totalorder %s25_s24, 0  ;;  %p35_p1 = scmp.ne.s32.totalorder %s12837_s20, %s12833_s19 }
   0x8   : > { %p36_p2 = scmp.eq.s32.totalorder %s12841_s21, 0  ;;  %p41_p3 = scmp.ne.s32.totalorder %s12833_s19, %s12829_s18 }
   0x9   : > { %s12910_s26 = scalar_select %p26_p0, %s12837_s20, %s28_s25  }
   0xa   : > { %p37_p4 = por %p36_p2, %p35_p1  ;;  %p42_p5 = scmp.eq.s32.totalorder %s12897_s22, 0 }
   0xb   : > { %p12163_p6 = scmp.lt.s32.totalorder %s12841_s21, 4  ;;  %s221_s28 = sand.u32 1, %s12837_s20  }
   0xc   : > { %p12914_p7 = por %p42_p5, %p41_p3  ;;  %s12921_s29 = sshll.u32 %s221_s28, 10 }
   0xd   : > { %s12924_s30 = sshll.u32 %s12841_s21, 14  ;;  %p12926_p8 = pnand %p12163_p6, %p37_p4 }
   0xe   : > { %s16607_s27 = scalar_select %p12914_p7, 1, 0 }
   0xf   : > { %s243_s7 = sand.u32 1, %s12841_s21   ;;  %s12935_s10 = scalar_lea.hbm %s16422_s1, %s12924_s30 }
  0x10   : > { %s247_s11 = scalar_lea.vmem [#allocation4], %s12921_s29  ;;  %s12942_s13 = scalar_lea.sflag [#allocation5], %s243_s7 }
  0x11   : > { %s255_s12 = sshll.u32 %s247_s11, 4  ;;  %s12713_s14 = scalar_lea.hbm %s12935_s10, 16384  ;;  %s12939_s12 = int_to_ptr.vmem [resolvable:$true] %s255_s12 }
  0x12   : > { %p12714_p11 = scmp.ne.s32.totalorder %s12935_s10, %s12713_s14  ;;  %p12948_p12 = pneg %p12926_p8 }
  0x13   : > { %s12718_s18 = scalar_lea.hbm %s16422_s1, 65536  ;;  %p12719_p1 = scmp.lt.u32.totalorder %s12935_s10, %s16422_s1 }
  0x14   : > { %p12716_p13 = pnand %p12948_p12, %p12714_p11  ;;  %p12720_p2 = scmp.lt.u32.totalorder %s12718_s18, %s12713_s14 }
  0x15   : > { %p12722_p4 = scmp.lt.u32.totalorder %s12713_s14, %s12935_s10 }
  0x16   : > { %p12717_p0 = pneg %p12716_p13  ;;  %p12721_p3 = por %p12720_p2, %p12719_p1 }
  0x18   : > { %p12723_p5 = por %p12722_p4, %p12721_p3 }
  0x1a   : > { %p12724_p6 = pnand %p12723_p5, %p12717_p0 }
  0x1c   : > { %12727 = shalt.err (!%p12724_p6)
}
  0x1d   : > { %s12728_s7 = scalar_lea.vmem %s12939_s12, 16384  ;;  %s12843_s8 = smov [#allocation4]  }
  0x1e   : > { %p12729_p11 = scmp.ne.s32.totalorder %s12939_s12, %s12728_s7  ;;  %s12733_s9 = sshll.u32 %s12843_s8, 4  ;;  %s12734_s9 = int_to_ptr.vmem [resolvable:$false] %s12733_s9 }
  0x1f   : > { %s12735_s11 = scalar_lea.vmem %s12734_s9, 32768  ;;  %p12736_p10 = scmp.lt.s32.totalorder %s12939_s12, %s12734_s9 }
  0x20   : > { %p12731_p13 = pnand %p12729_p11, %p12948_p12  ;;  %p12737_p7 = scmp.lt.s32.totalorder %s12735_s11, %s12728_s7 }
  0x22   : > { %p12732_p9 = pneg %p12731_p13  ;;  %p12738_p1 = por %p12737_p7, %p12736_p10 }
  0x24   : > { %p12739_p2 = pnand %p12738_p1, %p12732_p9 }
  0x26   : > { %12742 = shalt.err (!%p12739_p2)
}
  0x27   : > { %s16428_s14 = smov 128   ;;  %s16430_s16 = smov 8  }
  0x28   : > { %12159 = dma.hbm_to_vmem [thread:$0]  (!%p12926_p8), %s12935_s10, 16384, %s12939_s12, %s12942_s13, %s16428_s14, %s16428_s14, %s16430_s16  }
  0x29   : > { %p16610_p7 = scmp.lt.s32.totalorder %s12841_s21, 5  ;;  %p16611_p9 = scmp.ge.s32.totalorder %s12841_s21, 1 }
  0x2a   : > { %s12987_s25 = scalar_lea.hbm %s16421_s0, %s12924_s30  ;;  %s225_s7 = scalar_lea.vmem [#allocation2], %s12921_s29 }
  0x2b   : > { %p12979_p10 = pnand %p16611_p9, %p16610_p7  ;;  %s233_s8 = sshll.u32 %s225_s7, 4  ;;  %s12990_s8 = int_to_ptr.vmem [resolvable:$true] %s233_s8 }
  0x2c   : > { %s12996_s21 = scalar_lea.hbm %s16423_s2, %s12924_s30  ;;  %s13000_s9 = scalar_lea.sflag [#allocation3], %s221_s28 }
  0x2d   : > { %s16612_s17 = scalar_select %p12979_p10, 1, 0 }
  0x2e   : > { %s12743_s11 = scalar_lea.hbm %s12987_s25, 16384  ;;  %s12748_s14 = scalar_lea.hbm %s16421_s0, 65536 }
  0x2f   : > { %p12744_p0 = scmp.ne.s32.totalorder %s12987_s25, %s12743_s11  ;;  %p12749_p5 = scmp.lt.u32.totalorder %s12987_s25, %s16421_s0 }
  0x30   : > { %p12750_p6 = scmp.lt.u32.totalorder %s12748_s14, %s12743_s11  ;;  %p12752_p13 = scmp.lt.u32.totalorder %s12743_s11, %s12987_s25 }
  0x31   : > { %p12746_p3 = pnand %p12744_p0, %p12948_p12 }
  0x32   : > { %p12751_p11 = por %p12750_p6, %p12749_p5 }
  0x33   : > { %p12747_p4 = pneg %p12746_p3 }
  0x34   : > { %p12753_p1 = por %p12752_p13, %p12751_p11 }
  0x36   : > { %p12754_p2 = pnand %p12753_p1, %p12747_p4 }
  0x38   : > { %12757 = shalt.err (!%p12754_p2)
}
  0x39   : > { %s12758_s28 = scalar_lea.vmem %s12990_s8, 16384  ;;  %s12846_s30 = smov [#allocation2]  }
  0x3a   : > { %p12759_p7 = scmp.ne.s32.totalorder %s12990_s8, %s12758_s28  ;;  %s12763_s10 = sshll.u32 %s12846_s30, 4  ;;  %s12764_s10 = int_to_ptr.vmem [resolvable:$false] %s12763_s10 }
  0x3b   : > { %s12765_s16 = scalar_lea.vmem %s12764_s10, 32768  ;;  %p12766_p3 = scmp.lt.s32.totalorder %s12990_s8, %s12764_s10 }
  0x3c   : > { %p12761_p9 = pnand %p12759_p7, %p12948_p12  ;;  %p12767_p10 = scmp.lt.s32.totalorder %s12765_s16, %s12758_s28 }
  0x3e   : > { %p12762_p0 = pneg %p12761_p9  ;;  %p12768_p5 = por %p12767_p10, %p12766_p3 }
  0x40   : > { %p12769_p6 = pnand %p12768_p5, %p12762_p0 }
  0x42   : > { %12772 = shalt.err (!%p12769_p6)
}
  0x43   : > { %s16613_s14 = smov 8   ;;  %s16614_s12 = smov 128  }
  0x44   : > { %12156 = dma.hbm_to_vmem [thread:$0]  (!%p12926_p8), %s12987_s25, 16384, %s12990_s8, %s13000_s9, %s16614_s12, %s16614_s12, %s16613_s14  }
  0x45   : > { %s269_s11 = scalar_lea.vmem [#allocation6], %s12921_s29  ;;  %s12773_s24 = scalar_lea.hbm %s12996_s21, 16384 }
  0x46   : > { %s277_s18 = sshll.u32 %s269_s11, 4  ;;  %p12774_p10 = scmp.ne.s32.totalorder %s12996_s21, %s12773_s24  ;;  %s13028_s18 = int_to_ptr.vmem [resolvable:$true] %s277_s18 }
  0x47   : > { %s12778_s30 = scalar_lea.hbm %s16423_s2, 65536  ;;  %p12779_p13 = scmp.lt.u32.totalorder %s12996_s21, %s16423_s2 }
  0x48   : > { %p12776_p4 = pnand %p12774_p10, %p12948_p12  ;;  %p12780_p1 = scmp.lt.u32.totalorder %s12778_s30, %s12773_s24 }
  0x49   : > { %p12782_p7 = scmp.lt.u32.totalorder %s12773_s24, %s12996_s21 }
  0x4a   : > { %p12777_p11 = pneg %p12776_p4  ;;  %p12781_p2 = por %p12780_p1, %p12779_p13 }
  0x4c   : > { %p12783_p9 = por %p12782_p7, %p12781_p2 }
  0x4e   : > { %p12784_p0 = pnand %p12783_p9, %p12777_p11 }
  0x50   : > { %12787 = shalt.err (!%p12784_p0)
}
  0x51   : > { %s12788_s29 = scalar_lea.vmem %s13028_s18, 16384  ;;  %s12847_s25 = smov [#allocation6]  }
  0x52   : > { %p12789_p3 = scmp.ne.s32.totalorder %s13028_s18, %s12788_s29  ;;  %s12793_s8 = sshll.u32 %s12847_s25, 4  ;;  %s12794_s8 = int_to_ptr.vmem [resolvable:$false] %s12793_s8 }
  0x53   : > { %s12795_s9 = scalar_lea.vmem %s12794_s8, 32768  ;;  %p12796_p10 = scmp.lt.s32.totalorder %s13028_s18, %s12794_s8 }
  0x54   : > { %p12791_p5 = pnand %p12789_p3, %p12948_p12  ;;  %p12797_p4 = scmp.lt.s32.totalorder %s12795_s9, %s12788_s29 }
  0x56   : > { %p12792_p6 = pneg %p12791_p5  ;;  %p12798_p13 = por %p12797_p4, %p12796_p10 }
  0x58   : > { %p12799_p1 = pnand %p12798_p13, %p12792_p6 }
  0x5a   : > { %12802 = shalt.err (!%p12799_p1)
}
  0x5b   : > { %12162 = dma.hbm_to_vmem [thread:$0]  (!%p12926_p8), %s12996_s21, 16384, %s13028_s18, %s12942_s13, %s16614_s12, %s16614_s12, %s16613_s14  }
  0x5c   : > { %p16615_p12 = scmp.ne.s32.totalorder %s16612_s17, 0 }
  0x5e   : > { %335 = sbr.rel (%p16615_p12) target bundleno = 1227 (0x4cb), region = 40 }
  0x65   : > { %s337_s15 = sand.u32 1, %s12833_s19   ;;  %p16616_p11 = scmp.ne.s32.totalorder %s16607_s27, 0 }
  0x66   : > { %s13058_s11 = sshll.u32 %s337_s15, 10  ;;  %s338_s24 = scalar_lea.sflag [#allocation3], %s337_s15 }
  0x67   : > { %s13061_s7 = scalar_lea.vmem [#allocation2], %s13058_s11 }
  0x68   : > { %12820 = dma.done.wait (%p16616_p11), %s338_s24, 16384  }
  0x69   : > { %12822 = vsyncadd (%p16616_p11), %s338_s24, 4294950912  ;;  %s346_s6 = sand.u32 1, %s12897_s22   ;;  %s13069_s17 = scalar_lea.vmem [#allocation4], %s13058_s11 }
  0x6a   : > { %s347_s13 = scalar_lea.sflag [#allocation5], %s346_s6 }
  0x6b   : > { %12824 = dma.done.wait (%p16616_p11), %s347_s13, 32768  }
  0x6c   : > { %12826 = vsyncadd (%p16616_p11), %s347_s13, 4294934528  ;;  %vm984_vm0 = vcmask 64512   ;;  %v728_v1 = vld [vmem:[%s13069_s17] sm:$0xff]  ;;  %v729_v2 = vld [vmem:[%s13069_s17 + $0x8] sm:$0xff]  ;;  %s426_s27 = ssub.s32 0, %s12897_s22  ;;  %p425_p8 = scmp.lt.s32.totalorder %s12897_s22, 0 }
  0x6d   : > { %vm13077_vm1 = vmpackc.low %vm984_vm0, %vm984_vm0  ;;  %v732_v3 = vld [vmem:[%s13069_s17 + $0x20] sm:$0xff]  ;;  %v11507_v4 = vpack.c.bf16 %v729_v2, %v728_v1  ;;  %v733_v5 = vld [vmem:[%s13069_s17 + $0x28] sm:$0xff]  ;;  %s9692_s21 = smin.u32 %s12897_s22, %s426_s27  ;;  %s9698_s30 = sshll.u32 %s12897_s22, 3  ;;  %vm4889_vm2 = vcmask 261120  }
  0x6e   : > { %v730_v6 = vld [vmem:[%s13069_s17 + $0x10] sm:$0xff]  ;;  %v731_v7 = vld [vmem:[%s13069_s17 + $0x18] sm:$0xff]  ;;  %v11519_v8 = vpack.c.bf16 %v733_v5, %v732_v3  ;;  %v472_v12 = vld [vmem:[%s13061_s7] sm:$0xff]  ;;  %12199 = sdivrem.u32 %s9692_s21, 45  ;;  %p13625_p9 = scmp.lt.s32.totalorder %s9698_s30, 31 }
  0x6f   : > { %v11513_v9 = vpack.c.bf16 %v731_v7, %v730_v6  ;;  %v734_v10 = vld [vmem:[%s13069_s17 + $0x30] sm:$0xff]  ;;  %v735_v11 = vld [vmem:[%s13069_s17 + $0x38] sm:$0xff]  ;;  %11509 = vmatprep.subr.msk.bf16.mxu0 %vm13077_vm1, %v11507_v4  ;;  %v600_v14 = vmul.f32 0.35355338, %v472_v12  ;;  %v476_v15 = vld [vmem:[%s13061_s7 + $0x20] sm:$0xff] }
  0x70   : > { %v11525_v13 = vpack.c.bf16 %v735_v11, %v734_v10  ;;  %11521 = vmatprep.subr.msk.bf16.mxu1 %vm13077_vm1, %v11519_v8  ;;  %11512 = vmatpush3.bf16.xpose.msk.msra.mxu0 %vm13077_vm1, %v11507_v4  ;;  %v604_v16 = vmul.f32 0.35355338, %v476_v15  ;;  %v736_v17 = vld [vmem:[%s13069_s17 + $0x40] sm:$0xff]  ;;  %v737_v18 = vld [vmem:[%s13069_s17 + $0x48] sm:$0xff]  ;;  %v478_v25 = vld [vmem:[%s13061_s7 + $0x30] sm:$0xff]  ;;  %s17012_s30 = smov (!%p13625_p9, %s9698_s30), 31 }
  0x71   : > { %11524 = vmatpush3.bf16.xpose.msk.msra.mxu1 %vm13077_vm1, %v11519_v8  ;;  %11515 = vmatprep.subr.msk.bf16.mxu0 %vm13077_vm1, %v11513_v9  ;;  %v740_v19 = vld [vmem:[%s13069_s17 + $0x60] sm:$0xff]  ;;  %v741_v20 = vld [vmem:[%s13069_s17 + $0x68] sm:$0xff]  ;;  %v11531_v21 = vpack.c.bf16 %v737_v18, %v736_v17  ;;  %v474_v27 = vld [vmem:[%s13061_s7 + $0x10] sm:$0xff]  ;;  %v606_v34 = vmul.f32 0.35355338, %v478_v25  ;;  %s10097_s29 = sshll.u32 %s17012_s30, 5 }
  0x72   : > { %11527 = vmatprep.subr.msk.bf16.mxu1 %vm13077_vm1, %v11525_v13  ;;  %10619 = vmatprep.mubr.msk.f32.mxu0 %vm984_vm0, %v600_v14  ;;  %v11543_v22 = vpack.c.bf16 %v741_v20, %v740_v19  ;;  %v473_v23 = vld [vmem:[%s13061_s7 + $0x8] sm:$0xff]  ;;  %v742_v28 = vld [vmem:[%s13069_s17 + $0x70] sm:$0xff]  ;;  %v743_v29 = vld [vmem:[%s13069_s17 + $0x78] sm:$0xff]  ;;  %v602_v37 = vmul.f32 0.35355338, %v474_v27  ;;  %s13673_s6 = scalar_lea.vmem %s16425_s4, %s10097_s29 }
  0x73   : > { %10633 = vmatprep.mubr.msk.f32.mxu1 %vm984_vm0, %v604_v16  ;;  %v477_v24 = vld [vmem:[%s13061_s7 + $0x28] sm:$0xff]  ;;  %v601_v26 = vmul.f32 0.35355338, %v473_v23  ;;  %v475_v31 = vld [vmem:[%s13061_s7 + $0x18] sm:$0xff]  ;;  %v738_v32 = vld [vmem:[%s13069_s17 + $0x50] sm:$0xff]  ;;  %v11549_v38 = vpack.c.bf16 %v743_v29, %v742_v28 }
  0x74   : > { %v605_v30 = vmul.f32 0.35355338, %v477_v24  ;;  %v739_v33 = vld [vmem:[%s13069_s17 + $0x58] sm:$0xff]  ;;  %v480_v36 = vld [vmem:[%s13061_s7 + $0x40] sm:$0xff]  ;;  %v603_v40 = vmul.f32 0.35355338, %v475_v31 }
  0x75   : > { %v479_v35 = vld [vmem:[%s13061_s7 + $0x38] sm:$0xff]  ;;  %v484_v39 = vld [vmem:[%s13061_s7 + $0x60] sm:$0xff]  ;;  %v11537_v41 = vpack.c.bf16 %v739_v33, %v738_v32  ;;  %v608_v43 = vmul.f32 0.35355338, %v480_v36  ;;  %v745_v46 = vld [vmem:[%s13069_s17 + $0x88] sm:$0xff] }
  0x76   : > { %v607_v42 = vmul.f32 0.35355338, %v479_v35  ;;  %v612_v44 = vmul.f32 0.35355338, %v484_v39  ;;  %v744_v45 = vld [vmem:[%s13069_s17 + $0x80] sm:$0xff]  ;;  %v749_v48 = vld [vmem:[%s13069_s17 + $0xa8] sm:$0xff] }
  0x77   : > { %v748_v47 = vld [vmem:[%s13069_s17 + $0xa0] sm:$0xff]  ;;  %v11555_v49 = vpack.c.bf16 %v745_v46, %v744_v45  ;;  %v481_v51 = vld [vmem:[%s13061_s7 + $0x48] sm:$0xff]  ;;  %v486_v53 = vld [vmem:[%s13061_s7 + $0x70] sm:$0xff]  ;;  %s12200_s14 = spop.drf %12199 }
  0x78   : > { %11518 = vmatpush3.bf16.xpose.msk.msra.mxu0 %vm13077_vm1, %v11513_v9  ;;  %v11567_v50 = vpack.c.bf16 %v749_v48, %v748_v47  ;;  %v485_v52 = vld [vmem:[%s13061_s7 + $0x68] sm:$0xff]  ;;  %v609_v54 = vmul.f32 0.35355338, %v481_v51  ;;  %v482_v55 = vld [vmem:[%s13061_s7 + $0x50] sm:$0xff]  ;;  %v751_v57 = vld [vmem:[%s13069_s17 + $0xb8] sm:$0xff]  ;;  %s430_s12 = ssub.s32 0, %s12200_s14 }
  0x79   : > { %11530 = vmatpush3.bf16.xpose.msk.msra.mxu1 %vm13077_vm1, %v11525_v13  ;;  %11533 = vmatprep.subr.msk.bf16.mxu0 %vm13077_vm1, %v11531_v21  ;;  %v750_v56 = vld [vmem:[%s13069_s17 + $0xb0] sm:$0xff]  ;;  %v613_v58 = vmul.f32 0.35355338, %v485_v52  ;;  %v483_v59 = vld [vmem:[%s13061_s7 + $0x58] sm:$0xff]  ;;  %v614_v62 = vmul.f32 0.35355338, %v486_v53  ;;  %s17006_s12 = smov (!%p425_p8, %s430_s12), %s12200_s14 }
  0x7a   : > { %11545 = vmatprep.subr.msk.bf16.mxu1 %vm13077_vm1, %v11543_v22  ;;  %v746_v60 = vld [vmem:[%s13069_s17 + $0x90] sm:$0xff]  ;;  %v747_v61 = vld [vmem:[%s13069_s17 + $0x98] sm:$0xff]  ;;  %v488_v1 = vld [vmem:[%s13061_s7 + $0x80] sm:$0xff]  ;;  %v610_v2 = vmul.f32 0.35355338, %v482_v55  ;;  %v11573_v3 = vpack.c.bf16 %v751_v57, %v750_v56  ;;  %p9694_p2 = scmp.lt.s32.totalorder %s17006_s12, 0 }
  0x7b   : > { %v487_v63 = vld [vmem:[%s13061_s7 + $0x78] sm:$0xff]  ;;  %v492_v4 = vld [vmem:[%s13061_s7 + $0xa0] sm:$0xff]  ;;  %v611_v5 = vmul.f32 0.35355338, %v483_v59  ;;  %v11561_v6 = vpack.c.bf16 %v747_v61, %v746_v60  ;;  %v616_v8 = vmul.f32 0.35355338, %v488_v1 }
  0x7c   : > { %v615_v7 = vmul.f32 0.35355338, %v487_v63  ;;  %v620_v9 = vmul.f32 0.35355338, %v492_v4  ;;  %v752_v10 = vld [vmem:[%s13069_s17 + $0xc0] sm:$0xff]  ;;  %v753_v11 = vld [vmem:[%s13069_s17 + $0xc8] sm:$0xff] }
  0x7d   : > { %v756_v12 = vld [vmem:[%s13069_s17 + $0xe0] sm:$0xff]  ;;  %v757_v13 = vld [vmem:[%s13069_s17 + $0xe8] sm:$0xff]  ;;  %v11579_v14 = vpack.c.bf16 %v753_v11, %v752_v10  ;;  %v494_v18 = vld [vmem:[%s13061_s7 + $0xb0] sm:$0xff]  ;;  %s436_s18 = sadd.s32 45, %s17006_s12 }
  0x7e   : > { %v11591_v15 = vpack.c.bf16 %v757_v13, %v756_v12  ;;  %v489_v16 = vld [vmem:[%s13061_s7 + $0x88] sm:$0xff]  ;;  %v490_v20 = vld [vmem:[%s13061_s7 + $0x90] sm:$0xff]  ;;  %v491_v24 = vld [vmem:[%s13061_s7 + $0x98] sm:$0xff]  ;;  %v622_v27 = vmul.f32 0.35355338, %v494_v18  ;;  %s17008_s18 = smov (!%p9694_p2, %s436_s18), %s17006_s12 }
  0x7f   : > { %10620 = vmatmul.mubr.msk.f32.vlgmr.msra.gmra.mrb[0].mxu0 %vm984_vm0, %v601_v26  ;;  %v493_v17 = vld [vmem:[%s13061_s7 + $0xa8] sm:$0xff]  ;;  %v617_v19 = vmul.f32 0.35355338, %v489_v16  ;;  %v754_v25 = vld [vmem:[%s13069_s17 + $0xd0] sm:$0xff]  ;;  %v755_v26 = vld [vmem:[%s13069_s17 + $0xd8] sm:$0xff]  ;;  %s9695_s28 = sshll.u32 %s17008_s18, 3 }
  0x80   : > { %10634 = vmatmul.mubr.msk.f32.vlgmr.msra.gmra.mrb[0].mxu1 %vm984_vm0, %v605_v30  ;;  %11536 = vmatpush3.bf16.xpose.msk.msra.mxu0 %vm13077_vm1, %v11531_v21  ;;  %v758_v21 = vld [vmem:[%s13069_s17 + $0xf0] sm:$0xff]  ;;  %v621_v23 = vmul.f32 0.35355338, %v493_v17  ;;  %v495_v28 = vld [vmem:[%s13061_s7 + $0xb8] sm:$0xff]  ;;  %v496_v29 = vld [vmem:[%s13061_s7 + $0xc0] sm:$0xff]  ;;  %p13619_p7 = scmp.lt.s32.totalorder %s9695_s28, 359 }
  0x81   : > { %11548 = vmatpush3.bf16.xpose.msk.msra.mxu1 %vm13077_vm1, %v11543_v22  ;;  %10636 = vmatprep.mubr.msk.f32.mxu1 %vm984_vm0, %v606_v34  ;;  %v759_v22 = vld [vmem:[%s13069_s17 + $0xf8] sm:$0xff]  ;;  %v618_v30 = vmul.f32 0.35355338, %v490_v20  ;;  %v500_v32 = vld [vmem:[%s13061_s7 + $0xe0] sm:$0xff]  ;;  %v619_v33 = vmul.f32 0.35355338, %v491_v24  ;;  %v11585_v34 = vpack.c.bf16 %v755_v26, %v754_v25 }
  0x82   : > { %10622 = vmatprep.mubr.msk.f32.mxu0 %vm984_vm0, %v602_v37  ;;  %11551 = vmatprep.subr.msk.bf16.mxu1 %vm13077_vm1, %v11549_v38  ;;  %v11597_v31 = vpack.c.bf16 %v759_v22, %v758_v21  ;;  %v623_v35 = vmul.f32 0.35355338, %v495_v28  ;;  %v624_v36 = vmul.f32 0.35355338, %v496_v29  ;;  %v628_v37 = vmul.f32 0.35355338, %v500_v32 }
  0x83   : > { %10623 = vmatmul.mubr.msk.f32.gmra.mrb[2].mxu0 %vm984_vm0, %v603_v40  ;;  %11539 = vmatprep.subr.msk.bf16.mxu0 %vm13077_vm1, %v11537_v41  ;;  %v761_v39 = vld [vmem:[%s13069_s17 + $0x108] sm:$0xff]  ;;  %v764_v40 = vld [vmem:[%s13069_s17 + $0x120] sm:$0xff]  ;;  %v502_v46 = vld [vmem:[%s13061_s7 + $0xf0] sm:$0xff]  ;;  %s17010_s28 = smov (!%p13619_p7, %s9695_s28), 359 }
  0x84   : > { %10637 = vmatmul.mubr.msk.f32.gmra.mrb[2].mxu1 %vm984_vm0, %v607_v42  ;;  %10647 = vmatprep.mubr.msk.f32.mxu0 %vm984_vm0, %v608_v43  ;;  %v501_v45 = vld [vmem:[%s13061_s7 + $0xe8] sm:$0xff]  ;;  %v498_v48 = vld [vmem:[%s13061_s7 + $0xd0] sm:$0xff]  ;;  %v499_v52 = vld [vmem:[%s13061_s7 + $0xd8] sm:$0xff]  ;;  %v630_v55 = vmul.f32 0.35355338, %v502_v46  ;;  %s10096_s16 = sshll.u32 %s17010_s28, 7 }
  0x85   : > { %10661 = vmatprep.mubr.msk.f32.mxu1 %vm984_vm0, %v612_v44  ;;  %v497_v44 = vld [vmem:[%s13061_s7 + $0xc8] sm:$0xff]  ;;  %v629_v51 = vmul.f32 0.35355338, %v501_v45  ;;  %v762_v53 = vld [vmem:[%s13069_s17 + $0x110] sm:$0xff]  ;;  %v503_v56 = vld [vmem:[%s13061_s7 + $0xf8] sm:$0xff]  ;;  %s13665_s9 = scalar_lea.vmem %s16424_s3, %s10096_s16 }
  0x86   : > { %v625_v47 = vmul.f32 0.35355338, %v497_v44  ;;  %v504_v57 = vld [vmem:[%s13061_s7 + $0x100] sm:$0xff]  ;;  %v627_v61 = vmul.f32 0.35355338, %v499_v52  ;;  %v769_v4 = vld [vmem:[%s13069_s17 + $0x148] sm:$0xff] }
  0x87   : > { %v508_v60 = vld [vmem:[%s13061_s7 + $0x120] sm:$0xff]  ;;  %v631_v63 = vmul.f32 0.35355338, %v503_v56  ;;  %v632_v1 = vmul.f32 0.35355338, %v504_v57  ;;  %v509_v10 = vld [vmem:[%s13061_s7 + $0x128] sm:$0xff] }
  0x88   : > { %11542 = vmatpush3.bf16.xpose.msk.msra.mxu0 %vm13077_vm1, %v11537_v41  ;;  %v765_v41 = vld [vmem:[%s13069_s17 + $0x128] sm:$0xff]  ;;  %v510_v11 = vld [vmem:[%s13061_s7 + $0x130] sm:$0xff]  ;;  %v637_v16 = vmul.f32 0.35355338, %v509_v10  ;;  %v507_v17 = vld [vmem:[%s13061_s7 + $0x118] sm:$0xff] }
  0x89   : > { %11554 = vmatpush3.bf16.xpose.msk.msra.mxu1 %vm13077_vm1, %v11549_v38  ;;  %11557 = vmatprep.subr.msk.bf16.mxu0 %vm13077_vm1, %v11555_v49  ;;  %v760_v38 = vld [vmem:[%s13069_s17 + $0x100] sm:$0xff]  ;;  %v11615_v43 = vpack.c.bf16 %v765_v41, %v764_v40  ;;  %v506_v13 = vld [vmem:[%s13061_s7 + $0x110] sm:$0xff]  ;;  %v638_v20 = vmul.f32 0.35355338, %v510_v11  ;;  %v511_v21 = vld [vmem:[%s13061_s7 + $0x138] sm:$0xff] }
  0x8a   : > { %11569 = vmatprep.subr.msk.bf16.mxu1 %vm13077_vm1, %v11567_v50  ;;  %v11603_v42 = vpack.c.bf16 %v761_v39, %v760_v38  ;;  %v770_v18 = vld [vmem:[%s13069_s17 + $0x150] sm:$0xff]  ;;  %v512_v22 = vld [vmem:[%s13061_s7 + $0x140] sm:$0xff]  ;;  %v635_v26 = vmul.f32 0.35355338, %v507_v17  ;;  %v639_v28 = vmul.f32 0.35355338, %v511_v21 }
  0x8b   : > { %v516_v25 = vld [vmem:[%s13061_s7 + $0x160] sm:$0xff]  ;;  %v640_v29 = vmul.f32 0.35355338, %v512_v22  ;;  %v777_v32 = vld [vmem:[%s13069_s17 + $0x188] sm:$0xff]  ;;  %v518_v39 = vld [vmem:[%s13061_s7 + $0x170] sm:$0xff] }
  0x8c   : > { %v517_v38 = vld [vmem:[%s13061_s7 + $0x168] sm:$0xff]  ;;  %v514_v41 = vld [vmem:[%s13061_s7 + $0x150] sm:$0xff]  ;;  %v515_v45 = vld [vmem:[%s13061_s7 + $0x158] sm:$0xff] }
  0x8d   : > { %v645_v44 = vmul.f32 0.35355338, %v517_v38  ;;  %v778_v46 = vld [vmem:[%s13069_s17 + $0x190] sm:$0xff]  ;;  %v523_v10 = vld [vmem:[%s13061_s7 + $0x198] sm:$0xff]  ;;  %v4494_v0 = vld [vmem:[%s13665_s9 + $0xa8] sm:$0xff] }
  0x8e   : > { %v786_v11 = vld [vmem:[%s13069_s17 + $0x1d0] sm:$0xff]  ;;  %v531_v38 = vld [vmem:[%s13061_s7 + $0x1d8] sm:$0xff] }
  0x8f   : > { %10648 = vmatmul.mubr.msk.f32.vlgmr.msra.gmra.mrb[4].mxu0 %vm984_vm0, %v609_v54  ;;  %v763_v54 = vld [vmem:[%s13069_s17 + $0x118] sm:$0xff] }
  0x90   : > { %10662 = vmatmul.mubr.msk.f32.vlgmr.msra.gmra.mrb[4].mxu1 %vm984_vm0, %v613_v58  ;;  %11560 = vmatpush3.bf16.xpose.msk.msra.mxu0 %vm13077_vm1, %v11555_v49  ;;  %v766_v49 = vld [vmem:[%s13069_s17 + $0x130] sm:$0xff]  ;;  %v626_v58 = vmul.f32 0.35355338, %v498_v48  ;;  %v646_v48 = vmul.f32 0.35355338, %v518_v39 }
  0x91   : > { %11572 = vmatpush3.bf16.xpose.msk.msra.mxu1 %vm13077_vm1, %v11567_v50  ;;  %10664 = vmatprep.mubr.msk.f32.mxu1 %vm984_vm0, %v614_v62  ;;  %v767_v50 = vld [vmem:[%s13069_s17 + $0x138] sm:$0xff]  ;;  %v11609_v62 = vpack.c.bf16 %v763_v54, %v762_v53  ;;  %v524_v53 = vld [vmem:[%s13061_s7 + $0x1a0] sm:$0xff]  ;;  %v643_v54 = vmul.f32 0.35355338, %v515_v45  ;;  %v794_v39 = vld [vmem:[%s13069_s17 + $0x210] sm:$0xff] }
  0x92   : > { %10650 = vmatprep.mubr.msk.f32.mxu0 %vm984_vm0, %v610_v2  ;;  %11575 = vmatprep.subr.msk.bf16.mxu1 %vm13077_vm1, %v11573_v3  ;;  %v11621_v59 = vpack.c.bf16 %v767_v50, %v766_v49  ;;  %v636_v2 = vmul.f32 0.35355338, %v508_v60  ;;  %v519_v49 = vld [vmem:[%s13061_s7 + $0x178] sm:$0xff]  ;;  %v520_v50 = vld [vmem:[%s13061_s7 + $0x180] sm:$0xff]  ;;  %v785_v60 = vld [vmem:[%s13069_s17 + $0x1c8] sm:$0xff] }
  0x93   : > { %10651 = vmatmul.mubr.msk.f32.gmra.mrb[6].mxu0 %vm984_vm0, %v611_v5  ;;  %11563 = vmatprep.subr.msk.bf16.mxu0 %vm13077_vm1, %v11561_v6  ;;  %v772_v5 = vld [vmem:[%s13069_s17 + $0x160] sm:$0xff]  ;;  %v647_v56 = vmul.f32 0.35355338, %v519_v49  ;;  %v648_v57 = vmul.f32 0.35355338, %v520_v50 }
  0x94   : > { %10665 = vmatmul.mubr.msk.f32.gmra.mrb[6].mxu1 %vm984_vm0, %v615_v7  ;;  %10675 = vmatprep.mubr.msk.f32.mxu0 %vm984_vm0, %v616_v8 }
  0x95   : > { %10689 = vmatprep.mubr.msk.f32.mxu1 %vm984_vm0, %v620_v9  ;;  %v505_v9 = vld [vmem:[%s13061_s7 + $0x108] sm:$0xff] }
  0x96   : > { %v633_v12 = vmul.f32 0.35355338, %v505_v9 }
  0x98   : > { %11566 = vmatpush3.bf16.xpose.msk.msra.mxu0 %vm13077_vm1, %v11561_v6  ;;  %v773_v6 = vld [vmem:[%s13069_s17 + $0x168] sm:$0xff] }
  0x99   : > { %11578 = vmatpush3.bf16.xpose.msk.msra.mxu1 %vm13077_vm1, %v11573_v3  ;;  %11581 = vmatprep.subr.msk.bf16.mxu0 %vm13077_vm1, %v11579_v14  ;;  %v768_v3 = vld [vmem:[%s13069_s17 + $0x140] sm:$0xff]  ;;  %v11639_v8 = vpack.c.bf16 %v773_v6, %v772_v5  ;;  %v522_v6 = vld [vmem:[%s13061_s7 + $0x190] sm:$0xff] }
  0x9a   : > { %11593 = vmatprep.subr.msk.bf16.mxu1 %vm13077_vm1, %v11591_v15  ;;  %v11627_v7 = vpack.c.bf16 %v769_v4, %v768_v3  ;;  %v525_v3 = vld [vmem:[%s13061_s7 + $0x1a8] sm:$0xff]  ;;  %v526_v4 = vld [vmem:[%s13061_s7 + $0x1b0] sm:$0xff] }
  0x9b   : > { %v653_v9 = vmul.f32 0.35355338, %v525_v3  ;;  %v539_v3 = vld [vmem:[%s13061_s7 + $0x218] sm:$0xff] }
  0x9f   : > { %10676 = vmatmul.mubr.msk.f32.vlgmr.msra.gmra.mrb[8].mxu0 %vm984_vm0, %v617_v19  ;;  %v771_v19 = vld [vmem:[%s13069_s17 + $0x158] sm:$0xff] }
  0xa0   : > { %10690 = vmatmul.mubr.msk.f32.vlgmr.msra.gmra.mrb[8].mxu1 %vm984_vm0, %v621_v23  ;;  %11584 = vmatpush3.bf16.xpose.msk.msra.mxu0 %vm13077_vm1, %v11579_v14  ;;  %v774_v14 = vld [vmem:[%s13069_s17 + $0x170] sm:$0xff]  ;;  %v634_v23 = vmul.f32 0.35355338, %v506_v13  ;;  %v654_v13 = vmul.f32 0.35355338, %v526_v4 }
  0xa1   : > { %11596 = vmatpush3.bf16.xpose.msk.msra.mxu1 %vm13077_vm1, %v11591_v15  ;;  %10692 = vmatprep.mubr.msk.f32.mxu1 %vm984_vm0, %v622_v27  ;;  %v775_v15 = vld [vmem:[%s13069_s17 + $0x178] sm:$0xff]  ;;  %v11633_v27 = vpack.c.bf16 %v771_v19, %v770_v18  ;;  %v532_v18 = vld [vmem:[%s13061_s7 + $0x1e0] sm:$0xff]  ;;  %v651_v19 = vmul.f32 0.35355338, %v523_v10  ;;  %v802_v4 = vld [vmem:[%s13069_s17 + $0x250] sm:$0xff] }
  0xa2   : > { %10678 = vmatprep.mubr.msk.f32.mxu0 %vm984_vm0, %v618_v30  ;;  %11599 = vmatprep.subr.msk.bf16.mxu1 %vm13077_vm1, %v11597_v31  ;;  %v11645_v24 = vpack.c.bf16 %v775_v15, %v774_v14  ;;  %v644_v30 = vmul.f32 0.35355338, %v516_v25  ;;  %v527_v14 = vld [vmem:[%s13061_s7 + $0x1b8] sm:$0xff]  ;;  %v528_v15 = vld [vmem:[%s13061_s7 + $0x1c0] sm:$0xff]  ;;  %v793_v25 = vld [vmem:[%s13069_s17 + $0x208] sm:$0xff] }
  0xa3   : > { %10679 = vmatmul.mubr.msk.f32.gmra.mrb[10].mxu0 %vm984_vm0, %v619_v33  ;;  %11587 = vmatprep.subr.msk.bf16.mxu0 %vm13077_vm1, %v11585_v34  ;;  %v780_v33 = vld [vmem:[%s13069_s17 + $0x1a0] sm:$0xff]  ;;  %v655_v21 = vmul.f32 0.35355338, %v527_v14  ;;  %v656_v22 = vmul.f32 0.35355338, %v528_v15 }
  0xa4   : > { %10693 = vmatmul.mubr.msk.f32.gmra.mrb[10].mxu1 %vm984_vm0, %v623_v35  ;;  %10703 = vmatprep.mubr.msk.f32.mxu0 %vm984_vm0, %v624_v36 }
  0xa5   : > { %10717 = vmatprep.mubr.msk.f32.mxu1 %vm984_vm0, %v628_v37  ;;  %v513_v37 = vld [vmem:[%s13061_s7 + $0x148] sm:$0xff] }
  0xa6   : > { %v641_v40 = vmul.f32 0.35355338, %v513_v37 }
  0xa8   : > { %11590 = vmatpush3.bf16.xpose.msk.msra.mxu0 %vm13077_vm1, %v11585_v34  ;;  %v781_v34 = vld [vmem:[%s13069_s17 + $0x1a8] sm:$0xff] }
  0xa9   : > { %11602 = vmatpush3.bf16.xpose.msk.msra.mxu1 %vm13077_vm1, %v11597_v31  ;;  %11605 = vmatprep.subr.msk.bf16.mxu0 %vm13077_vm1, %v11603_v42  ;;  %v776_v31 = vld [vmem:[%s13069_s17 + $0x180] sm:$0xff]  ;;  %v11663_v36 = vpack.c.bf16 %v781_v34, %v780_v33  ;;  %v530_v34 = vld [vmem:[%s13061_s7 + $0x1d0] sm:$0xff] }
  0xaa   : > { %11617 = vmatprep.subr.msk.bf16.mxu1 %vm13077_vm1, %v11615_v43  ;;  %v11651_v35 = vpack.c.bf16 %v777_v32, %v776_v31  ;;  %v533_v31 = vld [vmem:[%s13061_s7 + $0x1e8] sm:$0xff]  ;;  %v534_v32 = vld [vmem:[%s13061_s7 + $0x1f0] sm:$0xff] }
  0xab   : > { %v661_v37 = vmul.f32 0.35355338, %v533_v31 }
  0xaf   : > { %10704 = vmatmul.mubr.msk.f32.vlgmr.msra.gmra.mrb[12].mxu0 %vm984_vm0, %v625_v47  ;;  %v779_v47 = vld [vmem:[%s13069_s17 + $0x198] sm:$0xff] }
  0xb0   : > { %10718 = vmatmul.mubr.msk.f32.vlgmr.msra.gmra.mrb[12].mxu1 %vm984_vm0, %v629_v51  ;;  %11608 = vmatpush3.bf16.xpose.msk.msra.mxu0 %vm13077_vm1, %v11603_v42  ;;  %v782_v42 = vld [vmem:[%s13069_s17 + $0x1b0] sm:$0xff]  ;;  %v642_v51 = vmul.f32 0.35355338, %v514_v41  ;;  %v662_v41 = vmul.f32 0.35355338, %v534_v32  ;;  %v547_v32 = vld [vmem:[%s13061_s7 + $0x258] sm:$0xff] }
  0xb1   : > { %11620 = vmatpush3.bf16.xpose.msk.msra.mxu1 %vm13077_vm1, %v11615_v43  ;;  %10720 = vmatprep.mubr.msk.f32.mxu1 %vm984_vm0, %v630_v55  ;;  %v783_v43 = vld [vmem:[%s13069_s17 + $0x1b8] sm:$0xff]  ;;  %v11657_v55 = vpack.c.bf16 %v779_v47, %v778_v46  ;;  %v540_v46 = vld [vmem:[%s13061_s7 + $0x220] sm:$0xff]  ;;  %v659_v47 = vmul.f32 0.35355338, %v531_v38 }
  0xb2   : > { %10706 = vmatprep.mubr.msk.f32.mxu0 %vm984_vm0, %v626_v58  ;;  %11623 = vmatprep.subr.msk.bf16.mxu1 %vm13077_vm1, %v11621_v59  ;;  %v11669_v52 = vpack.c.bf16 %v783_v43, %v782_v42  ;;  %v652_v58 = vmul.f32 0.35355338, %v524_v53  ;;  %v535_v42 = vld [vmem:[%s13061_s7 + $0x1f8] sm:$0xff]  ;;  %v536_v43 = vld [vmem:[%s13061_s7 + $0x200] sm:$0xff]  ;;  %v801_v53 = vld [vmem:[%s13069_s17 + $0x248] sm:$0xff] }
  0xb3   : > { %10707 = vmatmul.mubr.msk.f32.gmra.mrb[14].mxu0 %vm984_vm0, %v627_v61  ;;  %11611 = vmatprep.subr.msk.bf16.mxu0 %vm13077_vm1, %v11609_v62  ;;  %v788_v61 = vld [vmem:[%s13069_s17 + $0x1e0] sm:$0xff]  ;;  %v663_v49 = vmul.f32 0.35355338, %v535_v42  ;;  %v664_v50 = vmul.f32 0.35355338, %v536_v43 }
  0xb4   : > { %10721 = vmatmul.mubr.msk.f32.gmra.mrb[14].mxu1 %vm984_vm0, %v631_v63  ;;  %10731 = vmatprep.mubr.msk.f32.mxu0 %vm984_vm0, %v632_v1 }
  0xb5   : > { %10745 = vmatprep.mubr.msk.f32.mxu1 %vm984_vm0, %v636_v2  ;;  %v521_v2 = vld [vmem:[%s13061_s7 + $0x188] sm:$0xff] }
  0xb6   : > { %v649_v5 = vmul.f32 0.35355338, %v521_v2 }
  0xb8   : > { %11614 = vmatpush3.bf16.xpose.msk.msra.mxu0 %vm13077_vm1, %v11609_v62  ;;  %v789_v62 = vld [vmem:[%s13069_s17 + $0x1e8] sm:$0xff] }
  0xb9   : > { %11626 = vmatpush3.bf16.xpose.msk.msra.mxu1 %vm13077_vm1, %v11621_v59  ;;  %11629 = vmatprep.subr.msk.bf16.mxu0 %vm13077_vm1, %v11627_v7  ;;  %v784_v59 = vld [vmem:[%s13069_s17 + $0x1c0] sm:$0xff]  ;;  %v11687_v1 = vpack.c.bf16 %v789_v62, %v788_v61  ;;  %v538_v62 = vld [vmem:[%s13061_s7 + $0x210] sm:$0xff] }
  0xba   : > { %11641 = vmatprep.subr.msk.bf16.mxu1 %vm13077_vm1, %v11639_v8  ;;  %v11675_v63 = vpack.c.bf16 %v785_v60, %v784_v59  ;;  %v541_v59 = vld [vmem:[%s13061_s7 + $0x228] sm:$0xff]  ;;  %v542_v60 = vld [vmem:[%s13061_s7 + $0x230] sm:$0xff] }
  0xbb   : > { %v669_v2 = vmul.f32 0.35355338, %v541_v59 }
  0xbf   : > { %10732 = vmatmul.mubr.msk.f32.vlgmr.msra.gmra.mrb[16].mxu0 %vm984_vm0, %v633_v12  ;;  %v787_v12 = vld [vmem:[%s13069_s17 + $0x1d8] sm:$0xff] }
  0xc0   : > { %10746 = vmatmul.mubr.msk.f32.vlgmr.msra.gmra.mrb[16].mxu1 %vm984_vm0, %v637_v16  ;;  %11632 = vmatpush3.bf16.xpose.msk.msra.mxu0 %vm13077_vm1, %v11627_v7  ;;  %v790_v7 = vld [vmem:[%s13069_s17 + $0x1f0] sm:$0xff]  ;;  %v650_v16 = vmul.f32 0.35355338, %v522_v6  ;;  %v670_v6 = vmul.f32 0.35355338, %v542_v60  ;;  %v555_v60 = vld [vmem:[%s13061_s7 + $0x298] sm:$0xff] }
  0xc1   : > { %11644 = vmatpush3.bf16.xpose.msk.msra.mxu1 %vm13077_vm1, %v11639_v8  ;;  %10748 = vmatprep.mubr.msk.f32.mxu1 %vm984_vm0, %v638_v20  ;;  %v791_v8 = vld [vmem:[%s13069_s17 + $0x1f8] sm:$0xff]  ;;  %v11681_v20 = vpack.c.bf16 %v787_v12, %v786_v11  ;;  %v548_v11 = vld [vmem:[%s13061_s7 + $0x260] sm:$0xff]  ;;  %v667_v12 = vmul.f32 0.35355338, %v539_v3 }
  0xc2   : > { %10734 = vmatprep.mubr.msk.f32.mxu0 %vm984_vm0, %v634_v23  ;;  %11647 = vmatprep.subr.msk.bf16.mxu1 %vm13077_vm1, %v11645_v24  ;;  %v11693_v17 = vpack.c.bf16 %v791_v8, %v790_v7  ;;  %v660_v23 = vmul.f32 0.35355338, %v532_v18  ;;  %v543_v7 = vld [vmem:[%s13061_s7 + $0x238] sm:$0xff]  ;;  %v544_v8 = vld [vmem:[%s13061_s7 + $0x240] sm:$0xff]  ;;  %v809_v18 = vld [vmem:[%s13069_s17 + $0x288] sm:$0xff] }
  0xc3   : > { %10735 = vmatmul.mubr.msk.f32.gmra.mrb[18].mxu0 %vm984_vm0, %v635_v26  ;;  %11635 = vmatprep.subr.msk.bf16.mxu0 %vm13077_vm1, %v11633_v27  ;;  %v796_v26 = vld [vmem:[%s13069_s17 + $0x220] sm:$0xff]  ;;  %v671_v14 = vmul.f32 0.35355338, %v543_v7  ;;  %v672_v15 = vmul.f32 0.35355338, %v544_v8 }
  0xc4   : > { %10749 = vmatmul.mubr.msk.f32.gmra.mrb[18].mxu1 %vm984_vm0, %v639_v28  ;;  %10759 = vmatprep.mubr.msk.f32.mxu0 %vm984_vm0, %v640_v29 }
  0xc5   : > { %10773 = vmatprep.mubr.msk.f32.mxu1 %vm984_vm0, %v644_v30  ;;  %v529_v30 = vld [vmem:[%s13061_s7 + $0x1c8] sm:$0xff] }
  0xc6   : > { %v657_v33 = vmul.f32 0.35355338, %v529_v30  ;;  %v811_v30 = vld [vmem:[%s13069_s17 + $0x298] sm:$0xff] }
  0xc8   : > { %11638 = vmatpush3.bf16.xpose.msk.msra.mxu0 %vm13077_vm1, %v11633_v27  ;;  %v797_v27 = vld [vmem:[%s13069_s17 + $0x228] sm:$0xff] }
  0xc9   : > { %11650 = vmatpush3.bf16.xpose.msk.msra.mxu1 %vm13077_vm1, %v11645_v24  ;;  %11653 = vmatprep.subr.msk.bf16.mxu0 %vm13077_vm1, %v11651_v35  ;;  %v792_v24 = vld [vmem:[%s13069_s17 + $0x200] sm:$0xff]  ;;  %v11711_v29 = vpack.c.bf16 %v797_v27, %v796_v26  ;;  %v550_v26 = vld [vmem:[%s13061_s7 + $0x270] sm:$0xff] }
  0xca   : > { %11665 = vmatprep.subr.msk.bf16.mxu1 %vm13077_vm1, %v11663_v36  ;;  %v11699_v28 = vpack.c.bf16 %v793_v25, %v792_v24  ;;  %v545_v24 = vld [vmem:[%s13061_s7 + $0x248] sm:$0xff]  ;;  %v546_v25 = vld [vmem:[%s13061_s7 + $0x250] sm:$0xff] }
  0xcb   : > { %v674_v31 = vmul.f32 0.35355338, %v546_v25  ;;  %v563_v25 = vld [vmem:[%s13061_s7 + $0x2d8] sm:$0xff] }
  0xcf   : > { %10760 = vmatmul.mubr.msk.f32.vlgmr.msra.gmra.mrb[20].mxu0 %vm984_vm0, %v641_v40  ;;  %v795_v40 = vld [vmem:[%s13069_s17 + $0x218] sm:$0xff] }
  0xd0   : > { %10774 = vmatmul.mubr.msk.f32.vlgmr.msra.gmra.mrb[20].mxu1 %vm984_vm0, %v645_v44  ;;  %11656 = vmatpush3.bf16.xpose.msk.msra.mxu0 %vm13077_vm1, %v11651_v35  ;;  %v798_v35 = vld [vmem:[%s13069_s17 + $0x230] sm:$0xff]  ;;  %v658_v44 = vmul.f32 0.35355338, %v530_v34  ;;  %v815_v34 = vld [vmem:[%s13069_s17 + $0x2b8] sm:$0xff] }
  0xd1   : > { %11668 = vmatpush3.bf16.xpose.msk.msra.mxu1 %vm13077_vm1, %v11663_v36  ;;  %10776 = vmatprep.mubr.msk.f32.mxu1 %vm984_vm0, %v646_v48  ;;  %v799_v36 = vld [vmem:[%s13069_s17 + $0x238] sm:$0xff]  ;;  %v11705_v48 = vpack.c.bf16 %v795_v40, %v794_v39  ;;  %v556_v39 = vld [vmem:[%s13061_s7 + $0x2a0] sm:$0xff]  ;;  %v675_v40 = vmul.f32 0.35355338, %v547_v32 }
  0xd2   : > { %10762 = vmatprep.mubr.msk.f32.mxu0 %vm984_vm0, %v642_v51  ;;  %11671 = vmatprep.subr.msk.bf16.mxu1 %vm13077_vm1, %v11669_v52  ;;  %v11717_v45 = vpack.c.bf16 %v799_v36, %v798_v35  ;;  %v668_v51 = vmul.f32 0.35355338, %v540_v46  ;;  %v678_v35 = vmul.f32 0.35355338, %v550_v26  ;;  %v551_v36 = vld [vmem:[%s13061_s7 + $0x278] sm:$0xff]  ;;  %v817_v46 = vld [vmem:[%s13069_s17 + $0x2c8] sm:$0xff] }
  0xd3   : > { %10763 = vmatmul.mubr.msk.f32.gmra.mrb[22].mxu0 %vm984_vm0, %v643_v54  ;;  %11659 = vmatprep.subr.msk.bf16.mxu0 %vm13077_vm1, %v11657_v55  ;;  %v804_v54 = vld [vmem:[%s13069_s17 + $0x260] sm:$0xff]  ;;  %v679_v42 = vmul.f32 0.35355338, %v551_v36  ;;  %v830_v26 = vld [vmem:[%s13069_s17 + $0x330] sm:$0xff] }
  0xd4   : > { %10777 = vmatmul.mubr.msk.f32.gmra.mrb[22].mxu1 %vm984_vm0, %v647_v56  ;;  %10787 = vmatprep.mubr.msk.f32.mxu0 %vm984_vm0, %v648_v57  ;;  %v572_v32 = vld [vmem:[%s13061_s7 + $0x320] sm:$0xff] }
  0xd5   : > { %10801 = vmatprep.mubr.msk.f32.mxu1 %vm984_vm0, %v652_v58  ;;  %v537_v58 = vld [vmem:[%s13061_s7 + $0x208] sm:$0xff] }
  0xd6   : > { %v665_v61 = vmul.f32 0.35355338, %v537_v58  ;;  %v819_v58 = vld [vmem:[%s13069_s17 + $0x2d8] sm:$0xff] }
  0xd8   : > { %11662 = vmatpush3.bf16.xpose.msk.msra.mxu0 %vm13077_vm1, %v11657_v55  ;;  %v805_v55 = vld [vmem:[%s13069_s17 + $0x268] sm:$0xff] }
  0xd9   : > { %11674 = vmatpush3.bf16.xpose.msk.msra.mxu1 %vm13077_vm1, %v11669_v52  ;;  %11677 = vmatprep.subr.msk.bf16.mxu0 %vm13077_vm1, %v11675_v63  ;;  %v800_v52 = vld [vmem:[%s13069_s17 + $0x240] sm:$0xff]  ;;  %v11735_v57 = vpack.c.bf16 %v805_v55, %v804_v54  ;;  %v558_v54 = vld [vmem:[%s13061_s7 + $0x2b0] sm:$0xff] }
  0xda   : > { %11689 = vmatprep.subr.msk.bf16.mxu1 %vm13077_vm1, %v11687_v1  ;;  %v11723_v56 = vpack.c.bf16 %v801_v53, %v800_v52  ;;  %v557_v52 = vld [vmem:[%s13061_s7 + $0x2a8] sm:$0xff]  ;;  %v554_v53 = vld [vmem:[%s13061_s7 + $0x290] sm:$0xff] }
  0xdb   : > { %v682_v59 = vmul.f32 0.35355338, %v554_v53  ;;  %v571_v53 = vld [vmem:[%s13061_s7 + $0x318] sm:$0xff] }
  0xdf   : > { %10788 = vmatmul.mubr.msk.f32.vlgmr.msra.gmra.mrb[24].mxu0 %vm984_vm0, %v649_v5  ;;  %v803_v5 = vld [vmem:[%s13069_s17 + $0x258] sm:$0xff] }
  0xe0   : > { %10802 = vmatmul.mubr.msk.f32.vlgmr.msra.gmra.mrb[24].mxu1 %vm984_vm0, %v653_v9  ;;  %11680 = vmatpush3.bf16.xpose.msk.msra.mxu0 %vm13077_vm1, %v11675_v63  ;;  %v806_v63 = vld [vmem:[%s13069_s17 + $0x270] sm:$0xff]  ;;  %v666_v9 = vmul.f32 0.35355338, %v538_v62  ;;  %v823_v62 = vld [vmem:[%s13069_s17 + $0x2f8] sm:$0xff] }
  0xe1   : > { %11692 = vmatpush3.bf16.xpose.msk.msra.mxu1 %vm13077_vm1, %v11687_v1  ;;  %10804 = vmatprep.mubr.msk.f32.mxu1 %vm984_vm0, %v654_v13  ;;  %v807_v1 = vld [vmem:[%s13069_s17 + $0x278] sm:$0xff]  ;;  %v11729_v13 = vpack.c.bf16 %v803_v5, %v802_v4  ;;  %v564_v4 = vld [vmem:[%s13061_s7 + $0x2e0] sm:$0xff]  ;;  %v683_v5 = vmul.f32 0.35355338, %v555_v60 }
  0xe2   : > { %10790 = vmatprep.mubr.msk.f32.mxu0 %vm984_vm0, %v650_v16  ;;  %11695 = vmatprep.subr.msk.bf16.mxu1 %vm13077_vm1, %v11693_v17  ;;  %v11741_v10 = vpack.c.bf16 %v807_v1, %v806_v63  ;;  %v676_v16 = vmul.f32 0.35355338, %v548_v11  ;;  %v686_v63 = vmul.f32 0.35355338, %v558_v54  ;;  %v559_v1 = vld [vmem:[%s13061_s7 + $0x2b8] sm:$0xff]  ;;  %v825_v11 = vld [vmem:[%s13069_s17 + $0x308] sm:$0xff] }
  0xe3   : > { %10791 = vmatmul.mubr.msk.f32.gmra.mrb[26].mxu0 %vm984_vm0, %v651_v19  ;;  %11683 = vmatprep.subr.msk.bf16.mxu0 %vm13077_vm1, %v11681_v20  ;;  %v812_v19 = vld [vmem:[%s13069_s17 + $0x2a0] sm:$0xff]  ;;  %v687_v7 = vmul.f32 0.35355338, %v559_v1  ;;  %v838_v54 = vld [vmem:[%s13069_s17 + $0x370] sm:$0xff] }
  0xe4   : > { %10805 = vmatmul.mubr.msk.f32.gmra.mrb[26].mxu1 %vm984_vm0, %v655_v21  ;;  %10815 = vmatprep.mubr.msk.f32.mxu0 %vm984_vm0, %v656_v22  ;;  %v580_v60 = vld [vmem:[%s13061_s7 + $0x360] sm:$0xff] }
  0xe5   : > { %10829 = vmatprep.mubr.msk.f32.mxu1 %vm984_vm0, %v660_v23  ;;  %v549_v23 = vld [vmem:[%s13061_s7 + $0x268] sm:$0xff] }
  0xe6   : > { %v677_v27 = vmul.f32 0.35355338, %v549_v23  ;;  %v827_v23 = vld [vmem:[%s13069_s17 + $0x318] sm:$0xff] }
  0xe8   : > { %11686 = vmatpush3.bf16.xpose.msk.msra.mxu0 %vm13077_vm1, %v11681_v20  ;;  %v813_v20 = vld [vmem:[%s13069_s17 + $0x2a8] sm:$0xff] }
  0xe9   : > { %11698 = vmatpush3.bf16.xpose.msk.msra.mxu1 %vm13077_vm1, %v11693_v17  ;;  %11701 = vmatprep.subr.msk.bf16.mxu0 %vm13077_vm1, %v11699_v28  ;;  %v808_v17 = vld [vmem:[%s13069_s17 + $0x280] sm:$0xff]  ;;  %v11759_v22 = vpack.c.bf16 %v813_v20, %v812_v19  ;;  %v566_v19 = vld [vmem:[%s13061_s7 + $0x2f0] sm:$0xff] }
  0xea   : > { %11713 = vmatprep.subr.msk.bf16.mxu1 %vm13077_vm1, %v11711_v29  ;;  %v11747_v21 = vpack.c.bf16 %v809_v18, %v808_v17  ;;  %v565_v17 = vld [vmem:[%s13061_s7 + $0x2e8] sm:$0xff]  ;;  %v562_v18 = vld [vmem:[%s13061_s7 + $0x2d0] sm:$0xff] }
  0xef   : > { %10816 = vmatmul.mubr.msk.f32.vlgmr.msra.gmra.mrb[28].mxu0 %vm984_vm0, %v657_v33  ;;  %v814_v33 = vld [vmem:[%s13069_s17 + $0x2b0] sm:$0xff] }
  0xf0   : > { %10830 = vmatmul.mubr.msk.f32.vlgmr.msra.gmra.mrb[28].mxu1 %vm984_vm0, %v661_v37  ;;  %11704 = vmatpush3.bf16.xpose.msk.msra.mxu0 %vm13077_vm1, %v11699_v28  ;;  %v673_v28 = vmul.f32 0.35355338, %v545_v24  ;;  %v552_v37 = vld [vmem:[%s13061_s7 + $0x280] sm:$0xff]  ;;  %v690_v24 = vmul.f32 0.35355338, %v562_v18  ;;  %v579_v18 = vld [vmem:[%s13061_s7 + $0x358] sm:$0xff] }
  0xf1   : > { %11716 = vmatpush3.bf16.xpose.msk.msra.mxu1 %vm13077_vm1, %v11711_v29  ;;  %10832 = vmatprep.mubr.msk.f32.mxu1 %vm984_vm0, %v662_v41  ;;  %v810_v29 = vld [vmem:[%s13069_s17 + $0x290] sm:$0xff]  ;;  %v11765_v41 = vpack.c.bf16 %v815_v34, %v814_v33  ;;  %v680_v43 = vmul.f32 0.35355338, %v552_v37  ;;  %v691_v33 = vmul.f32 0.35355338, %v563_v25 }
  0xf2   : > { %10818 = vmatprep.mubr.msk.f32.mxu0 %vm984_vm0, %v658_v44  ;;  %11719 = vmatprep.subr.msk.bf16.mxu1 %vm13077_vm1, %v11717_v45  ;;  %v11753_v38 = vpack.c.bf16 %v811_v30, %v810_v29  ;;  %v684_v44 = vmul.f32 0.35355338, %v556_v39  ;;  %v567_v29 = vld [vmem:[%s13061_s7 + $0x2f8] sm:$0xff]  ;;  %v568_v30 = vld [vmem:[%s13061_s7 + $0x300] sm:$0xff]  ;;  %v700_v37 = vmul.f32 0.35355338, %v572_v32 }
  0xf3   : > { %10819 = vmatmul.mubr.msk.f32.gmra.mrb[30].mxu0 %vm984_vm0, %v659_v47  ;;  %11707 = vmatprep.subr.msk.bf16.mxu0 %vm13077_vm1, %v11705_v48  ;;  %v820_v47 = vld [vmem:[%s13069_s17 + $0x2e0] sm:$0xff]  ;;  %v696_v36 = vmul.f32 0.35355338, %v568_v30  ;;  %v833_v39 = vld [vmem:[%s13069_s17 + $0x348] sm:$0xff] }
  0xf4   : > { %10833 = vmatmul.mubr.msk.f32.gmra.mrb[30].mxu1 %vm984_vm0, %v663_v49  ;;  %10843 = vmatprep.mubr.msk.f32.mxu0 %vm984_vm0, %v664_v50 }
  0xf5   : > { %10857 = vmatprep.mubr.msk.f32.mxu1 %vm984_vm0, %v668_v51  ;;  %v553_v51 = vld [vmem:[%s13061_s7 + $0x288] sm:$0xff] }
  0xf6   : > { %v681_v55 = vmul.f32 0.35355338, %v553_v51  ;;  %v835_v51 = vld [vmem:[%s13069_s17 + $0x358] sm:$0xff] }
  0xf8   : > { %11710 = vmatpush3.bf16.xpose.msk.msra.mxu0 %vm13077_vm1, %v11705_v48  ;;  %v821_v48 = vld [vmem:[%s13069_s17 + $0x2e8] sm:$0xff] }
  0xf9   : > { %11722 = vmatpush3.bf16.xpose.msk.msra.mxu1 %vm13077_vm1, %v11717_v45  ;;  %11725 = vmatprep.subr.msk.bf16.mxu0 %vm13077_vm1, %v11723_v56  ;;  %v816_v45 = vld [vmem:[%s13069_s17 + $0x2c0] sm:$0xff]  ;;  %v11783_v50 = vpack.c.bf16 %v821_v48, %v820_v47  ;;  %v574_v47 = vld [vmem:[%s13061_s7 + $0x330] sm:$0xff] }
  0xfa   : > { %11737 = vmatprep.subr.msk.bf16.mxu1 %vm13077_vm1, %v11735_v57  ;;  %v11771_v49 = vpack.c.bf16 %v817_v46, %v816_v45  ;;  %v573_v45 = vld [vmem:[%s13061_s7 + $0x328] sm:$0xff]  ;;  %v570_v46 = vld [vmem:[%s13061_s7 + $0x310] sm:$0xff] }
  0xff   : > { %10844 = vmatmul.mubr.msk.f32.vlgmr.msra.gmra.mrb[32].mxu0 %vm984_vm0, %v665_v61  ;;  %v822_v61 = vld [vmem:[%s13069_s17 + $0x2f0] sm:$0xff] }
 0x100   : > { %10858 = vmatmul.mubr.msk.f32.vlgmr.msra.gmra.mrb[32].mxu1 %vm984_vm0, %v669_v2  ;;  %11728 = vmatpush3.bf16.xpose.msk.msra.mxu0 %vm13077_vm1, %v11723_v56  ;;  %v685_v56 = vmul.f32 0.35355338, %v557_v52  ;;  %v560_v2 = vld [vmem:[%s13061_s7 + $0x2c0] sm:$0xff]  ;;  %v698_v52 = vmul.f32 0.35355338, %v570_v46  ;;  %v4480_v46 = vld [vmem:[%s13665_s9 + $0x38] sm:$0xff] }
 0x101   : > { %11740 = vmatpush3.bf16.xpose.msk.msra.mxu1 %vm13077_vm1, %v11735_v57  ;;  %10860 = vmatprep.mubr.msk.f32.mxu1 %vm984_vm0, %v670_v6  ;;  %v818_v57 = vld [vmem:[%s13069_s17 + $0x2d0] sm:$0xff]  ;;  %v11789_v6 = vpack.c.bf16 %v823_v62, %v822_v61  ;;  %v688_v8 = vmul.f32 0.35355338, %v560_v2  ;;  %v699_v61 = vmul.f32 0.35355338, %v571_v53 }
 0x102   : > { %10846 = vmatprep.mubr.msk.f32.mxu0 %vm984_vm0, %v666_v9  ;;  %11743 = vmatprep.subr.msk.bf16.mxu1 %vm13077_vm1, %v11741_v10  ;;  %v11777_v3 = vpack.c.bf16 %v819_v58, %v818_v57  ;;  %v692_v9 = vmul.f32 0.35355338, %v564_v4  ;;  %v575_v57 = vld [vmem:[%s13061_s7 + $0x338] sm:$0xff]  ;;  %v576_v58 = vld [vmem:[%s13061_s7 + $0x340] sm:$0xff]  ;;  %v708_v2 = vmul.f32 0.35355338, %v580_v60 }
 0x103   : > { %10847 = vmatmul.mubr.msk.f32.gmra.mrb[34].mxu0 %vm984_vm0, %v667_v12  ;;  %11731 = vmatprep.subr.msk.bf16.mxu0 %vm13077_vm1, %v11729_v13  ;;  %v828_v12 = vld [vmem:[%s13069_s17 + $0x320] sm:$0xff]  ;;  %v704_v1 = vmul.f32 0.35355338, %v576_v58  ;;  %v841_v4 = vld [vmem:[%s13069_s17 + $0x388] sm:$0xff] }
 0x104   : > { %10861 = vmatmul.mubr.msk.f32.gmra.mrb[34].mxu1 %vm984_vm0, %v671_v14  ;;  %10871 = vmatprep.mubr.msk.f32.mxu0 %vm984_vm0, %v672_v15 }
 0x105   : > { %10885 = vmatprep.mubr.msk.f32.mxu1 %vm984_vm0, %v676_v16  ;;  %v561_v16 = vld [vmem:[%s13061_s7 + $0x2c8] sm:$0xff] }
 0x106   : > { %v689_v20 = vmul.f32 0.35355338, %v561_v16  ;;  %v843_v16 = vld [vmem:[%s13069_s17 + $0x398] sm:$0xff] }
 0x108   : > { %11734 = vmatpush3.bf16.xpose.msk.msra.mxu0 %vm13077_vm1, %v11729_v13  ;;  %v829_v13 = vld [vmem:[%s13069_s17 + $0x328] sm:$0xff] }
 0x109   : > { %11746 = vmatpush3.bf16.xpose.msk.msra.mxu1 %vm13077_vm1, %v11741_v10  ;;  %11749 = vmatprep.subr.msk.bf16.mxu0 %vm13077_vm1, %v11747_v21  ;;  %v824_v10 = vld [vmem:[%s13069_s17 + $0x300] sm:$0xff]  ;;  %v11807_v15 = vpack.c.bf16 %v829_v13, %v828_v12  ;;  %v582_v12 = vld [vmem:[%s13061_s7 + $0x370] sm:$0xff] }
 0x10a   : > { %11761 = vmatprep.subr.msk.bf16.mxu1 %vm13077_vm1, %v11759_v22  ;;  %v11795_v14 = vpack.c.bf16 %v825_v11, %v824_v10  ;;  %v581_v10 = vld [vmem:[%s13061_s7 + $0x368] sm:$0xff]  ;;  %v578_v11 = vld [vmem:[%s13061_s7 + $0x350] sm:$0xff] }
 0x10f   : > { %10872 = vmatmul.mubr.msk.f32.vlgmr.msra.gmra.mrb[36].mxu0 %vm984_vm0, %v673_v28  ;;  %v694_v28 = vmul.f32 0.35355338, %v566_v19  ;;  %v846_v19 = vld [vmem:[%s13069_s17 + $0x3b0] sm:$0xff] }
 0x110   : > { %10886 = vmatmul.mubr.msk.f32.vlgmr.msra.gmra.mrb[36].mxu1 %vm984_vm0, %v677_v27  ;;  %10874 = vmatprep.mubr.msk.f32.mxu0 %vm984_vm0, %v674_v31  ;;  %v831_v27 = vld [vmem:[%s13069_s17 + $0x338] sm:$0xff] }
 0x111   : > { %10888 = vmatprep.mubr.msk.f32.mxu1 %vm984_vm0, %v678_v35  ;;  %11752 = vmatpush3.bf16.xpose.msk.msra.mxu0 %vm13077_vm1, %v11747_v21  ;;  %v693_v21 = vmul.f32 0.35355338, %v565_v17  ;;  %v11813_v34 = vpack.c.bf16 %v831_v27, %v830_v26  ;;  %v695_v35 = vmul.f32 0.35355338, %v567_v29  ;;  %v706_v17 = vmul.f32 0.35355338, %v578_v11 }
 0x112   : > { %11764 = vmatpush3.bf16.xpose.msk.msra.mxu1 %vm13077_vm1, %v11759_v22  ;;  %11755 = vmatprep.subr.msk.bf16.mxu0 %vm13077_vm1, %v11753_v38  ;;  %v826_v22 = vld [vmem:[%s13069_s17 + $0x310] sm:$0xff]  ;;  %v4478_v26 = vld [vmem:[%s13665_s9 + $0x28] sm:$0xff]  ;;  %v584_v29 = vld [vmem:[%s13061_s7 + $0x380] sm:$0xff] }
 0x113   : > { %10875 = vmatmul.mubr.msk.f32.gmra.mrb[38].mxu0 %vm984_vm0, %v675_v40  ;;  %11767 = vmatprep.subr.msk.bf16.mxu1 %vm13077_vm1, %v11765_v41  ;;  %v11801_v31 = vpack.c.bf16 %v827_v23, %v826_v22  ;;  %v836_v40 = vld [vmem:[%s13069_s17 + $0x360] sm:$0xff]  ;;  %v710_v23 = vmul.f32 0.35355338, %v582_v12  ;;  %v13685_v27 = vld [vmem:[%s13673_s6 + $0x8] sm:$0xff]  ;;  %v13754_v11 = vld [vmem:[%s13673_s6 + $0x10] sm:$0xff] }
 0x114   : > { %10889 = vmatmul.mubr.msk.f32.gmra.mrb[38].mxu1 %vm984_vm0, %v679_v42  ;;  %10899 = vmatprep.mubr.msk.f32.mxu0 %vm984_vm0, %v680_v43  ;;  %v4473_v22 = vld [vmem:[%s13665_s9] sm:$0xff]  ;;  %v585_v12 = vld [vmem:[%s13061_s7 + $0x388] sm:$0xff] }
 0x115   : > { %10913 = vmatprep.mubr.msk.f32.mxu1 %vm984_vm0, %v684_v44  ;;  %v569_v44 = vld [vmem:[%s13061_s7 + $0x308] sm:$0xff] }
 0x116   : > { %v697_v48 = vmul.f32 0.35355338, %v569_v44  ;;  %v712_v44 = vmul.f32 0.35355338, %v584_v29  ;;  %v851_v29 = vld [vmem:[%s13069_s17 + $0x3d8] sm:$0xff] }
 0x119   : > { %11758 = vmatpush3.bf16.xpose.msk.msra.mxu0 %vm13077_vm1, %v11753_v38  ;;  %v832_v38 = vld [vmem:[%s13069_s17 + $0x340] sm:$0xff] }
 0x11a   : > { %11770 = vmatpush3.bf16.xpose.msk.msra.mxu1 %vm13077_vm1, %v11765_v41  ;;  %11773 = vmatprep.subr.msk.bf16.mxu0 %vm13077_vm1, %v11771_v49  ;;  %v837_v41 = vld [vmem:[%s13069_s17 + $0x368] sm:$0xff]  ;;  %v11819_v42 = vpack.c.bf16 %v833_v39, %v832_v38 }
 0x11b   : > { %11785 = vmatprep.subr.msk.bf16.mxu1 %vm13077_vm1, %v11783_v50  ;;  %v11831_v43 = vpack.c.bf16 %v837_v41, %v836_v40  ;;  %v4477_v40 = vld [vmem:[%s13665_s9 + $0x20] sm:$0xff] }
 0x120   : > { %10900 = vmatmul.mubr.msk.f32.vlgmr.msra.gmra.mrb[40].mxu0 %vm984_vm0, %v681_v55  ;;  %v839_v55 = vld [vmem:[%s13069_s17 + $0x378] sm:$0xff] }
 0x121   : > { %10914 = vmatmul.mubr.msk.f32.vlgmr.msra.gmra.mrb[40].mxu1 %vm984_vm0, %v685_v56  ;;  %10902 = vmatprep.mubr.msk.f32.mxu0 %vm984_vm0, %v682_v59  ;;  %v702_v56 = vmul.f32 0.35355338, %v574_v47  ;;  %v11837_v62 = vpack.c.bf16 %v839_v55, %v838_v54  ;;  %v848_v54 = vld [vmem:[%s13069_s17 + $0x3c0] sm:$0xff]  ;;  %v849_v55 = vld [vmem:[%s13069_s17 + $0x3c8] sm:$0xff] }
 0x122   : > { %10916 = vmatprep.mubr.msk.f32.mxu1 %vm984_vm0, %v686_v63  ;;  %11776 = vmatpush3.bf16.xpose.msk.msra.mxu0 %vm13077_vm1, %v11771_v49  ;;  %v701_v49 = vmul.f32 0.35355338, %v573_v45  ;;  %v703_v63 = vmul.f32 0.35355338, %v575_v57 }
 0x123   : > { %11788 = vmatpush3.bf16.xpose.msk.msra.mxu1 %vm13077_vm1, %v11783_v50  ;;  %11779 = vmatprep.subr.msk.bf16.mxu0 %vm13077_vm1, %v11777_v3  ;;  %v834_v50 = vld [vmem:[%s13069_s17 + $0x350] sm:$0xff] }
 0x124   : > { %10903 = vmatmul.mubr.msk.f32.gmra.mrb[42].mxu0 %vm984_vm0, %v683_v5  ;;  %11791 = vmatprep.subr.msk.bf16.mxu1 %vm13077_vm1, %v11789_v6  ;;  %v11825_v59 = vpack.c.bf16 %v835_v51, %v834_v50  ;;  %v844_v5 = vld [vmem:[%s13069_s17 + $0x3a0] sm:$0xff]  ;;  %v4476_v51 = vld [vmem:[%s13665_s9 + $0x18] sm:$0xff] }
 0x125   : > { %10917 = vmatmul.mubr.msk.f32.gmra.mrb[42].mxu1 %vm984_vm0, %v687_v7  ;;  %10927 = vmatprep.mubr.msk.f32.mxu0 %vm984_vm0, %v688_v8 }
 0x126   : > { %10941 = vmatprep.mubr.msk.f32.mxu1 %vm984_vm0, %v692_v9  ;;  %v577_v9 = vld [vmem:[%s13061_s7 + $0x348] sm:$0xff] }
 0x127   : > { %v705_v13 = vmul.f32 0.35355338, %v577_v9 }
 0x12a   : > { %11782 = vmatpush3.bf16.xpose.msk.msra.mxu0 %vm13077_vm1, %v11777_v3  ;;  %v840_v3 = vld [vmem:[%s13069_s17 + $0x380] sm:$0xff] }
 0x12b   : > { %11794 = vmatpush3.bf16.xpose.msk.msra.mxu1 %vm13077_vm1, %v11789_v6  ;;  %11797 = vmatprep.subr.msk.bf16.mxu0 %vm13077_vm1, %v11795_v14  ;;  %v845_v6 = vld [vmem:[%s13069_s17 + $0x3a8] sm:$0xff]  ;;  %v11843_v7 = vpack.c.bf16 %v841_v4, %v840_v3 }
 0x12c   : > { %11809 = vmatprep.subr.msk.bf16.mxu1 %vm13077_vm1, %v11807_v15  ;;  %v11855_v8 = vpack.c.bf16 %v845_v6, %v844_v5  ;;  %v4475_v5 = vld [vmem:[%s13665_s9 + $0x10] sm:$0xff] }
 0x131   : > { %10928 = vmatmul.mubr.msk.f32.vlgmr.msra.gmra.mrb[44].mxu0 %vm984_vm0, %v689_v20  ;;  %v847_v20 = vld [vmem:[%s13069_s17 + $0x3b8] sm:$0xff] }
 0x132   : > { %10942 = vmatmul.mubr.msk.f32.vlgmr.msra.gmra.mrb[44].mxu1 %vm984_vm0, %v693_v21  ;;  %10930 = vmatprep.mubr.msk.f32.mxu0 %vm984_vm0, %v690_v24  ;;  %v4474_v21 = vld [vmem:[%s13665_s9 + $0x8] sm:$0xff]  ;;  %v583_v24 = vld [vmem:[%s13061_s7 + $0x378] sm:$0xff] }
 0x133   : > { %10944 = vmatprep.mubr.msk.f32.mxu1 %vm984_vm0, %v694_v28  ;;  %11800 = vmatpush3.bf16.xpose.msk.msra.mxu0 %vm13077_vm1, %v11795_v14  ;;  %v709_v14 = vmul.f32 0.35355338, %v581_v10  ;;  %v711_v41 = vmul.f32 0.35355338, %v583_v24  ;;  %v4481_v24 = vld [vmem:[%s13665_s9 + $0x40] sm:$0xff] }
 0x134   : > { %11812 = vmatpush3.bf16.xpose.msk.msra.mxu1 %vm13077_vm1, %v11807_v15  ;;  %11803 = vmatprep.subr.msk.bf16.mxu0 %vm13077_vm1, %v11801_v31  ;;  %v842_v15 = vld [vmem:[%s13069_s17 + $0x390] sm:$0xff] }
 0x135   : > { %10931 = vmatmul.mubr.msk.f32.gmra.mrb[46].mxu0 %vm984_vm0, %v691_v33  ;;  %11815 = vmatprep.subr.msk.bf16.mxu1 %vm13077_vm1, %v11813_v34  ;;  %v13687_v28 = vpack.c.bf16 %v843_v16, %v842_v15  ;;  %v13691_v33 = vld [vmem:[%s13673_s6] sm:$0xff] }
 0x136   : > { %10945 = vmatmul.mubr.msk.f32.gmra.mrb[46].mxu1 %vm984_vm0, %v695_v35  ;;  %10955 = vmatprep.mubr.msk.f32.mxu0 %vm984_vm0, %v696_v36  ;;  %v11861_v35 = vpack.c.bf16 %v847_v20, %v846_v19  ;;  %v588_v36 = vld [vmem:[%s13061_s7 + $0x3a0] sm:$0xff]  ;;  %v4482_v20 = vld [vmem:[%s13665_s9 + $0x48] sm:$0xff] }
 0x137   : > { %10969 = vmatprep.mubr.msk.f32.mxu1 %vm984_vm0, %v700_v37 }
 0x13b   : > { %11806 = vmatpush3.bf16.xpose.msk.msra.mxu0 %vm13077_vm1, %v11801_v31 }
 0x13c   : > { %11818 = vmatpush3.bf16.xpose.msk.msra.mxu1 %vm13077_vm1, %v11813_v34  ;;  %11821 = vmatprep.subr.msk.bf16.mxu0 %vm13077_vm1, %v11819_v42  ;;  %v707_v34 = vmul.f32 0.35355338, %v579_v18  ;;  %v587_v18 = vld [vmem:[%s13061_s7 + $0x398] sm:$0xff] }
 0x13d   : > { %11833 = vmatprep.subr.msk.bf16.mxu1 %vm13077_vm1, %v11831_v43 }
 0x142   : > { %10956 = vmatmul.mubr.msk.f32.vlgmr.msra.gmra.mrb[48].mxu0 %vm984_vm0, %v697_v48  ;;  %v716_v48 = vmul.f32 0.35355338, %v588_v36 }
 0x143   : > { %10970 = vmatmul.mubr.msk.f32.vlgmr.msra.gmra.mrb[48].mxu1 %vm984_vm0, %v701_v49  ;;  %10958 = vmatprep.mubr.msk.f32.mxu0 %vm984_vm0, %v698_v52 }
 0x144   : > { %10972 = vmatprep.mubr.msk.f32.mxu1 %vm984_vm0, %v702_v56  ;;  %11824 = vmatpush3.bf16.xpose.msk.msra.mxu0 %vm13077_vm1, %v11819_v42 }
 0x145   : > { %11836 = vmatpush3.bf16.xpose.msk.msra.mxu1 %vm13077_vm1, %v11831_v43  ;;  %11827 = vmatprep.subr.msk.bf16.mxu0 %vm13077_vm1, %v11825_v59 }
 0x146   : > { %10959 = vmatmul.mubr.msk.f32.gmra.mrb[50].mxu0 %vm984_vm0, %v699_v61  ;;  %11839 = vmatprep.subr.msk.bf16.mxu1 %vm13077_vm1, %v11837_v62  ;;  %v13730_v61 = vld [vmem:[%s13673_s6 + $0x18] sm:$0xff] }
 0x147   : > { %10973 = vmatmul.mubr.msk.f32.gmra.mrb[50].mxu1 %vm984_vm0, %v703_v63  ;;  %10983 = vmatprep.mubr.msk.f32.mxu0 %vm984_vm0, %v704_v1  ;;  %v853_v63 = vld [vmem:[%s13069_s17 + $0x3e8] sm:$0xff]  ;;  %v4479_v1 = vld [vmem:[%s13665_s9 + $0x30] sm:$0xff] }
 0x148   : > { %10997 = vmatprep.mubr.msk.f32.mxu1 %vm984_vm0, %v708_v2  ;;  %v13738_v2 = vpack.c.bf16 %v849_v55, %v848_v54  ;;  %v4488_v55 = vld [vmem:[%s13665_s9 + $0x78] sm:$0xff] }
 0x14c   : > { %11830 = vmatpush3.bf16.xpose.msk.msra.mxu0 %vm13077_vm1, %v11825_v59 }
 0x14d   : > { %11842 = vmatpush3.bf16.xpose.msk.msra.mxu1 %vm13077_vm1, %v11837_v62  ;;  %11845 = vmatprep.subr.msk.bf16.mxu0 %vm13077_vm1, %v11843_v7  ;;  %v852_v62 = vld [vmem:[%s13069_s17 + $0x3e0] sm:$0xff] }
 0x14e   : > { %11857 = vmatprep.subr.msk.bf16.mxu1 %vm13077_vm1, %v11855_v8 }
 0x152   : > { %v10621_v25 = vpop.f32.mrb[0].mxu0 }
 0x153   : > { %v4602_v30 = vadd.f32 %v10621_v25, %v4474_v21  ;;  %v1075_v31 = vpop.f32.mrb[1].mxu0  ;;  %v10635_v32 = vpop.f32.mrb[0].mxu1  ;;  %10984 = vmatmul.mubr.msk.f32.vlgmr.msra.gmra.mrb[52].mxu0 %vm984_vm0, %v705_v13  ;;  %v589_v13 = vld [vmem:[%s13061_s7 + $0x3a8] sm:$0xff] }
 0x154   : > { %v4601_v37 = vadd.f32 %v4473_v22, %v1075_v31  ;;  %v4606_v38 = vadd.f32 %v10635_v32, %v4478_v26  ;;  %v1184_v39 = vpop.f32.mrb[1].mxu1  ;;  %10998 = vmatmul.mubr.msk.f32.vlgmr.msra.gmra.mrb[52].mxu1 %vm984_vm0, %v709_v14  ;;  %10986 = vmatprep.mubr.msk.f32.mxu0 %vm984_vm0, %v706_v17  ;;  %v586_v14 = vld [vmem:[%s13061_s7 + $0x390] sm:$0xff]  ;;  %v713_v22 = vmul.f32 0.35355338, %v585_v12  ;;  %v717_v25 = vmul.f32 0.35355338, %v589_v13 }
 0x155   : > { %v4605_v42 = vadd.f32 %v4477_v40, %v1184_v39  ;;  %v13699_v43 = vadd.f32 %v13685_v27, %v4602_v30  ;;  %11000 = vmatprep.mubr.msk.f32.mxu1 %vm984_vm0, %v710_v23  ;;  %11848 = vmatpush3.bf16.xpose.msk.msra.mxu0 %vm13077_vm1, %v11843_v7  ;;  %v13746_v7 = vpack.c.bf16 %v853_v63, %v852_v62  ;;  %v590_v17 = vld [vmem:[%s13061_s7 + $0x3b0] sm:$0xff]  ;;  %v4486_v23 = vld [vmem:[%s13665_s9 + $0x68] sm:$0xff]  ;;  %v714_v26 = vmul.f32 0.35355338, %v586_v14  ;;  %v855_v40 = vld [vmem:[%s13069_s17 + $0x3f8] sm:$0xff] }
 0x156   : > { %v13705_v45 = vadd.f32 %v13691_v33, %v4601_v37  ;;  %v10624_v47 = vpop.f32.mrb[2].mxu0  ;;  %11860 = vmatpush3.bf16.xpose.msk.msra.mxu1 %vm13077_vm1, %v11855_v8  ;;  %11851 = vmatprep.subr.msk.bf16.mxu0 %vm13077_vm1, %v13687_v28  ;;  %v13717_v52 = vadd.f32 %v13685_v27, %v4606_v38  ;;  %v718_v31 = vmul.f32 0.35355338, %v590_v17  ;;  %v715_v32 = vmul.f32 0.35355338, %v587_v18  ;;  %v854_v39 = vld [vmem:[%s13069_s17 + $0x3f0] sm:$0xff] }
 0x157   : > { %v4893_v49 = vsel %vm4889_vm2, %v13699_v43, -inf  ;;  %v10638_v50 = vpop.f32.mrb[2].mxu1  ;;  %v1085_v53 = vpop.f32.mrb[3].mxu0  ;;  %10987 = vmatmul.mubr.msk.f32.gmra.mrb[54].mxu0 %vm984_vm0, %v707_v34  ;;  %11863 = vmatprep.subr.msk.bf16.mxu1 %vm13077_vm1, %v11861_v35  ;;  %v4604_v58 = vadd.f32 %v10624_v47, %v4476_v51  ;;  %v13727_v60 = vadd.f32 %v13691_v33, %v4605_v42  ;;  %v591_v34 = vld [vmem:[%s13061_s7 + $0x3b8] sm:$0xff] }
 0x158   : > { %4894 = vmax.xlane.f32.xlu1 %v4893_v49  ;;  %v4890_v56 = vsel %vm4889_vm2, %v13705_v45, -inf  ;;  %v4608_v57 = vadd.f32 %v10638_v50, %v4480_v46  ;;  %v1194_v59 = vpop.f32.mrb[3].mxu1  ;;  %11001 = vmatmul.mubr.msk.f32.gmra.mrb[54].mxu1 %vm984_vm0, %v711_v41  ;;  %v4905_v4 = vsel %vm4889_vm2, %v13717_v52, -inf  ;;  %v4603_v8 = vadd.f32 %v4475_v5, %v1085_v53  ;;  %v592_v41 = vld [vmem:[%s13061_s7 + $0x3c0] sm:$0xff] }
 0x159   : > { %4891 = vmax.xlane.f32.xlu0 %v4890_v56  ;;  %11011 = vmatprep.mubr.msk.f32.mxu0 %vm984_vm0, %v712_v44  ;;  %v4607_v3 = vadd.f32 %v4479_v1, %v1194_v59  ;;  %v4902_v9 = vsel %vm4889_vm2, %v13727_v60, -inf  ;;  %v13751_v10 = vadd.f32 %v13730_v61, %v4604_v58  ;;  %v4485_v46 = vld [vmem:[%s13665_s9 + $0x60] sm:$0xff]  ;;  %v11885_v58 = vpack.c.bf16 %v855_v40, %v854_v39  ;;  %v4484_v1 = vld [vmem:[%s13665_s9 + $0x58] sm:$0xff] }
 0x15a   : > { %11025 = vmatprep.mubr.msk.f32.mxu1 %vm984_vm0, %v716_v48  ;;  %v13744_v6 = vadd.f32 %v13730_v61, %v4608_v57  ;;  %v13781_v21 = vadd.f32 %v13754_v11, %v4603_v8  ;;  %v596_v50 = vld [vmem:[%s13061_s7 + $0x3e0] sm:$0xff]  ;;  %v719_v57 = vmul.f32 0.35355338, %v591_v34  ;;  %v720_v59 = vmul.f32 0.35355338, %v592_v41  ;;  %v13867_v34 = vld [vmem:[%s13673_s6 + $0x28] sm:$0xff] }
 0x15b   : > { %v13770_v16 = vadd.f32 %v13754_v11, %v4607_v3  ;;  %v4899_v19 = vsel %vm4889_vm2, %v13751_v10, -inf  ;;  %v595_v40 = vld [vmem:[%s13061_s7 + $0x3d8] sm:$0xff] }
 0x15c   : > { %4906 = vmax.xlane.f32.xlu1 %v4905_v4  ;;  %v4911_v15 = vsel %vm4889_vm2, %v13744_v6, -inf  ;;  %v4896_v48 = vsel %vm4889_vm2, %v13781_v21, -inf  ;;  %v599_v41 = vld [vmem:[%s13061_s7 + $0x3f8] sm:$0xff] }
 0x15d   : > { %4903 = vmax.xlane.f32.xlu0 %v4902_v9  ;;  %11854 = vmatpush3.bf16.xpose.msk.msra.mxu0 %vm13077_vm1, %v13687_v28  ;;  %v850_v28 = vld [vmem:[%s13069_s17 + $0x3d0] sm:$0xff]  ;;  %v4908_v37 = vsel %vm4889_vm2, %v13770_v16, -inf }
 0x15e   : > { %11866 = vmatpush3.bf16.xpose.msk.msra.mxu1 %vm13077_vm1, %v11861_v35  ;;  %11869 = vmatprep.subr.msk.bf16.mxu0 %vm13077_vm1, %v13738_v2  ;;  %v11873_v49 = vpack.c.bf16 %v851_v29, %v850_v28  ;;  %v598_v28 = vld [vmem:[%s13061_s7 + $0x3f0] sm:$0xff]  ;;  %v4490_v29 = vld [vmem:[%s13665_s9 + $0x88] sm:$0xff] }
 0x15f   : > { %11881 = vmatprep.subr.msk.bf16.mxu1 %vm13077_vm1, %v13746_v7  ;;  %v726_v39 = vmul.f32 0.35355338, %v598_v28  ;;  %v4735_v28 = vld [vmem:[%s13673_s6 + $0x30] sm:$0xff] }
 0x160   : > { %4912 = vmax.xlane.f32.xlu1 %v4911_v15 }
 0x161   : > { %4900 = vmax.xlane.f32.xlu0 %v4899_v19 }
 0x162   : > { %v10649_v30 = vpop.f32.mrb[4].mxu0 }
 0x163   : > { %v10663_v35 = vpop.f32.mrb[4].mxu1  ;;  %v4610_v36 = vadd.f32 %v10649_v30, %v4482_v20  ;;  %v1293_v38 = vpop.f32.mrb[5].mxu0  ;;  %v593_v20 = vld [vmem:[%s13061_s7 + $0x3c8] sm:$0xff]  ;;  %v4489_v30 = vld [vmem:[%s13665_s9 + $0x80] sm:$0xff] }
 0x164   : > { %v4614_v42 = vadd.f32 %v10663_v35, %v4486_v23  ;;  %v1402_v44 = vpop.f32.mrb[5].mxu1  ;;  %4909 = vmax.xlane.f32.xlu1 %v4908_v37  ;;  %v4609_v47 = vadd.f32 %v4481_v24, %v1293_v38  ;;  %11012 = vmatmul.mubr.msk.f32.vlgmr.msra.gmra.mrb[56].mxu0 %vm984_vm0, %v713_v22  ;;  %v597_v22 = vld [vmem:[%s13061_s7 + $0x3e8] sm:$0xff]  ;;  %v594_v23 = vld [vmem:[%s13061_s7 + $0x3d0] sm:$0xff]  ;;  %s14465_s7 = scalar_lea.vmem [#allocation6], %s13058_s11  ;;  %s10098_s11 = sshll.u32 %s17012_s30, 7 }
 0x165   : > { %v4613_v51 = vadd.f32 %v4485_v46, %v1402_v44  ;;  %4897 = vmax.xlane.f32.xlu0 %v4896_v48  ;;  %v13799_v53 = vadd.f32 %v13685_v27, %v4610_v36  ;;  %11026 = vmatmul.mubr.msk.f32.vlgmr.msra.gmra.mrb[56].mxu1 %vm984_vm0, %v717_v25  ;;  %v725_v35 = vmul.f32 0.35355338, %v597_v22  ;;  %v722_v36 = vmul.f32 0.35355338, %v594_v23  ;;  %v4493_v46 = vld [vmem:[%s13665_s9 + $0xa0] sm:$0xff]  ;;  %s15957_s27 = scalar_lea.vmem %s16426_s5, %s10098_s11 }
 0x166   : > { %v13803_v54 = vadd.f32 %v13685_v27, %v4614_v42  ;;  %v10652_v56 = vpop.f32.mrb[6].mxu0  ;;  %11014 = vmatprep.mubr.msk.f32.mxu0 %vm984_vm0, %v714_v26  ;;  %11028 = vmatprep.mubr.msk.f32.mxu1 %vm984_vm0, %v718_v31  ;;  %v13812_v4 = vadd.f32 %v13691_v33, %v4609_v47  ;;  %v724_v27 = vmul.f32 0.35355338, %v596_v50  ;;  %v721_v31 = vmul.f32 0.35355338, %v593_v20  ;;  %v13877_v50 = vld [vmem:[%s13673_s6 + $0x20] sm:$0xff] }
 0x167   : > { %v4917_v62 = vsel %vm4889_vm2, %v13799_v53, -inf  ;;  %v10666_v63 = vpop.f32.mrb[6].mxu1  ;;  %v1303_v3 = vpop.f32.mrb[7].mxu0  ;;  %11872 = vmatpush3.bf16.xpose.msk.msra.mxu0 %vm13077_vm1, %v13738_v2  ;;  %11884 = vmatpush3.bf16.xpose.msk.msra.mxu1 %vm13077_vm1, %v13746_v7  ;;  %v4612_v9 = vadd.f32 %v10652_v56, %v4484_v1  ;;  %v13823_v13 = vadd.f32 %v13691_v33, %v4613_v51  ;;  %v4483_v2 = vld [vmem:[%s13665_s9 + $0x50] sm:$0xff]  ;;  %v4496_v1 = vld [vmem:[%s13665_s9 + $0xb8] sm:$0xff] }
 0x168   : > { %v4929_v5 = vsel %vm4889_vm2, %v13803_v54, -inf  ;;  %v4616_v8 = vadd.f32 %v10666_v63, %v4488_v55  ;;  %v1412_v12 = vpop.f32.mrb[7].mxu1  ;;  %11015 = vmatmul.mubr.msk.f32.gmra.mrb[58].mxu0 %vm984_vm0, %v715_v32  ;;  %11875 = vmatprep.subr.msk.bf16.mxu0 %vm13077_vm1, %v11873_v49  ;;  %v4487_v7 = vld [vmem:[%s13665_s9 + $0x70] sm:$0xff]  ;;  %v4611_v14 = vadd.f32 %v4483_v2, %v1303_v3  ;;  %v4914_v33 = vsel %vm4889_vm2, %v13812_v4, -inf  ;;  %v4492_v3 = vld [vmem:[%s13665_s9 + $0x98] sm:$0xff] }
 0x169   : > { %4930 = vmax.xlane.f32.xlu1 %v4929_v5  ;;  %4918 = vmax.xlane.f32.xlu0 %v4917_v62  ;;  %v4615_v15 = vadd.f32 %v4487_v7, %v1412_v12  ;;  %v4926_v17 = vsel %vm4889_vm2, %v13823_v13, -inf  ;;  %v13843_v19 = vadd.f32 %v13730_v61, %v4612_v9 }
 0x16a   : > { %11029 = vmatmul.mubr.msk.f32.gmra.mrb[58].mxu1 %vm984_vm0, %v719_v57  ;;  %11887 = vmatprep.subr.msk.bf16.mxu1 %vm13077_vm1, %v11885_v58  ;;  %v13840_v18 = vadd.f32 %v13730_v61, %v4616_v8  ;;  %v13860_v26 = vadd.f32 %v13754_v11, %v4611_v14  ;;  %v4736_v14 = vld [vmem:[%s13673_s6 + $0x38] sm:$0xff] }
 0x16b   : > { %11039 = vmatprep.mubr.msk.f32.mxu0 %vm984_vm0, %v720_v59  ;;  %11053 = vmatprep.mubr.msk.f32.mxu1 %vm984_vm0, %v724_v27  ;;  %v4923_v61 = vsel %vm4889_vm2, %v13843_v19, -inf  ;;  %v13857_v25 = vadd.f32 %v13754_v11, %v4615_v15  ;;  %v727_v59 = vmul.f32 0.35355338, %v599_v41  ;;  %v4495_v15 = vld [vmem:[%s13665_s9 + $0xb0] sm:$0xff] }
 0x16c   : > { %v4935_v24 = vsel %vm4889_vm2, %v13840_v18, -inf }
 0x16d   : > { %4927 = vmax.xlane.f32.xlu1 %v4926_v17  ;;  %4915 = vmax.xlane.f32.xlu0 %v4914_v33  ;;  %v4932_v47 = vsel %vm4889_vm2, %v13857_v25, -inf  ;;  %v4491_v33 = vld [vmem:[%s13665_s9 + $0x90] sm:$0xff] }
 0x16f   : > { %11878 = vmatpush3.bf16.xpose.msk.msra.mxu0 %vm13077_vm1, %v11873_v49  ;;  %11890 = vmatpush3.bf16.xpose.msk.msra.mxu1 %vm13077_vm1, %v11885_v58  ;;  %v4920_v49 = vsel %vm4889_vm2, %v13860_v26, -inf  ;;  %v723_v58 = vmul.f32 0.35355338, %v595_v40 }
 0x171   : > { %4936 = vmax.xlane.f32.xlu1 %v4935_v24  ;;  %4924 = vmax.xlane.f32.xlu0 %v4923_v61 }
 0x172   : > { %v10677_v32 = vpop.f32.mrb[8].mxu0 }
 0x173   : > { %v10691_v37 = vpop.f32.mrb[8].mxu1  ;;  %v4618_v38 = vadd.f32 %v10677_v32, %v4490_v29  ;;  %v1511_v11 = vpop.f32.mrb[9].mxu0 }
 0x174   : > { %v4622_v42 = vadd.f32 %v10691_v37, %v4494_v0  ;;  %v1620_v44 = vpop.f32.mrb[9].mxu1  ;;  %v4617_v48 = vadd.f32 %v4489_v30, %v1511_v11  ;;  %v4502_v37 = vld [vmem:[%s13665_s9 + $0xe8] sm:$0xff] }
 0x175   : > { %v4621_v51 = vadd.f32 %v4493_v46, %v1620_v44  ;;  %4933 = vmax.xlane.f32.xlu1 %v4932_v47  ;;  %4921 = vmax.xlane.f32.xlu0 %v4920_v49  ;;  %v13880_v55 = vadd.f32 %v13867_v34, %v4618_v38 }
 0x176   : > { %v13883_v56 = vadd.f32 %v13867_v34, %v4622_v42  ;;  %v10680_v57 = vpop.f32.mrb[10].mxu0  ;;  %11040 = vmatmul.mubr.msk.f32.vlgmr.msra.gmra.mrb[60].mxu0 %vm984_vm0, %v721_v31  ;;  %11054 = vmatmul.mubr.msk.f32.vlgmr.msra.gmra.mrb[60].mxu1 %vm984_vm0, %v725_v35  ;;  %v13892_v5 = vadd.f32 %v13877_v50, %v4617_v48  ;;  %v4498_v35 = vld [vmem:[%s13665_s9 + $0xc8] sm:$0xff]  ;;  %v4501_v42 = vld [vmem:[%s13665_s9 + $0xe0] sm:$0xff] }
 0x177   : > { %v4941_v62 = vsel %vm4889_vm2, %v13880_v55, -inf  ;;  %v10694_v63 = vpop.f32.mrb[10].mxu1  ;;  %v1521_v27 = vpop.f32.mrb[11].mxu0  ;;  %11042 = vmatprep.mubr.msk.f32.mxu0 %vm984_vm0, %v722_v36  ;;  %11056 = vmatprep.mubr.msk.f32.mxu1 %vm984_vm0, %v726_v39  ;;  %v4620_v12 = vadd.f32 %v10680_v57, %v4492_v3  ;;  %v13899_v7 = vadd.f32 %v13877_v50, %v4621_v51  ;;  %v4497_v39 = vld [vmem:[%s13665_s9 + $0xc0] sm:$0xff] }
 0x178   : > { %v4953_v8 = vsel %vm4889_vm2, %v13883_v56, -inf  ;;  %v4624_v9 = vadd.f32 %v10694_v63, %v4496_v1  ;;  %v1630_v2 = vpop.f32.mrb[11].mxu1  ;;  %v4619_v17 = vadd.f32 %v4491_v33, %v1521_v27  ;;  %v4938_v20 = vsel %vm4889_vm2, %v13892_v5, -inf  ;;  %v4500_v63 = vld [vmem:[%s13665_s9 + $0xd8] sm:$0xff]  ;;  %v4503_v33 = vld [vmem:[%s13665_s9 + $0xf0] sm:$0xff] }
 0x179   : > { %4954 = vmax.xlane.f32.xlu1 %v4953_v8  ;;  %4942 = vmax.xlane.f32.xlu0 %v4941_v62  ;;  %v4623_v22 = vadd.f32 %v4495_v15, %v1630_v2  ;;  %v4950_v23 = vsel %vm4889_vm2, %v13899_v7, -inf  ;;  %v13912_v61 = vadd.f32 %v4736_v14, %v4620_v12  ;;  %v4504_v62 = vld [vmem:[%s13665_s9 + $0xf8] sm:$0xff]  ;;  %v4499_v2 = vld [vmem:[%s13665_s9 + $0xd0] sm:$0xff] }
 0x17a   : > { %11043 = vmatmul.mubr.msk.f32.gmra.mrb[62].mxu0 %vm984_vm0, %v723_v58  ;;  %11057 = vmatmul.mubr.msk.f32.gmra.mrb[62].mxu1 %vm984_vm0, %v727_v59  ;;  %v13910_v24 = vadd.f32 %v4736_v14, %v4624_v9  ;;  %v13921_v31 = vadd.f32 %v4735_v28, %v4619_v17 }
 0x17b   : > { %v4947_v29 = vsel %vm4889_vm2, %v13912_v61, -inf  ;;  %v13919_v30 = vadd.f32 %v4735_v28, %v4623_v22 }
 0x17c   : > { %v4959_v0 = vsel %vm4889_vm2, %v13910_v24, -inf  ;;  %v4944_v47 = vsel %vm4889_vm2, %v13921_v31, -inf }
 0x17d   : > { %4951 = vmax.xlane.f32.xlu1 %v4950_v23  ;;  %4939 = vmax.xlane.f32.xlu0 %v4938_v20  ;;  %v4956_v44 = vsel %vm4889_vm2, %v13919_v30, -inf }
 0x181   : > { %4960 = vmax.xlane.f32.xlu1 %v4959_v0  ;;  %4948 = vmax.xlane.f32.xlu0 %v4947_v29 }
 0x182   : > { %v10705_v32 = vpop.f32.mrb[12].mxu0 }
 0x183   : > { %v10719_v36 = vpop.f32.mrb[12].mxu1  ;;  %v4626_v38 = vadd.f32 %v10705_v32, %v4498_v35  ;;  %v1729_v11 = vpop.f32.mrb[13].mxu0 }
 0x184   : > { %v4630_v40 = vadd.f32 %v10719_v36, %v4502_v37  ;;  %v1838_v41 = vpop.f32.mrb[13].mxu1  ;;  %v4625_v46 = vadd.f32 %v4497_v39, %v1729_v11  ;;  %v13969_v37 = vld [vmem:[%s13673_s6 + $0x48] sm:$0xff] }
 0x185   : > { %v4629_v48 = vadd.f32 %v4501_v42, %v1838_v41  ;;  %4957 = vmax.xlane.f32.xlu1 %v4956_v44  ;;  %4945 = vmax.xlane.f32.xlu0 %v4944_v47  ;;  %v13932_v49 = vadd.f32 %v13867_v34, %v4626_v38  ;;  %v4510_v11 = vld [vmem:[%s13665_s9 + $0x128] sm:$0xff]  ;;  %v4505_v41 = vld [vmem:[%s13665_s9 + $0x100] sm:$0xff] }
 0x186   : > { %v13935_v51 = vadd.f32 %v13867_v34, %v4630_v40  ;;  %v10708_v57 = vpop.f32.mrb[14].mxu0  ;;  %v13942_v3 = vadd.f32 %v13877_v50, %v4625_v46  ;;  %v4509_v46 = vld [vmem:[%s13665_s9 + $0x120] sm:$0xff] }
 0x187   : > { %v4965_v58 = vsel %vm4889_vm2, %v13932_v49, -inf  ;;  %v10722_v59 = vpop.f32.mrb[14].mxu1  ;;  %v1739_v1 = vpop.f32.mrb[15].mxu0  ;;  %v4628_v9 = vadd.f32 %v10708_v57, %v4500_v63  ;;  %v13947_v34 = vadd.f32 %v13877_v50, %v4629_v48  ;;  %v13979_v57 = vld [vmem:[%s13673_s6 + $0x40] sm:$0xff] }
 0x188   : > { %v4977_v27 = vsel %vm4889_vm2, %v13935_v51, -inf  ;;  %v4632_v8 = vadd.f32 %v10722_v59, %v4504_v62  ;;  %v1848_v12 = vpop.f32.mrb[15].mxu1  ;;  %v4627_v15 = vadd.f32 %v4499_v2, %v1739_v1  ;;  %v4962_v17 = vsel %vm4889_vm2, %v13942_v3, -inf  ;;  %v4508_v1 = vld [vmem:[%s13665_s9 + $0x118] sm:$0xff] }
 0x189   : > { %4978 = vmax.xlane.f32.xlu1 %v4977_v27  ;;  %4966 = vmax.xlane.f32.xlu0 %v4965_v58  ;;  %v4631_v20 = vadd.f32 %v4503_v33, %v1848_v12  ;;  %v4974_v22 = vsel %vm4889_vm2, %v13947_v34, -inf  ;;  %v13957_v0 = vadd.f32 %v4736_v14, %v4628_v9  ;;  %v4512_v9 = vld [vmem:[%s13665_s9 + $0x138] sm:$0xff]  ;;  %v4507_v33 = vld [vmem:[%s13665_s9 + $0x110] sm:$0xff] }
 0x18a   : > { %v13955_v23 = vadd.f32 %v4736_v14, %v4632_v8  ;;  %v13965_v35 = vadd.f32 %v4735_v28, %v4627_v15  ;;  %v4506_v14 = vld [vmem:[%s13665_s9 + $0x108] sm:$0xff] }
 0x18b   : > { %v4971_v29 = vsel %vm4889_vm2, %v13957_v0, -inf  ;;  %v13963_v32 = vadd.f32 %v4735_v28, %v4631_v20 }
 0x18c   : > { %v4983_v50 = vsel %vm4889_vm2, %v13955_v23, -inf  ;;  %v4968_v48 = vsel %vm4889_vm2, %v13965_v35, -inf }
 0x18d   : > { %4975 = vmax.xlane.f32.xlu1 %v4974_v22  ;;  %4963 = vmax.xlane.f32.xlu0 %v4962_v17  ;;  %v4980_v28 = vsel %vm4889_vm2, %v13963_v32, -inf }
 0x191   : > { %4984 = vmax.xlane.f32.xlu1 %v4983_v50  ;;  %4972 = vmax.xlane.f32.xlu0 %v4971_v29  ;;  %v4511_v50 = vld [vmem:[%s13665_s9 + $0x130] sm:$0xff] }
 0x192   : > { %v10733_v36 = vpop.f32.mrb[16].mxu0 }
 0x193   : > { %v10747_v38 = vpop.f32.mrb[16].mxu1  ;;  %v4634_v39 = vadd.f32 %v10733_v36, %v4506_v14  ;;  %v1947_v40 = vpop.f32.mrb[17].mxu0 }
 0x194   : > { %v4638_v42 = vadd.f32 %v10747_v38, %v4510_v11  ;;  %v2056_v44 = vpop.f32.mrb[17].mxu1  ;;  %v4633_v47 = vadd.f32 %v4505_v41, %v1947_v40  ;;  %v4740_v38 = vld [vmem:[%s13673_s6 + $0x58] sm:$0xff] }
 0x195   : > { %v4637_v58 = vadd.f32 %v4509_v46, %v2056_v44  ;;  %4981 = vmax.xlane.f32.xlu1 %v4980_v28  ;;  %4969 = vmax.xlane.f32.xlu0 %v4968_v48  ;;  %v13982_v59 = vadd.f32 %v13969_v37, %v4634_v39 }
 0x196   : > { %v13985_v62 = vadd.f32 %v13969_v37, %v4638_v42  ;;  %v10736_v63 = vpop.f32.mrb[18].mxu0  ;;  %v13993_v15 = vadd.f32 %v13979_v57, %v4633_v47  ;;  %v4739_v42 = vld [vmem:[%s13673_s6 + $0x50] sm:$0xff] }
 0x197   : > { %v4989_v27 = vsel %vm4889_vm2, %v13982_v59, -inf  ;;  %v10750_v8 = vpop.f32.mrb[18].mxu1  ;;  %v4636_v12 = vadd.f32 %v10736_v63, %v4508_v1  ;;  %v1957_v2 = vpop.f32.mrb[19].mxu0  ;;  %v13999_v29 = vadd.f32 %v13979_v57, %v4637_v58  ;;  %v4514_v58 = vld [vmem:[%s13665_s9 + $0x148] sm:$0xff] }
 0x198   : > { %16621 = vst [vmem:[#allocation9_spill] sm:$0xff] %v13985_v62  ;;  %16622 = vst [vmem:[#allocation10_spill] sm:$0xff] %v13993_v15  ;;  %v5001_v17 = vsel %vm4889_vm2, %v13985_v62, -inf  ;;  %v4640_v20 = vadd.f32 %v10750_v8, %v4512_v9  ;;  %v2066_v22 = vpop.f32.mrb[19].mxu1  ;;  %v4635_v36 = vadd.f32 %v4507_v33, %v1957_v2  ;;  %v4986_v39 = vsel %vm4889_vm2, %v13993_v15, -inf  ;;  %v4518_v1 = vld [vmem:[%s13665_s9 + $0x168] sm:$0xff] }
 0x199   : > { %16623 = vst [vmem:[#allocation11_spill] sm:$0xff] %v13999_v29  ;;  %5002 = vmax.xlane.f32.xlu1 %v5001_v17  ;;  %4990 = vmax.xlane.f32.xlu0 %v4989_v27  ;;  %v4639_v14 = vadd.f32 %v4511_v50, %v2066_v22  ;;  %v4998_v11 = vsel %vm4889_vm2, %v13999_v29, -inf  ;;  %v14008_v41 = vadd.f32 %v4740_v38, %v4636_v12  ;;  %v4513_v9 = vld [vmem:[%s13665_s9 + $0x140] sm:$0xff] }
 0x19a   : > { %v14006_v40 = vadd.f32 %v4740_v38, %v4640_v20  ;;  %v14017_v47 = vadd.f32 %v4739_v42, %v4635_v36  ;;  %v4517_v33 = vld [vmem:[%s13665_s9 + $0x160] sm:$0xff] }
 0x19b   : > { %16625 = vst [vmem:[#allocation13_spill] sm:$0xff] %v14008_v41  ;;  %v4995_v46 = vsel %vm4889_vm2, %v14008_v41, -inf  ;;  %v14015_v28 = vadd.f32 %v4739_v42, %v4639_v14  ;;  %v4573_v15 = vld [vmem:[%s13665_s9 + $0x320] sm:$0xff] }
 0x19c   : > { %16624 = vst [vmem:[#allocation12_spill] sm:$0xff] %v14006_v40  ;;  %v5007_v44 = vsel %vm4889_vm2, %v14006_v40, -inf  ;;  %16627 = vst [vmem:[#allocation15_spill] sm:$0xff] %v14017_v47  ;;  %v4992_v22 = vsel %vm4889_vm2, %v14017_v47, -inf }
 0x19d   : > { %4999 = vmax.xlane.f32.xlu1 %v4998_v11  ;;  %4987 = vmax.xlane.f32.xlu0 %v4986_v39  ;;  %16626 = vst [vmem:[#allocation14_spill] sm:$0xff] %v14015_v28  ;;  %v5004_v17 = vsel %vm4889_vm2, %v14015_v28, -inf  ;;  %v4516_v39 = vld [vmem:[%s13665_s9 + $0x158] sm:$0xff] }
 0x1a1   : > { %5008 = vmax.xlane.f32.xlu1 %v5007_v44  ;;  %4996 = vmax.xlane.f32.xlu0 %v4995_v46 }
 0x1a2   : > { %v10761_v48 = vpop.f32.mrb[20].mxu0 }
 0x1a3   : > { %v10775_v63 = vpop.f32.mrb[20].mxu1  ;;  %v4642_v27 = vadd.f32 %v10761_v48, %v4514_v58  ;;  %v2165_v8 = vpop.f32.mrb[21].mxu0  ;;  %v4520_v48 = vld [vmem:[%s13665_s9 + $0x178] sm:$0xff] }
 0x1a4   : > { %v4646_v12 = vadd.f32 %v10775_v63, %v4518_v1  ;;  %v2274_v2 = vpop.f32.mrb[21].mxu1  ;;  %v4641_v20 = vadd.f32 %v4513_v9, %v2165_v8  ;;  %v4515_v1 = vld [vmem:[%s13665_s9 + $0x150] sm:$0xff] }
 0x1a5   : > { %v4645_v50 = vadd.f32 %v4517_v33, %v2274_v2  ;;  %5005 = vmax.xlane.f32.xlu1 %v5004_v17  ;;  %4993 = vmax.xlane.f32.xlu0 %v4992_v22  ;;  %v14028_v36 = vadd.f32 %v13969_v37, %v4642_v27 }
 0x1a6   : > { %v14031_v14 = vadd.f32 %v13969_v37, %v4646_v12  ;;  %v10764_v11 = vpop.f32.mrb[22].mxu0  ;;  %v14039_v8 = vadd.f32 %v13979_v57, %v4641_v20  ;;  %v4519_v37 = vld [vmem:[%s13665_s9 + $0x170] sm:$0xff] }
 0x1a7   : > { %16628 = vst [vmem:[#allocation16_spill] sm:$0xff] %v14028_v36  ;;  %v5013_v44 = vsel %vm4889_vm2, %v14028_v36, -inf  ;;  %v10778_v46 = vpop.f32.mrb[22].mxu1  ;;  %v4644_v58 = vadd.f32 %v10764_v11, %v4516_v39  ;;  %v2175_v63 = vpop.f32.mrb[23].mxu0  ;;  %v14045_v12 = vadd.f32 %v13979_v57, %v4645_v50  ;;  %v4551_v36 = vld [vmem:[%s13665_s9 + $0x270] sm:$0xff] }
 0x1a8   : > { %16629 = vst [vmem:[#allocation17_spill] sm:$0xff] %v14031_v14  ;;  %16630 = vst [vmem:[#allocation18_spill] sm:$0xff] %v14039_v8  ;;  %v5025_v27 = vsel %vm4889_vm2, %v14031_v14, -inf  ;;  %v4648_v9 = vadd.f32 %v10778_v46, %v4520_v48  ;;  %v2284_v2 = vpop.f32.mrb[23].mxu1  ;;  %v4643_v33 = vadd.f32 %v4515_v1, %v2175_v63  ;;  %v5010_v20 = vsel %vm4889_vm2, %v14039_v8, -inf  ;;  %v4526_v1 = vld [vmem:[%s13665_s9 + $0x1a8] sm:$0xff] }
 0x1a9   : > { %16631 = vst [vmem:[#allocation19_spill] sm:$0xff] %v14045_v12  ;;  %5026 = vmax.xlane.f32.xlu1 %v5025_v27  ;;  %5014 = vmax.xlane.f32.xlu0 %v5013_v44  ;;  %v4647_v17 = vadd.f32 %v4519_v37, %v2284_v2  ;;  %v5022_v22 = vsel %vm4889_vm2, %v14045_v12, -inf  ;;  %v14053_v39 = vadd.f32 %v4740_v38, %v4644_v58  ;;  %v14065_v58 = vld [vmem:[%s13673_s6 + $0x68] sm:$0xff]  ;;  %v4521_v2 = vld [vmem:[%s13665_s9 + $0x180] sm:$0xff] }
 0x1aa   : > { %v14051_v11 = vadd.f32 %v4740_v38, %v4648_v9  ;;  %v14061_v46 = vadd.f32 %v4739_v42, %v4643_v33  ;;  %v4522_v38 = vld [vmem:[%s13665_s9 + $0x188] sm:$0xff] }
 0x1ab   : > { %16633 = vst [vmem:[#allocation21_spill] sm:$0xff] %v14053_v39  ;;  %v5019_v50 = vsel %vm4889_vm2, %v14053_v39, -inf  ;;  %v14059_v44 = vadd.f32 %v4739_v42, %v4647_v17  ;;  %v4525_v17 = vld [vmem:[%s13665_s9 + $0x1a0] sm:$0xff] }
 0x1ac   : > { %16632 = vst [vmem:[#allocation20_spill] sm:$0xff] %v14051_v11  ;;  %v5031_v57 = vsel %vm4889_vm2, %v14051_v11, -inf  ;;  %16635 = vst [vmem:[#allocation23_spill] sm:$0xff] %v14061_v46 }
 0x1ad   : > { %5023 = vmax.xlane.f32.xlu1 %v5022_v22  ;;  %5011 = vmax.xlane.f32.xlu0 %v5010_v20  ;;  %16634 = vst [vmem:[#allocation22_spill] sm:$0xff] %v14059_v44  ;;  %v5028_v42 = vsel %vm4889_vm2, %v14059_v44, -inf  ;;  %v5016_v20 = vsel %vm4889_vm2, %v14061_v46, -inf  ;;  %v4528_v46 = vld [vmem:[%s13665_s9 + $0x1b8] sm:$0xff] }
 0x1b1   : > { %5032 = vmax.xlane.f32.xlu1 %v5031_v57  ;;  %5020 = vmax.xlane.f32.xlu0 %v5019_v50  ;;  %v14075_v57 = vld [vmem:[%s13673_s6 + $0x60] sm:$0xff] }
 0x1b2   : > { %v10789_v48 = vpop.f32.mrb[24].mxu0 }
 0x1b3   : > { %v10803_v63 = vpop.f32.mrb[24].mxu1  ;;  %v4650_v27 = vadd.f32 %v10789_v48, %v4522_v38  ;;  %v2383_v9 = vpop.f32.mrb[25].mxu0 }
 0x1b4   : > { %v4654_v37 = vadd.f32 %v10803_v63, %v4526_v1  ;;  %v2492_v22 = vpop.f32.mrb[25].mxu1  ;;  %v4649_v33 = vadd.f32 %v4521_v2, %v2383_v9  ;;  %v4524_v1 = vld [vmem:[%s13665_s9 + $0x198] sm:$0xff] }
 0x1b5   : > { %v4653_v50 = vadd.f32 %v4525_v17, %v2492_v22  ;;  %5029 = vmax.xlane.f32.xlu1 %v5028_v42  ;;  %5017 = vmax.xlane.f32.xlu0 %v5016_v20  ;;  %v14078_v48 = vadd.f32 %v14065_v58, %v4650_v27  ;;  %v4523_v22 = vld [vmem:[%s13665_s9 + $0x190] sm:$0xff] }
 0x1b6   : > { %v14081_v38 = vadd.f32 %v14065_v58, %v4654_v37  ;;  %v10792_v63 = vpop.f32.mrb[26].mxu0  ;;  %v14089_v17 = vadd.f32 %v14075_v57, %v4649_v33  ;;  %v4527_v20 = vld [vmem:[%s13665_s9 + $0x1b0] sm:$0xff] }
 0x1b7   : > { %16636 = vst [vmem:[#allocation24_spill] sm:$0xff] %v14078_v48  ;;  %v5037_v9 = vsel %vm4889_vm2, %v14078_v48, -inf  ;;  %v10806_v2 = vpop.f32.mrb[26].mxu1  ;;  %v4652_v44 = vadd.f32 %v10792_v63, %v4524_v1  ;;  %v2393_v39 = vpop.f32.mrb[27].mxu0  ;;  %v14095_v11 = vadd.f32 %v14075_v57, %v4653_v50  ;;  %v4744_v63 = vld [vmem:[%s13673_s6 + $0x78] sm:$0xff] }
 0x1b8   : > { %16637 = vst [vmem:[#allocation25_spill] sm:$0xff] %v14081_v38  ;;  %16638 = vst [vmem:[#allocation26_spill] sm:$0xff] %v14089_v17  ;;  %v5049_v27 = vsel %vm4889_vm2, %v14081_v38, -inf  ;;  %v4656_v37 = vadd.f32 %v10806_v2, %v4528_v46  ;;  %v2502_v42 = vpop.f32.mrb[27].mxu1  ;;  %v4651_v48 = vadd.f32 %v4523_v22, %v2393_v39  ;;  %v5034_v1 = vsel %vm4889_vm2, %v14089_v17, -inf  ;;  %v4743_v39 = vld [vmem:[%s13673_s6 + $0x70] sm:$0xff] }
 0x1b9   : > { %16639 = vst [vmem:[#allocation27_spill] sm:$0xff] %v14095_v11  ;;  %5050 = vmax.xlane.f32.xlu1 %v5049_v27  ;;  %5038 = vmax.xlane.f32.xlu0 %v5037_v9  ;;  %v4655_v8 = vadd.f32 %v4527_v20, %v2502_v42  ;;  %v5046_v33 = vsel %vm4889_vm2, %v14095_v11, -inf  ;;  %v14104_v46 = vadd.f32 %v4744_v63, %v4652_v44  ;;  %v4530_v44 = vld [vmem:[%s13665_s9 + $0x1c8] sm:$0xff]  ;;  %v4533_v11 = vld [vmem:[%s13665_s9 + $0x1e0] sm:$0xff] }
 0x1ba   : > { %v14102_v38 = vadd.f32 %v4744_v63, %v4656_v37  ;;  %v14113_v22 = vadd.f32 %v4743_v39, %v4651_v48  ;;  %v4534_v42 = vld [vmem:[%s13665_s9 + $0x1e8] sm:$0xff] }
 0x1bb   : > { %16641 = vst [vmem:[#allocation29_spill] sm:$0xff] %v14104_v46  ;;  %v5043_v9 = vsel %vm4889_vm2, %v14104_v46, -inf  ;;  %v14111_v2 = vadd.f32 %v4743_v39, %v4655_v8 }
 0x1bc   : > { %16640 = vst [vmem:[#allocation28_spill] sm:$0xff] %v14102_v38  ;;  %v5055_v50 = vsel %vm4889_vm2, %v14102_v38, -inf  ;;  %16643 = vst [vmem:[#allocation31_spill] sm:$0xff] %v14113_v22 }
 0x1bd   : > { %5047 = vmax.xlane.f32.xlu1 %v5046_v33  ;;  %5035 = vmax.xlane.f32.xlu0 %v5034_v1  ;;  %16642 = vst [vmem:[#allocation30_spill] sm:$0xff] %v14111_v2  ;;  %v4529_v1 = vld [vmem:[%s13665_s9 + $0x1c0] sm:$0xff]  ;;  %v5052_v8 = vsel %vm4889_vm2, %v14111_v2, -inf }
 0x1c1   : > { %5056 = vmax.xlane.f32.xlu1 %v5055_v50  ;;  %5044 = vmax.xlane.f32.xlu0 %v5043_v9  ;;  %v5040_v50 = vsel %vm4889_vm2, %v14113_v22, -inf  ;;  %v4531_v22 = vld [vmem:[%s13665_s9 + $0x1d0] sm:$0xff] }
 0x1c2   : > { %v10817_v27 = vpop.f32.mrb[28].mxu0 }
 0x1c3   : > { %v10831_v37 = vpop.f32.mrb[28].mxu1  ;;  %v4658_v20 = vadd.f32 %v10817_v27, %v4530_v44  ;;  %v2601_v33 = vpop.f32.mrb[29].mxu0 }
 0x1c4   : > { %v4662_v17 = vadd.f32 %v10831_v37, %v4534_v42  ;;  %v2710_v38 = vpop.f32.mrb[29].mxu1  ;;  %v4657_v48 = vadd.f32 %v4529_v1, %v2601_v33  ;;  %v4532_v42 = vld [vmem:[%s13665_s9 + $0x1d8] sm:$0xff] }
 0x1c5   : > { %v4661_v9 = vadd.f32 %v4533_v11, %v2710_v38  ;;  %5053 = vmax.xlane.f32.xlu1 %v5052_v8  ;;  %5041 = vmax.xlane.f32.xlu0 %v5040_v50  ;;  %v14124_v27 = vadd.f32 %v14065_v58, %v4658_v20  ;;  %v4536_v33 = vld [vmem:[%s13665_s9 + $0x1f8] sm:$0xff] }
 0x1c6   : > { %v14127_v44 = vadd.f32 %v14065_v58, %v4662_v17  ;;  %v10820_v37 = vpop.f32.mrb[30].mxu0  ;;  %v14135_v11 = vadd.f32 %v14075_v57, %v4657_v48  ;;  %v4535_v58 = vld [vmem:[%s13665_s9 + $0x1f0] sm:$0xff] }
 0x1c7   : > { %16644 = vst [vmem:[#allocation32_spill] sm:$0xff] %v14124_v27  ;;  %v5061_v46 = vsel %vm4889_vm2, %v14124_v27, -inf  ;;  %v10834_v2 = vpop.f32.mrb[30].mxu1  ;;  %v4660_v1 = vadd.f32 %v10820_v37, %v4532_v42  ;;  %v2611_v12 = vpop.f32.mrb[31].mxu0  ;;  %v14141_v17 = vadd.f32 %v14075_v57, %v4661_v9 }
 0x1c8   : > { %16645 = vst [vmem:[#allocation33_spill] sm:$0xff] %v14127_v44  ;;  %16646 = vst [vmem:[#allocation34_spill] sm:$0xff] %v14135_v11  ;;  %v5073_v38 = vsel %vm4889_vm2, %v14127_v44, -inf  ;;  %v4664_v20 = vadd.f32 %v10834_v2, %v4536_v33  ;;  %v2720_v8 = vpop.f32.mrb[31].mxu1  ;;  %v4659_v50 = vadd.f32 %v4531_v22, %v2611_v12  ;;  %v5058_v48 = vsel %vm4889_vm2, %v14135_v11, -inf  ;;  %v14161_v33 = vld [vmem:[%s13673_s6 + $0x88] sm:$0xff] }
 0x1c9   : > { %16647 = vst [vmem:[#allocation35_spill] sm:$0xff] %v14141_v17  ;;  %5074 = vmax.xlane.f32.xlu1 %v5073_v38  ;;  %5062 = vmax.xlane.f32.xlu0 %v5061_v46  ;;  %v4663_v37 = vadd.f32 %v4535_v58, %v2720_v8  ;;  %v5070_v42 = vsel %vm4889_vm2, %v14141_v17, -inf  ;;  %v14149_v2 = vadd.f32 %v4744_v63, %v4660_v1  ;;  %v4542_v38 = vld [vmem:[%s13665_s9 + $0x228] sm:$0xff]  ;;  %v4537_v58 = vld [vmem:[%s13665_s9 + $0x200] sm:$0xff] }
 0x1ca   : > { %v14147_v27 = vadd.f32 %v4744_v63, %v4664_v20  ;;  %v14157_v22 = vadd.f32 %v4743_v39, %v4659_v50  ;;  %v4538_v63 = vld [vmem:[%s13665_s9 + $0x208] sm:$0xff] }
 0x1cb   : > { %16649 = vst [vmem:[#allocation37_spill] sm:$0xff] %v14149_v2  ;;  %v5067_v57 = vsel %vm4889_vm2, %v14149_v2, -inf  ;;  %v14155_v46 = vadd.f32 %v4743_v39, %v4663_v37  ;;  %v4541_v37 = vld [vmem:[%s13665_s9 + $0x220] sm:$0xff] }
 0x1cc   : > { %16648 = vst [vmem:[#allocation36_spill] sm:$0xff] %v14147_v27  ;;  %v5079_v12 = vsel %vm4889_vm2, %v14147_v27, -inf  ;;  %16651 = vst [vmem:[#allocation39_spill] sm:$0xff] %v14157_v22 }
 0x1cd   : > { %5071 = vmax.xlane.f32.xlu1 %v5070_v42  ;;  %5059 = vmax.xlane.f32.xlu0 %v5058_v48  ;;  %16650 = vst [vmem:[#allocation38_spill] sm:$0xff] %v14155_v46  ;;  %v5076_v39 = vsel %vm4889_vm2, %v14155_v46, -inf }
 0x1d1   : > { %5080 = vmax.xlane.f32.xlu1 %v5079_v12  ;;  %5068 = vmax.xlane.f32.xlu0 %v5067_v57  ;;  %v5064_v12 = vsel %vm4889_vm2, %v14157_v22, -inf  ;;  %v14171_v57 = vld [vmem:[%s13673_s6 + $0x80] sm:$0xff]  ;;  %v4544_v22 = vld [vmem:[%s13665_s9 + $0x238] sm:$0xff] }
 0x1d2   : > { %v10845_v9 = vpop.f32.mrb[32].mxu0 }
 0x1d3   : > { %v10859_v1 = vpop.f32.mrb[32].mxu1  ;;  %v4666_v20 = vadd.f32 %v10845_v9, %v4538_v63  ;;  %v2819_v8 = vpop.f32.mrb[33].mxu0 }
 0x1d4   : > { %v4670_v42 = vadd.f32 %v10859_v1, %v4542_v38  ;;  %v2928_v48 = vpop.f32.mrb[33].mxu1  ;;  %v4665_v50 = vadd.f32 %v4537_v58, %v2819_v8  ;;  %v4540_v38 = vld [vmem:[%s13665_s9 + $0x218] sm:$0xff] }
 0x1d5   : > { %v4669_v2 = vadd.f32 %v4541_v37, %v2928_v48  ;;  %5077 = vmax.xlane.f32.xlu1 %v5076_v39  ;;  %5065 = vmax.xlane.f32.xlu0 %v5064_v12  ;;  %v14174_v9 = vadd.f32 %v14161_v33, %v4666_v20  ;;  %v4539_v48 = vld [vmem:[%s13665_s9 + $0x210] sm:$0xff] }
 0x1d6   : > { %v14177_v63 = vadd.f32 %v14161_v33, %v4670_v42  ;;  %v10848_v1 = vpop.f32.mrb[34].mxu0  ;;  %v14185_v37 = vadd.f32 %v14171_v57, %v4665_v50  ;;  %v4543_v12 = vld [vmem:[%s13665_s9 + $0x230] sm:$0xff] }
 0x1d7   : > { %16652 = vst [vmem:[#allocation40_spill] sm:$0xff] %v14174_v9  ;;  %v5085_v8 = vsel %vm4889_vm2, %v14174_v9, -inf  ;;  %v10862_v58 = vpop.f32.mrb[34].mxu1  ;;  %v4668_v46 = vadd.f32 %v10848_v1, %v4540_v38  ;;  %v2829_v27 = vpop.f32.mrb[35].mxu0  ;;  %v14191_v11 = vadd.f32 %v14171_v57, %v4669_v2  ;;  %v14194_v1 = vld [vmem:[%s13673_s6 + $0x98] sm:$0xff] }
 0x1d8   : > { %16653 = vst [vmem:[#allocation41_spill] sm:$0xff] %v14177_v63  ;;  %16654 = vst [vmem:[#allocation42_spill] sm:$0xff] %v14185_v37  ;;  %v5097_v20 = vsel %vm4889_vm2, %v14177_v63, -inf  ;;  %v4672_v42 = vadd.f32 %v10862_v58, %v4544_v22  ;;  %v2938_v39 = vpop.f32.mrb[35].mxu1  ;;  %v4667_v9 = vadd.f32 %v4539_v48, %v2829_v27  ;;  %v5082_v38 = vsel %vm4889_vm2, %v14185_v37, -inf  ;;  %v14207_v27 = vld [vmem:[%s13673_s6 + $0x90] sm:$0xff] }
 0x1d9   : > { %16655 = vst [vmem:[#allocation43_spill] sm:$0xff] %v14191_v11  ;;  %5098 = vmax.xlane.f32.xlu1 %v5097_v20  ;;  %5086 = vmax.xlane.f32.xlu0 %v5085_v8  ;;  %v4671_v17 = vadd.f32 %v4543_v12, %v2938_v39  ;;  %v5094_v50 = vsel %vm4889_vm2, %v14191_v11, -inf  ;;  %v14204_v2 = vadd.f32 %v14194_v1, %v4668_v46  ;;  %v4550_v12 = vld [vmem:[%s13665_s9 + $0x268] sm:$0xff]  ;;  %v4545_v37 = vld [vmem:[%s13665_s9 + $0x240] sm:$0xff] }
 0x1da   : > { %v14201_v22 = vadd.f32 %v14194_v1, %v4672_v42  ;;  %v14217_v20 = vadd.f32 %v14207_v27, %v4667_v9  ;;  %v4546_v42 = vld [vmem:[%s13665_s9 + $0x248] sm:$0xff]  ;;  %v4549_v63 = vld [vmem:[%s13665_s9 + $0x260] sm:$0xff] }
 0x1db   : > { %16657 = vst [vmem:[#allocation45_spill] sm:$0xff] %v14204_v2  ;;  %v5091_v58 = vsel %vm4889_vm2, %v14204_v2, -inf  ;;  %v14214_v48 = vadd.f32 %v14207_v27, %v4671_v17 }
 0x1dc   : > { %16656 = vst [vmem:[#allocation44_spill] sm:$0xff] %v14201_v22  ;;  %v5103_v8 = vsel %vm4889_vm2, %v14201_v22, -inf  ;;  %16659 = vst [vmem:[#allocation47_spill] sm:$0xff] %v14217_v20  ;;  %v5088_v9 = vsel %vm4889_vm2, %v14217_v20, -inf }
 0x1dd   : > { %5095 = vmax.xlane.f32.xlu1 %v5094_v50  ;;  %5083 = vmax.xlane.f32.xlu0 %v5082_v38  ;;  %16658 = vst [vmem:[#allocation46_spill] sm:$0xff] %v14214_v48  ;;  %v5100_v17 = vsel %vm4889_vm2, %v14214_v48, -inf }
 0x1e1   : > { %5104 = vmax.xlane.f32.xlu1 %v5103_v8  ;;  %5092 = vmax.xlane.f32.xlu0 %v5091_v58 }
 0x1e2   : > { %v10873_v46 = vpop.f32.mrb[36].mxu0 }
 0x1e3   : > { %v10887_v39 = vpop.f32.mrb[36].mxu1  ;;  %v4674_v50 = vadd.f32 %v10873_v46, %v4546_v42  ;;  %v3037_v38 = vpop.f32.mrb[37].mxu0 }
 0x1e4   : > { %v4678_v22 = vadd.f32 %v10887_v39, %v4550_v12  ;;  %v3146_v11 = vpop.f32.mrb[37].mxu1  ;;  %v4673_v2 = vadd.f32 %v4545_v37, %v3037_v38  ;;  %v4548_v38 = vld [vmem:[%s13665_s9 + $0x258] sm:$0xff] }
 0x1e5   : > { %v4677_v8 = vadd.f32 %v4549_v63, %v3146_v11  ;;  %5101 = vmax.xlane.f32.xlu1 %v5100_v17  ;;  %v4895_v58 = vpop.xlane.xlu1 %4894  ;;  %5089 = vmax.xlane.f32.xlu0 %v5088_v9  ;;  %v14228_v46 = vadd.f32 %v14161_v33, %v4674_v50  ;;  %v4552_v50 = vld [vmem:[%s13665_s9 + $0x278] sm:$0xff] }
 0x1e6   : > { %v5275_v42 = vsub.f32 %v13699_v43, %v4895_v58  ;;  %v4892_v39 = vpop.xlane.xlu0 %4891  ;;  %v14232_v12 = vadd.f32 %v14161_v33, %v4678_v22  ;;  %v10876_v37 = vpop.f32.mrb[38].mxu0  ;;  %v14236_v48 = vadd.f32 %v14171_v57, %v4673_v2  ;;  %v4547_v33 = vld [vmem:[%s13665_s9 + $0x250] sm:$0xff] }
 0x1e7   : > { %16660 = vst [vmem:[#allocation48_spill] sm:$0xff] %v14228_v46  ;;  %v5274_v11 = vsub.f32 %v13705_v45, %v4892_v39  ;;  %v5109_v63 = vsel %vm4889_vm2, %v14228_v46, -inf  ;;  %v10890_v17 = vpop.f32.mrb[38].mxu1  ;;  %v4676_v9 = vadd.f32 %v10876_v37, %v4548_v38  ;;  %v14243_v43 = vadd.f32 %v14171_v57, %v4677_v8  ;;  %v3047_v58 = vpop.f32.mrb[39].mxu0 }
 0x1e8   : > { %16661 = vst [vmem:[#allocation49_spill] sm:$0xff] %v14232_v12  ;;  %16662 = vst [vmem:[#allocation50_spill] sm:$0xff] %v14236_v48  ;;  %v5404_v22 = vmul.f32 1.442695, %v5275_v42  ;;  %v5121_v20 = vsel %vm4889_vm2, %v14232_v12, -inf  ;;  %v4680_v44 = vadd.f32 %v10890_v17, %v4552_v50  ;;  %v3156_v2 = vpop.f32.mrb[39].mxu1  ;;  %v4675_v14 = vadd.f32 %v4547_v33, %v3047_v58 }
 0x1e9   : > { %16663 = vst [vmem:[#allocation51_spill] sm:$0xff] %v14243_v43  ;;  %5122 = vmax.xlane.f32.xlu1 %v5121_v20  ;;  %v4907_v45 = vpop.xlane.xlu1 %4906  ;;  %5110 = vmax.xlane.f32.xlu0 %v5109_v63  ;;  %v4679_v39 = vadd.f32 %v4551_v36, %v3156_v2  ;;  %v5402_v57 = vmul.f32 1.442695, %v5274_v11  ;;  %v5118_v42 = vsel %vm4889_vm2, %v14243_v43, -inf  ;;  %v5106_v17 = vsel %vm4889_vm2, %v14236_v48, -inf  ;;  %v4554_v2 = vld [vmem:[%s13665_s9 + $0x288] sm:$0xff] }
 0x1ea   : > { %v5279_v46 = vsub.f32 %v13717_v52, %v4907_v45  ;;  %v4904_v37 = vpop.xlane.xlu0 %4903  ;;  %12201 = vpow2.f32 %v5404_v22  ;;  %v14256_v50 = vadd.f32 %v14194_v1, %v4680_v44  ;;  %v14259_v20 = vadd.f32 %v14194_v1, %v4676_v9 }
 0x1eb   : > { %v5278_v8 = vsub.f32 %v13727_v60, %v4904_v37  ;;  %v14262_v11 = vadd.f32 %v14207_v27, %v4679_v39 }
 0x1ec   : > { %v5412_v38 = vmul.f32 1.442695, %v5279_v46  ;;  %16664 = vst [vmem:[#allocation52_spill] sm:$0xff] %v14256_v50  ;;  %16665 = vst [vmem:[#allocation53_spill] sm:$0xff] %v14259_v20  ;;  %v5127_v44 = vsel %vm4889_vm2, %v14256_v50, -inf  ;;  %v5115_v1 = vsel %vm4889_vm2, %v14259_v20, -inf  ;;  %v14269_v46 = vadd.f32 %v14207_v27, %v4675_v14 }
 0x1ed   : > { %v5410_v36 = vmul.f32 1.442695, %v5278_v8  ;;  %5119 = vmax.xlane.f32.xlu1 %v5118_v42  ;;  %v4913_v52 = vpop.xlane.xlu1 %4912  ;;  %5107 = vmax.xlane.f32.xlu0 %v5106_v17  ;;  %16666 = vst [vmem:[#allocation54_spill] sm:$0xff] %v14262_v11  ;;  %v5124_v45 = vsel %vm4889_vm2, %v14262_v11, -inf  ;;  %v4558_v27 = vld [vmem:[%s13665_s9 + $0x2a8] sm:$0xff]  ;;  %v4553_v8 = vld [vmem:[%s13665_s9 + $0x280] sm:$0xff] }
 0x1ee   : > { %12203 = vpow2.f32 %v5412_v38  ;;  %v4901_v60 = vpop.xlane.xlu0 %4900  ;;  %16667 = vst [vmem:[#allocation55_spill] sm:$0xff] %v14269_v46  ;;  %v5281_v9 = vsub.f32 %v13744_v6, %v4913_v52  ;;  %v5112_v39 = vsel %vm4889_vm2, %v14269_v46, -inf  ;;  %v4557_v17 = vld [vmem:[%s13665_s9 + $0x2a0] sm:$0xff]  ;;  %v4556_v46 = vld [vmem:[%s13665_s9 + $0x298] sm:$0xff]  ;;  %v4559_v20 = vld [vmem:[%s13665_s9 + $0x2b0] sm:$0xff] }
 0x1ef   : > { %12205 = vpow2.f32 %v5402_v57  ;;  %v5277_v33 = vsub.f32 %v13751_v10, %v4901_v60 }
 0x1f0   : > { %12207 = vpow2.f32 %v5410_v36  ;;  %v5416_v36 = vmul.f32 1.442695, %v5281_v9 }
 0x1f1   : > { %5128 = vmax.xlane.f32.xlu1 %v5127_v44  ;;  %v4910_v63 = vpop.xlane.xlu1 %4909  ;;  %5116 = vmax.xlane.f32.xlu0 %v5115_v1  ;;  %v5408_v1 = vmul.f32 1.442695, %v5277_v33  ;;  %v4560_v33 = vld [vmem:[%s13665_s9 + $0x2b8] sm:$0xff] }
 0x1f2   : > { %v4898_v58 = vpop.xlane.xlu0 %4897  ;;  %12209 = vpow2.f32 %v5416_v36 }
 0x1f3   : > { %v10901_v22 = vpop.f32.mrb[40].mxu0  ;;  %12211 = vpow2.f32 %v5408_v1 }
 0x1f4   : > { %v4682_v37 = vadd.f32 %v10901_v22, %v4554_v2  ;;  %v10915_v14 = vpop.f32.mrb[40].mxu1  ;;  %v3255_v57 = vpop.f32.mrb[41].mxu0  ;;  %v5276_v22 = vsub.f32 %v13781_v21, %v4898_v58  ;;  %v14301_v58 = vld [vmem:[%s13673_s6 + $0xa8] sm:$0xff] }
 0x1f5   : > { %v14280_v42 = vpop.eup %12201  ;;  %5125 = vmax.xlane.f32.xlu1 %v5124_v45  ;;  %5113 = vmax.xlane.f32.xlu0 %v5112_v39  ;;  %v4686_v6 = vadd.f32 %v10915_v14, %v4558_v27  ;;  %v4681_v10 = vadd.f32 %v4553_v8, %v3255_v57  ;;  %v3364_v38 = vpop.f32.mrb[41].mxu1  ;;  %v5280_v45 = vsub.f32 %v13770_v16, %v4910_v63 }
 0x1f6   : > { %16668 = vst [vmem:[#allocation56_spill] sm:$0xff] %v14280_v42  ;;  %v14283_v52 = vpop.xlane.xlu1 %4930  ;;  %v14285_v60 = vpop.xlane.xlu0 %4918  ;;  %v4685_v44 = vadd.f32 %v4557_v17, %v3364_v38  ;;  %v5661_v9 = vsel %vm4889_vm2, %v14280_v42, 0.0  ;;  %v4555_v38 = vld [vmem:[%s13665_s9 + $0x290] sm:$0xff]  ;;  %v5406_v17 = vmul.f32 1.442695, %v5276_v22  ;;  %v14319_v36 = vadd.f32 %v14301_v58, %v4682_v37  ;;  %v14329_v22 = vld [vmem:[%s13673_s6 + $0xa0] sm:$0xff] }
 0x1f7   : > { %v10904_v2 = vpop.f32.mrb[42].mxu0  ;;  %v5414_v50 = vmul.f32 1.442695, %v5280_v45  ;;  %v14326_v1 = vadd.f32 %v14301_v58, %v4686_v6 }
 0x1f8   : > { %v14289_v11 = vpop.eup %12203  ;;  %v14294_v39 = vadd.f32 %v10904_v2, %v4556_v46  ;;  %v10918_v14 = vpop.f32.mrb[42].mxu1  ;;  %16672 = vst [vmem:[#allocation60_spill] sm:$0xff] %v14319_v36  ;;  %12213 = vpow2.f32 %v5406_v17  ;;  %v14343_v6 = vadd.f32 %v14329_v22, %v4685_v44  ;;  %v4562_v44 = vld [vmem:[%s13665_s9 + $0x2c8] sm:$0xff] }
 0x1f9   : > { %16669 = vst [vmem:[#allocation57_spill] sm:$0xff] %v14289_v11  ;;  %v3265_v27 = vpop.f32.mrb[43].mxu0  ;;  %v14296_v57 = vpop.eup %12205  ;;  %5662 = vadd.xlane.f32.xlu0 %v5661_v9  ;;  %v5673_v21 = vsel %vm4889_vm2, %v14289_v11, 0.0  ;;  %v14310_v63 = vadd.f32 %v10918_v14, %v4560_v33  ;;  %16673 = vst [vmem:[#allocation61_spill] sm:$0xff] %v14326_v1  ;;  %12215 = vpow2.f32 %v5414_v50  ;;  %v5145_v37 = vsel %vm4889_vm2, %v14326_v1, -inf  ;;  %v4566_v1 = vld [vmem:[%s13665_s9 + $0x2e8] sm:$0xff] }
 0x1fa   : > { %16670 = vst [vmem:[#allocation58_spill] sm:$0xff] %v14296_v57  ;;  %v14304_v8 = vpop.eup %12207  ;;  %v14306_v16 = vpop.xlane.xlu1 %4927  ;;  %5674 = vadd.xlane.f32.xlu1 %v5673_v21  ;;  %v14313_v2 = vadd.f32 %v4555_v38, %v3265_v27  ;;  %v5658_v48 = vsel %vm4889_vm2, %v14296_v57, 0.0  ;;  %16675 = vst [vmem:[#allocation63_spill] sm:$0xff] %v14343_v6  ;;  %v5287_v33 = vsub.f32 %v13803_v54, %v14283_v52  ;;  %v5142_v54 = vsel %vm4889_vm2, %v14343_v6, -inf }
 0x1fb   : > { %16671 = vst [vmem:[#allocation59_spill] sm:$0xff] %v14304_v8  ;;  %v14308_v46 = vpop.xlane.xlu0 %4915  ;;  %v3374_v9 = vpop.f32.mrb[43].mxu1  ;;  %v5670_v14 = vsel %vm4889_vm2, %v14304_v8, 0.0  ;;  %v5286_v11 = vsub.f32 %v13823_v13, %v14306_v16  ;;  %v4565_v8 = vld [vmem:[%s13665_s9 + $0x2e0] sm:$0xff] }
 0x1fc   : > { %v14321_v21 = vadd.f32 %v4559_v20, %v3374_v9  ;;  %v5133_v20 = vsel %vm4889_vm2, %v14319_v36, -inf  ;;  %v14353_v17 = vpop.eup %12209  ;;  %v5428_v36 = vmul.f32 1.442695, %v5287_v33 }
 0x1fd   : > { %5659 = vadd.xlane.f32.xlu0 %v5658_v48  ;;  %v14338_v48 = vadd.f32 %v14329_v22, %v4681_v10  ;;  %v5283_v10 = vsub.f32 %v13799_v53, %v14285_v60  ;;  %16676 = vst [vmem:[#allocation64_spill] sm:$0xff] %v14353_v17  ;;  %v4561_v60 = vld [vmem:[%s13665_s9 + $0x2c0] sm:$0xff] }
 0x1fe   : > { %v14331_v27 = vpop.xlane.xlu1 %4936  ;;  %5671 = vadd.xlane.f32.xlu1 %v5670_v14  ;;  %12217 = vpow2.f32 %v5428_v36 }
 0x1ff   : > { %v14333_v45 = vpop.xlane.xlu0 %4924  ;;  %16674 = vst [vmem:[#allocation62_spill] sm:$0xff] %v14338_v48  ;;  %v5130_v9 = vsel %vm4889_vm2, %v14338_v48, -inf  ;;  %v5420_v6 = vmul.f32 1.442695, %v5283_v10  ;;  %v14387_v10 = vld [vmem:[%s13673_s6 + $0xb8] sm:$0xff] }
 0x201   : > { %5134 = vmax.xlane.f32.xlu0 %v5133_v20  ;;  %v14358_v20 = vpop.eup %12211  ;;  %12219 = vpow2.f32 %v5420_v6  ;;  %v14413_v6 = vadd.f32 %v14387_v10, %v14310_v63 }
 0x202   : > { %v14347_v38 = vpop.xlane.xlu1 %4933  ;;  %5146 = vmax.xlane.f32.xlu1 %v5145_v37  ;;  %16677 = vst [vmem:[#allocation65_spill] sm:$0xff] %v14358_v20  ;;  %v5667_v33 = vsel %vm4889_vm2, %v14358_v20, 0.0  ;;  %v14382_v57 = vpop.eup %12213  ;;  %v4563_v20 = vld [vmem:[%s13665_s9 + $0x2d0] sm:$0xff] }
 0x203   : > { %v14349_v50 = vpop.xlane.xlu0 %4921  ;;  %16678 = vst [vmem:[#allocation66_spill] sm:$0xff] %v14382_v57  ;;  %16681 = vst [vmem:[#allocation69_spill] sm:$0xff] %v14413_v6 }
 0x204   : > { %v10929_v14 = vpop.f32.mrb[44].mxu0 }
 0x205   : > { %5131 = vmax.xlane.f32.xlu0 %v5130_v9  ;;  %v14362_v52 = vadd.f32 %v10929_v14, %v4562_v44  ;;  %v10943_v37 = vpop.f32.mrb[44].mxu1  ;;  %v3473_v53 = vpop.f32.mrb[45].mxu0  ;;  %v5282_v14 = vsub.f32 %v13812_v4, %v14308_v46 }
 0x206   : > { %v14366_v43 = vpop.xlane.xlu1 %4954  ;;  %5143 = vmax.xlane.f32.xlu1 %v5142_v54  ;;  %v14370_v12 = vadd.f32 %v10943_v37, %v4566_v1  ;;  %v14372_v9 = vadd.f32 %v4561_v60, %v3473_v53  ;;  %v3582_v44 = vpop.f32.mrb[45].mxu1  ;;  %v4564_v54 = vld [vmem:[%s13665_s9 + $0x2d8] sm:$0xff]  ;;  %v5679_v1 = vsel %vm4889_vm2, %v14353_v17, 0.0 }
 0x207   : > { %v14368_v48 = vpop.xlane.xlu0 %4942  ;;  %v14389_v4 = vadd.f32 %v4565_v8, %v3582_v44  ;;  %v14393_v37 = vpop.eup %12215  ;;  %v4568_v17 = vld [vmem:[%s13665_s9 + $0x2f8] sm:$0xff]  ;;  %v5426_v44 = vmul.f32 1.442695, %v5286_v11 }
 0x208   : > { %v10932_v42 = vpop.f32.mrb[46].mxu0  ;;  %16679 = vst [vmem:[#allocation67_spill] sm:$0xff] %v14393_v37 }
 0x209   : > { %5668 = vadd.xlane.f32.xlu0 %v5667_v33  ;;  %v14391_v46 = vadd.f32 %v10932_v42, %v4564_v54  ;;  %v10946_v13 = vpop.f32.mrb[46].mxu1  ;;  %v3483_v16 = vpop.f32.mrb[47].mxu0  ;;  %v5418_v33 = vmul.f32 1.442695, %v5282_v14  ;;  %v5664_v42 = vsel %vm4889_vm2, %v14382_v57, 0.0  ;;  %v14404_v54 = vadd.f32 %v14387_v10, %v14294_v39  ;;  %v14416_v14 = vld [vmem:[%s13673_s6 + $0xb0] sm:$0xff] }
 0x20a   : > { %v14395_v53 = vpop.xlane.xlu1 %4951  ;;  %5680 = vadd.xlane.f32.xlu1 %v5679_v1  ;;  %v3592_v8 = vpop.f32.mrb[47].mxu1  ;;  %v14406_v36 = vadd.f32 %v10946_v13, %v4568_v17  ;;  %v5676_v1 = vsel %vm4889_vm2, %v14393_v37, 0.0  ;;  %v14418_v11 = vadd.f32 %v4563_v20, %v3483_v16  ;;  %v4567_v57 = vld [vmem:[%s13665_s9 + $0x2f0] sm:$0xff]  ;;  %v14431_v63 = vadd.f32 %v14416_v14, %v14313_v2 }
 0x20b   : > { %v14397_v60 = vpop.xlane.xlu0 %4939  ;;  %16680 = vst [vmem:[#allocation68_spill] sm:$0xff] %v14404_v54  ;;  %v14425_v17 = vadd.f32 %v4567_v57, %v3592_v8  ;;  %12221 = vpow2.f32 %v5418_v33  ;;  %v5139_v13 = vsel %vm4889_vm2, %v14404_v54, -inf  ;;  %v5151_v20 = vsel %vm4889_vm2, %v14413_v6, -inf  ;;  %v4574_v6 = vld [vmem:[%s13665_s9 + $0x328] sm:$0xff] }
 0x20c   : > { %12223 = vpow2.f32 %v5426_v44  ;;  %16682 = vst [vmem:[#allocation70_spill] sm:$0xff] %v14431_v63  ;;  %v14437_v16 = vadd.f32 %v14416_v14, %v14321_v21  ;;  %v5289_v2 = vsub.f32 %v13840_v18, %v14331_v27  ;;  %v5285_v8 = vsub.f32 %v13843_v19, %v14333_v45  ;;  %v14447_v44 = vpop.eup %12217  ;;  %v4569_v27 = vld [vmem:[%s13665_s9 + $0x300] sm:$0xff] }
 0x20d   : > { %5665 = vadd.xlane.f32.xlu0 %v5664_v42  ;;  %16684 = vst [vmem:[#allocation72_spill] sm:$0xff] %v14447_v44  ;;  %v5136_v42 = vsel %vm4889_vm2, %v14431_v63, -inf  ;;  %v14451_v21 = vpop.eup %12219  ;;  %v856_v45 = vld [vmem:[%s14465_s7] sm:$0xff]  ;;  %v5284_v37 = vsub.f32 %v13860_v26, %v14349_v50  ;;  %v5697_v26 = vsel %vm4889_vm2, %v14447_v44, 0.0 }
 0x20e   : > { %v14421_v28 = vpop.xlane.xlu1 %4960  ;;  %5677 = vadd.xlane.f32.xlu1 %v5676_v1  ;;  %16683 = vst [vmem:[#allocation71_spill] sm:$0xff] %v14437_v16  ;;  %16685 = vst [vmem:[#allocation73_spill] sm:$0xff] %v14451_v21  ;;  %v5148_v1 = vsel %vm4889_vm2, %v14437_v16, -inf  ;;  %v5432_v63 = vmul.f32 1.442695, %v5289_v2 }
 0x20f   : > { %v14423_v39 = vpop.xlane.xlu0 %4948  ;;  %v5424_v16 = vmul.f32 1.442695, %v5285_v8 }
 0x211   : > { %5140 = vmax.xlane.f32.xlu0 %v5139_v13  ;;  %12225 = vpow2.f32 %v5424_v16 }
 0x212   : > { %v14439_v57 = vpop.xlane.xlu1 %4957  ;;  %5152 = vmax.xlane.f32.xlu1 %v5151_v20  ;;  %v4570_v20 = vld [vmem:[%s13665_s9 + $0x308] sm:$0xff]  ;;  %12227 = vpow2.f32 %v5432_v63 }
 0x213   : > { %v14441_v33 = vpop.xlane.xlu0 %4945 }
 0x215   : > { %5137 = vmax.xlane.f32.xlu0 %v5136_v42  ;;  %v10957_v13 = vpop.f32.mrb[48].mxu0  ;;  %v857_v42 = vld [vmem:[%s14465_s7 + $0x8] sm:$0xff]  ;;  %v14480_v62 = vpop.eup %12221 }
 0x216   : > { %v14457_v54 = vpop.xlane.xlu1 %4978  ;;  %5149 = vmax.xlane.f32.xlu1 %v5148_v1  ;;  %v14461_v19 = vadd.f32 %v10957_v13, %v4570_v20  ;;  %v10971_v47 = vpop.f32.mrb[48].mxu1  ;;  %v5288_v1 = vsub.f32 %v13857_v25, %v14347_v38  ;;  %v5685_v13 = vsel %vm4889_vm2, %v14451_v21, 0.0  ;;  %16686 = vst [vmem:[#allocation74_spill] sm:$0xff] %v14480_v62  ;;  %v11891_v25 = vpack.c.bf16 %v857_v42, %v856_v45  ;;  %v4572_v42 = vld [vmem:[%s13665_s9 + $0x318] sm:$0xff] }
 0x217   : > { %v14459_v18 = vpop.xlane.xlu0 %4966  ;;  %v3691_v40 = vpop.f32.mrb[49].mxu0  ;;  %v14475_v20 = vadd.f32 %v10971_v47, %v4574_v6  ;;  %v5422_v47 = vmul.f32 1.442695, %v5284_v37  ;;  %v5682_v45 = vsel %vm4889_vm2, %v14480_v62, 0.0  ;;  %v14501_v37 = vadd.f32 %v14301_v58, %v14370_v12  ;;  %v4581_v62 = vld [vmem:[%s13665_s9 + $0x360] sm:$0xff] }
 0x218   : > { %v14477_v41 = vadd.f32 %v4569_v27, %v3691_v40  ;;  %v3800_v29 = vpop.f32.mrb[49].mxu1  ;;  %v14486_v38 = vpop.eup %12223  ;;  %11892 = vmatprep.subr.bf16.mxu0 %v11891_v25 }
 0x219   : > { %5686 = vadd.xlane.f32.xlu0 %v5685_v13  ;;  %v14484_v50 = vadd.f32 %v4573_v15, %v3800_v29  ;;  %v10960_v2 = vpop.f32.mrb[50].mxu0  ;;  %16687 = vst [vmem:[#allocation75_spill] sm:$0xff] %v14486_v38  ;;  %v5430_v15 = vmul.f32 1.442695, %v5288_v1  ;;  %v14494_v29 = vadd.f32 %v14301_v58, %v14362_v52  ;;  %11894 = vmatpush3.bf16.msra.mxu0 %v11891_v25  ;;  %16689 = vst [vmem:[#allocation77_spill] sm:$0xff] %v14501_v37  ;;  %v4576_v52 = vld [vmem:[%s13665_s9 + $0x338] sm:$0xff] }
 0x21a   : > { %v14488_v8 = vpop.xlane.xlu1 %4975  ;;  %5698 = vadd.xlane.f32.xlu1 %v5697_v26  ;;  %v10974_v6 = vpop.f32.mrb[50].mxu1  ;;  %v5694_v63 = vsel %vm4889_vm2, %v14486_v38, 0.0  ;;  %v14505_v16 = vadd.f32 %v10960_v2, %v4572_v42  ;;  %v4571_v1 = vld [vmem:[%s13665_s9 + $0x310] sm:$0xff]  ;;  %v860_v2 = vld [vmem:[%s14465_s7 + $0x20] sm:$0xff]  ;;  %12229 = vpow2.f32 %v5422_v47  ;;  %v14524_v42 = vadd.f32 %v14329_v22, %v14372_v9 }
 0x21b   : > { %v14490_v40 = vpop.xlane.xlu0 %4963  ;;  %v3701_v27 = vpop.f32.mrb[51].mxu0  ;;  %16688 = vst [vmem:[#allocation76_spill] sm:$0xff] %v14494_v29  ;;  %v4575_v26 = vld [vmem:[%s13665_s9 + $0x330] sm:$0xff]  ;;  %v14514_v25 = vadd.f32 %v10974_v6, %v4576_v52  ;;  %12231 = vpow2.f32 %v5430_v15  ;;  %v14531_v6 = vadd.f32 %v14329_v22, %v14389_v4  ;;  %v859_v52 = vld [vmem:[%s14465_s7 + $0x18] sm:$0xff]  ;;  %v5291_v22 = vsub.f32 %v13880_v55, %v14368_v48  ;;  %v4578_v55 = vld [vmem:[%s13665_s9 + $0x348] sm:$0xff] }
 0x21c   : > { %v3810_v13 = vpop.f32.mrb[51].mxu1  ;;  %v14516_v12 = vadd.f32 %v4571_v1, %v3701_v27  ;;  %16690 = vst [vmem:[#allocation78_spill] sm:$0xff] %v14524_v42  ;;  %v858_v38 = vld [vmem:[%s14465_s7 + $0x10] sm:$0xff]  ;;  %v5169_v27 = vsel %vm4889_vm2, %v14501_v37, -inf  ;;  %v863_v15 = vld [vmem:[%s14465_s7 + $0x38] sm:$0xff]  ;;  %v5154_v4 = vsel %vm4889_vm2, %v14524_v42, -inf }
 0x21d   : > { %5683 = vadd.xlane.f32.xlu0 %v5682_v45  ;;  %v14518_v58 = vadd.f32 %v4575_v26, %v3810_v13  ;;  %v861_v45 = vld [vmem:[%s14465_s7 + $0x28] sm:$0xff]  ;;  %16691 = vst [vmem:[#allocation79_spill] sm:$0xff] %v14531_v6  ;;  %v862_v47 = vld [vmem:[%s14465_s7 + $0x30] sm:$0xff]  ;;  %v5295_v26 = vsub.f32 %v13883_v56, %v14366_v43 }
 0x21e   : > { %v14510_v44 = vpop.xlane.xlu1 %4984  ;;  %5695 = vadd.xlane.f32.xlu1 %v5694_v63  ;;  %v5157_v63 = vsel %vm4889_vm2, %v14494_v29, -inf  ;;  %v11899_v13 = vpack.c.bf16 %v861_v45, %v860_v2  ;;  %v11895_v2 = vpack.c.bf16 %v859_v52, %v858_v38  ;;  %v11903_v45 = vpack.c.bf16 %v863_v15, %v862_v47  ;;  %v4582_v43 = vld [vmem:[%s13665_s9 + $0x368] sm:$0xff] }
 0x21f   : > { %v14512_v21 = vpop.xlane.xlu0 %4972  ;;  %v5444_v48 = vmul.f32 1.442695, %v5295_v26  ;;  %v5436_v38 = vmul.f32 1.442695, %v5291_v22  ;;  %v5294_v15 = vsub.f32 %v13899_v7, %v14395_v53  ;;  %v4577_v26 = vld [vmem:[%s13665_s9 + $0x340] sm:$0xff] }
 0x220   : > { %11900 = vmatprep.subr.bf16.mxu1 %v11899_v13  ;;  %11896 = vmatprep.subr.bf16.mxu0 %v11895_v2 }
 0x221   : > { %5158 = vmax.xlane.f32.xlu0 %v5157_v63  ;;  %11902 = vmatpush3.bf16.msra.mxu1 %v11899_v13  ;;  %v14548_v63 = vpop.eup %12225  ;;  %v5290_v13 = vsub.f32 %v13892_v5, %v14397_v60  ;;  %12233 = vpow2.f32 %v5436_v38  ;;  %v4580_v38 = vld [vmem:[%s13665_s9 + $0x358] sm:$0xff] }
 0x222   : > { %v14538_v1 = vpop.xlane.xlu1 %4981  ;;  %5170 = vmax.xlane.f32.xlu1 %v5169_v27  ;;  %16692 = vst [vmem:[#allocation80_spill] sm:$0xff] %v14548_v63  ;;  %v5166_v27 = vsel %vm4889_vm2, %v14531_v6, -inf  ;;  %v14552_v37 = vpop.eup %12227  ;;  %11898 = vmatpush3.bf16.msra.mxu0 %v11895_v2  ;;  %12235 = vpow2.f32 %v5444_v48 }
 0x223   : > { %v14540_v9 = vpop.xlane.xlu0 %4969  ;;  %16693 = vst [vmem:[#allocation81_spill] sm:$0xff] %v14552_v37  ;;  %11904 = vmatprep.subr.bf16.mxu1 %v11903_v45  ;;  %v5703_v60 = vsel %vm4889_vm2, %v14552_v37, 0.0 }
 0x224   : > { %v14572_v5 = vpop.eup %12229 }
 0x225   : > { %5155 = vmax.xlane.f32.xlu0 %v5154_v4  ;;  %v5691_v4 = vsel %vm4889_vm2, %v14548_v63, 0.0  ;;  %11906 = vmatpush3.bf16.msra.mxu1 %v11903_v45  ;;  %16694 = vst [vmem:[#allocation82_spill] sm:$0xff] %v14572_v5  ;;  %v14580_v53 = vpop.eup %12231  ;;  %v5434_v45 = vmul.f32 1.442695, %v5290_v13  ;;  %v4584_v13 = vld [vmem:[%s13665_s9 + $0x378] sm:$0xff] }
 0x226   : > { %v14554_v29 = vpop.xlane.xlu1 %5002  ;;  %5167 = vmax.xlane.f32.xlu1 %v5166_v27  ;;  %v10985_v52 = vpop.f32.mrb[52].mxu0  ;;  %16695 = vst [vmem:[#allocation83_spill] sm:$0xff] %v14580_v53  ;;  %v5700_v48 = vsel %vm4889_vm2, %v14580_v53, 0.0 }
 0x227   : > { %v14556_v56 = vpop.xlane.xlu0 %4990  ;;  %v10999_v47 = vpop.f32.mrb[52].mxu1  ;;  %v14566_v27 = vadd.f32 %v10985_v52, %v4578_v55  ;;  %12237 = vpow2.f32 %v5434_v45 }
 0x228   : > { %v14568_v6 = vadd.f32 %v10999_v47, %v4582_v43  ;;  %v3909_v42 = vpop.f32.mrb[53].mxu0  ;;  %v4018_v22 = vpop.f32.mrb[53].mxu1 }
 0x229   : > { %5692 = vadd.xlane.f32.xlu0 %v5691_v4  ;;  %v14576_v2 = vadd.f32 %v4577_v26, %v3909_v42  ;;  %v14578_v7 = vadd.f32 %v4581_v62, %v4018_v22  ;;  %v5442_v4 = vmul.f32 1.442695, %v5294_v15  ;;  %v14588_v62 = vadd.f32 %v14387_v10, %v14391_v46 }
 0x22a   : > { %v14582_v55 = vpop.xlane.xlu1 %4999  ;;  %5704 = vadd.xlane.f32.xlu1 %v5703_v60  ;;  %v10988_v52 = vpop.f32.mrb[54].mxu0  ;;  %v5688_v42 = vsel %vm4889_vm2, %v14572_v5, 0.0  ;;  %v14594_v60 = vadd.f32 %v14387_v10, %v14406_v36  ;;  %v4579_v5 = vld [vmem:[%s13665_s9 + $0x350] sm:$0xff]  ;;  %v14611_v10 = vadd.f32 %v14416_v14, %v14418_v11 }
 0x22b   : > { %v14584_v43 = vpop.xlane.xlu0 %4987  ;;  %v11002_v47 = vpop.f32.mrb[54].mxu1  ;;  %16696 = vst [vmem:[#allocation84_spill] sm:$0xff] %v14588_v62  ;;  %v14604_v37 = vadd.f32 %v10988_v52, %v4580_v38  ;;  %12239 = vpow2.f32 %v5442_v4  ;;  %v5163_v36 = vsel %vm4889_vm2, %v14588_v62, -inf  ;;  %v14620_v52 = vadd.f32 %v14416_v14, %v14425_v17  ;;  %v864_v38 = vld [vmem:[%s14465_s7 + $0x40] sm:$0xff]  ;;  %v4590_v62 = vld [vmem:[%s13665_s9 + $0x3a8] sm:$0xff] }
 0x22c   : > { %v3919_v26 = vpop.f32.mrb[55].mxu0  ;;  %v4028_v22 = vpop.f32.mrb[55].mxu1  ;;  %16697 = vst [vmem:[#allocation85_spill] sm:$0xff] %v14594_v60  ;;  %v14606_v63 = vadd.f32 %v11002_v47, %v4584_v13  ;;  %16698 = vst [vmem:[#allocation86_spill] sm:$0xff] %v14611_v10  ;;  %v5175_v45 = vsel %vm4889_vm2, %v14594_v60, -inf  ;;  %v5293_v14 = vsub.f32 %v13912_v61, %v14423_v39  ;;  %v5160_v17 = vsel %vm4889_vm2, %v14611_v10, -inf }
 0x22d   : > { %5689 = vadd.xlane.f32.xlu0 %v5688_v42  ;;  %v14615_v42 = vadd.f32 %v4579_v5, %v3919_v26  ;;  %16699 = vst [vmem:[#allocation87_spill] sm:$0xff] %v14620_v52  ;;  %v5297_v5 = vsub.f32 %v13910_v24, %v14421_v28  ;;  %v14636_v26 = vpop.eup %12233  ;;  %v5296_v24 = vsub.f32 %v13919_v30, %v14439_v57  ;;  %v865_v39 = vld [vmem:[%s14465_s7 + $0x48] sm:$0xff] }
 0x22e   : > { %v14600_v15 = vpop.xlane.xlu1 %5008  ;;  %5701 = vadd.xlane.f32.xlu1 %v5700_v48  ;;  %v4583_v48 = vld [vmem:[%s13665_s9 + $0x370] sm:$0xff]  ;;  %16701 = vst [vmem:[#allocation89_spill] sm:$0xff] %v14636_v26  ;;  %v14641_v13 = vpop.eup %12235  ;;  %v4586_v60 = vld [vmem:[%s13665_s9 + $0x388] sm:$0xff]  ;;  %v5709_v30 = vsel %vm4889_vm2, %v14636_v26, 0.0  ;;  %v4589_v26 = vld [vmem:[%s13665_s9 + $0x3a0] sm:$0xff] }
 0x22f   : > { %v14602_v46 = vpop.xlane.xlu0 %4996  ;;  %v14624_v47 = vadd.f32 %v4583_v48, %v4028_v22  ;;  %v5172_v22 = vsel %vm4889_vm2, %v14620_v52, -inf  ;;  %16702 = vst [vmem:[#allocation90_spill] sm:$0xff] %v14641_v13  ;;  %v869_v48 = vld [vmem:[%s14465_s7 + $0x68] sm:$0xff]  ;;  %v5292_v52 = vsub.f32 %v13921_v31, %v14441_v33  ;;  %v5721_v31 = vsel %vm4889_vm2, %v14641_v13, 0.0  ;;  %v4587_v13 = vld [vmem:[%s13665_s9 + $0x390] sm:$0xff] }
 0x230   : > { %v14670_v33 = vld [vmem:[%s13673_s6 + $0xc8] sm:$0xff] }
 0x231   : > { %5164 = vmax.xlane.f32.xlu0 %v5163_v36  ;;  %v868_v36 = vld [vmem:[%s14465_s7 + $0x60] sm:$0xff] }
 0x232   : > { %v14626_v11 = vpop.xlane.xlu1 %5005  ;;  %5176 = vmax.xlane.f32.xlu1 %v5175_v45  ;;  %v5448_v45 = vmul.f32 1.442695, %v5297_v5  ;;  %v14663_v5 = vpack.c.bf16 %v869_v48, %v868_v36 }
 0x233   : > { %16700 = vst [vmem:[#allocation88_spill] sm:$0xff] %v14626_v11  ;;  %v14628_v4 = vpop.xlane.xlu0 %4993 }
 0x234   : > { %16707 = vst [vmem:[#allocation95_spill] sm:$0xff] %v14663_v5  ;;  %11916 = vmatprep.subr.bf16.mxu1 %v14663_v5  ;;  %v4591_v5 = vld [vmem:[%s13665_s9 + $0x3b0] sm:$0xff] }
 0x235   : > { %5161 = vmax.xlane.f32.xlu0 %v5160_v17  ;;  %v5440_v17 = vmul.f32 1.442695, %v5293_v14  ;;  %v14665_v14 = vpop.eup %12237 }
 0x236   : > { %v14645_v28 = vpop.xlane.xlu1 %5026  ;;  %5173 = vmax.xlane.f32.xlu1 %v5172_v22  ;;  %16708 = vst [vmem:[#allocation96_spill] sm:$0xff] %v14665_v14 }
 0x237   : > { %16703 = vst [vmem:[#allocation91_spill] sm:$0xff] %v14645_v28  ;;  %v14647_v61 = vpop.xlane.xlu0 %5014  ;;  %v11013_v10 = vpop.f32.mrb[56].mxu0  ;;  %v14661_v28 = vpack.c.bf16 %v865_v39, %v864_v38  ;;  %v5446_v38 = vmul.f32 1.442695, %v5296_v24  ;;  %12241 = vpow2.f32 %v5440_v17  ;;  %v14689_v24 = vadd.f32 %v14670_v33, %v14461_v19  ;;  %v14698_v17 = vld [vmem:[%s13673_s6 + $0xc0] sm:$0xff] }
 0x238   : > { %16704 = vst [vmem:[#allocation92_spill] sm:$0xff] %v14647_v61  ;;  %v14657_v57 = vadd.f32 %v11013_v10, %v4586_v60  ;;  %v11027_v22 = vpop.f32.mrb[56].mxu1  ;;  %v4127_v53 = vpop.f32.mrb[57].mxu0  ;;  %v4585_v61 = vld [vmem:[%s13665_s9 + $0x380] sm:$0xff]  ;;  %12243 = vpow2.f32 %v5448_v45  ;;  %v4588_v45 = vld [vmem:[%s13665_s9 + $0x398] sm:$0xff] }
 0x239   : > { %16706 = vst [vmem:[#allocation94_spill] sm:$0xff] %v14661_v28  ;;  %5710 = vadd.xlane.f32.xlu0 %v5709_v30  ;;  %v14672_v11 = vadd.f32 %v11027_v22, %v4590_v62  ;;  %v14674_v60 = vadd.f32 %v4585_v61, %v4127_v53  ;;  %v4236_v10 = vpop.f32.mrb[57].mxu1  ;;  %11908 = vmatprep.subr.bf16.mxu0 %v14661_v28  ;;  %v5438_v62 = vmul.f32 1.442695, %v5292_v52  ;;  %16710 = vst [vmem:[#allocation98_spill] sm:$0xff] %v14689_v24 }
 0x23a   : > { %16705 = vst [vmem:[#allocation93_spill] sm:$0xff] %v14657_v57  ;;  %v14677_v57 = vpop.eup %12239  ;;  %v14679_v39 = vpop.xlane.xlu1 %5023  ;;  %5722 = vadd.xlane.f32.xlu1 %v5721_v31  ;;  %v14683_v48 = vadd.f32 %v4589_v26, %v4236_v10  ;;  %v5706_v61 = vsel %vm4889_vm2, %v14665_v14, 0.0  ;;  %v14695_v26 = vadd.f32 %v14670_v33, %v14475_v20  ;;  %12245 = vpow2.f32 %v5446_v38  ;;  %v4592_v20 = vld [vmem:[%s13665_s9 + $0x3b8] sm:$0xff] }
 0x23b   : > { %16709 = vst [vmem:[#allocation97_spill] sm:$0xff] %v14677_v57  ;;  %v14681_v36 = vpop.xlane.xlu0 %5011  ;;  %v11016_v53 = vpop.f32.mrb[58].mxu0  ;;  %v5718_v52 = vsel %vm4889_vm2, %v14677_v57, 0.0  ;;  %12247 = vpow2.f32 %v5438_v62  ;;  %v5181_v57 = vsel %vm4889_vm2, %v14689_v24, -inf }
 0x23c   : > { %v4137_v30 = vpop.f32.mrb[59].mxu0  ;;  %16711 = vst [vmem:[#allocation99_spill] sm:$0xff] %v14695_v26  ;;  %v14707_v31 = vadd.f32 %v11016_v53, %v4588_v45  ;;  %v14724_v53 = vadd.f32 %v14698_v17, %v14484_v50  ;;  %v5193_v62 = vsel %vm4889_vm2, %v14695_v26, -inf }
 0x23d   : > { %5707 = vadd.xlane.f32.xlu0 %v5706_v61  ;;  %v11030_v10 = vpop.f32.mrb[58].mxu1  ;;  %v14713_v61 = vadd.f32 %v14698_v17, %v14477_v41  ;;  %v14719_v38 = vadd.f32 %v4587_v13, %v4137_v30  ;;  %v5303_v41 = vsub.f32 %v13935_v51, %v14457_v54  ;;  %v5299_v30 = vsub.f32 %v13932_v49, %v14459_v18 }
 0x23e   : > { %v14703_v19 = vpop.xlane.xlu1 %5032  ;;  %5719 = vadd.xlane.f32.xlu1 %v5718_v52  ;;  %v14717_v14 = vadd.f32 %v11030_v10, %v4592_v20  ;;  %v4246_v52 = vpop.f32.mrb[59].mxu1  ;;  %16713 = vst [vmem:[#allocation101_spill] sm:$0xff] %v14724_v53  ;;  %v5298_v18 = vsub.f32 %v13942_v3, %v14490_v40  ;;  %v4594_v40 = vld [vmem:[%s13665_s9 + $0x3c8] sm:$0xff] }
 0x23f   : > { %v14705_v22 = vpop.xlane.xlu0 %5020  ;;  %16712 = vst [vmem:[#allocation100_spill] sm:$0xff] %v14713_v61  ;;  %v14728_v45 = vadd.f32 %v4591_v5, %v4246_v52  ;;  %v5178_v50 = vsel %vm4889_vm2, %v14713_v61, -inf  ;;  %v5190_v5 = vsel %vm4889_vm2, %v14724_v53, -inf  ;;  %v5460_v54 = vmul.f32 1.442695, %v5303_v41  ;;  %v4598_v61 = vld [vmem:[%s13665_s9 + $0x3e8] sm:$0xff] }
 0x240   : > { %v5452_v49 = vmul.f32 1.442695, %v5299_v30 }
 0x241   : > { %5182 = vmax.xlane.f32.xlu0 %v5181_v57  ;;  %v14740_v57 = vpop.eup %12241  ;;  %12249 = vpow2.f32 %v5460_v54 }
 0x242   : > { %v14732_v24 = vpop.xlane.xlu1 %5029  ;;  %5194 = vmax.xlane.f32.xlu1 %v5193_v62  ;;  %16714 = vst [vmem:[#allocation102_spill] sm:$0xff] %v14740_v57  ;;  %v14744_v51 = vpop.eup %12243  ;;  %v5302_v62 = vsub.f32 %v13947_v34, %v14488_v8  ;;  %12251 = vpow2.f32 %v5452_v49  ;;  %v14790_v49 = vld [vmem:[%s13673_s6 + $0xd0] sm:$0xff] }
 0x243   : > { %v14734_v13 = vpop.xlane.xlu0 %5017  ;;  %16715 = vst [vmem:[#allocation103_spill] sm:$0xff] %v14744_v51  ;;  %v5727_v41 = vsel %vm4889_vm2, %v14744_v51, 0.0  ;;  %v5450_v51 = vmul.f32 1.442695, %v5298_v18 }
 0x244   : > { %v14752_v52 = vpop.eup %12245  ;;  %v5458_v28 = vmul.f32 1.442695, %v5302_v62 }
 0x245   : > { %5179 = vmax.xlane.f32.xlu0 %v5178_v50  ;;  %16718 = vst [vmem:[#allocation106_spill] sm:$0xff] %v14752_v52  ;;  %v5715_v50 = vsel %vm4889_vm2, %v14740_v57, 0.0  ;;  %v14758_v53 = vpop.eup %12247  ;;  %v5724_v18 = vsel %vm4889_vm2, %v14752_v52, 0.0  ;;  %12253 = vpow2.f32 %v5450_v51  ;;  %v4596_v52 = vld [vmem:[%s13665_s9 + $0x3d8] sm:$0xff] }
 0x246   : > { %v14746_v10 = vpop.xlane.xlu1 %5050  ;;  %5191 = vmax.xlane.f32.xlu1 %v5190_v5  ;;  %16719 = vst [vmem:[#allocation107_spill] sm:$0xff] %v14758_v53  ;;  %v14763_v5 = vld [vmem:[%s13673_s6 + $0xd8] sm:$0xff]  ;;  %12255 = vpow2.f32 %v5458_v28  ;;  %v4595_v28 = vld [vmem:[%s13665_s9 + $0x3d0] sm:$0xff] }
 0x247   : > { %16716 = vst [vmem:[#allocation104_spill] sm:$0xff] %v14746_v10  ;;  %v14748_v20 = vpop.xlane.xlu0 %5038  ;;  %v14778_v54 = vadd.f32 %v14763_v5, %v14505_v16 }
 0x248   : > { %16717 = vst [vmem:[#allocation105_spill] sm:$0xff] %v14748_v20  ;;  %v4593_v20 = vld [vmem:[%s13665_s9 + $0x3c0] sm:$0xff] }
 0x249   : > { %5716 = vadd.xlane.f32.xlu0 %v5715_v50  ;;  %v11055_v30 = vpop.f32.mrb[60].mxu1  ;;  %v11041_v3 = vpop.f32.mrb[60].mxu0  ;;  %16722 = vst [vmem:[#allocation110_spill] sm:$0xff] %v14778_v54 }
 0x24a   : > { %v14767_v26 = vpop.xlane.xlu1 %5047  ;;  %5728 = vadd.xlane.f32.xlu1 %v5727_v41  ;;  %v14771_v8 = vadd.f32 %v11055_v30, %v4598_v61  ;;  %v14773_v50 = vadd.f32 %v11041_v3, %v4594_v40  ;;  %v4345_v57 = vpop.f32.mrb[61].mxu0  ;;  %v5712_v41 = vsel %vm4889_vm2, %v14758_v53, 0.0  ;;  %v4597_v61 = vld [vmem:[%s13665_s9 + $0x3e0] sm:$0xff]  ;;  %v14787_v30 = vadd.f32 %v14763_v5, %v14514_v25  ;;  %v4600_v25 = vld [vmem:[%s13665_s9 + $0x3f8] sm:$0xff] }
 0x24b   : > { %16720 = vst [vmem:[#allocation108_spill] sm:$0xff] %v14767_v26  ;;  %v14769_v34 = vpop.xlane.xlu0 %5035  ;;  %v4454_v10 = vpop.f32.mrb[61].mxu1  ;;  %v14782_v26 = vadd.f32 %v4593_v20, %v4345_v57 }
 0x24c   : > { %16721 = vst [vmem:[#allocation109_spill] sm:$0xff] %v14769_v34  ;;  %16723 = vst [vmem:[#allocation111_spill] sm:$0xff] %v14787_v30  ;;  %v14794_v62 = vadd.f32 %v4597_v61, %v4454_v10  ;;  %v5187_v10 = vsel %vm4889_vm2, %v14778_v54, -inf  ;;  %v5199_v51 = vsel %vm4889_vm2, %v14787_v30, -inf }
 0x24d   : > { %5713 = vadd.xlane.f32.xlu0 %v5712_v41  ;;  %v11058_v16 = vpop.f32.mrb[62].mxu1  ;;  %v11044_v3 = vpop.f32.mrb[62].mxu0  ;;  %v14803_v41 = vadd.f32 %v14790_v49, %v14516_v12 }
 0x24e   : > { %v14796_v40 = vpop.xlane.xlu1 %5056  ;;  %5725 = vadd.xlane.f32.xlu1 %v5724_v18  ;;  %v4355_v20 = vpop.f32.mrb[63].mxu0  ;;  %v14807_v61 = vadd.f32 %v11058_v16, %v4600_v25  ;;  %v14812_v18 = vadd.f32 %v14790_v49, %v14518_v58  ;;  %v5301_v58 = vsub.f32 %v13957_v0, %v14512_v21  ;;  %v5300_v21 = vsub.f32 %v13965_v35, %v14540_v9 }
 0x24f   : > { %16724 = vst [vmem:[#allocation112_spill] sm:$0xff] %v14796_v40  ;;  %v14798_v57 = vpop.xlane.xlu0 %5044  ;;  %v4464_v53 = vpop.f32.mrb[63].mxu1  ;;  %16726 = vst [vmem:[#allocation114_spill] sm:$0xff] %v14803_v41  ;;  %v4599_v40 = vld [vmem:[%s13665_s9 + $0x3f0] sm:$0xff]  ;;  %v14824_v16 = vadd.f32 %v4595_v28, %v4355_v20 }
 0x250   : > { %16725 = vst [vmem:[#allocation113_spill] sm:$0xff] %v14798_v57  ;;  %16727 = vst [vmem:[#allocation115_spill] sm:$0xff] %v14812_v18  ;;  %v14816_v57 = vadd.f32 %v11044_v3, %v4596_v52  ;;  %v14826_v25 = vadd.f32 %v4599_v40, %v4464_v53  ;;  %v5305_v52 = vsub.f32 %v13955_v23, %v14510_v44  ;;  %v5184_v3 = vsel %vm4889_vm2, %v14803_v41, -inf }
 0x251   : > { %5188 = vmax.xlane.f32.xlu0 %v5187_v10  ;;  %v14830_v10 = vpop.eup %12249  ;;  %v5196_v20 = vsel %vm4889_vm2, %v14812_v18, -inf  ;;  %v5456_v0 = vmul.f32 1.442695, %v5301_v58  ;;  %v5304_v23 = vsub.f32 %v13963_v32, %v14538_v1  ;;  %v5454_v35 = vmul.f32 1.442695, %v5300_v21 }
 0x252   : > { %v14820_v12 = vpop.xlane.xlu1 %5053  ;;  %5200 = vmax.xlane.f32.xlu1 %v5199_v51  ;;  %16728 = vst [vmem:[#allocation116_spill] sm:$0xff] %v14830_v10  ;;  %v14836_v30 = vpop.eup %12251  ;;  %v5464_v40 = vmul.f32 1.442695, %v5305_v52  ;;  %v14862_v1 = vadd.f32 %v14670_v33, %v14566_v27  ;;  %v14868_v52 = vadd.f32 %v14670_v33, %v14568_v6  ;;  %v14878_v27 = vadd.f32 %v14698_v17, %v14576_v2 }
 0x253   : > { %v14822_v34 = vpop.xlane.xlu0 %5041  ;;  %16729 = vst [vmem:[#allocation117_spill] sm:$0xff] %v14836_v30  ;;  %v5733_v44 = vsel %vm4889_vm2, %v14836_v30, 0.0  ;;  %v14850_v28 = vpop.eup %12253  ;;  %12257 = vpow2.f32 %v5456_v0  ;;  %v5462_v32 = vmul.f32 1.442695, %v5304_v23  ;;  %v14884_v6 = vadd.f32 %v14698_v17, %v14578_v7 }
 0x254   : > { %16730 = vst [vmem:[#allocation118_spill] sm:$0xff] %v14850_v28  ;;  %12259 = vpow2.f32 %v5464_v40  ;;  %16732 = vst [vmem:[#allocation120_spill] sm:$0xff] %v14862_v1  ;;  %v5730_v9 = vsel %vm4889_vm2, %v14850_v28, 0.0  ;;  %v5205_v21 = vsel %vm4889_vm2, %v14862_v1, -inf  ;;  %v5217_v33 = vsel %vm4889_vm2, %v14868_v52, -inf }
 0x255   : > { %5185 = vmax.xlane.f32.xlu0 %v5184_v3  ;;  %v5745_v3 = vsel %vm4889_vm2, %v14830_v10, 0.0  ;;  %16733 = vst [vmem:[#allocation121_spill] sm:$0xff] %v14868_v52  ;;  %12261 = vpow2.f32 %v5454_v35  ;;  %16734 = vst [vmem:[#allocation122_spill] sm:$0xff] %v14878_v27  ;;  %v5307_v2 = vsub.f32 %v13982_v59, %v14556_v56  ;;  %v16736_v35 = vld [vmem:[#allocation9_spill] sm:$0xff]  ;;  %v5214_v17 = vsel %vm4889_vm2, %v14884_v6, -inf  ;;  %v16739_v56 = vld [vmem:[#allocation10_spill] sm:$0xff] }
 0x256   : > { %v14840_v51 = vpop.xlane.xlu1 %5074  ;;  %5197 = vmax.xlane.f32.xlu1 %v5196_v20  ;;  %v14854_v20 = vpop.eup %12255  ;;  %12263 = vpow2.f32 %v5462_v32  ;;  %16735 = vst [vmem:[#allocation123_spill] sm:$0xff] %v14884_v6  ;;  %v5311_v32 = vsub.f32 %v16736_v35, %v14554_v29  ;;  %v5306_v29 = vsub.f32 %v16739_v56, %v14584_v43  ;;  %v14932_v56 = vadd.f32 %v14763_v5, %v14606_v63  ;;  %v870_v10 = vld [vmem:[%s14465_s7 + $0x70] sm:$0xff] }
 0x257   : > { %v14842_v53 = vpop.xlane.xlu0 %5062  ;;  %16731 = vst [vmem:[#allocation119_spill] sm:$0xff] %v14854_v20  ;;  %v5468_v59 = vmul.f32 1.442695, %v5307_v2  ;;  %v14948_v63 = vadd.f32 %v14790_v49, %v14624_v47 }
 0x258   : > { %v5476_v35 = vmul.f32 1.442695, %v5311_v32  ;;  %v5466_v43 = vmul.f32 1.442695, %v5306_v29  ;;  %16744 = vst [vmem:[#allocation126_spill] sm:$0xff] %v14932_v56 }
 0x259   : > { %5734 = vadd.xlane.f32.xlu0 %v5733_v44  ;;  %v5742_v44 = vsel %vm4889_vm2, %v14854_v20, 0.0  ;;  %12265 = vpow2.f32 %v5468_v59  ;;  %16746 = vst [vmem:[#allocation128_spill] sm:$0xff] %v14948_v63 }
 0x25a   : > { %v14856_v18 = vpop.xlane.xlu1 %5071  ;;  %5746 = vadd.xlane.f32.xlu1 %v5745_v3  ;;  %12267 = vpow2.f32 %v5476_v35 }
 0x25b   : > { %v14858_v58 = vpop.xlane.xlu0 %5059  ;;  %12269 = vpow2.f32 %v5466_v43  ;;  %v16747_v43 = vld [vmem:[#allocation13_spill] sm:$0xff] }
 0x25d   : > { %5731 = vadd.xlane.f32.xlu0 %v5730_v9  ;;  %v5202_v9 = vsel %vm4889_vm2, %v14878_v27, -inf  ;;  %v14898_v7 = vpop.eup %12257  ;;  %v16740_v27 = vld [vmem:[#allocation11_spill] sm:$0xff] }
 0x25e   : > { %v14872_v3 = vpop.xlane.xlu1 %5080  ;;  %5743 = vadd.xlane.f32.xlu1 %v5742_v44  ;;  %16737 = vst [vmem:[#allocation9_spill] sm:$0xff] %v14898_v7  ;;  %v14902_v44 = vpop.eup %12259  ;;  %v5310_v52 = vsub.f32 %v16740_v27, %v14582_v55  ;;  %v14926_v27 = vadd.f32 %v14763_v5, %v14604_v37  ;;  %v14942_v37 = vadd.f32 %v14790_v49, %v14615_v42  ;;  %v5223_v5 = vsel %vm4889_vm2, %v14932_v56, -inf }
 0x25f   : > { %v14874_v0 = vpop.xlane.xlu0 %5068  ;;  %16738 = vst [vmem:[#allocation124_spill] sm:$0xff] %v14902_v44  ;;  %v14914_v1 = vpop.eup %12261  ;;  %v5751_v6 = vsel %vm4889_vm2, %v14902_v44, 0.0  ;;  %v5309_v42 = vsub.f32 %v16747_v43, %v14602_v46  ;;  %v5220_v49 = vsel %vm4889_vm2, %v14948_v63, -inf  ;;  %v14983_v44 = vld [vmem:[%s13673_s6 + $0xe8] sm:$0xff] }
 0x260   : > { %16741 = vst [vmem:[#allocation10_spill] sm:$0xff] %v14914_v1  ;;  %v5474_v55 = vmul.f32 1.442695, %v5310_v52  ;;  %16743 = vst [vmem:[#allocation125_spill] sm:$0xff] %v14926_v27  ;;  %v5736_v32 = vsel %vm4889_vm2, %v14914_v1, 0.0  ;;  %v5211_v52 = vsel %vm4889_vm2, %v14926_v27, -inf }
 0x261   : > { %5206 = vmax.xlane.f32.xlu0 %v5205_v21  ;;  %16745 = vst [vmem:[#allocation127_spill] sm:$0xff] %v14942_v37  ;;  %v5472_v46 = vmul.f32 1.442695, %v5309_v42  ;;  %v16753_v27 = vld [vmem:[#allocation14_spill] sm:$0xff] }
 0x262   : > { %v14888_v40 = vpop.xlane.xlu1 %5077  ;;  %5218 = vmax.xlane.f32.xlu1 %v5217_v33  ;;  %12271 = vpow2.f32 %v5474_v55  ;;  %v16748_v55 = vld [vmem:[#allocation12_spill] sm:$0xff] }
 0x263   : > { %v14890_v23 = vpop.xlane.xlu0 %5065  ;;  %12273 = vpow2.f32 %v5472_v46 }
 0x265   : > { %5203 = vmax.xlane.f32.xlu0 %v5202_v9  ;;  %v5739_v9 = vsel %vm4889_vm2, %v14898_v7, 0.0  ;;  %v16762_v7 = vld [vmem:[#allocation16_spill] sm:$0xff] }
 0x266   : > { %v14904_v21 = vpop.xlane.xlu1 %5098  ;;  %5215 = vmax.xlane.f32.xlu1 %v5214_v17  ;;  %v14918_v17 = vpop.eup %12263 }
 0x267   : > { %v14906_v33 = vpop.xlane.xlu0 %5086  ;;  %16742 = vst [vmem:[#allocation11_spill] sm:$0xff] %v14918_v17  ;;  %v14962_v47 = vpop.eup %12265 }
 0x268   : > { %16749 = vst [vmem:[#allocation13_spill] sm:$0xff] %v14962_v47 }
 0x269   : > { %5740 = vadd.xlane.f32.xlu0 %v5739_v9 }
 0x26a   : > { %v14920_v41 = vpop.xlane.xlu1 %5095  ;;  %5752 = vadd.xlane.f32.xlu1 %v5751_v6  ;;  %v5748_v6 = vsel %vm4889_vm2, %v14918_v17, 0.0 }
 0x26b   : > { %v14922_v2 = vpop.xlane.xlu0 %5083 }
 0x26d   : > { %5737 = vadd.xlane.f32.xlu0 %v5736_v32  ;;  %v5313_v32 = vsub.f32 %v16748_v55, %v14600_v15  ;;  %v16751_v15 = vld [vmem:[#allocation15_spill] sm:$0xff] }
 0x26e   : > { %v14936_v9 = vpop.xlane.xlu1 %5104  ;;  %5749 = vadd.xlane.f32.xlu1 %v5748_v6  ;;  %v5208_v6 = vsel %vm4889_vm2, %v14942_v37, -inf  ;;  %v5308_v43 = vsub.f32 %v16751_v15, %v14628_v4  ;;  %v16752_v37 = vld [vmem:[#allocation88_spill] sm:$0xff] }
 0x26f   : > { %v14938_v59 = vpop.xlane.xlu0 %5092  ;;  %v5480_v55 = vmul.f32 1.442695, %v5313_v32  ;;  %v5312_v54 = vsub.f32 %v16753_v27, %v16752_v37  ;;  %v16756_v32 = vld [vmem:[#allocation93_spill] sm:$0xff] }
 0x270   : > { %v5470_v27 = vmul.f32 1.442695, %v5308_v43  ;;  %v14993_v15 = vadd.f32 %v14983_v44, %v16756_v32 }
 0x271   : > { %5212 = vmax.xlane.f32.xlu0 %v5211_v52  ;;  %v14966_v52 = vpop.eup %12267  ;;  %12275 = vpow2.f32 %v5480_v55  ;;  %v5478_v37 = vmul.f32 1.442695, %v5312_v54  ;;  %v16759_v55 = vld [vmem:[#allocation91_spill] sm:$0xff] }
 0x272   : > { %v14952_v29 = vpop.xlane.xlu1 %5101  ;;  %5224 = vmax.xlane.f32.xlu1 %v5223_v5  ;;  %16750 = vst [vmem:[#allocation12_spill] sm:$0xff] %v14966_v52  ;;  %v14978_v63 = vpop.eup %12269  ;;  %16757 = vst [vmem:[#allocation14_spill] sm:$0xff] %v14993_v15  ;;  %12277 = vpow2.f32 %v5470_v27 }
 0x273   : > { %v14954_v35 = vpop.xlane.xlu0 %5089  ;;  %16754 = vst [vmem:[#allocation15_spill] sm:$0xff] %v14978_v63  ;;  %v14985_v42 = vpop.eup %12271  ;;  %12279 = vpow2.f32 %v5478_v37 }
 0x274   : > { %16755 = vst [vmem:[#allocation88_spill] sm:$0xff] %v14985_v42  ;;  %v5766_v46 = vsel %vm4889_vm2, %v14985_v42, 0.0 }
 0x275   : > { %5209 = vmax.xlane.f32.xlu0 %v5208_v6  ;;  %v5757_v6 = vsel %vm4889_vm2, %v14962_v47, 0.0  ;;  %v15002_v47 = vld [vmem:[%s13673_s6 + $0xe0] sm:$0xff] }
 0x276   : > { %v14968_v5 = vpop.xlane.xlu1 %5122  ;;  %5221 = vmax.xlane.f32.xlu1 %v5220_v49  ;;  %v5769_v49 = vsel %vm4889_vm2, %v14966_v52, 0.0  ;;  %v14999_v52 = vadd.f32 %v14983_v44, %v14672_v11  ;;  %v15016_v1 = vadd.f32 %v15002_v47, %v14674_v60 }
 0x277   : > { %v14970_v56 = vpop.xlane.xlu0 %5110 }
 0x278   : > { %16758 = vst [vmem:[#allocation93_spill] sm:$0xff] %v14999_v52  ;;  %16763 = vst [vmem:[#allocation91_spill] sm:$0xff] %v15016_v1  ;;  %v5241_v27 = vsel %vm4889_vm2, %v14999_v52, -inf  ;;  %v5226_v60 = vsel %vm4889_vm2, %v15016_v1, -inf }
 0x279   : > { %5758 = vadd.xlane.f32.xlu0 %v5757_v6  ;;  %v5754_v6 = vsel %vm4889_vm2, %v14978_v63, 0.0  ;;  %v16761_v63 = vld [vmem:[#allocation92_spill] sm:$0xff] }
 0x27a   : > { %v14987_v17 = vpop.xlane.xlu1 %5119  ;;  %5770 = vadd.xlane.f32.xlu1 %v5769_v49  ;;  %v16760_v49 = vld [vmem:[#allocation17_spill] sm:$0xff]  ;;  %v5315_v11 = vsub.f32 %v16762_v7, %v16761_v63 }
 0x27b   : > { %v14989_v4 = vpop.xlane.xlu0 %5107  ;;  %v5319_v32 = vsub.f32 %v16760_v49, %v16759_v55  ;;  %v15032_v49 = vpop.eup %12273 }
 0x27c   : > { %v5484_v63 = vmul.f32 1.442695, %v5315_v11  ;;  %16766 = vst [vmem:[#allocation16_spill] sm:$0xff] %v15032_v49  ;;  %v16769_v11 = vld [vmem:[#allocation18_spill] sm:$0xff]  ;;  %v5763_v42 = vsel %vm4889_vm2, %v15032_v49, 0.0 }
 0x27d   : > { %5755 = vadd.xlane.f32.xlu0 %v5754_v6  ;;  %v5229_v6 = vsel %vm4889_vm2, %v14993_v15, -inf  ;;  %v5492_v55 = vmul.f32 1.442695, %v5319_v32  ;;  %v16768_v32 = vld [vmem:[#allocation19_spill] sm:$0xff]  ;;  %v5314_v1 = vsub.f32 %v16769_v11, %v14681_v36 }
 0x27e   : > { %v15006_v43 = vpop.xlane.xlu1 %5128  ;;  %5767 = vadd.xlane.f32.xlu1 %v5766_v46  ;;  %v15022_v46 = vadd.f32 %v15002_v47, %v14683_v48  ;;  %v5318_v52 = vsub.f32 %v16768_v32, %v14679_v39 }
 0x27f   : > { %v15008_v54 = vpop.xlane.xlu0 %5116  ;;  %12281 = vpow2.f32 %v5492_v55  ;;  %v15049_v55 = vld [vmem:[%s13673_s6 + $0xf8] sm:$0xff]  ;;  %v5482_v32 = vmul.f32 1.442695, %v5314_v1 }
 0x280   : > { %16764 = vst [vmem:[#allocation17_spill] sm:$0xff] %v15022_v46  ;;  %v5238_v48 = vsel %vm4889_vm2, %v15022_v46, -inf  ;;  %12283 = vpow2.f32 %v5484_v63  ;;  %v5490_v63 = vmul.f32 1.442695, %v5318_v52  ;;  %v15061_v11 = vadd.f32 %v15049_v55, %v14717_v14 }
 0x281   : > { %5230 = vmax.xlane.f32.xlu0 %v5229_v6  ;;  %v15036_v6 = vpop.eup %12275 }
 0x282   : > { %5242 = vmax.xlane.f32.xlu1 %v5241_v27  ;;  %v15028_v7 = vpop.xlane.xlu1 %5125  ;;  %16767 = vst [vmem:[#allocation129_spill] sm:$0xff] %v15036_v6  ;;  %16773 = vst [vmem:[#allocation131_spill] sm:$0xff] %v15061_v11 }
 0x283   : > { %v15026_v37 = vpop.xlane.xlu0 %5113 }
 0x284   : > { %16765 = vst [vmem:[#allocation92_spill] sm:$0xff] %v15026_v37 }
 0x285   : > { %5227 = vmax.xlane.f32.xlu0 %v5226_v60  ;;  %v15044_v60 = vpop.eup %12277 }
 0x286   : > { %5239 = vmax.xlane.f32.xlu1 %v5238_v48  ;;  %16770 = vst [vmem:[#allocation19_spill] sm:$0xff] %v15044_v60  ;;  %v5775_v48 = vsel %vm4889_vm2, %v15036_v6, 0.0  ;;  %v15051_v46 = vpop.eup %12279  ;;  %v15064_v6 = vld [vmem:[%s13673_s6 + $0xf0] sm:$0xff] }
 0x287   : > { %v5663_v27 = vpop.xlane.xlu0 %5662  ;;  %v5675_v15 = vpop.xlane.xlu1 %5674  ;;  %16771 = vst [vmem:[#allocation18_spill] sm:$0xff] %v15051_v46  ;;  %v5772_v52 = vsel %vm4889_vm2, %v15051_v46, 0.0 }
 0x288   : > { %12285 = vrcp.f32 %v5663_v27  ;;  %v15055_v27 = vadd.f32 %v15049_v55, %v14707_v31  ;;  %v16775_v31 = vld [vmem:[#allocation20_spill] sm:$0xff] }
 0x289   : > { %5764 = vadd.xlane.f32.xlu0 %v5763_v42  ;;  %12287 = vrcp.f32 %v5675_v15  ;;  %v5760_v42 = vsel %vm4889_vm2, %v15044_v60, 0.0  ;;  %v5321_v15 = vsub.f32 %v16775_v31, %v14703_v19  ;;  %v5247_v19 = vsel %vm4889_vm2, %v15061_v11, -inf  ;;  %v867_v60 = vld [vmem:[%s14465_s7 + $0x58] sm:$0xff] }
 0x28a   : > { %5776 = vadd.xlane.f32.xlu1 %v5775_v48  ;;  %16772 = vst [vmem:[#allocation130_spill] sm:$0xff] %v15055_v27 }
 0x28b   : > { %v5660_v39 = vpop.xlane.xlu0 %5659  ;;  %v5672_v36 = vpop.xlane.xlu1 %5671  ;;  %v5496_v31 = vmul.f32 1.442695, %v5321_v15  ;;  %v16784_v15 = vld [vmem:[#allocation58_spill] sm:$0xff] }
 0x28c   : > { %12289 = vrcp.f32 %v5660_v39  ;;  %v16777_v39 = vld [vmem:[#allocation21_spill] sm:$0xff] }
 0x28d   : > { %12291 = vrcp.f32 %v5672_v36  ;;  %5761 = vadd.xlane.f32.xlu0 %v5760_v42  ;;  %v5317_v14 = vsub.f32 %v16777_v39, %v14705_v22  ;;  %v15078_v36 = vadd.f32 %v15064_v6, %v14719_v38  ;;  %v5235_v42 = vsel %vm4889_vm2, %v15055_v27, -inf }
 0x28e   : > { %5773 = vadd.xlane.f32.xlu1 %v5772_v52  ;;  %12293 = vpow2.f32 %v5490_v63  ;;  %v15082_v52 = vpop.eup %12281  ;;  %v15086_v63 = vadd.f32 %v15064_v6, %v14728_v45 }
 0x28f   : > { %v15068_v1 = vpop.xlane.xlu0 %5134  ;;  %v15072_v48 = vpop.xlane.xlu1 %5146  ;;  %12295 = vpow2.f32 %v5482_v32  ;;  %16778 = vst [vmem:[#allocation21_spill] sm:$0xff] %v15078_v36  ;;  %16779 = vst [vmem:[#allocation133_spill] sm:$0xff] %v15082_v52  ;;  %v5488_v46 = vmul.f32 1.442695, %v5317_v14  ;;  %v5232_v45 = vsel %vm4889_vm2, %v15078_v36, -inf  ;;  %v16785_v14 = vld [vmem:[#allocation22_spill] sm:$0xff] }
 0x290   : > { %16774 = vst [vmem:[#allocation132_spill] sm:$0xff] %v15068_v1  ;;  %16776 = vst [vmem:[#allocation20_spill] sm:$0xff] %v15072_v48  ;;  %v15090_v22 = vpop.eup %12283  ;;  %v5244_v11 = vsel %vm4889_vm2, %v15086_v63, -inf  ;;  %12297 = vpow2.f32 %v5496_v31  ;;  %v16787_v48 = vld [vmem:[#allocation59_spill] sm:$0xff] }
 0x291   : > { %16780 = vst [vmem:[#allocation134_spill] sm:$0xff] %v15086_v63  ;;  %5236 = vmax.xlane.f32.xlu0 %v5235_v42  ;;  %16781 = vst [vmem:[#allocation135_spill] sm:$0xff] %v15090_v22  ;;  %v866_v42 = vld [vmem:[%s14465_s7 + $0x50] sm:$0xff]  ;;  %12299 = vpow2.f32 %v5488_v46  ;;  %v873_v46 = vld [vmem:[%s14465_s7 + $0x88] sm:$0xff] }
 0x292   : > { %5248 = vmax.xlane.f32.xlu1 %v5247_v19  ;;  %v12286_v32 = vpop.eup %12285  ;;  %v871_v19 = vld [vmem:[%s14465_s7 + $0x78] sm:$0xff]  ;;  %v16788_v63 = vld [vmem:[#allocation23_spill] sm:$0xff] }
 0x293   : > { %v15092_v38 = vpop.xlane.xlu0 %5131  ;;  %v15094_v39 = vpop.xlane.xlu1 %5143  ;;  %v5316_v37 = vsub.f32 %v16788_v63, %v14734_v13  ;;  %v5793_v13 = vsel %vm4889_vm2, %v15082_v52, 0.0  ;;  %v16805_v52 = vld [vmem:[#allocation67_spill] sm:$0xff] }
 0x294   : > { %16782 = vst [vmem:[#allocation136_spill] sm:$0xff] %v15092_v38  ;;  %16783 = vst [vmem:[#allocation137_spill] sm:$0xff] %v15094_v39  ;;  %v12288_v27 = vpop.eup %12287  ;;  %v5320_v39 = vsub.f32 %v16785_v14, %v14732_v24  ;;  %v16786_v38 = vld [vmem:[#allocation56_spill] sm:$0xff]  ;;  %v16790_v24 = vld [vmem:[#allocation57_spill] sm:$0xff] }
 0x295   : > { %5233 = vmax.xlane.f32.xlu0 %v5232_v45  ;;  %v6045_v36 = vmul.f32 %v12286_v32, %v16786_v38  ;;  %v5486_v63 = vmul.f32 1.442695, %v5316_v37  ;;  %v16793_v32 = vld [vmem:[#allocation95_spill] sm:$0xff] }
 0x296   : > { %v12290_v49 = vpop.eup %12289  ;;  %5245 = vmax.xlane.f32.xlu1 %v5244_v11  ;;  %v11911_v11 = vpack.c.bf16 %v867_v60, %v866_v42 }
 0x297   : > { %v12292_v20 = vpop.eup %12291  ;;  %v5669_v30 = vpop.xlane.xlu0 %5668  ;;  %v6043_v28 = vmul.f32 %v12290_v49, %v16784_v15  ;;  %v11919_v49 = vpack.c.bf16 %v871_v19, %v870_v10  ;;  %v6053_v15 = vmul.f32 %v12288_v27, %v16790_v24  ;;  %v876_v27 = vld [vmem:[%s14465_s7 + $0xa0] sm:$0xff]  ;;  %v15136_v19 = vadd.f32 %v14983_v44, %v14771_v8  ;;  %v16794_v24 = vld [vmem:[#allocation104_spill] sm:$0xff] }
 0x298   : > { %v5681_v45 = vpop.xlane.xlu1 %5680  ;;  %v6051_v1 = vmul.f32 %v12292_v20, %v16787_v48  ;;  %v15112_v31 = vpop.eup %12293  ;;  %12301 = vrcp.f32 %v5669_v30  ;;  %v5781_v20 = vsel %vm4889_vm2, %v15090_v22, 0.0  ;;  %v877_v30 = vld [vmem:[%s14465_s7 + $0xa8] sm:$0xff]  ;;  %v5494_v48 = vmul.f32 1.442695, %v5320_v39 }
 0x299   : > { %11067 = vmatprep.mubr.msk.f32.mxu0 %vm4889_vm2, %v6043_v28  ;;  %16789 = vst [vmem:[#allocation58_spill] sm:$0xff] %v15112_v31  ;;  %v872_v28 = vld [vmem:[%s14465_s7 + $0x80] sm:$0xff]  ;;  %v15123_v60 = vpop.eup %12295  ;;  %12303 = vrcp.f32 %v5681_v45  ;;  %5782 = vadd.xlane.f32.xlu0 %v5781_v20  ;;  %v5790_v38 = vsel %vm4889_vm2, %v15112_v31, 0.0  ;;  %v15140_v39 = vadd.f32 %v14983_v44, %v14773_v50  ;;  %v15144_v14 = vpack.c.bf16 %v877_v30, %v876_v27  ;;  %v16797_v44 = vld [vmem:[#allocation24_spill] sm:$0xff]  ;;  %v16807_v22 = vld [vmem:[#allocation26_spill] sm:$0xff] }
 0x29a   : > { %11068 = vmatmul.mubr.msk.f32.vlgmr.msra.gmra.mrb[64].mxu0 %vm4889_vm2, %v6045_v36  ;;  %11081 = vmatprep.mubr.msk.f32.mxu1 %vm4889_vm2, %v6051_v1  ;;  %16791 = vst [vmem:[#allocation22_spill] sm:$0xff] %v15123_v60  ;;  %v16792_v36 = vld [vmem:[#allocation94_spill] sm:$0xff]  ;;  %v15132_v42 = vpack.c.bf16 %v873_v46, %v872_v28  ;;  %v5778_v37 = vsel %vm4889_vm2, %v15123_v60, 0.0  ;;  %v16796_v50 = vld [vmem:[#allocation105_spill] sm:$0xff]  ;;  %v15155_v28 = vpop.eup %12297  ;;  %v15159_v46 = vadd.f32 %v15002_v47, %v14782_v26  ;;  %v5265_v27 = vsel %vm4889_vm2, %v15136_v19, -inf }
 0x29b   : > { %5794 = vadd.xlane.f32.xlu1 %v5793_v13  ;;  %v5666_v10 = vpop.xlane.xlu0 %5665  ;;  %11082 = vmatmul.mubr.msk.f32.vlgmr.msra.gmra.mrb[64].mxu1 %vm4889_vm2, %v6053_v15  ;;  %v16795_v15 = vld [vmem:[#allocation25_spill] sm:$0xff]  ;;  %v5323_v13 = vsub.f32 %v16797_v44, %v16796_v50  ;;  %16798 = vst [vmem:[#allocation56_spill] sm:$0xff] %v15155_v28  ;;  %v16802_v50 = vld [vmem:[#allocation108_spill] sm:$0xff] }
 0x29c   : > { %12305 = vrcp.f32 %v5666_v10  ;;  %v5678_v1 = vpop.xlane.xlu1 %5677  ;;  %11910 = vmatpush3.bf16.msra.mxu0 %v16792_v36  ;;  %11918 = vmatpush3.bf16.msra.mxu1 %v16793_v32  ;;  %v5327_v20 = vsub.f32 %v16795_v15, %v16794_v24  ;;  %16799 = vst [vmem:[#allocation59_spill] sm:$0xff] %v15159_v46  ;;  %v15163_v10 = vadd.f32 %v15002_v47, %v14794_v62  ;;  %v16801_v24 = vld [vmem:[#allocation66_spill] sm:$0xff] }
 0x29d   : > { %12307 = vrcp.f32 %v5678_v1  ;;  %11912 = vmatprep.subr.bf16.mxu0 %v11911_v11  ;;  %11920 = vmatprep.subr.bf16.mxu1 %v11919_v49  ;;  %v5500_v47 = vmul.f32 1.442695, %v5323_v13 }
 0x29e   : > { %5779 = vadd.xlane.f32.xlu0 %v5778_v37  ;;  %12309 = vpow2.f32 %v5494_v48  ;;  %v5508_v48 = vmul.f32 1.442695, %v5327_v20  ;;  %v16803_v20 = vld [vmem:[#allocation27_spill] sm:$0xff] }
 0x29f   : > { %5791 = vadd.xlane.f32.xlu1 %v5790_v38  ;;  %v15146_v45 = vpop.xlane.xlu0 %5140  ;;  %12311 = vpow2.f32 %v5486_v63  ;;  %v5250_v63 = vsel %vm4889_vm2, %v15159_v46, -inf  ;;  %v5262_v38 = vsel %vm4889_vm2, %v15163_v10, -inf  ;;  %v5326_v44 = vsub.f32 %v16803_v20, %v16802_v50  ;;  %v16806_v46 = vld [vmem:[#allocation109_spill] sm:$0xff] }
 0x2a0   : > { %v15150_v8 = vpop.xlane.xlu1 %5152  ;;  %11914 = vmatpush3.bf16.msra.mxu0 %v11911_v11  ;;  %11922 = vmatpush3.bf16.msra.mxu1 %v11919_v49  ;;  %v5253_v11 = vsel %vm4889_vm2, %v15140_v39, -inf  ;;  %v15170_v49 = vpop.eup %12299  ;;  %12313 = vpow2.f32 %v5508_v48  ;;  %v5322_v60 = vsub.f32 %v16807_v22, %v16806_v46  ;;  %v16813_v50 = vld [vmem:[#allocation29_spill] sm:$0xff] }
 0x2a1   : > { %11924 = vmatprep.subr.bf16.mxu0 %v15132_v42  ;;  %11932 = vmatprep.subr.bf16.mxu1 %v15144_v14  ;;  %16800 = vst [vmem:[#allocation23_spill] sm:$0xff] %v15170_v49  ;;  %12315 = vpow2.f32 %v5500_v47  ;;  %v5787_v48 = vsel %vm4889_vm2, %v15170_v49, 0.0  ;;  %v5506_v46 = vmul.f32 1.442695, %v5326_v44  ;;  %v15212_v44 = vadd.f32 %v15049_v55, %v14816_v57 }
 0x2a2   : > { %5254 = vmax.xlane.f32.xlu0 %v5253_v11  ;;  %v12302_v26 = vpop.eup %12301 }
 0x2a3   : > { %5266 = vmax.xlane.f32.xlu1 %v5265_v27  ;;  %v15172_v30 = vpop.xlane.xlu0 %5137  ;;  %v12304_v62 = vpop.eup %12303  ;;  %v16804_v27 = vld [vmem:[#allocation65_spill] sm:$0xff] }
 0x2a4   : > { %v15174_v1 = vpop.xlane.xlu1 %5149  ;;  %v6049_v13 = vmul.f32 %v12302_v26, %v16804_v27  ;;  %v5799_v26 = vsel %vm4889_vm2, %v15155_v28, 0.0 }
 0x2a6   : > { %v12306_v36 = vpop.eup %12305  ;;  %5251 = vmax.xlane.f32.xlu0 %v5250_v63 }
 0x2a7   : > { %v12308_v32 = vpop.eup %12307  ;;  %5263 = vmax.xlane.f32.xlu1 %v5262_v38  ;;  %v5687_v37 = vpop.xlane.xlu0 %5686  ;;  %v6047_v15 = vmul.f32 %v12306_v36, %v16801_v24  ;;  %v16810_v38 = vld [vmem:[#allocation112_spill] sm:$0xff]  ;;  %v5498_v24 = vmul.f32 1.442695, %v5322_v60 }
 0x2a8   : > { %v5699_v11 = vpop.xlane.xlu1 %5698  ;;  %v6055_v31 = vmul.f32 %v12308_v32, %v16805_v52  ;;  %v15188_v63 = vpop.eup %12309  ;;  %12317 = vrcp.f32 %v5687_v37  ;;  %v16809_v52 = vld [vmem:[#allocation64_spill] sm:$0xff] }
 0x2a9   : > { %11070 = vmatprep.mubr.msk.f32.mxu0 %vm4889_vm2, %v6047_v15  ;;  %16808 = vst [vmem:[#allocation57_spill] sm:$0xff] %v15188_v63  ;;  %v6057_v47 = vmul.f32 %v12304_v62, %v16809_v52  ;;  %v15197_v36 = vpop.eup %12311  ;;  %12319 = vrcp.f32 %v5699_v11  ;;  %v16811_v32 = vld [vmem:[#allocation28_spill] sm:$0xff]  ;;  %v16812_v15 = vld [vmem:[#allocation113_spill] sm:$0xff]  ;;  %v15206_v62 = vadd.f32 %v15049_v55, %v14807_v61  ;;  %v16814_v11 = vld [vmem:[#allocation30_spill] sm:$0xff]  ;;  %v5796_v60 = vsel %vm4889_vm2, %v15188_v63, 0.0 }
 0x2aa   : > { %11071 = vmatmul.mubr.msk.f32.gmra.mrb[66].mxu0 %vm4889_vm2, %v6049_v13  ;;  %11084 = vmatprep.mubr.msk.f32.mxu1 %vm4889_vm2, %v6055_v31  ;;  %v5329_v37 = vsub.f32 %v16811_v32, %v16810_v38  ;;  %v5325_v20 = vsub.f32 %v16813_v50, %v16812_v15  ;;  %v5328_v27 = vsub.f32 %v16814_v11, %v14820_v12  ;;  %v5784_v13 = vsel %vm4889_vm2, %v15197_v36, 0.0  ;;  %v16816_v12 = vld [vmem:[#allocation33_spill] sm:$0xff]  ;;  %v16821_v63 = vld [vmem:[#allocation75_spill] sm:$0xff] }
 0x2ab   : > { %5788 = vadd.xlane.f32.xlu0 %v5787_v48  ;;  %5800 = vadd.xlane.f32.xlu1 %v5799_v26  ;;  %v5684_v22 = vpop.xlane.xlu0 %5683  ;;  %v16815_v48 = vld [vmem:[#allocation31_spill] sm:$0xff]  ;;  %v15230_v32 = vadd.f32 %v15064_v6, %v14824_v16 }
 0x2ac   : > { %11085 = vmatmul.mubr.msk.f32.gmra.mrb[66].mxu1 %vm4889_vm2, %v6057_v47  ;;  %12321 = vrcp.f32 %v5684_v22  ;;  %v5696_v31 = vpop.xlane.xlu1 %5695  ;;  %v5324_v26 = vsub.f32 %v16815_v48, %v14822_v34  ;;  %v5512_v52 = vmul.f32 1.442695, %v5329_v37  ;;  %v5335_v47 = vsub.f32 %v16816_v12, %v14840_v51  ;;  %v16817_v22 = vld [vmem:[#allocation32_spill] sm:$0xff]  ;;  %v15232_v34 = vpop.eup %12313  ;;  %v16818_v12 = vld [vmem:[#allocation74_spill] sm:$0xff] }
 0x2ad   : > { %12323 = vrcp.f32 %v5696_v31  ;;  %v5504_v55 = vmul.f32 1.442695, %v5325_v20  ;;  %v5331_v38 = vsub.f32 %v16817_v22, %v14842_v53  ;;  %v5510_v31 = vmul.f32 1.442695, %v5328_v27  ;;  %v875_v48 = vld [vmem:[%s14465_s7 + $0x98] sm:$0xff]  ;;  %v878_v22 = vld [vmem:[%s14465_s7 + $0xb0] sm:$0xff] }
 0x2ae   : > { %12325 = vpow2.f32 %v5506_v46  ;;  %v15236_v46 = vadd.f32 %v15064_v6, %v14826_v25  ;;  %v5259_v51 = vsel %vm4889_vm2, %v15212_v44, -inf  ;;  %v5271_v37 = vsel %vm4889_vm2, %v15206_v62, -inf }
 0x2af   : > { %5785 = vadd.xlane.f32.xlu0 %v5784_v13  ;;  %5797 = vadd.xlane.f32.xlu1 %v5796_v60  ;;  %v15220_v61 = vpop.xlane.xlu0 %5158  ;;  %12327 = vpow2.f32 %v5498_v24  ;;  %v15242_v24 = vpop.eup %12315  ;;  %v5502_v53 = vmul.f32 1.442695, %v5324_v26  ;;  %v5524_v50 = vmul.f32 1.442695, %v5335_v47  ;;  %v5516_v20 = vmul.f32 1.442695, %v5331_v38 }
 0x2b0   : > { %v15224_v57 = vpop.xlane.xlu1 %5170  ;;  %12329 = vpow2.f32 %v5512_v52  ;;  %v5256_v27 = vsel %vm4889_vm2, %v15230_v32, -inf  ;;  %v5268_v13 = vsel %vm4889_vm2, %v15236_v46, -inf  ;;  %v874_v60 = vld [vmem:[%s14465_s7 + $0x90] sm:$0xff] }
 0x2b1   : > { %12331 = vpow2.f32 %v5504_v55  ;;  %v879_v55 = vld [vmem:[%s14465_s7 + $0xb8] sm:$0xff]  ;;  %v16819_v38 = vld [vmem:[#allocation35_spill] sm:$0xff] }
 0x2b2   : > { %v12318_v15 = vpop.eup %12317  ;;  %12333 = vpow2.f32 %v5510_v31  ;;  %v5334_v31 = vsub.f32 %v16819_v38, %v14856_v18 }
 0x2b3   : > { %5260 = vmax.xlane.f32.xlu0 %v5259_v51  ;;  %5272 = vmax.xlane.f32.xlu1 %v5271_v37  ;;  %v15244_v16 = vpop.xlane.xlu0 %5155  ;;  %v12320_v6 = vpop.eup %12319  ;;  %12335 = vpow2.f32 %v5502_v53  ;;  %v16820_v51 = vld [vmem:[#allocation73_spill] sm:$0xff]  ;;  %v16822_v53 = vld [vmem:[#allocation34_spill] sm:$0xff] }
 0x2b4   : > { %v15246_v25 = vpop.xlane.xlu1 %5167  ;;  %12337 = vpow2.f32 %v5524_v50  ;;  %v6061_v37 = vmul.f32 %v12318_v15, %v16820_v51  ;;  %v11927_v50 = vpack.c.bf16 %v875_v48, %v874_v60  ;;  %v884_v48 = vld [vmem:[%s14465_s7 + $0xe0] sm:$0xff] }
 0x2b5   : > { %12339 = vpow2.f32 %v5516_v20  ;;  %v880_v20 = vld [vmem:[%s14465_s7 + $0xc0] sm:$0xff] }
 0x2b6   : > { %v12322_v11 = vpop.eup %12321 }
 0x2b7   : > { %v12324_v26 = vpop.eup %12323  ;;  %5257 = vmax.xlane.f32.xlu0 %v5256_v27  ;;  %5269 = vmax.xlane.f32.xlu1 %v5268_v13  ;;  %v5693_v52 = vpop.xlane.xlu0 %5692  ;;  %v6059_v47 = vmul.f32 %v12322_v11, %v16818_v12  ;;  %v5330_v27 = vsub.f32 %v16822_v53, %v14858_v58  ;;  %v5817_v11 = vsel %vm4889_vm2, %v15232_v34, 0.0  ;;  %v16823_v13 = vld [vmem:[#allocation72_spill] sm:$0xff]  ;;  %v5805_v58 = vsel %vm4889_vm2, %v15242_v24, 0.0 }
 0x2b8   : > { %v5705_v28 = vpop.xlane.xlu1 %5704  ;;  %v6067_v49 = vmul.f32 %v12324_v26, %v16821_v63  ;;  %v15266_v18 = vpop.eup %12325  ;;  %v6069_v15 = vmul.f32 %v12320_v6, %v16823_v13  ;;  %12341 = vrcp.f32 %v5693_v52  ;;  %v11935_v63 = vpack.c.bf16 %v879_v55, %v878_v22  ;;  %v881_v26 = vld [vmem:[%s14465_s7 + $0xc8] sm:$0xff]  ;;  %v16824_v52 = vld [vmem:[#allocation36_spill] sm:$0xff]  ;;  %v16825_v55 = vld [vmem:[#allocation37_spill] sm:$0xff] }
 0x2b9   : > { %11095 = vmatprep.mubr.msk.f32.mxu0 %vm4889_vm2, %v6059_v47  ;;  %v15275_v12 = vpop.eup %12327  ;;  %12343 = vrcp.f32 %v5705_v28  ;;  %v885_v47 = vld [vmem:[%s14465_s7 + $0xe8] sm:$0xff]  ;;  %v5522_v6 = vmul.f32 1.442695, %v5334_v31  ;;  %v5337_v38 = vsub.f32 %v16824_v52, %v14872_v3  ;;  %v5514_v22 = vmul.f32 1.442695, %v5330_v27 }
 0x2ba   : > { %11096 = vmatmul.mubr.msk.f32.vlgmr.msra.gmra.mrb[68].mxu0 %vm4889_vm2, %v6061_v37  ;;  %11109 = vmatprep.mubr.msk.f32.mxu1 %vm4889_vm2, %v6067_v49  ;;  %v5333_v51 = vsub.f32 %v16825_v55, %v14874_v0  ;;  %v15286_v28 = vpack.c.bf16 %v881_v26, %v880_v20  ;;  %v15288_v31 = vpop.eup %12329  ;;  %v16827_v3 = vld [vmem:[#allocation38_spill] sm:$0xff]  ;;  %v5802_v53 = vsel %vm4889_vm2, %v15275_v12, 0.0  ;;  %v15296_v27 = vpack.c.bf16 %v885_v47, %v884_v48 }
 0x2bb   : > { %5806 = vadd.xlane.f32.xlu0 %v5805_v58  ;;  %5818 = vadd.xlane.f32.xlu1 %v5817_v11  ;;  %v5690_v60 = vpop.xlane.xlu0 %5689  ;;  %16826 = vst [vmem:[#allocation94_spill] sm:$0xff] %v15288_v31  ;;  %v5336_v37 = vsub.f32 %v16827_v3, %v14888_v40  ;;  %v15298_v0 = vpop.eup %12331  ;;  %v5528_v40 = vmul.f32 1.442695, %v5337_v38  ;;  %v16830_v58 = vld [vmem:[#allocation41_spill] sm:$0xff] }
 0x2bc   : > { %11110 = vmatmul.mubr.msk.f32.vlgmr.msra.gmra.mrb[68].mxu1 %vm4889_vm2, %v6069_v15  ;;  %12345 = vrcp.f32 %v5690_v60  ;;  %v5702_v49 = vpop.xlane.xlu1 %5701  ;;  %11926 = vmatpush3.bf16.msra.mxu0 %v15132_v42  ;;  %v5814_v42 = vsel %vm4889_vm2, %v15266_v18, 0.0  ;;  %v15304_v15 = vpop.eup %12333  ;;  %v5343_v20 = vsub.f32 %v16830_v58, %v14904_v21  ;;  %v5520_v48 = vmul.f32 1.442695, %v5333_v51 }
 0x2bd   : > { %12347 = vrcp.f32 %v5702_v49  ;;  %11934 = vmatpush3.bf16.msra.mxu1 %v15144_v14  ;;  %11928 = vmatprep.subr.bf16.mxu0 %v11927_v50  ;;  %v16828_v14 = vld [vmem:[#allocation39_spill] sm:$0xff]  ;;  %16829 = vst [vmem:[#allocation95_spill] sm:$0xff] %v15304_v15  ;;  %v15310_v60 = vpop.eup %12335  ;;  %v5811_v38 = vsel %vm4889_vm2, %v15298_v0, 0.0  ;;  %v5823_v21 = vsel %vm4889_vm2, %v15288_v31, 0.0  ;;  %v16837_v31 = vld [vmem:[#allocation42_spill] sm:$0xff] }
 0x2be   : > { %11936 = vmatprep.subr.bf16.mxu1 %v11935_v63  ;;  %v5332_v11 = vsub.f32 %v16828_v14, %v14890_v23  ;;  %12349 = vpow2.f32 %v5522_v6  ;;  %v16831_v23 = vld [vmem:[#allocation40_spill] sm:$0xff]  ;;  %v15315_v52 = vpop.eup %12337  ;;  %v5526_v6 = vmul.f32 1.442695, %v5336_v37 }
 0x2bf   : > { %5803 = vadd.xlane.f32.xlu0 %v5802_v53  ;;  %5815 = vadd.xlane.f32.xlu1 %v5814_v42  ;;  %v15302_v13 = vpop.xlane.xlu0 %5164  ;;  %12351 = vpow2.f32 %v5514_v22  ;;  %v5339_v47 = vsub.f32 %v16831_v23, %v14906_v33  ;;  %16832 = vst [vmem:[#allocation104_spill] sm:$0xff] %v15315_v52  ;;  %v5540_v22 = vmul.f32 1.442695, %v5343_v20  ;;  %v5808_v53 = vsel %vm4889_vm2, %v15310_v60, 0.0  ;;  %v16834_v20 = vld [vmem:[#allocation43_spill] sm:$0xff] }
 0x2c0   : > { %v15308_v26 = vpop.xlane.xlu1 %5176  ;;  %11930 = vmatpush3.bf16.msra.mxu0 %v11927_v50  ;;  %v15322_v50 = vpop.eup %12339  ;;  %v5518_v49 = vmul.f32 1.442695, %v5332_v11  ;;  %12353 = vpow2.f32 %v5528_v40  ;;  %v5820_v42 = vsel %vm4889_vm2, %v15304_v15, 0.0  ;;  %v16833_v40 = vld [vmem:[#allocation82_spill] sm:$0xff]  ;;  %v5338_v15 = vsub.f32 %v16837_v31, %v14922_v2 }
 0x2c1   : > { %11938 = vmatpush3.bf16.msra.mxu1 %v11935_v63  ;;  %11940 = vmatprep.subr.bf16.mxu0 %v15286_v28  ;;  %12355 = vpow2.f32 %v5520_v48  ;;  %v5532_v3 = vmul.f32 1.442695, %v5339_v47  ;;  %v5342_v48 = vsub.f32 %v16834_v20, %v14920_v41  ;;  %v16835_v47 = vld [vmem:[#allocation80_spill] sm:$0xff]  ;;  %v5829_v41 = vsel %vm4889_vm2, %v15322_v50, 0.0  ;;  %v16843_v20 = vld [vmem:[#allocation46_spill] sm:$0xff] }
 0x2c2   : > { %11948 = vmatprep.subr.bf16.mxu1 %v15296_v27  ;;  %v12342_v63 = vpop.eup %12341  ;;  %12357 = vpow2.f32 %v5526_v6 }
 0x2c3   : > { %5812 = vadd.xlane.f32.xlu0 %v5811_v38  ;;  %5824 = vadd.xlane.f32.xlu1 %v5823_v21  ;;  %v15324_v33 = vpop.xlane.xlu0 %5161  ;;  %v12344_v51 = vpop.eup %12343  ;;  %12359 = vpow2.f32 %v5518_v49  ;;  %v6065_v6 = vmul.f32 %v12342_v63, %v16835_v47  ;;  %v16836_v38 = vld [vmem:[#allocation83_spill] sm:$0xff]  ;;  %v5841_v63 = vsel %vm4889_vm2, %v15315_v52, 0.0  ;;  %v5538_v31 = vmul.f32 1.442695, %v5342_v48  ;;  %v16855_v52 = vld [vmem:[#allocation97_spill] sm:$0xff] }
 0x2c4   : > { %v15326_v55 = vpop.xlane.xlu1 %5173  ;;  %12361 = vpow2.f32 %v5540_v22  ;;  %v16839_v22 = vld [vmem:[#allocation81_spill] sm:$0xff] }
 0x2c5   : > { %12363 = vpow2.f32 %v5532_v3  ;;  %v6073_v3 = vmul.f32 %v12344_v51, %v16839_v22 }
 0x2c6   : > { %v12346_v37 = vpop.eup %12345 }
 0x2c7   : > { %v12348_v14 = vpop.eup %12347  ;;  %5809 = vadd.xlane.f32.xlu0 %v5808_v53  ;;  %5821 = vadd.xlane.f32.xlu1 %v5820_v42  ;;  %v5711_v11 = vpop.xlane.xlu0 %5710  ;;  %v6063_v58 = vmul.f32 %v12346_v37, %v16833_v40  ;;  %v16840_v53 = vld [vmem:[#allocation44_spill] sm:$0xff]  ;;  %v16841_v40 = vld [vmem:[#allocation45_spill] sm:$0xff] }
 0x2c8   : > { %v5723_v23 = vpop.xlane.xlu1 %5722  ;;  %v6071_v21 = vmul.f32 %v12348_v14, %v16836_v38  ;;  %v15340_v49 = vpop.eup %12349  ;;  %12365 = vrcp.f32 %v5711_v11  ;;  %v5345_v42 = vsub.f32 %v16840_v53, %v14936_v9  ;;  %v5530_v11 = vmul.f32 1.442695, %v5338_v15 }
 0x2c9   : > { %11098 = vmatprep.mubr.msk.f32.mxu0 %vm4889_vm2, %v6063_v58  ;;  %16838 = vst [vmem:[#allocation25_spill] sm:$0xff] %v15340_v49  ;;  %v15349_v37 = vpop.eup %12351  ;;  %12367 = vrcp.f32 %v5723_v23  ;;  %v5341_v58 = vsub.f32 %v16841_v40, %v14938_v59  ;;  %v5344_v23 = vsub.f32 %v16843_v20, %v14952_v29  ;;  %v5838_v9 = vsel %vm4889_vm2, %v15340_v49, 0.0  ;;  %v16847_v29 = vld [vmem:[#allocation49_spill] sm:$0xff] }
 0x2ca   : > { %11099 = vmatmul.mubr.msk.f32.gmra.mrb[70].mxu0 %vm4889_vm2, %v6065_v6  ;;  %11112 = vmatprep.mubr.msk.f32.mxu1 %vm4889_vm2, %v6071_v21  ;;  %v15356_v51 = vpop.eup %12353  ;;  %v5826_v48 = vsel %vm4889_vm2, %v15349_v37, 0.0  ;;  %v16845_v6 = vld [vmem:[#allocation47_spill] sm:$0xff]  ;;  %v5544_v21 = vmul.f32 1.442695, %v5345_v42 }
 0x2cb   : > { %5830 = vadd.xlane.f32.xlu0 %v5829_v41  ;;  %5842 = vadd.xlane.f32.xlu1 %v5841_v63  ;;  %v5708_v2 = vpop.xlane.xlu0 %5707  ;;  %16842 = vst [vmem:[#allocation105_spill] sm:$0xff] %v15356_v51  ;;  %v15364_v47 = vpop.eup %12355  ;;  %v5340_v15 = vsub.f32 %v16845_v6, %v14954_v35  ;;  %v5351_v41 = vsub.f32 %v16847_v29, %v14968_v5  ;;  %v882_v29 = vld [vmem:[%s14465_s7 + $0xd0] sm:$0xff] }
 0x2cc   : > { %11113 = vmatmul.mubr.msk.f32.gmra.mrb[70].mxu1 %vm4889_vm2, %v6073_v3  ;;  %12369 = vrcp.f32 %v5708_v2  ;;  %v5720_v14 = vpop.xlane.xlu1 %5719  ;;  %16844 = vst [vmem:[#allocation24_spill] sm:$0xff] %v15364_v47  ;;  %v15370_v38 = vpop.eup %12357  ;;  %v5536_v3 = vmul.f32 1.442695, %v5341_v58  ;;  %v16849_v2 = vld [vmem:[#allocation48_spill] sm:$0xff]  ;;  %v5835_v40 = vsel %vm4889_vm2, %v15364_v47, 0.0  ;;  %v16854_v47 = vld [vmem:[#allocation89_spill] sm:$0xff] }
 0x2cd   : > { %12371 = vrcp.f32 %v5720_v14  ;;  %16846 = vst [vmem:[#allocation66_spill] sm:$0xff] %v15370_v38  ;;  %v15376_v22 = vpop.eup %12359  ;;  %v5347_v35 = vsub.f32 %v16849_v2, %v14970_v56  ;;  %v5542_v14 = vmul.f32 1.442695, %v5344_v23  ;;  %v5534_v5 = vmul.f32 1.442695, %v5340_v15  ;;  %v883_v2 = vld [vmem:[%s14465_s7 + $0xd8] sm:$0xff] }
 0x2ce   : > { %12373 = vpow2.f32 %v5538_v31  ;;  %16848 = vst [vmem:[#allocation108_spill] sm:$0xff] %v15376_v22  ;;  %v15380_v53 = vpop.eup %12361  ;;  %v5847_v31 = vsel %vm4889_vm2, %v15356_v51, 0.0  ;;  %v5556_v56 = vmul.f32 1.442695, %v5351_v41  ;;  %v5832_v6 = vsel %vm4889_vm2, %v15376_v22, 0.0  ;;  %v16852_v41 = vld [vmem:[#allocation96_spill] sm:$0xff] }
 0x2cf   : > { %5827 = vadd.xlane.f32.xlu0 %v5826_v48  ;;  %5839 = vadd.xlane.f32.xlu1 %v5838_v9  ;;  %v15368_v59 = vpop.xlane.xlu0 %5182  ;;  %12375 = vpow2.f32 %v5530_v11  ;;  %16850 = vst [vmem:[#allocation27_spill] sm:$0xff] %v15380_v53  ;;  %v15386_v42 = vpop.eup %12363  ;;  %v5548_v48 = vmul.f32 1.442695, %v5347_v35  ;;  %v5844_v15 = vsel %vm4889_vm2, %v15370_v38, 0.0  ;;  %v886_v51 = vld [vmem:[%s14465_s7 + $0xf0] sm:$0xff] }
 0x2d0   : > { %v15374_v63 = vpop.xlane.xlu1 %5194  ;;  %16851 = vst [vmem:[#allocation65_spill] sm:$0xff] %v15386_v42  ;;  %12377 = vpow2.f32 %v5544_v21  ;;  %v16853_v35 = vld [vmem:[#allocation51_spill] sm:$0xff] }
 0x2d1   : > { %12379 = vpow2.f32 %v5536_v3  ;;  %v887_v3 = vld [vmem:[%s14465_s7 + $0xf8] sm:$0xff] }
 0x2d2   : > { %v12366_v58 = vpop.eup %12365  ;;  %12381 = vpow2.f32 %v5542_v14  ;;  %v5350_v14 = vsub.f32 %v16853_v35, %v14987_v17 }
 0x2d3   : > { %5836 = vadd.xlane.f32.xlu0 %v5835_v40  ;;  %5848 = vadd.xlane.f32.xlu1 %v5847_v31  ;;  %v15388_v11 = vpop.xlane.xlu0 %5179  ;;  %v12368_v23 = vpop.eup %12367  ;;  %12383 = vpow2.f32 %v5534_v5  ;;  %v6077_v22 = vmul.f32 %v12366_v58, %v16854_v47  ;;  %v16856_v5 = vld [vmem:[#allocation50_spill] sm:$0xff]  ;;  %v888_v58 = vld [vmem:[%s14465_s7 + $0x100] sm:$0xff] }
 0x2d4   : > { %v15390_v20 = vpop.xlane.xlu1 %5191  ;;  %12385 = vpow2.f32 %v5556_v56  ;;  %v11943_v56 = vpack.c.bf16 %v883_v2, %v882_v29  ;;  %v892_v2 = vld [vmem:[%s14465_s7 + $0x120] sm:$0xff] }
 0x2d5   : > { %12387 = vpow2.f32 %v5548_v48  ;;  %v889_v48 = vld [vmem:[%s14465_s7 + $0x108] sm:$0xff] }
 0x2d6   : > { %v12370_v9 = vpop.eup %12369 }
 0x2d7   : > { %v12372_v40 = vpop.eup %12371  ;;  %5833 = vadd.xlane.f32.xlu0 %v5832_v6  ;;  %5845 = vadd.xlane.f32.xlu1 %v5844_v15  ;;  %v5717_v21 = vpop.xlane.xlu0 %5716  ;;  %v6075_v31 = vmul.f32 %v12370_v9, %v16852_v41  ;;  %v5346_v6 = vsub.f32 %v16856_v5, %v14989_v4  ;;  %v5865_v9 = vsel %vm4889_vm2, %v15380_v53, 0.0  ;;  %v16858_v15 = vld [vmem:[#allocation90_spill] sm:$0xff]  ;;  %v5853_v4 = vsel %vm4889_vm2, %v15386_v42, 0.0  ;;  %v16880_v42 = vld [vmem:[#allocation63_spill] sm:$0xff] }
 0x2d8   : > { %v5729_v38 = vpop.xlane.xlu1 %5728  ;;  %v6083_v49 = vmul.f32 %v12372_v40, %v16855_v52  ;;  %v15410_v17 = vpop.eup %12373  ;;  %v6085_v47 = vmul.f32 %v12368_v23, %v16858_v15  ;;  %12389 = vrcp.f32 %v5717_v21  ;;  %v11951_v52 = vpack.c.bf16 %v887_v3, %v886_v51  ;;  %v893_v41 = vld [vmem:[%s14465_s7 + $0x128] sm:$0xff]  ;;  %v16859_v21 = vld [vmem:[#allocation52_spill] sm:$0xff] }
 0x2d9   : > { %11123 = vmatprep.mubr.msk.f32.mxu0 %vm4889_vm2, %v6075_v31  ;;  %16857 = vst [vmem:[#allocation67_spill] sm:$0xff] %v15410_v17  ;;  %v15419_v40 = vpop.eup %12375  ;;  %12391 = vrcp.f32 %v5729_v38  ;;  %v5554_v23 = vmul.f32 1.442695, %v5350_v14  ;;  %v5546_v51 = vmul.f32 1.442695, %v5346_v6  ;;  %v16860_v31 = vld [vmem:[#allocation53_spill] sm:$0xff]  ;;  %v15430_v38 = vpack.c.bf16 %v889_v48, %v888_v58 }
 0x2da   : > { %11124 = vmatmul.mubr.msk.f32.vlgmr.msra.gmra.mrb[72].mxu0 %vm4889_vm2, %v6077_v22  ;;  %11137 = vmatprep.mubr.msk.f32.mxu1 %vm4889_vm2, %v6083_v49  ;;  %v5353_v22 = vsub.f32 %v16859_v21, %v15006_v43  ;;  %v5349_v3 = vsub.f32 %v16860_v31, %v15008_v54  ;;  %v15432_v35 = vpop.eup %12377  ;;  %v16862_v43 = vld [vmem:[#allocation54_spill] sm:$0xff]  ;;  %v5850_v5 = vsel %vm4889_vm2, %v15419_v40, 0.0  ;;  %v15440_v6 = vpack.c.bf16 %v893_v41, %v892_v2  ;;  %v16867_v58 = vld [vmem:[#allocation132_spill] sm:$0xff]  ;;  %v16871_v31 = vld [vmem:[#allocation61_spill] sm:$0xff] }
 0x2db   : > { %5854 = vadd.xlane.f32.xlu0 %v5853_v4  ;;  %5866 = vadd.xlane.f32.xlu1 %v5865_v9  ;;  %v5714_v29 = vpop.xlane.xlu0 %5713  ;;  %16861 = vst [vmem:[#allocation109_spill] sm:$0xff] %v15432_v35  ;;  %v5352_v14 = vsub.f32 %v16862_v43, %v15028_v7  ;;  %v15442_v54 = vpop.eup %12379  ;;  %v16865_v9 = vld [vmem:[#allocation55_spill] sm:$0xff]  ;;  %v16868_v48 = vld [vmem:[#allocation60_spill] sm:$0xff]  ;;  %v16878_v53 = vld [vmem:[#allocation106_spill] sm:$0xff] }
 0x2dc   : > { %11138 = vmatmul.mubr.msk.f32.vlgmr.msra.gmra.mrb[72].mxu1 %vm4889_vm2, %v6085_v47  ;;  %12393 = vrcp.f32 %v5714_v29  ;;  %v5726_v49 = vpop.xlane.xlu1 %5725  ;;  %11942 = vmatpush3.bf16.msra.mxu0 %v15286_v28  ;;  %v5862_v28 = vsel %vm4889_vm2, %v15410_v17, 0.0  ;;  %16863 = vst [vmem:[#allocation26_spill] sm:$0xff] %v15442_v54  ;;  %v15448_v4 = vpop.eup %12381  ;;  %v5560_v7 = vmul.f32 1.442695, %v5353_v22  ;;  %v5355_v29 = vsub.f32 %v16868_v48, %v16867_v58 }
 0x2dd   : > { %12395 = vrcp.f32 %v5726_v49  ;;  %11950 = vmatpush3.bf16.msra.mxu1 %v15296_v27  ;;  %11944 = vmatprep.subr.bf16.mxu0 %v11943_v56  ;;  %v16864_v27 = vld [vmem:[#allocation92_spill] sm:$0xff]  ;;  %16866 = vst [vmem:[#allocation64_spill] sm:$0xff] %v15448_v4  ;;  %v15454_v2 = vpop.eup %12383  ;;  %v5552_v41 = vmul.f32 1.442695, %v5349_v3  ;;  %v5859_v22 = vsel %vm4889_vm2, %v15442_v54, 0.0  ;;  %v16877_v54 = vld [vmem:[#allocation102_spill] sm:$0xff] }
 0x2de   : > { %11952 = vmatprep.subr.bf16.mxu1 %v11951_v52  ;;  %v5348_v15 = vsub.f32 %v16865_v9, %v16864_v27  ;;  %12397 = vpow2.f32 %v5554_v23  ;;  %16869 = vst [vmem:[#allocation112_spill] sm:$0xff] %v15454_v2  ;;  %v16870_v49 = vld [vmem:[#allocation20_spill] sm:$0xff]  ;;  %v5558_v23 = vmul.f32 1.442695, %v5352_v14  ;;  %v5564_v27 = vmul.f32 1.442695, %v5355_v29 }
 0x2df   : > { %5851 = vadd.xlane.f32.xlu0 %v5850_v5  ;;  %5863 = vadd.xlane.f32.xlu1 %v5862_v28  ;;  %v15446_v47 = vpop.xlane.xlu0 %5188  ;;  %12399 = vpow2.f32 %v5546_v51  ;;  %v5359_v43 = vsub.f32 %v16871_v31, %v16870_v49  ;;  %v15459_v5 = vpop.eup %12385  ;;  %v5871_v28 = vsel %vm4889_vm2, %v15432_v35, 0.0  ;;  %v5856_v49 = vsel %vm4889_vm2, %v15454_v2, 0.0  ;;  %v16876_v35 = vld [vmem:[#allocation62_spill] sm:$0xff]  ;;  %v16879_v2 = vld [vmem:[#allocation137_spill] sm:$0xff] }
 0x2e0   : > { %v15452_v21 = vpop.xlane.xlu1 %5200  ;;  %11946 = vmatpush3.bf16.msra.mxu0 %v11943_v56  ;;  %16872 = vst [vmem:[#allocation28_spill] sm:$0xff] %v15459_v5  ;;  %v15466_v56 = vpop.eup %12387  ;;  %v5550_v51 = vmul.f32 1.442695, %v5348_v15  ;;  %12401 = vpow2.f32 %v5560_v7  ;;  %v5868_v15 = vsel %vm4889_vm2, %v15448_v4, 0.0  ;;  %v16874_v7 = vld [vmem:[#allocation107_spill] sm:$0xff]  ;;  %v5358_v4 = vsub.f32 %v16880_v42, %v16879_v2 }
 0x2e1   : > { %11954 = vmatpush3.bf16.msra.mxu1 %v11951_v52  ;;  %11956 = vmatprep.subr.bf16.mxu0 %v15430_v38  ;;  %16873 = vst [vmem:[#allocation113_spill] sm:$0xff] %v15466_v56  ;;  %12403 = vpow2.f32 %v5552_v41  ;;  %v5572_v58 = vmul.f32 1.442695, %v5359_v43 }
 0x2e2   : > { %11964 = vmatprep.subr.bf16.mxu1 %v15440_v6  ;;  %v12390_v52 = vpop.eup %12389  ;;  %12405 = vpow2.f32 %v5558_v23 }
 0x2e3   : > { %5860 = vadd.xlane.f32.xlu0 %v5859_v22  ;;  %5872 = vadd.xlane.f32.xlu1 %v5871_v28  ;;  %v15468_v3 = vpop.xlane.xlu0 %5185  ;;  %v12392_v14 = vpop.eup %12391  ;;  %12407 = vpow2.f32 %v5550_v51  ;;  %v16875_v28 = vld [vmem:[#allocation136_spill] sm:$0xff]  ;;  %v6081_v23 = vmul.f32 %v12390_v52, %v16877_v54  ;;  %v5889_v54 = vsel %vm4889_vm2, %v15459_v5, 0.0 }
 0x2e4   : > { %v15470_v9 = vpop.xlane.xlu1 %5197  ;;  %12409 = vpow2.f32 %v5564_v27  ;;  %v5354_v41 = vsub.f32 %v16876_v35, %v16875_v28  ;;  %v5877_v35 = vsel %vm4889_vm2, %v15466_v56, 0.0  ;;  %v16897_v56 = vld [vmem:[#allocation79_spill] sm:$0xff] }
 0x2e5   : > { %12411 = vpow2.f32 %v5572_v58  ;;  %v16883_v58 = vld [vmem:[#allocation68_spill] sm:$0xff] }
 0x2e6   : > { %v12394_v48 = vpop.eup %12393  ;;  %v5562_v2 = vmul.f32 1.442695, %v5354_v41  ;;  %v16888_v41 = vld [vmem:[#allocation71_spill] sm:$0xff] }
 0x2e7   : > { %v12396_v31 = vpop.eup %12395  ;;  %5857 = vadd.xlane.f32.xlu0 %v5856_v49  ;;  %5869 = vadd.xlane.f32.xlu1 %v5868_v15  ;;  %v5735_v22 = vpop.xlane.xlu0 %5734  ;;  %v6079_v29 = vmul.f32 %v12394_v48, %v16874_v7  ;;  %v5357_v48 = vsub.f32 %v16883_v58, %v15146_v45  ;;  %v5570_v49 = vmul.f32 1.442695, %v5358_v4  ;;  %v16884_v15 = vld [vmem:[#allocation69_spill] sm:$0xff]  ;;  %v5360_v4 = vsub.f32 %v16888_v41, %v15174_v1 }
 0x2e8   : > { %v5747_v43 = vpop.xlane.xlu1 %5746  ;;  %v6087_v17 = vmul.f32 %v12396_v31, %v16878_v53  ;;  %v15484_v51 = vpop.eup %12397  ;;  %12413 = vrcp.f32 %v5735_v22  ;;  %v16882_v53 = vld [vmem:[#allocation103_spill] sm:$0xff]  ;;  %v5361_v31 = vsub.f32 %v16884_v15, %v15150_v8  ;;  %v16886_v22 = vld [vmem:[#allocation70_spill] sm:$0xff] }
 0x2e9   : > { %11126 = vmatprep.mubr.msk.f32.mxu0 %vm4889_vm2, %v6079_v29  ;;  %16881 = vst [vmem:[#allocation29_spill] sm:$0xff] %v15484_v51  ;;  %v6089_v52 = vmul.f32 %v12392_v14, %v16882_v53  ;;  %v15493_v27 = vpop.eup %12399  ;;  %12415 = vrcp.f32 %v5747_v43  ;;  %v5356_v7 = vsub.f32 %v16886_v22, %v15172_v30  ;;  %v5886_v45 = vsel %vm4889_vm2, %v15484_v51, 0.0  ;;  %v16890_v30 = vld [vmem:[#allocation76_spill] sm:$0xff] }
 0x2ea   : > { %11127 = vmatmul.mubr.msk.f32.gmra.mrb[74].mxu0 %vm4889_vm2, %v6081_v23  ;;  %11140 = vmatprep.mubr.msk.f32.mxu1 %vm4889_vm2, %v6087_v17  ;;  %v15500_v14 = vpop.eup %12401  ;;  %v5874_v29 = vsel %vm4889_vm2, %v15493_v27, 0.0  ;;  %v5568_v23 = vmul.f32 1.442695, %v5357_v48  ;;  %v5574_v15 = vmul.f32 1.442695, %v5360_v4 }
 0x2eb   : > { %5878 = vadd.xlane.f32.xlu0 %v5877_v35  ;;  %5890 = vadd.xlane.f32.xlu1 %v5889_v54  ;;  %v5732_v42 = vpop.xlane.xlu0 %5731  ;;  %16885 = vst [vmem:[#allocation30_spill] sm:$0xff] %v15500_v14  ;;  %v15508_v28 = vpop.eup %12403  ;;  %v5363_v35 = vsub.f32 %v16890_v30, %v15220_v61  ;;  %v5895_v48 = vsel %vm4889_vm2, %v15500_v14, 0.0 }
 0x2ec   : > { %11141 = vmatmul.mubr.msk.f32.gmra.mrb[74].mxu1 %vm4889_vm2, %v6089_v52  ;;  %12417 = vrcp.f32 %v5732_v42  ;;  %v5744_v17 = vpop.xlane.xlu1 %5743  ;;  %16887 = vst [vmem:[#allocation31_spill] sm:$0xff] %v15508_v28  ;;  %v15514_v43 = vpop.eup %12405  ;;  %v5576_v52 = vmul.f32 1.442695, %v5361_v31  ;;  %v16892_v42 = vld [vmem:[#allocation77_spill] sm:$0xff] }
 0x2ed   : > { %12419 = vrcp.f32 %v5744_v17  ;;  %16889 = vst [vmem:[#allocation33_spill] sm:$0xff] %v15514_v43  ;;  %v15520_v53 = vpop.eup %12407  ;;  %v5367_v1 = vsub.f32 %v16892_v42, %v15224_v57  ;;  %v5566_v17 = vmul.f32 1.442695, %v5356_v7  ;;  %v5580_v31 = vmul.f32 1.442695, %v5363_v35  ;;  %v891_v42 = vld [vmem:[%s14465_s7 + $0x118] sm:$0xff] }
 0x2ee   : > { %12421 = vpow2.f32 %v5562_v2  ;;  %16891 = vst [vmem:[#allocation32_spill] sm:$0xff] %v15520_v53  ;;  %v15524_v58 = vpop.eup %12409  ;;  %v5883_v2 = vsel %vm4889_vm2, %v15508_v28, 0.0  ;;  %v5880_v4 = vsel %vm4889_vm2, %v15520_v53, 0.0  ;;  %v5892_v30 = vsel %vm4889_vm2, %v15514_v43, 0.0  ;;  %v16893_v35 = vld [vmem:[#allocation118_spill] sm:$0xff]  ;;  %v16895_v28 = vld [vmem:[#allocation117_spill] sm:$0xff] }
 0x2ef   : > { %5875 = vadd.xlane.f32.xlu0 %v5874_v29  ;;  %5887 = vadd.xlane.f32.xlu1 %v5886_v45  ;;  %v15512_v8 = vpop.xlane.xlu0 %5206  ;;  %12423 = vpow2.f32 %v5570_v49  ;;  %v15530_v61 = vpop.eup %12411  ;;  %v5588_v29 = vmul.f32 1.442695, %v5367_v1  ;;  %v890_v45 = vld [vmem:[%s14465_s7 + $0x110] sm:$0xff]  ;;  %v16894_v1 = vld [vmem:[#allocation78_spill] sm:$0xff] }
 0x2f0   : > { %v15518_v54 = vpop.xlane.xlu1 %5218  ;;  %12425 = vpow2.f32 %v5568_v23  ;;  %v16896_v43 = vld [vmem:[#allocation119_spill] sm:$0xff] }
 0x2f1   : > { %12427 = vpow2.f32 %v5576_v52 }
 0x2f2   : > { %v12414_v57 = vpop.eup %12413  ;;  %12429 = vpow2.f32 %v5566_v17  ;;  %v5362_v17 = vsub.f32 %v16894_v1, %v15244_v16  ;;  %v16898_v16 = vld [vmem:[#allocation116_spill] sm:$0xff] }
 0x2f3   : > { %5884 = vadd.xlane.f32.xlu0 %v5883_v2  ;;  %5896 = vadd.xlane.f32.xlu1 %v5895_v48  ;;  %v15532_v49 = vpop.xlane.xlu0 %5203  ;;  %v12416_v7 = vpop.eup %12415  ;;  %v894_v2 = vld [vmem:[%s14465_s7 + $0x130] sm:$0xff]  ;;  %v895_v48 = vld [vmem:[%s14465_s7 + $0x138] sm:$0xff]  ;;  %12431 = vpow2.f32 %v5574_v15  ;;  %v6093_v53 = vmul.f32 %v12414_v57, %v16895_v28  ;;  %v5366_v15 = vsub.f32 %v16897_v56, %v15246_v25  ;;  %v5913_v25 = vsel %vm4889_vm2, %v15530_v61, 0.0  ;;  %v896_v56 = vld [vmem:[%s14465_s7 + $0x140] sm:$0xff] }
 0x2f4   : > { %v15534_v22 = vpop.xlane.xlu1 %5215  ;;  %12433 = vpow2.f32 %v5580_v31  ;;  %v897_v28 = vld [vmem:[%s14465_s7 + $0x148] sm:$0xff] }
 0x2f5   : > { %12435 = vpow2.f32 %v5588_v29  ;;  %v901_v29 = vld [vmem:[%s14465_s7 + $0x168] sm:$0xff] }
 0x2f6   : > { %v12418_v41 = vpop.eup %12417 }
 0x2f7   : > { %v12420_v14 = vpop.eup %12419  ;;  %5881 = vadd.xlane.f32.xlu0 %v5880_v4  ;;  %5893 = vadd.xlane.f32.xlu1 %v5892_v30  ;;  %v5741_v23 = vpop.xlane.xlu0 %5740  ;;  %v6091_v52 = vmul.f32 %v12418_v41, %v16893_v35  ;;  %v11959_v4 = vpack.c.bf16 %v891_v42, %v890_v45  ;;  %v11967_v41 = vpack.c.bf16 %v895_v48, %v894_v2  ;;  %v5578_v45 = vmul.f32 1.442695, %v5362_v17  ;;  %v16900_v48 = vld [vmem:[#allocation85_spill] sm:$0xff] }
 0x2f8   : > { %v5753_v5 = vpop.xlane.xlu1 %5752  ;;  %v6099_v51 = vmul.f32 %v12420_v14, %v16896_v43  ;;  %v15552_v31 = vpop.eup %12421  ;;  %v6101_v30 = vmul.f32 %v12416_v7, %v16898_v16  ;;  %12437 = vrcp.f32 %v5741_v23  ;;  %v5901_v14 = vsel %vm4889_vm2, %v15524_v58, 0.0  ;;  %v900_v7 = vld [vmem:[%s14465_s7 + $0x160] sm:$0xff] }
 0x2f9   : > { %11151 = vmatprep.mubr.msk.f32.mxu0 %vm4889_vm2, %v6091_v52  ;;  %v15563_v43 = vpop.eup %12423  ;;  %12439 = vrcp.f32 %v5753_v5  ;;  %v5586_v2 = vmul.f32 1.442695, %v5366_v15  ;;  %v5369_v23 = vsub.f32 %v16900_v48, %v15308_v26  ;;  %v15574_v5 = vpack.c.bf16 %v897_v28, %v896_v56 }
 0x2fa   : > { %11152 = vmatmul.mubr.msk.f32.vlgmr.msra.gmra.mrb[76].mxu0 %vm4889_vm2, %v6093_v53  ;;  %11165 = vmatprep.mubr.msk.f32.mxu1 %vm4889_vm2, %v6099_v51  ;;  %v16899_v53 = vld [vmem:[#allocation84_spill] sm:$0xff]  ;;  %v15576_v35 = vpop.eup %12425  ;;  %v5898_v1 = vsel %vm4889_vm2, %v15552_v31, 0.0  ;;  %v15584_v17 = vpack.c.bf16 %v901_v29, %v900_v7 }
 0x2fb   : > { %5902 = vadd.xlane.f32.xlu0 %v5901_v14  ;;  %5914 = vadd.xlane.f32.xlu1 %v5913_v25  ;;  %v5738_v57 = vpop.xlane.xlu0 %5737  ;;  %v5365_v51 = vsub.f32 %v16899_v53, %v15302_v13  ;;  %v16901_v13 = vld [vmem:[#allocation86_spill] sm:$0xff]  ;;  %v15586_v26 = vpop.eup %12427  ;;  %v5907_v53 = vsel %vm4889_vm2, %v15576_v35, 0.0 }
 0x2fc   : > { %11166 = vmatmul.mubr.msk.f32.vlgmr.msra.gmra.mrb[76].mxu1 %vm4889_vm2, %v6101_v30  ;;  %12441 = vrcp.f32 %v5738_v57  ;;  %v5750_v42 = vpop.xlane.xlu1 %5749  ;;  %11958 = vmatpush3.bf16.msra.mxu0 %v15430_v38  ;;  %v5364_v52 = vsub.f32 %v16901_v13, %v15324_v33  ;;  %v5910_v38 = vsel %vm4889_vm2, %v15563_v43, 0.0  ;;  %16902 = vst [vmem:[#allocation74_spill] sm:$0xff] %v15586_v26  ;;  %v15592_v30 = vpop.eup %12429  ;;  %v16904_v14 = vld [vmem:[#allocation98_spill] sm:$0xff]  ;;  %v5592_v57 = vmul.f32 1.442695, %v5369_v23 }
 0x2fd   : > { %12443 = vrcp.f32 %v5750_v42  ;;  %11966 = vmatpush3.bf16.msra.mxu1 %v15440_v6  ;;  %11960 = vmatprep.subr.bf16.mxu0 %v11959_v4  ;;  %v16903_v6 = vld [vmem:[#allocation87_spill] sm:$0xff]  ;;  %v5584_v33 = vmul.f32 1.442695, %v5365_v51  ;;  %v5371_v25 = vsub.f32 %v16904_v14, %v15368_v59  ;;  %v15598_v28 = vpop.eup %12431  ;;  %v5919_v59 = vsel %vm4889_vm2, %v15586_v26, 0.0  ;;  %v16909_v14 = vld [vmem:[#allocation100_spill] sm:$0xff] }
 0x2fe   : > { %11968 = vmatprep.subr.bf16.mxu1 %v11967_v41  ;;  %v5368_v15 = vsub.f32 %v16903_v6, %v15326_v55  ;;  %12445 = vpow2.f32 %v5578_v45  ;;  %v16905_v55 = vld [vmem:[#allocation99_spill] sm:$0xff]  ;;  %v15603_v29 = vpop.eup %12433  ;;  %v5582_v45 = vmul.f32 1.442695, %v5364_v52  ;;  %v5904_v52 = vsel %vm4889_vm2, %v15592_v30, 0.0 }
 0x2ff   : > { %5899 = vadd.xlane.f32.xlu0 %v5898_v1  ;;  %5911 = vadd.xlane.f32.xlu1 %v5910_v38  ;;  %v15590_v16 = vpop.xlane.xlu0 %5212  ;;  %12447 = vpow2.f32 %v5586_v2  ;;  %v5375_v7 = vsub.f32 %v16905_v55, %v15374_v63  ;;  %16906 = vst [vmem:[#allocation35_spill] sm:$0xff] %v15603_v29  ;;  %v5596_v42 = vmul.f32 1.442695, %v5371_v25  ;;  %v5916_v1 = vsel %vm4889_vm2, %v15598_v28, 0.0  ;;  %v16910_v55 = vld [vmem:[#allocation9_spill] sm:$0xff] }
 0x300   : > { %v15596_v56 = vpop.xlane.xlu1 %5224  ;;  %11962 = vmatpush3.bf16.msra.mxu0 %v11959_v4  ;;  %v15610_v4 = vpop.eup %12435  ;;  %v5590_v51 = vmul.f32 1.442695, %v5368_v15  ;;  %12449 = vpow2.f32 %v5584_v33  ;;  %v16908_v15 = vld [vmem:[#allocation10_spill] sm:$0xff]  ;;  %v5370_v25 = vsub.f32 %v16909_v14, %v15388_v11  ;;  %v5925_v11 = vsel %vm4889_vm2, %v15603_v29, 0.0  ;;  %v16929_v29 = vld [vmem:[#allocation123_spill] sm:$0xff] }
 0x301   : > { %11970 = vmatpush3.bf16.msra.mxu1 %v11967_v41  ;;  %11972 = vmatprep.subr.bf16.mxu0 %v15574_v5  ;;  %16907 = vst [vmem:[#allocation73_spill] sm:$0xff] %v15610_v4  ;;  %12451 = vpow2.f32 %v5592_v57  ;;  %v5604_v23 = vmul.f32 1.442695, %v5375_v7 }
 0x302   : > { %11980 = vmatprep.subr.bf16.mxu1 %v15584_v17  ;;  %v12438_v41 = vpop.eup %12437  ;;  %12453 = vpow2.f32 %v5582_v45  ;;  %v16911_v45 = vld [vmem:[#allocation11_spill] sm:$0xff] }
 0x303   : > { %5908 = vadd.xlane.f32.xlu0 %v5907_v53  ;;  %5920 = vadd.xlane.f32.xlu1 %v5919_v59  ;;  %v15612_v63 = vpop.xlane.xlu0 %5209  ;;  %v12440_v48 = vpop.eup %12439  ;;  %12455 = vpow2.f32 %v5590_v51  ;;  %v6097_v7 = vmul.f32 %v12438_v41, %v16910_v55  ;;  %v16912_v59 = vld [vmem:[#allocation101_spill] sm:$0xff]  ;;  %v5937_v41 = vsel %vm4889_vm2, %v15610_v4, 0.0 }
 0x304   : > { %v15614_v2 = vpop.xlane.xlu1 %5221  ;;  %12457 = vpow2.f32 %v5596_v42  ;;  %v5374_v26 = vsub.f32 %v16912_v59, %v15390_v20  ;;  %v16913_v42 = vld [vmem:[#allocation124_spill] sm:$0xff] }
 0x305   : > { %12459 = vpow2.f32 %v5604_v23  ;;  %v6105_v23 = vmul.f32 %v12440_v48, %v16913_v42 }
 0x306   : > { %v12442_v13 = vpop.eup %12441 }
 0x307   : > { %v12444_v38 = vpop.eup %12443  ;;  %5905 = vadd.xlane.f32.xlu0 %v5904_v52  ;;  %5917 = vadd.xlane.f32.xlu1 %v5916_v1  ;;  %v5759_v6 = vpop.xlane.xlu0 %5758  ;;  %v6095_v33 = vmul.f32 %v12442_v13, %v16908_v15  ;;  %v5594_v52 = vmul.f32 1.442695, %v5370_v25  ;;  %v16915_v1 = vld [vmem:[#allocation110_spill] sm:$0xff]  ;;  %v5602_v15 = vmul.f32 1.442695, %v5374_v26 }
 0x308   : > { %v5771_v57 = vpop.xlane.xlu1 %5770  ;;  %v6103_v53 = vmul.f32 %v12444_v38, %v16911_v45  ;;  %v15628_v51 = vpop.eup %12445  ;;  %12461 = vrcp.f32 %v5759_v6  ;;  %v5373_v38 = vsub.f32 %v16915_v1, %v15446_v47  ;;  %v16920_v45 = vld [vmem:[#allocation115_spill] sm:$0xff] }
 0x309   : > { %11154 = vmatprep.mubr.msk.f32.mxu0 %vm4889_vm2, %v6095_v33  ;;  %v15637_v13 = vpop.eup %12447  ;;  %12463 = vrcp.f32 %v5771_v57  ;;  %v16916_v33 = vld [vmem:[#allocation111_spill] sm:$0xff]  ;;  %v16918_v57 = vld [vmem:[#allocation114_spill] sm:$0xff]  ;;  %v5922_v25 = vsel %vm4889_vm2, %v15628_v51, 0.0  ;;  %v5376_v26 = vsub.f32 %v16920_v45, %v15470_v9 }
 0x30a   : > { %11155 = vmatmul.mubr.msk.f32.gmra.mrb[78].mxu0 %vm4889_vm2, %v6097_v7  ;;  %11168 = vmatprep.mubr.msk.f32.mxu1 %vm4889_vm2, %v6103_v53  ;;  %16914 = vst [vmem:[#allocation75_spill] sm:$0xff] %v15637_v13  ;;  %v5377_v14 = vsub.f32 %v16916_v33, %v15452_v21  ;;  %v15644_v48 = vpop.eup %12449  ;;  %v5372_v55 = vsub.f32 %v16918_v57, %v15468_v3  ;;  %v5934_v47 = vsel %vm4889_vm2, %v15637_v13, 0.0  ;;  %v5600_v59 = vmul.f32 1.442695, %v5373_v38  ;;  %v16922_v3 = vld [vmem:[#allocation120_spill] sm:$0xff] }
 0x30b   : > { %5926 = vadd.xlane.f32.xlu0 %v5925_v11  ;;  %5938 = vadd.xlane.f32.xlu1 %v5937_v41  ;;  %v5756_v20 = vpop.xlane.xlu0 %5755  ;;  %16917 = vst [vmem:[#allocation34_spill] sm:$0xff] %v15644_v48  ;;  %v15652_v7 = vpop.eup %12451  ;;  %v5379_v11 = vsub.f32 %v16922_v3, %v15512_v8  ;;  %v5606_v33 = vmul.f32 1.442695, %v5376_v26 }
 0x30c   : > { %11169 = vmatmul.mubr.msk.f32.gmra.mrb[78].mxu1 %vm4889_vm2, %v6105_v23  ;;  %12465 = vrcp.f32 %v5756_v20  ;;  %v5768_v6 = vpop.xlane.xlu1 %5767  ;;  %16919 = vst [vmem:[#allocation72_spill] sm:$0xff] %v15652_v7  ;;  %v15658_v53 = vpop.eup %12453  ;;  %v5608_v23 = vmul.f32 1.442695, %v5377_v14  ;;  %v16924_v20 = vld [vmem:[#allocation121_spill] sm:$0xff]  ;;  %v5943_v38 = vsel %vm4889_vm2, %v15652_v7, 0.0 }
 0x30d   : > { %12467 = vrcp.f32 %v5768_v6  ;;  %16921 = vst [vmem:[#allocation36_spill] sm:$0xff] %v15658_v53  ;;  %v15664_v42 = vpop.eup %12455  ;;  %v5383_v9 = vsub.f32 %v16924_v20, %v15518_v54  ;;  %v5598_v6 = vmul.f32 1.442695, %v5372_v55  ;;  %v5612_v14 = vmul.f32 1.442695, %v5379_v11  ;;  %v899_v20 = vld [vmem:[%s14465_s7 + $0x158] sm:$0xff] }
 0x30e   : > { %12469 = vpow2.f32 %v5594_v52  ;;  %16923 = vst [vmem:[#allocation37_spill] sm:$0xff] %v15664_v42  ;;  %v15668_v1 = vpop.eup %12457  ;;  %v5931_v52 = vsel %vm4889_vm2, %v15644_v48, 0.0  ;;  %v5928_v26 = vsel %vm4889_vm2, %v15658_v53, 0.0  ;;  %v5940_v3 = vsel %vm4889_vm2, %v15664_v42, 0.0  ;;  %v16925_v11 = vld [vmem:[#allocation15_spill] sm:$0xff]  ;;  %v16927_v48 = vld [vmem:[#allocation13_spill] sm:$0xff] }
 0x30f   : > { %5923 = vadd.xlane.f32.xlu0 %v5922_v25  ;;  %5935 = vadd.xlane.f32.xlu1 %v5934_v47  ;;  %v15656_v21 = vpop.xlane.xlu0 %5230  ;;  %12471 = vpow2.f32 %v5602_v15  ;;  %v15674_v8 = vpop.eup %12459  ;;  %v5620_v25 = vmul.f32 1.442695, %v5383_v9  ;;  %v898_v47 = vld [vmem:[%s14465_s7 + $0x150] sm:$0xff]  ;;  %v16926_v9 = vld [vmem:[#allocation122_spill] sm:$0xff]  ;;  %v16928_v42 = vld [vmem:[#allocation88_spill] sm:$0xff] }
 0x310   : > { %v15662_v41 = vpop.xlane.xlu1 %5242  ;;  %12473 = vpow2.f32 %v5600_v59 }
 0x311   : > { %12475 = vpow2.f32 %v5608_v23 }
 0x312   : > { %v12462_v54 = vpop.eup %12461  ;;  %12477 = vpow2.f32 %v5598_v6  ;;  %v5378_v6 = vsub.f32 %v16926_v9, %v15532_v49  ;;  %v16930_v49 = vld [vmem:[#allocation12_spill] sm:$0xff] }
 0x313   : > { %5932 = vadd.xlane.f32.xlu0 %v5931_v52  ;;  %5944 = vadd.xlane.f32.xlu1 %v5943_v38  ;;  %v15676_v15 = vpop.xlane.xlu0 %5227  ;;  %v12464_v55 = vpop.eup %12463  ;;  %v902_v52 = vld [vmem:[%s14465_s7 + $0x170] sm:$0xff]  ;;  %v903_v38 = vld [vmem:[%s14465_s7 + $0x178] sm:$0xff]  ;;  %12479 = vpow2.f32 %v5606_v33  ;;  %v6109_v53 = vmul.f32 %v12462_v54, %v16927_v48  ;;  %v5382_v33 = vsub.f32 %v16929_v29, %v15534_v22  ;;  %v5949_v48 = vsel %vm4889_vm2, %v15668_v1, 0.0  ;;  %v904_v29 = vld [vmem:[%s14465_s7 + $0x180] sm:$0xff] }
 0x314   : > { %v15678_v57 = vpop.xlane.xlu1 %5239  ;;  %12481 = vpow2.f32 %v5612_v14  ;;  %v5961_v22 = vsel %vm4889_vm2, %v15674_v8, 0.0 }
 0x315   : > { %12483 = vpow2.f32 %v5620_v25  ;;  %v909_v25 = vld [vmem:[%s14465_s7 + $0x1a8] sm:$0xff] }
 0x316   : > { %v12466_v45 = vpop.eup %12465 }
 0x317   : > { %v12468_v7 = vpop.eup %12467  ;;  %5929 = vadd.xlane.f32.xlu0 %v5928_v26  ;;  %5941 = vadd.xlane.f32.xlu1 %v5940_v3  ;;  %v5765_v59 = vpop.xlane.xlu0 %5764  ;;  %v6107_v23 = vmul.f32 %v12466_v45, %v16925_v11  ;;  %v11975_v26 = vpack.c.bf16 %v899_v20, %v898_v47  ;;  %v11983_v45 = vpack.c.bf16 %v903_v38, %v902_v52  ;;  %v5610_v47 = vmul.f32 1.442695, %v5378_v6  ;;  %v16932_v38 = vld [vmem:[#allocation126_spill] sm:$0xff] }
 0x318   : > { %v5777_v4 = vpop.xlane.xlu1 %5776  ;;  %v6115_v13 = vmul.f32 %v12468_v7, %v16928_v42  ;;  %v15696_v14 = vpop.eup %12469  ;;  %v6117_v3 = vmul.f32 %v12464_v55, %v16930_v49  ;;  %12485 = vrcp.f32 %v5765_v59  ;;  %v905_v7 = vld [vmem:[%s14465_s7 + $0x188] sm:$0xff]  ;;  %v908_v55 = vld [vmem:[%s14465_s7 + $0x1a0] sm:$0xff]  ;;  %v5618_v52 = vmul.f32 1.442695, %v5382_v33 }
 0x319   : > { %11179 = vmatprep.mubr.msk.f32.mxu0 %vm4889_vm2, %v6107_v23  ;;  %v15707_v42 = vpop.eup %12471  ;;  %12487 = vrcp.f32 %v5777_v4  ;;  %v5385_v59 = vsub.f32 %v16932_v38, %v15596_v56  ;;  %v15718_v4 = vpack.c.bf16 %v905_v7, %v904_v29  ;;  %v16933_v56 = vld [vmem:[#allocation127_spill] sm:$0xff] }
 0x31a   : > { %11180 = vmatmul.mubr.msk.f32.vlgmr.msra.gmra.mrb[80].mxu0 %vm4889_vm2, %v6109_v53  ;;  %11193 = vmatprep.mubr.msk.f32.mxu1 %vm4889_vm2, %v6115_v13  ;;  %v16931_v53 = vld [vmem:[#allocation125_spill] sm:$0xff]  ;;  %v15720_v11 = vpop.eup %12473  ;;  %v5958_v23 = vsel %vm4889_vm2, %v15707_v42, 0.0  ;;  %v5380_v6 = vsub.f32 %v16933_v56, %v15612_v63  ;;  %v16935_v63 = vld [vmem:[#allocation14_spill] sm:$0xff] }
 0x31b   : > { %5950 = vadd.xlane.f32.xlu0 %v5949_v48  ;;  %5962 = vadd.xlane.f32.xlu1 %v5961_v22  ;;  %v5762_v54 = vpop.xlane.xlu0 %5761  ;;  %v5381_v13 = vsub.f32 %v16931_v53, %v15590_v16  ;;  %v5946_v16 = vsel %vm4889_vm2, %v15696_v14, 0.0  ;;  %v15728_v9 = vpop.eup %12475  ;;  %v5624_v7 = vmul.f32 1.442695, %v5385_v59 }
 0x31c   : > { %11194 = vmatmul.mubr.msk.f32.vlgmr.msra.gmra.mrb[80].mxu1 %vm4889_vm2, %v6117_v3  ;;  %12489 = vrcp.f32 %v5762_v54  ;;  %v5774_v20 = vpop.xlane.xlu1 %5773  ;;  %11974 = vmatpush3.bf16.msra.mxu0 %v15574_v5  ;;  %v15726_v5 = vpack.c.bf16 %v909_v25, %v908_v55  ;;  %v15734_v33 = vpop.eup %12477  ;;  %v16934_v3 = vld [vmem:[#allocation128_spill] sm:$0xff]  ;;  %v5387_v54 = vsub.f32 %v16935_v63, %v15656_v21  ;;  %v16936_v25 = vld [vmem:[#allocation93_spill] sm:$0xff] }
 0x31d   : > { %12491 = vrcp.f32 %v5774_v20  ;;  %11982 = vmatpush3.bf16.msra.mxu1 %v15584_v17  ;;  %11976 = vmatprep.subr.bf16.mxu0 %v11975_v26  ;;  %v5616_v49 = vmul.f32 1.442695, %v5381_v13  ;;  %v5384_v48 = vsub.f32 %v16934_v3, %v15614_v2  ;;  %v15740_v29 = vpop.eup %12479  ;;  %v5955_v2 = vsel %vm4889_vm2, %v15720_v11, 0.0  ;;  %v16938_v3 = vld [vmem:[#allocation19_spill] sm:$0xff] }
 0x31e   : > { %11984 = vmatprep.subr.bf16.mxu1 %v11983_v45  ;;  %12493 = vpow2.f32 %v5610_v47  ;;  %v15745_v55 = vpop.eup %12481  ;;  %v5391_v47 = vsub.f32 %v16936_v25, %v15662_v41  ;;  %v5614_v13 = vmul.f32 1.442695, %v5380_v6  ;;  %v5628_v38 = vmul.f32 1.442695, %v5387_v54  ;;  %v16939_v25 = vld [vmem:[#allocation16_spill] sm:$0xff]  ;;  %v16940_v54 = vld [vmem:[#allocation18_spill] sm:$0xff] }
 0x31f   : > { %5947 = vadd.xlane.f32.xlu0 %v5946_v16  ;;  %5959 = vadd.xlane.f32.xlu1 %v5958_v23  ;;  %v15732_v17 = vpop.xlane.xlu0 %5236  ;;  %12495 = vpow2.f32 %v5618_v52  ;;  %v15754_v53 = vpop.eup %12483  ;;  %v5622_v20 = vmul.f32 1.442695, %v5384_v48  ;;  %v5952_v23 = vsel %vm4889_vm2, %v15734_v33, 0.0  ;;  %v5964_v56 = vsel %vm4889_vm2, %v15740_v29, 0.0 }
 0x320   : > { %v15738_v22 = vpop.xlane.xlu1 %5248  ;;  %11978 = vmatpush3.bf16.msra.mxu0 %v11975_v26  ;;  %v5967_v26 = vsel %vm4889_vm2, %v15728_v9, 0.0  ;;  %16937 = vst [vmem:[#allocation38_spill] sm:$0xff] %v15754_v53  ;;  %12497 = vpow2.f32 %v5616_v49  ;;  %v5636_v16 = vmul.f32 1.442695, %v5391_v47  ;;  %v16941_v47 = vld [vmem:[#allocation91_spill] sm:$0xff] }
 0x321   : > { %11986 = vmatpush3.bf16.msra.mxu1 %v11983_v45  ;;  %11988 = vmatprep.subr.bf16.mxu0 %v15718_v4  ;;  %12499 = vpow2.f32 %v5624_v7 }
 0x322   : > { %11996 = vmatprep.subr.bf16.mxu1 %v15726_v5  ;;  %v12486_v45 = vpop.eup %12485  ;;  %12501 = vpow2.f32 %v5614_v13  ;;  %v5973_v13 = vsel %vm4889_vm2, %v15745_v55, 0.0 }
 0x323   : > { %5956 = vadd.xlane.f32.xlu0 %v5955_v2  ;;  %5968 = vadd.xlane.f32.xlu1 %v5967_v26  ;;  %v15756_v21 = vpop.xlane.xlu0 %5233  ;;  %v12488_v41 = vpop.eup %12487  ;;  %12503 = vpow2.f32 %v5622_v20  ;;  %v6113_v7 = vmul.f32 %v12486_v45, %v16939_v25  ;;  %v5386_v26 = vsub.f32 %v16941_v47, %v15676_v15  ;;  %v16942_v20 = vld [vmem:[#allocation17_spill] sm:$0xff]  ;;  %v5985_v45 = vsel %vm4889_vm2, %v15754_v53, 0.0  ;;  %v16956_v53 = vld [vmem:[#allocation58_spill] sm:$0xff] }
 0x324   : > { %v15758_v52 = vpop.xlane.xlu1 %5245  ;;  %12505 = vpow2.f32 %v5628_v38  ;;  %v16943_v38 = vld [vmem:[#allocation129_spill] sm:$0xff] }
 0x325   : > { %12507 = vpow2.f32 %v5636_v16  ;;  %v6121_v15 = vmul.f32 %v12488_v41, %v16943_v38  ;;  %v16949_v47 = vld [vmem:[#allocation21_spill] sm:$0xff] }
 0x326   : > { %v12490_v59 = vpop.eup %12489 }
 0x327   : > { %v12492_v6 = vpop.eup %12491  ;;  %5953 = vadd.xlane.f32.xlu0 %v5952_v23  ;;  %5965 = vadd.xlane.f32.xlu1 %v5964_v56  ;;  %v6111_v49 = vmul.f32 %v12490_v59, %v16938_v3  ;;  %v5783_v48 = vpop.xlane.xlu0 %5782  ;;  %v5390_v59 = vsub.f32 %v16942_v20, %v15678_v57  ;;  %v5626_v57 = vmul.f32 1.442695, %v5386_v26  ;;  %v16945_v3 = vld [vmem:[#allocation130_spill] sm:$0xff]  ;;  %v5388_v26 = vsub.f32 %v16949_v47, %v15756_v21 }
 0x328   : > { %v5795_v63 = vpop.xlane.xlu1 %5794  ;;  %v6119_v2 = vmul.f32 %v12492_v6, %v16940_v54  ;;  %v15772_v23 = vpop.eup %12493  ;;  %12509 = vrcp.f32 %v5783_v48  ;;  %v16947_v48 = vld [vmem:[#allocation131_spill] sm:$0xff] }
 0x329   : > { %11182 = vmatprep.mubr.msk.f32.mxu0 %vm4889_vm2, %v6111_v49  ;;  %v15781_v56 = vpop.eup %12495  ;;  %12511 = vrcp.f32 %v5795_v63  ;;  %v5389_v49 = vsub.f32 %v16945_v3, %v15732_v17  ;;  %v5970_v25 = vsel %vm4889_vm2, %v15772_v23, 0.0  ;;  %v5634_v41 = vmul.f32 1.442695, %v5390_v59  ;;  %v16950_v17 = vld [vmem:[#allocation134_spill] sm:$0xff] }
 0x32a   : > { %11183 = vmatmul.mubr.msk.f32.gmra.mrb[82].mxu0 %vm4889_vm2, %v6113_v7  ;;  %11196 = vmatprep.mubr.msk.f32.mxu1 %vm4889_vm2, %v6119_v2  ;;  %16944 = vst [vmem:[#allocation39_spill] sm:$0xff] %v15781_v56  ;;  %v15788_v7 = vpop.eup %12497  ;;  %v5393_v54 = vsub.f32 %v16947_v48, %v15738_v22  ;;  %v5982_v63 = vsel %vm4889_vm2, %v15781_v56, 0.0 }
 0x32b   : > { %5974 = vadd.xlane.f32.xlu0 %v5973_v13  ;;  %5986 = vadd.xlane.f32.xlu1 %v5985_v45  ;;  %v5780_v16 = vpop.xlane.xlu0 %5779  ;;  %16946 = vst [vmem:[#allocation41_spill] sm:$0xff] %v15788_v7  ;;  %v15794_v2 = vpop.eup %12499  ;;  %v5392_v13 = vsub.f32 %v16950_v17, %v15758_v52  ;;  %v5632_v22 = vmul.f32 1.442695, %v5389_v49  ;;  %v906_v17 = vld [vmem:[%s14465_s7 + $0x190] sm:$0xff] }
 0x32c   : > { %11197 = vmatmul.mubr.msk.f32.gmra.mrb[82].mxu1 %vm4889_vm2, %v6121_v15  ;;  %v5792_v6 = vpop.xlane.xlu1 %5791  ;;  %12513 = vrcp.f32 %v5780_v16  ;;  %16948 = vst [vmem:[#allocation40_spill] sm:$0xff] %v15794_v2  ;;  %v15800_v59 = vpop.eup %12501  ;;  %v5979_v15 = vsel %vm4889_vm2, %v15788_v7, 0.0  ;;  %v5640_v21 = vmul.f32 1.442695, %v5393_v54  ;;  %v5991_v52 = vsel %vm4889_vm2, %v15794_v2, 0.0  ;;  %v16954_v2 = vld [vmem:[#allocation135_spill] sm:$0xff] }
 0x32d   : > { %12515 = vrcp.f32 %v5792_v6  ;;  %16951 = vst [vmem:[#allocation82_spill] sm:$0xff] %v15800_v59  ;;  %v15805_v16 = vpop.eup %12503  ;;  %v5976_v47 = vsel %vm4889_vm2, %v15800_v59, 0.0  ;;  %v16955_v59 = vld [vmem:[#allocation59_spill] sm:$0xff] }
 0x32e   : > { %12517 = vpow2.f32 %v5626_v57  ;;  %16952 = vst [vmem:[#allocation43_spill] sm:$0xff] %v15805_v16  ;;  %v15810_v3 = vpop.eup %12505 }
 0x32f   : > { %5971 = vadd.xlane.f32.xlu0 %v5970_v25  ;;  %5983 = vadd.xlane.f32.xlu1 %v5982_v63  ;;  %v5255_v20 = vpop.xlane.xlu0 %5254  ;;  %12519 = vpow2.f32 %v5634_v41  ;;  %v5630_v25 = vmul.f32 1.442695, %v5388_v26  ;;  %v15812_v57 = vpop.eup %12507  ;;  %v5988_v26 = vsel %vm4889_vm2, %v15805_v16, 0.0 }
 0x330   : > { %v5267_v45 = vpop.xlane.xlu1 %5266  ;;  %v5395_v38 = vsub.f32 %v15140_v39, %v5255_v20  ;;  %v5638_v39 = vmul.f32 1.442695, %v5392_v13  ;;  %12521 = vpow2.f32 %v5632_v22  ;;  %v907_v13 = vld [vmem:[%s14465_s7 + $0x198] sm:$0xff] }
 0x331   : > { %v5399_v6 = vsub.f32 %v15136_v19, %v5267_v45  ;;  %12523 = vpow2.f32 %v5640_v21  ;;  %v910_v45 = vld [vmem:[%s14465_s7 + $0x1b0] sm:$0xff]  ;;  %v16953_v21 = vld [vmem:[#allocation22_spill] sm:$0xff] }
 0x332   : > { %v12510_v41 = vpop.eup %12509  ;;  %v5644_v19 = vmul.f32 1.442695, %v5395_v38  ;;  %12525 = vpow2.f32 %v5630_v25 }
 0x333   : > { %5980 = vadd.xlane.f32.xlu0 %v5979_v15  ;;  %5992 = vadd.xlane.f32.xlu1 %v5991_v52  ;;  %v5252_v49 = vpop.xlane.xlu0 %5251  ;;  %v12512_v54 = vpop.eup %12511  ;;  %v5652_v63 = vmul.f32 1.442695, %v5399_v6  ;;  %v911_v15 = vld [vmem:[%s14465_s7 + $0x1b8] sm:$0xff]  ;;  %12527 = vpow2.f32 %v5638_v39  ;;  %v6125_v7 = vmul.f32 %v12510_v41, %v16954_v2 }
 0x334   : > { %v5264_v48 = vpop.xlane.xlu1 %5263  ;;  %12529 = vpow2.f32 %v5644_v19  ;;  %v5394_v16 = vsub.f32 %v16955_v59, %v5252_v49  ;;  %v11999_v39 = vpack.c.bf16 %v911_v15, %v910_v45  ;;  %v912_v59 = vld [vmem:[%s14465_s7 + $0x1c0] sm:$0xff]  ;;  %v913_v49 = vld [vmem:[%s14465_s7 + $0x1c8] sm:$0xff] }
 0x335   : > { %12531 = vpow2.f32 %v5652_v63  ;;  %v917_v63 = vld [vmem:[%s14465_s7 + $0x1e8] sm:$0xff] }
 0x336   : > { %v12514_v20 = vpop.eup %12513 }
 0x337   : > { %5977 = vadd.xlane.f32.xlu0 %v5976_v47  ;;  %5989 = vadd.xlane.f32.xlu1 %v5988_v26  ;;  %v12516_v52 = vpop.eup %12515  ;;  %v6123_v6 = vmul.f32 %v12514_v20, %v16953_v21  ;;  %v5398_v47 = vsub.f32 %v15163_v10, %v5264_v48  ;;  %v11991_v26 = vpack.c.bf16 %v907_v13, %v906_v17  ;;  %v16957_v20 = vld [vmem:[#allocation133_spill] sm:$0xff]  ;;  %v6009_v10 = vsel %vm4889_vm2, %v15812_v57, 0.0 }
 0x338   : > { %v5789_v22 = vpop.xlane.xlu0 %5788  ;;  %v5801_v38 = vpop.xlane.xlu1 %5800  ;;  %v6131_v25 = vmul.f32 %v12516_v52, %v16956_v53  ;;  %v6133_v2 = vmul.f32 %v12512_v54, %v16957_v20  ;;  %v5997_v53 = vsel %vm4889_vm2, %v15810_v3, 0.0  ;;  %v916_v54 = vld [vmem:[%s14465_s7 + $0x1e0] sm:$0xff]  ;;  %v15846_v13 = vpack.c.bf16 %v913_v49, %v912_v59 }
 0x339   : > { %11207 = vmatprep.mubr.msk.f32.mxu0 %vm4889_vm2, %v6123_v6  ;;  %v15828_v56 = vpop.eup %12517  ;;  %12533 = vrcp.f32 %v5789_v22  ;;  %v5650_v17 = vmul.f32 1.442695, %v5398_v47  ;;  %v15854_v52 = vpack.c.bf16 %v917_v63, %v916_v54 }
 0x33a   : > { %11208 = vmatmul.mubr.msk.f32.vlgmr.msra.gmra.mrb[84].mxu0 %vm4889_vm2, %v6125_v7  ;;  %11221 = vmatprep.mubr.msk.f32.mxu1 %vm4889_vm2, %v6131_v25  ;;  %v15839_v48 = vpop.eup %12519  ;;  %12535 = vrcp.f32 %v5801_v38  ;;  %v5642_v7 = vmul.f32 1.442695, %v5394_v16  ;;  %v5994_v15 = vsel %vm4889_vm2, %v15828_v56, 0.0 }
 0x33b   : > { %5998 = vadd.xlane.f32.xlu0 %v5997_v53  ;;  %6010 = vadd.xlane.f32.xlu1 %v6009_v10  ;;  %v15848_v45 = vpop.eup %12521  ;;  %v6006_v16 = vsel %vm4889_vm2, %v15839_v48, 0.0 }
 0x33c   : > { %v5786_v41 = vpop.xlane.xlu0 %5785  ;;  %v5798_v19 = vpop.xlane.xlu1 %5797  ;;  %11222 = vmatmul.mubr.msk.f32.vlgmr.msra.gmra.mrb[84].mxu1 %vm4889_vm2, %v6133_v2  ;;  %11990 = vmatpush3.bf16.msra.mxu0 %v15718_v4  ;;  %v6003_v2 = vsel %vm4889_vm2, %v15848_v45, 0.0 }
 0x33d   : > { %12537 = vrcp.f32 %v5786_v41  ;;  %11998 = vmatpush3.bf16.msra.mxu1 %v15726_v5  ;;  %11992 = vmatprep.subr.bf16.mxu0 %v11991_v26  ;;  %v15856_v22 = vpop.eup %12523 }
 0x33e   : > { %12539 = vrcp.f32 %v5798_v19  ;;  %12000 = vmatprep.subr.bf16.mxu1 %v11999_v39  ;;  %v15858_v38 = vpop.eup %12525  ;;  %v6015_v53 = vsel %vm4889_vm2, %v15856_v22, 0.0 }
 0x33f   : > { %5995 = vadd.xlane.f32.xlu0 %v5994_v15  ;;  %6007 = vadd.xlane.f32.xlu1 %v6006_v16  ;;  %12541 = vpow2.f32 %v5642_v7  ;;  %v15862_v25 = vpop.eup %12527  ;;  %v6000_v19 = vsel %vm4889_vm2, %v15858_v38, 0.0 }
 0x340   : > { %v5261_v4 = vpop.xlane.xlu0 %5260  ;;  %v5273_v5 = vpop.xlane.xlu1 %5272  ;;  %11994 = vmatpush3.bf16.msra.mxu0 %v11991_v26  ;;  %12543 = vpow2.f32 %v5650_v17  ;;  %v6012_v17 = vsel %vm4889_vm2, %v15862_v25, 0.0 }
 0x341   : > { %v5397_v21 = vsub.f32 %v15212_v44, %v5261_v4  ;;  %v5401_v6 = vsub.f32 %v15206_v62, %v5273_v5  ;;  %12002 = vmatpush3.bf16.msra.mxu1 %v11999_v39  ;;  %12004 = vmatprep.subr.bf16.mxu0 %v15846_v13  ;;  %v15865_v47 = vpop.eup %12529 }
 0x342   : > { %12012 = vmatprep.subr.bf16.mxu1 %v15854_v52  ;;  %v15872_v44 = vpop.eup %12531 }
 0x343   : > { %v5648_v20 = vmul.f32 1.442695, %v5397_v21  ;;  %v5656_v62 = vmul.f32 1.442695, %v5401_v6  ;;  %6004 = vadd.xlane.f32.xlu0 %v6003_v2  ;;  %6016 = vadd.xlane.f32.xlu1 %v6015_v53  ;;  %v12534_v10 = vpop.eup %12533  ;;  %v16959_v21 = vld [vmem:[#allocation57_spill] sm:$0xff]  ;;  %v6021_v2 = vsel %vm4889_vm2, %v15865_v47, 0.0 }
 0x344   : > { %v5258_v26 = vpop.xlane.xlu0 %5257  ;;  %v5270_v39 = vpop.xlane.xlu1 %5269  ;;  %v16960_v53 = vld [vmem:[#allocation56_spill] sm:$0xff] }
 0x345   : > { %v5396_v59 = vsub.f32 %v15230_v32, %v5258_v26  ;;  %v5400_v49 = vsub.f32 %v15236_v46, %v5270_v39  ;;  %v12536_v41 = vpop.eup %12535  ;;  %12545 = vpow2.f32 %v5648_v20  ;;  %v16958_v46 = vld [vmem:[#allocation23_spill] sm:$0xff] }
 0x346   : > { %12547 = vpow2.f32 %v5656_v62  ;;  %v6129_v5 = vmul.f32 %v12534_v10, %v16958_v46  ;;  %v6137_v62 = vmul.f32 %v12536_v41, %v16960_v53  ;;  %v919_v53 = vld [vmem:[%s14465_s7 + $0x1f8] sm:$0xff] }
 0x347   : > { %v12538_v54 = vpop.eup %12537  ;;  %v5646_v63 = vmul.f32 1.442695, %v5396_v59  ;;  %v5654_v7 = vmul.f32 1.442695, %v5400_v49  ;;  %6001 = vadd.xlane.f32.xlu0 %v6000_v19  ;;  %6013 = vadd.xlane.f32.xlu1 %v6012_v17 }
 0x348   : > { %v12540_v15 = vpop.eup %12539  ;;  %v5807_v16 = vpop.xlane.xlu0 %5806  ;;  %v6127_v32 = vmul.f32 %v12538_v54, %v15197_v36  ;;  %v6033_v36 = vsel %vm4889_vm2, %v15872_v44, 0.0 }
 0x349   : > { %v5819_v4 = vpop.xlane.xlu1 %5818  ;;  %12549 = vpow2.f32 %v5646_v63  ;;  %v6135_v6 = vmul.f32 %v12540_v15, %v16959_v21  ;;  %v15884_v20 = vpop.eup %12541  ;;  %v914_v21 = vld [vmem:[%s14465_s7 + $0x1d0] sm:$0xff] }
 0x34a   : > { %12551 = vpow2.f32 %v5654_v7  ;;  %11210 = vmatprep.mubr.msk.f32.mxu0 %vm4889_vm2, %v6127_v32  ;;  %v15893_v26 = vpop.eup %12543  ;;  %v6018_v59 = vsel %vm4889_vm2, %v15884_v20, 0.0 }
 0x34b   : > { %12553 = vrcp.f32 %v5807_v16  ;;  %11211 = vmatmul.mubr.msk.f32.gmra.mrb[86].mxu0 %vm4889_vm2, %v6129_v5  ;;  %11224 = vmatprep.mubr.msk.f32.mxu1 %vm4889_vm2, %v6135_v6  ;;  %v6030_v49 = vsel %vm4889_vm2, %v15893_v26, 0.0  ;;  %v915_v6 = vld [vmem:[%s14465_s7 + $0x1d8] sm:$0xff] }
 0x34c   : > { %12555 = vrcp.f32 %v5819_v4  ;;  %6022 = vadd.xlane.f32.xlu0 %v6021_v2  ;;  %6034 = vadd.xlane.f32.xlu1 %v6033_v36  ;;  %v5804_v39 = vpop.xlane.xlu0 %5803  ;;  %v918_v36 = vld [vmem:[%s14465_s7 + $0x1f0] sm:$0xff] }
 0x34d   : > { %v5816_v10 = vpop.xlane.xlu1 %5815  ;;  %11225 = vmatmul.mubr.msk.f32.gmra.mrb[86].mxu1 %vm4889_vm2, %v6137_v62  ;;  %12557 = vrcp.f32 %v5804_v39 }
 0x34e   : > { %12559 = vrcp.f32 %v5816_v10 }
 0x34f   : > { %v15900_v54 = vpop.eup %12545 }
 0x350   : > { %6019 = vadd.xlane.f32.xlu0 %v6018_v59  ;;  %6031 = vadd.xlane.f32.xlu1 %v6030_v49  ;;  %v5813_v41 = vpop.xlane.xlu0 %5812  ;;  %16961 = vst [vmem:[#allocation80_spill] sm:$0xff] %v15900_v54  ;;  %v15902_v63 = vpop.eup %12547  ;;  %v6027_v59 = vsel %vm4889_vm2, %v15900_v54, 0.0  ;;  %v920_v54 = vld [vmem:[%s14465_s7 + $0x200] sm:$0xff] }
 0x351   : > { %v5825_v19 = vpop.xlane.xlu1 %5824  ;;  %12561 = vrcp.f32 %v5813_v41 }
 0x352   : > { %12563 = vrcp.f32 %v5825_v19  ;;  %v6039_v19 = vsel %vm4889_vm2, %v15902_v63, 0.0 }
 0x353   : > { %v15904_v7 = vpop.eup %12549 }
 0x354   : > { %v15906_v17 = vpop.eup %12551  ;;  %v5810_v15 = vpop.xlane.xlu0 %5809  ;;  %v6024_v4 = vsel %vm4889_vm2, %v15904_v7, 0.0 }
 0x355   : > { %16962 = vst [vmem:[#allocation83_spill] sm:$0xff] %v15906_v17  ;;  %v5822_v16 = vpop.xlane.xlu1 %5821  ;;  %v12554_v32 = vpop.eup %12553  ;;  %12565 = vrcp.f32 %v5810_v15  ;;  %6025 = vadd.xlane.f32.xlu0 %v6024_v4  ;;  %v6036_v46 = vsel %vm4889_vm2, %v15906_v17, 0.0  ;;  %v921_v17 = vld [vmem:[%s14465_s7 + $0x208] sm:$0xff] }
 0x356   : > { %v12556_v5 = vpop.eup %12555  ;;  %12567 = vrcp.f32 %v5822_v16  ;;  %6037 = vadd.xlane.f32.xlu1 %v6036_v46  ;;  %v6141_v41 = vmul.f32 %v12554_v32, %v15242_v24  ;;  %v12007_v16 = vpack.c.bf16 %v915_v6, %v914_v21  ;;  %v12015_v46 = vpack.c.bf16 %v919_v53, %v918_v36  ;;  %v924_v24 = vld [vmem:[%s14465_s7 + $0x220] sm:$0xff] }
 0x357   : > { %v12558_v2 = vpop.eup %12557  ;;  %v6149_v4 = vmul.f32 %v12556_v5, %v15232_v34  ;;  %v12019_v5 = vpack.c.bf16 %v921_v17, %v920_v54 }
 0x358   : > { %v12560_v62 = vpop.eup %12559  ;;  %v5831_v39 = vpop.xlane.xlu0 %5830  ;;  %v6139_v49 = vmul.f32 %v12558_v2, %v15275_v12  ;;  %v925_v12 = vld [vmem:[%s14465_s7 + $0x228] sm:$0xff] }
 0x359   : > { %v5843_v10 = vpop.xlane.xlu1 %5842  ;;  %6028 = vadd.xlane.f32.xlu0 %v6027_v59  ;;  %v6147_v15 = vmul.f32 %v12560_v62, %v15266_v18  ;;  %12569 = vrcp.f32 %v5831_v39  ;;  %v12027_v6 = vpack.c.bf16 %v925_v12, %v924_v24 }
 0x35a   : > { %6040 = vadd.xlane.f32.xlu1 %v6039_v19  ;;  %11235 = vmatprep.mubr.msk.f32.mxu0 %vm4889_vm2, %v6139_v49  ;;  %12571 = vrcp.f32 %v5843_v10  ;;  %v923_v19 = vld [vmem:[%s14465_s7 + $0x218] sm:$0xff] }
 0x35b   : > { %11236 = vmatmul.mubr.msk.f32.vlgmr.msra.gmra.mrb[88].mxu0 %vm4889_vm2, %v6141_v41  ;;  %11249 = vmatprep.mubr.msk.f32.mxu1 %vm4889_vm2, %v6147_v15  ;;  %v12562_v34 = vpop.eup %12561  ;;  %v922_v41 = vld [vmem:[%s14465_s7 + $0x210] sm:$0xff] }
 0x35c   : > { %11250 = vmatmul.mubr.msk.f32.vlgmr.msra.gmra.mrb[88].mxu1 %vm4889_vm2, %v6149_v4  ;;  %v5828_v18 = vpop.xlane.xlu0 %5827  ;;  %12006 = vmatpush3.bf16.msra.mxu0 %v15846_v13  ;;  %v12564_v21 = vpop.eup %12563  ;;  %v6145_v10 = vmul.f32 %v12562_v34, %v15298_v0  ;;  %v16963_v13 = vld [vmem:[#allocation95_spill] sm:$0xff]  ;;  %v927_v4 = vld [vmem:[%s14465_s7 + $0x238] sm:$0xff]  ;;  %v16965_v34 = vld [vmem:[#allocation25_spill] sm:$0xff] }
 0x35d   : > { %v5840_v32 = vpop.xlane.xlu1 %5839  ;;  %12573 = vrcp.f32 %v5828_v18  ;;  %12014 = vmatpush3.bf16.msra.mxu1 %v15854_v52  ;;  %12008 = vmatprep.subr.bf16.mxu0 %v12007_v16  ;;  %v16964_v52 = vld [vmem:[#allocation94_spill] sm:$0xff] }
 0x35e   : > { %12575 = vrcp.f32 %v5840_v32  ;;  %12016 = vmatprep.subr.bf16.mxu1 %v12015_v46  ;;  %v6153_v54 = vmul.f32 %v12564_v21, %v16964_v52 }
 0x35f   : > { %v12566_v2 = vpop.eup %12565 }
 0x360   : > { %v12568_v36 = vpop.eup %12567  ;;  %v5837_v53 = vpop.xlane.xlu0 %5836  ;;  %v6143_v39 = vmul.f32 %v12566_v2, %v15310_v60  ;;  %12010 = vmatpush3.bf16.msra.mxu0 %v12007_v16  ;;  %v926_v16 = vld [vmem:[%s14465_s7 + $0x230] sm:$0xff]  ;;  %v12023_v2 = vpack.c.bf16 %v923_v19, %v922_v41 }
 0x361   : > { %v5849_v62 = vpop.xlane.xlu1 %5848  ;;  %v6151_v59 = vmul.f32 %v12568_v36, %v16963_v13  ;;  %12018 = vmatpush3.bf16.msra.mxu1 %v12015_v46  ;;  %12020 = vmatprep.subr.bf16.mxu0 %v12019_v5  ;;  %12577 = vrcp.f32 %v5837_v53  ;;  %v16966_v36 = vld [vmem:[#allocation104_spill] sm:$0xff] }
 0x362   : > { %11238 = vmatprep.mubr.msk.f32.mxu0 %vm4889_vm2, %v6143_v39  ;;  %12028 = vmatprep.subr.bf16.mxu1 %v12027_v6  ;;  %12579 = vrcp.f32 %v5849_v62  ;;  %v12031_v62 = vpack.c.bf16 %v927_v4, %v926_v16  ;;  %v928_v39 = vld [vmem:[%s14465_s7 + $0x240] sm:$0xff] }
 0x363   : > { %11239 = vmatmul.mubr.msk.f32.gmra.mrb[90].mxu0 %vm4889_vm2, %v6145_v10  ;;  %11252 = vmatprep.mubr.msk.f32.mxu1 %vm4889_vm2, %v6151_v59  ;;  %v12570_v17 = vpop.eup %12569  ;;  %v929_v10 = vld [vmem:[%s14465_s7 + $0x248] sm:$0xff] }
 0x364   : > { %11253 = vmatmul.mubr.msk.f32.gmra.mrb[90].mxu1 %vm4889_vm2, %v6153_v54  ;;  %v5834_v0 = vpop.xlane.xlu0 %5833  ;;  %v12572_v49 = vpop.eup %12571  ;;  %v6157_v32 = vmul.f32 %v12570_v17, %v15322_v50  ;;  %v932_v50 = vld [vmem:[%s14465_s7 + $0x260] sm:$0xff] }
 0x365   : > { %v5846_v60 = vpop.xlane.xlu1 %5845  ;;  %12581 = vrcp.f32 %v5834_v0  ;;  %v6165_v53 = vmul.f32 %v12572_v49, %v16966_v36  ;;  %v12035_v0 = vpack.c.bf16 %v929_v10, %v928_v39  ;;  %v930_v39 = vld [vmem:[%s14465_s7 + $0x250] sm:$0xff]  ;;  %v931_v10 = vld [vmem:[%s14465_s7 + $0x258] sm:$0xff] }
 0x366   : > { %12583 = vrcp.f32 %v5846_v60 }
 0x367   : > { %v12574_v15 = vpop.eup %12573 }
 0x368   : > { %v12576_v46 = vpop.eup %12575  ;;  %v5855_v24 = vpop.xlane.xlu0 %5854  ;;  %v6155_v18 = vmul.f32 %v12574_v15, %v15349_v37  ;;  %v933_v37 = vld [vmem:[%s14465_s7 + $0x268] sm:$0xff] }
 0x369   : > { %v5867_v12 = vpop.xlane.xlu1 %5866  ;;  %v6163_v21 = vmul.f32 %v12576_v46, %v16965_v34  ;;  %12585 = vrcp.f32 %v5855_v24  ;;  %v12043_v49 = vpack.c.bf16 %v933_v37, %v932_v50  ;;  %v16968_v24 = vld [vmem:[#allocation24_spill] sm:$0xff]  ;;  %v16970_v34 = vld [vmem:[#allocation105_spill] sm:$0xff]  ;;  %v934_v37 = vld [vmem:[%s14465_s7 + $0x270] sm:$0xff] }
 0x36a   : > { %11263 = vmatprep.mubr.msk.f32.mxu0 %vm4889_vm2, %v6155_v18  ;;  %12587 = vrcp.f32 %v5867_v12  ;;  %v16969_v18 = vld [vmem:[#allocation66_spill] sm:$0xff] }
 0x36b   : > { %11264 = vmatmul.mubr.msk.f32.vlgmr.msra.gmra.mrb[92].mxu0 %vm4889_vm2, %v6157_v32  ;;  %11277 = vmatprep.mubr.msk.f32.mxu1 %vm4889_vm2, %v6163_v21  ;;  %v12578_v52 = vpop.eup %12577 }
 0x36c   : > { %11278 = vmatmul.mubr.msk.f32.vlgmr.msra.gmra.mrb[92].mxu1 %vm4889_vm2, %v6165_v53  ;;  %v5852_v13 = vpop.xlane.xlu0 %5851  ;;  %12022 = vmatpush3.bf16.msra.mxu0 %v12019_v5  ;;  %v12580_v60 = vpop.eup %12579  ;;  %v6161_v12 = vmul.f32 %v12578_v52, %v16968_v24  ;;  %v937_v24 = vld [vmem:[%s14465_s7 + $0x288] sm:$0xff] }
 0x36d   : > { %v5864_v59 = vpop.xlane.xlu1 %5863  ;;  %12589 = vrcp.f32 %v5852_v13  ;;  %v11069_v54 = vpop.f32.mrb[64].mxu0  ;;  %12030 = vmatpush3.bf16.msra.mxu1 %v12027_v6  ;;  %12024 = vmatprep.subr.bf16.mxu0 %v12023_v2  ;;  %v16967_v6 = vld [vmem:[#allocation108_spill] sm:$0xff]  ;;  %v6169_v21 = vmul.f32 %v12580_v60, %v16970_v34  ;;  %v16971_v60 = vld [vmem:[#allocation65_spill] sm:$0xff] }
 0x36e   : > { %12591 = vrcp.f32 %v5864_v59  ;;  %9403 = vst.msk [vmem:[%s15957_s27 + $0x8] sm:$0xff] %vm984_vm0, %v11069_v54  ;;  %v6376_v17 = vpop.f32.mrb[65].mxu0  ;;  %12032 = vmatprep.subr.bf16.mxu1 %v12031_v62  ;;  %v11083_v19 = vpop.f32.mrb[64].mxu1  ;;  %v935_v13 = vld [vmem:[%s14465_s7 + $0x278] sm:$0xff] }
 0x36f   : > { %v12582_v41 = vpop.eup %12581  ;;  %9402 = vst.msk [vmem:[%s15957_s27] sm:$0xff] %vm984_vm0, %v6376_v17  ;;  %9407 = vst.msk [vmem:[%s15957_s27 + $0x28] sm:$0xff] %vm984_vm0, %v11083_v19  ;;  %v6473_v15 = vpop.f32.mrb[65].mxu1  ;;  %v16972_v19 = vld [vmem:[#allocation67_spill] sm:$0xff] }
 0x370   : > { %v12584_v5 = vpop.eup %12583  ;;  %v5861_v16 = vpop.xlane.xlu0 %5860  ;;  %v6159_v4 = vmul.f32 %v12582_v41, %v16967_v6  ;;  %12026 = vmatpush3.bf16.msra.mxu0 %v12023_v2  ;;  %9406 = vst.msk [vmem:[%s15957_s27 + $0x20] sm:$0xff] %vm984_vm0, %v6473_v15  ;;  %v12039_v15 = vpack.c.bf16 %v931_v10, %v930_v39 }
 0x371   : > { %v5873_v46 = vpop.xlane.xlu1 %5872  ;;  %v6167_v32 = vmul.f32 %v12584_v5, %v16969_v18  ;;  %12034 = vmatpush3.bf16.msra.mxu1 %v12031_v62  ;;  %12036 = vmatprep.subr.bf16.mxu0 %v12035_v0  ;;  %12593 = vrcp.f32 %v5861_v16  ;;  %v16973_v16 = vld [vmem:[#allocation27_spill] sm:$0xff] }
 0x372   : > { %11266 = vmatprep.mubr.msk.f32.mxu0 %vm4889_vm2, %v6159_v4  ;;  %12044 = vmatprep.subr.bf16.mxu1 %v12043_v49  ;;  %12595 = vrcp.f32 %v5873_v46  ;;  %v12047_v4 = vpack.c.bf16 %v935_v13, %v934_v37  ;;  %v936_v46 = vld [vmem:[%s14465_s7 + $0x280] sm:$0xff] }
 0x373   : > { %11267 = vmatmul.mubr.msk.f32.gmra.mrb[94].mxu0 %vm4889_vm2, %v6161_v12  ;;  %11280 = vmatprep.mubr.msk.f32.mxu1 %vm4889_vm2, %v6167_v32  ;;  %v12586_v36 = vpop.eup %12585  ;;  %v941_v12 = vld [vmem:[%s14465_s7 + $0x2a8] sm:$0xff] }
 0x374   : > { %11281 = vmatmul.mubr.msk.f32.gmra.mrb[94].mxu1 %vm4889_vm2, %v6169_v21  ;;  %v5858_v2 = vpop.xlane.xlu0 %5857  ;;  %v12588_v62 = vpop.eup %12587  ;;  %v6173_v17 = vmul.f32 %v12586_v36, %v16971_v60  ;;  %v16976_v60 = vld [vmem:[#allocation64_spill] sm:$0xff] }
 0x375   : > { %12597 = vrcp.f32 %v5858_v2  ;;  %v5870_v53 = vpop.xlane.xlu1 %5869  ;;  %v6181_v6 = vmul.f32 %v12588_v62, %v16973_v16  ;;  %v12051_v2 = vpack.c.bf16 %v937_v24, %v936_v46  ;;  %v939_v46 = vld [vmem:[%s14465_s7 + $0x298] sm:$0xff] }
 0x376   : > { %12599 = vrcp.f32 %v5870_v53 }
 0x377   : > { %v12590_v50 = vpop.eup %12589 }
 0x378   : > { %v12592_v59 = vpop.eup %12591  ;;  %v5879_v52 = vpop.xlane.xlu0 %5878  ;;  %v6171_v54 = vmul.f32 %v12590_v50, %v15419_v40  ;;  %v940_v40 = vld [vmem:[%s14465_s7 + $0x2a0] sm:$0xff] }
 0x379   : > { %v5891_v41 = vpop.xlane.xlu1 %5890  ;;  %v6179_v5 = vmul.f32 %v12592_v59, %v16972_v19  ;;  %12601 = vrcp.f32 %v5879_v52  ;;  %v12059_v62 = vpack.c.bf16 %v941_v12, %v940_v40  ;;  %v16975_v52 = vld [vmem:[#allocation26_spill] sm:$0xff]  ;;  %v942_v40 = vld [vmem:[%s14465_s7 + $0x2b0] sm:$0xff]  ;;  %v943_v12 = vld [vmem:[%s14465_s7 + $0x2b8] sm:$0xff] }
 0x37a   : > { %11291 = vmatprep.mubr.msk.f32.mxu0 %vm4889_vm2, %v6171_v54  ;;  %12603 = vrcp.f32 %v5891_v41  ;;  %v16977_v41 = vld [vmem:[#allocation109_spill] sm:$0xff] }
 0x37b   : > { %11292 = vmatmul.mubr.msk.f32.vlgmr.msra.gmra.mrb[96].mxu0 %vm4889_vm2, %v6173_v17  ;;  %11305 = vmatprep.mubr.msk.f32.mxu1 %vm4889_vm2, %v6179_v5  ;;  %v12594_v32 = vpop.eup %12593 }
 0x37c   : > { %11306 = vmatmul.mubr.msk.f32.vlgmr.msra.gmra.mrb[96].mxu1 %vm4889_vm2, %v6181_v6  ;;  %v5876_v18 = vpop.xlane.xlu0 %5875  ;;  %12038 = vmatpush3.bf16.msra.mxu0 %v12035_v0  ;;  %v12596_v36 = vpop.eup %12595  ;;  %v6177_v54 = vmul.f32 %v12594_v32, %v16975_v52  ;;  %v949_v52 = vld [vmem:[%s14465_s7 + $0x2e8] sm:$0xff] }
 0x37d   : > { %12605 = vrcp.f32 %v5876_v18  ;;  %v5888_v34 = vpop.xlane.xlu1 %5887  ;;  %v11072_v21 = vpop.f32.mrb[66].mxu0  ;;  %12046 = vmatpush3.bf16.msra.mxu1 %v12043_v49  ;;  %12040 = vmatprep.subr.bf16.mxu0 %v12039_v15  ;;  %v16974_v49 = vld [vmem:[#allocation112_spill] sm:$0xff]  ;;  %v6185_v19 = vmul.f32 %v12596_v36, %v16977_v41 }
 0x37e   : > { %12607 = vrcp.f32 %v5888_v34  ;;  %9405 = vst.msk [vmem:[%s15957_s27 + $0x18] sm:$0xff] %vm984_vm0, %v11072_v21  ;;  %v6386_v53 = vpop.f32.mrb[67].mxu0  ;;  %12048 = vmatprep.subr.bf16.mxu1 %v12047_v4  ;;  %v16978_v21 = vld [vmem:[#allocation113_spill] sm:$0xff] }
 0x37f   : > { %v12598_v39 = vpop.eup %12597  ;;  %9404 = vst.msk [vmem:[%s15957_s27 + $0x10] sm:$0xff] %vm984_vm0, %v6386_v53  ;;  %v11086_v0 = vpop.f32.mrb[66].mxu1 }
 0x380   : > { %v12600_v10 = vpop.eup %12599  ;;  %9409 = vst.msk [vmem:[%s15957_s27 + $0x38] sm:$0xff] %vm984_vm0, %v11086_v0  ;;  %v6483_v50 = vpop.f32.mrb[67].mxu1  ;;  %v6175_v13 = vmul.f32 %v12598_v39, %v16974_v49  ;;  %12042 = vmatpush3.bf16.msra.mxu0 %v12039_v15  ;;  %v16979_v39 = vld [vmem:[#allocation29_spill] sm:$0xff]  ;;  %v12063_v49 = vpack.c.bf16 %v943_v12, %v942_v40 }
 0x381   : > { %v5885_v37 = vpop.xlane.xlu0 %5884  ;;  %9408 = vst.msk [vmem:[%s15957_s27 + $0x30] sm:$0xff] %vm984_vm0, %v6483_v50  ;;  %v5897_v59 = vpop.xlane.xlu1 %5896  ;;  %v6183_v17 = vmul.f32 %v12600_v10, %v16976_v60  ;;  %12050 = vmatpush3.bf16.msra.mxu1 %v12047_v4  ;;  %12052 = vmatprep.subr.bf16.mxu0 %v12051_v2  ;;  %v938_v4 = vld [vmem:[%s14465_s7 + $0x290] sm:$0xff]  ;;  %v16980_v50 = vld [vmem:[#allocation28_spill] sm:$0xff] }
 0x382   : > { %11294 = vmatprep.mubr.msk.f32.mxu0 %vm4889_vm2, %v6175_v13  ;;  %12060 = vmatprep.subr.bf16.mxu1 %v12059_v62  ;;  %12609 = vrcp.f32 %v5885_v37  ;;  %v12055_v10 = vpack.c.bf16 %v939_v46, %v938_v4  ;;  %v944_v13 = vld [vmem:[%s14465_s7 + $0x2c0] sm:$0xff] }
 0x383   : > { %11295 = vmatmul.mubr.msk.f32.gmra.mrb[98].mxu0 %vm4889_vm2, %v6177_v54  ;;  %11308 = vmatprep.mubr.msk.f32.mxu1 %vm4889_vm2, %v6183_v17  ;;  %12611 = vrcp.f32 %v5897_v59  ;;  %v12602_v15 = vpop.eup %12601  ;;  %v945_v59 = vld [vmem:[%s14465_s7 + $0x2c8] sm:$0xff] }
 0x384   : > { %11309 = vmatmul.mubr.msk.f32.gmra.mrb[98].mxu1 %vm4889_vm2, %v6185_v19  ;;  %v12604_v6 = vpop.eup %12603  ;;  %v6189_v36 = vmul.f32 %v12602_v15, %v16978_v21  ;;  %v12067_v19 = vpack.c.bf16 %v945_v59, %v944_v13  ;;  %v950_v59 = vld [vmem:[%s14465_s7 + $0x2f0] sm:$0xff] }
 0x385   : > { %v5882_v5 = vpop.xlane.xlu0 %5881  ;;  %v5894_v16 = vpop.xlane.xlu1 %5893  ;;  %v6197_v37 = vmul.f32 %v12604_v6, %v16980_v50 }
 0x386   : > { %12613 = vrcp.f32 %v5882_v5 }
 0x387   : > { %12615 = vrcp.f32 %v5894_v16  ;;  %v12606_v24 = vpop.eup %12605 }
 0x388   : > { %v12608_v18 = vpop.eup %12607  ;;  %v6187_v34 = vmul.f32 %v12606_v24, %v15493_v27  ;;  %v948_v27 = vld [vmem:[%s14465_s7 + $0x2e0] sm:$0xff] }
 0x389   : > { %v5903_v32 = vpop.xlane.xlu0 %5902  ;;  %v5915_v53 = vpop.xlane.xlu1 %5914  ;;  %v6195_v0 = vmul.f32 %v12608_v18, %v16979_v39  ;;  %v12075_v16 = vpack.c.bf16 %v949_v52, %v948_v27  ;;  %v16982_v18 = vld [vmem:[#allocation31_spill] sm:$0xff]  ;;  %v951_v27 = vld [vmem:[%s14465_s7 + $0x2f8] sm:$0xff] }
 0x38a   : > { %11319 = vmatprep.mubr.msk.f32.mxu0 %vm4889_vm2, %v6187_v34  ;;  %12617 = vrcp.f32 %v5903_v32  ;;  %v16983_v34 = vld [vmem:[#allocation33_spill] sm:$0xff] }
 0x38b   : > { %11320 = vmatmul.mubr.msk.f32.vlgmr.msra.gmra.mrb[100].mxu0 %vm4889_vm2, %v6189_v36  ;;  %11333 = vmatprep.mubr.msk.f32.mxu1 %vm4889_vm2, %v6195_v0  ;;  %12619 = vrcp.f32 %v5915_v53  ;;  %v16984_v36 = vld [vmem:[#allocation30_spill] sm:$0xff] }
 0x38c   : > { %11334 = vmatmul.mubr.msk.f32.vlgmr.msra.gmra.mrb[100].mxu1 %vm4889_vm2, %v6197_v37  ;;  %12054 = vmatpush3.bf16.msra.mxu0 %v12051_v2  ;;  %v12610_v60 = vpop.eup %12609  ;;  %v946_v37 = vld [vmem:[%s14465_s7 + $0x2d0] sm:$0xff] }
 0x38d   : > { %v5900_v54 = vpop.xlane.xlu0 %5899  ;;  %v5912_v17 = vpop.xlane.xlu1 %5911  ;;  %12062 = vmatpush3.bf16.msra.mxu1 %v12059_v62  ;;  %12056 = vmatprep.subr.bf16.mxu0 %v12055_v10  ;;  %v16981_v62 = vld [vmem:[#allocation32_spill] sm:$0xff]  ;;  %v6193_v32 = vmul.f32 %v12610_v60, %v16982_v18 }
 0x38e   : > { %12621 = vrcp.f32 %v5900_v54  ;;  %v11097_v41 = vpop.f32.mrb[68].mxu0  ;;  %v12612_v5 = vpop.eup %12611  ;;  %12064 = vmatprep.subr.bf16.mxu1 %v12063_v49 }
 0x38f   : > { %12623 = vrcp.f32 %v5912_v17  ;;  %9411 = vst.msk [vmem:[%s15957_s27 + $0x48] sm:$0xff] %vm984_vm0, %v11097_v41  ;;  %v6570_v15 = vpop.f32.mrb[69].mxu0  ;;  %v11111_v2 = vpop.f32.mrb[68].mxu1  ;;  %v6201_v53 = vmul.f32 %v12612_v5, %v16984_v36 }
 0x390   : > { %v12614_v6 = vpop.eup %12613  ;;  %9410 = vst.msk [vmem:[%s15957_s27 + $0x40] sm:$0xff] %vm984_vm0, %v6570_v15  ;;  %9415 = vst.msk [vmem:[%s15957_s27 + $0x68] sm:$0xff] %vm984_vm0, %v11111_v2  ;;  %v6667_v46 = vpop.f32.mrb[69].mxu1  ;;  %12058 = vmatpush3.bf16.msra.mxu0 %v12055_v10  ;;  %v12079_v2 = vpack.c.bf16 %v951_v27, %v950_v59  ;;  %v955_v59 = vld [vmem:[%s14465_s7 + $0x318] sm:$0xff] }
 0x391   : > { %v12616_v4 = vpop.eup %12615  ;;  %v5909_v24 = vpop.xlane.xlu0 %5908  ;;  %v6191_v40 = vmul.f32 %v12614_v6, %v16981_v62  ;;  %9414 = vst.msk [vmem:[%s15957_s27 + $0x60] sm:$0xff] %vm984_vm0, %v6667_v46  ;;  %12066 = vmatpush3.bf16.msra.mxu1 %v12063_v49  ;;  %12068 = vmatprep.subr.bf16.mxu0 %v12067_v19  ;;  %v947_v49 = vld [vmem:[%s14465_s7 + $0x2d8] sm:$0xff]  ;;  %v953_v46 = vld [vmem:[%s14465_s7 + $0x308] sm:$0xff] }
 0x392   : > { %v5921_v12 = vpop.xlane.xlu1 %5920  ;;  %v6199_v21 = vmul.f32 %v12616_v4, %v16983_v34  ;;  %12076 = vmatprep.subr.bf16.mxu1 %v12075_v16  ;;  %12625 = vrcp.f32 %v5909_v24  ;;  %v12071_v15 = vpack.c.bf16 %v947_v49, %v946_v37  ;;  %v952_v4 = vld [vmem:[%s14465_s7 + $0x300] sm:$0xff]  ;;  %v957_v24 = vld [vmem:[%s14465_s7 + $0x328] sm:$0xff] }
 0x393   : > { %11322 = vmatprep.mubr.msk.f32.mxu0 %vm4889_vm2, %v6191_v40  ;;  %12627 = vrcp.f32 %v5921_v12  ;;  %v12083_v40 = vpack.c.bf16 %v953_v46, %v952_v4 }
 0x394   : > { %11323 = vmatmul.mubr.msk.f32.gmra.mrb[102].mxu0 %vm4889_vm2, %v6193_v32  ;;  %11336 = vmatprep.mubr.msk.f32.mxu1 %vm4889_vm2, %v6199_v21  ;;  %v12618_v0 = vpop.eup %12617 }
 0x395   : > { %11337 = vmatmul.mubr.msk.f32.gmra.mrb[102].mxu1 %vm4889_vm2, %v6201_v53  ;;  %v5906_v39 = vpop.xlane.xlu0 %5905  ;;  %v12620_v50 = vpop.eup %12619  ;;  %v6205_v17 = vmul.f32 %v12618_v0, %v15524_v58 }
 0x396   : > { %12629 = vrcp.f32 %v5906_v39  ;;  %v5918_v10 = vpop.xlane.xlu1 %5917  ;;  %v6213_v6 = vmul.f32 %v12620_v50, %v15530_v61  ;;  %v16985_v50 = vld [vmem:[#allocation74_spill] sm:$0xff] }
 0x397   : > { %12631 = vrcp.f32 %v5918_v10 }
 0x398   : > { %v12622_v13 = vpop.eup %12621 }
 0x399   : > { %v12624_v52 = vpop.eup %12623  ;;  %v5927_v54 = vpop.xlane.xlu0 %5926  ;;  %v6203_v60 = vmul.f32 %v12622_v13, %v15552_v31  ;;  %v956_v31 = vld [vmem:[%s14465_s7 + $0x320] sm:$0xff]  ;;  %v954_v13 = vld [vmem:[%s14465_s7 + $0x310] sm:$0xff] }
 0x39a   : > { %v5939_v41 = vpop.xlane.xlu1 %5938  ;;  %v6211_v5 = vmul.f32 %v12624_v52, %v15563_v43  ;;  %12633 = vrcp.f32 %v5927_v54  ;;  %v12091_v32 = vpack.c.bf16 %v957_v24, %v956_v31  ;;  %v958_v52 = vld [vmem:[%s14465_s7 + $0x330] sm:$0xff]  ;;  %v959_v54 = vld [vmem:[%s14465_s7 + $0x338] sm:$0xff]  ;;  %v12087_v46 = vpack.c.bf16 %v955_v59, %v954_v13  ;;  %v16988_v31 = vld [vmem:[#allocation73_spill] sm:$0xff] }
 0x39b   : > { %11347 = vmatprep.mubr.msk.f32.mxu0 %vm4889_vm2, %v6203_v60  ;;  %12635 = vrcp.f32 %v5939_v41  ;;  %v16992_v59 = vld [vmem:[#allocation72_spill] sm:$0xff] }
 0x39c   : > { %11348 = vmatmul.mubr.msk.f32.vlgmr.msra.gmra.mrb[104].mxu0 %vm4889_vm2, %v6205_v17  ;;  %11361 = vmatprep.mubr.msk.f32.mxu1 %vm4889_vm2, %v6211_v5  ;;  %v12626_v61 = vpop.eup %12625  ;;  %v16986_v5 = vld [vmem:[#allocation35_spill] sm:$0xff] }
 0x39d   : > { %11362 = vmatmul.mubr.msk.f32.vlgmr.msra.gmra.mrb[104].mxu1 %vm4889_vm2, %v6213_v6  ;;  %v5924_v58 = vpop.xlane.xlu0 %5923  ;;  %12070 = vmatpush3.bf16.msra.mxu0 %v12067_v19  ;;  %v11100_v62 = vpop.f32.mrb[70].mxu0  ;;  %v6209_v0 = vmul.f32 %v12626_v61, %v15576_v35  ;;  %v960_v61 = vld [vmem:[%s14465_s7 + $0x340] sm:$0xff] }
 0x39e   : > { %12637 = vrcp.f32 %v5924_v58  ;;  %v5936_v43 = vpop.xlane.xlu1 %5935  ;;  %12078 = vmatpush3.bf16.msra.mxu1 %v12075_v16  ;;  %12072 = vmatprep.subr.bf16.mxu0 %v12071_v15  ;;  %v12628_v12 = vpop.eup %12627  ;;  %9413 = vst.msk [vmem:[%s15957_s27 + $0x58] sm:$0xff] %vm984_vm0, %v11100_v62  ;;  %v12095_v58 = vpack.c.bf16 %v959_v54, %v958_v52  ;;  %v965_v62 = vld [vmem:[%s14465_s7 + $0x368] sm:$0xff] }
 0x39f   : > { %12639 = vrcp.f32 %v5936_v43  ;;  %v6580_v18 = vpop.f32.mrb[71].mxu0  ;;  %12080 = vmatprep.subr.bf16.mxu1 %v12079_v2  ;;  %v11114_v19 = vpop.f32.mrb[70].mxu1  ;;  %v6217_v37 = vmul.f32 %v12628_v12, %v16985_v50  ;;  %v961_v43 = vld [vmem:[%s14465_s7 + $0x348] sm:$0xff] }
 0x3a0   : > { %v12630_v34 = vpop.eup %12629  ;;  %9412 = vst.msk [vmem:[%s15957_s27 + $0x50] sm:$0xff] %vm984_vm0, %v6580_v18  ;;  %9417 = vst.msk [vmem:[%s15957_s27 + $0x78] sm:$0xff] %vm984_vm0, %v11114_v19  ;;  %v6677_v36 = vpop.f32.mrb[71].mxu1 }
 0x3a1   : > { %v12632_v21 = vpop.eup %12631  ;;  %v5933_v53 = vpop.xlane.xlu0 %5932  ;;  %v6207_v16 = vmul.f32 %v12630_v34, %v15592_v30  ;;  %12074 = vmatpush3.bf16.msra.mxu0 %v12071_v15  ;;  %9416 = vst.msk [vmem:[%s15957_s27 + $0x70] sm:$0xff] %vm984_vm0, %v6677_v36 }
 0x3a2   : > { %v5945_v39 = vpop.xlane.xlu1 %5944  ;;  %v6215_v10 = vmul.f32 %v12632_v21, %v15598_v28  ;;  %12082 = vmatpush3.bf16.msra.mxu1 %v12079_v2  ;;  %12084 = vmatprep.subr.bf16.mxu0 %v12083_v40  ;;  %12641 = vrcp.f32 %v5933_v53  ;;  %v16987_v2 = vld [vmem:[#allocation75_spill] sm:$0xff]  ;;  %v12099_v21 = vpack.c.bf16 %v961_v43, %v960_v61 }
 0x3a3   : > { %11350 = vmatprep.mubr.msk.f32.mxu0 %vm4889_vm2, %v6207_v16  ;;  %12092 = vmatprep.subr.bf16.mxu1 %v12091_v32  ;;  %12643 = vrcp.f32 %v5945_v39 }
 0x3a4   : > { %11351 = vmatmul.mubr.msk.f32.gmra.mrb[106].mxu0 %vm4889_vm2, %v6209_v0  ;;  %11364 = vmatprep.mubr.msk.f32.mxu1 %vm4889_vm2, %v6215_v10  ;;  %v12634_v30 = vpop.eup %12633 }
 0x3a5   : > { %11365 = vmatmul.mubr.msk.f32.gmra.mrb[106].mxu1 %vm4889_vm2, %v6217_v37  ;;  %v5930_v35 = vpop.xlane.xlu0 %5929  ;;  %v12636_v49 = vpop.eup %12635  ;;  %v6221_v15 = vmul.f32 %v12634_v30, %v16986_v5  ;;  %v16990_v30 = vld [vmem:[#allocation34_spill] sm:$0xff]  ;;  %v963_v5 = vld [vmem:[%s14465_s7 + $0x358] sm:$0xff] }
 0x3a6   : > { %12645 = vrcp.f32 %v5930_v35  ;;  %v5942_v28 = vpop.xlane.xlu1 %5941  ;;  %v6229_v24 = vmul.f32 %v12636_v49, %v16988_v31  ;;  %v16991_v49 = vld [vmem:[#allocation37_spill] sm:$0xff] }
 0x3a7   : > { %12647 = vrcp.f32 %v5942_v28 }
 0x3a8   : > { %v12638_v27 = vpop.eup %12637 }
 0x3a9   : > { %v12640_v60 = vpop.eup %12639  ;;  %v5951_v17 = vpop.xlane.xlu0 %5950  ;;  %v6219_v41 = vmul.f32 %v12638_v27, %v15628_v51  ;;  %v964_v51 = vld [vmem:[%s14465_s7 + $0x360] sm:$0xff] }
 0x3aa   : > { %v5963_v6 = vpop.xlane.xlu1 %5962  ;;  %v6227_v4 = vmul.f32 %v12640_v60, %v16987_v2  ;;  %12649 = vrcp.f32 %v5951_v17  ;;  %v12107_v16 = vpack.c.bf16 %v965_v62, %v964_v51  ;;  %v967_v2 = vld [vmem:[%s14465_s7 + $0x378] sm:$0xff] }
 0x3ab   : > { %11375 = vmatprep.mubr.msk.f32.mxu0 %vm4889_vm2, %v6219_v41  ;;  %12651 = vrcp.f32 %v5963_v6  ;;  %v962_v41 = vld [vmem:[%s14465_s7 + $0x350] sm:$0xff] }
 0x3ac   : > { %11376 = vmatmul.mubr.msk.f32.vlgmr.msra.gmra.mrb[108].mxu0 %vm4889_vm2, %v6221_v15  ;;  %11389 = vmatprep.mubr.msk.f32.mxu1 %vm4889_vm2, %v6227_v4  ;;  %v12642_v18 = vpop.eup %12641  ;;  %v966_v6 = vld [vmem:[%s14465_s7 + $0x370] sm:$0xff]  ;;  %v12103_v43 = vpack.c.bf16 %v963_v5, %v962_v41 }
 0x3ad   : > { %11390 = vmatmul.mubr.msk.f32.vlgmr.msra.gmra.mrb[108].mxu1 %vm4889_vm2, %v6229_v24  ;;  %v5948_v12 = vpop.xlane.xlu0 %5947  ;;  %12086 = vmatpush3.bf16.msra.mxu0 %v12083_v40  ;;  %v11125_v19 = vpop.f32.mrb[72].mxu0  ;;  %v6225_v28 = vmul.f32 %v12642_v18, %v16990_v30  ;;  %v12111_v62 = vpack.c.bf16 %v967_v2, %v966_v6  ;;  %v969_v18 = vld [vmem:[%s14465_s7 + $0x388] sm:$0xff] }
 0x3ae   : > { %12653 = vrcp.f32 %v5948_v12  ;;  %v5960_v34 = vpop.xlane.xlu1 %5959  ;;  %12094 = vmatpush3.bf16.msra.mxu1 %v12091_v32  ;;  %12088 = vmatprep.subr.bf16.mxu0 %v12087_v46  ;;  %v12644_v36 = vpop.eup %12643  ;;  %9419 = vst.msk [vmem:[%s15957_s27 + $0x88] sm:$0xff] %vm984_vm0, %v11125_v19  ;;  %v16989_v32 = vld [vmem:[#allocation36_spill] sm:$0xff]  ;;  %v968_v12 = vld [vmem:[%s14465_s7 + $0x380] sm:$0xff] }
 0x3af   : > { %12655 = vrcp.f32 %v5960_v34  ;;  %v6764_v53 = vpop.f32.mrb[73].mxu0  ;;  %12096 = vmatprep.subr.bf16.mxu1 %v12095_v58  ;;  %v11139_v40 = vpop.f32.mrb[72].mxu1  ;;  %v6233_v27 = vmul.f32 %v12644_v36, %v16992_v59  ;;  %v973_v34 = vld [vmem:[%s14465_s7 + $0x3a8] sm:$0xff]  ;;  %v12115_v36 = vpack.c.bf16 %v969_v18, %v968_v12 }
 0x3b0   : > { %v12646_v39 = vpop.eup %12645  ;;  %9418 = vst.msk [vmem:[%s15957_s27 + $0x80] sm:$0xff] %vm984_vm0, %v6764_v53  ;;  %9423 = vst.msk [vmem:[%s15957_s27 + $0xa8] sm:$0xff] %vm984_vm0, %v11139_v40  ;;  %v6861_v10 = vpop.f32.mrb[73].mxu1 }
 0x3b1   : > { %v12648_v0 = vpop.eup %12647  ;;  %v5957_v50 = vpop.xlane.xlu0 %5956  ;;  %v6223_v37 = vmul.f32 %v12646_v39, %v16989_v32  ;;  %12090 = vmatpush3.bf16.msra.mxu0 %v12087_v46  ;;  %9422 = vst.msk [vmem:[%s15957_s27 + $0xa0] sm:$0xff] %vm984_vm0, %v6861_v10 }
 0x3b2   : > { %v5969_v35 = vpop.xlane.xlu1 %5968  ;;  %v6231_v13 = vmul.f32 %v12648_v0, %v16991_v49  ;;  %12098 = vmatpush3.bf16.msra.mxu1 %v12095_v58  ;;  %12100 = vmatprep.subr.bf16.mxu0 %v12099_v21  ;;  %12657 = vrcp.f32 %v5957_v50 }
 0x3b3   : > { %11378 = vmatprep.mubr.msk.f32.mxu0 %vm4889_vm2, %v6223_v37  ;;  %12108 = vmatprep.subr.bf16.mxu1 %v12107_v16  ;;  %12659 = vrcp.f32 %v5969_v35 }
 0x3b4   : > { %11379 = vmatmul.mubr.msk.f32.gmra.mrb[110].mxu0 %vm4889_vm2, %v6225_v28  ;;  %11392 = vmatprep.mubr.msk.f32.mxu1 %vm4889_vm2, %v6231_v13  ;;  %v12650_v54 = vpop.eup %12649  ;;  %v970_v13 = vld [vmem:[%s14465_s7 + $0x390] sm:$0xff] }
 0x3b5   : > { %11393 = vmatmul.mubr.msk.f32.gmra.mrb[110].mxu1 %vm4889_vm2, %v6233_v27  ;;  %v5954_v52 = vpop.xlane.xlu0 %5953  ;;  %v12652_v17 = vpop.eup %12651  ;;  %v6237_v24 = vmul.f32 %v12650_v54, %v15668_v1  ;;  %v974_v27 = vld [vmem:[%s14465_s7 + $0x3b0] sm:$0xff] }
 0x3b6   : > { %12661 = vrcp.f32 %v5954_v52  ;;  %v5966_v60 = vpop.xlane.xlu1 %5965  ;;  %v6245_v51 = vmul.f32 %v12652_v17, %v15674_v8  ;;  %v975_v52 = vld [vmem:[%s14465_s7 + $0x3b8] sm:$0xff] }
 0x3b7   : > { %12663 = vrcp.f32 %v5966_v60 }
 0x3b8   : > { %v12654_v15 = vpop.eup %12653 }
 0x3b9   : > { %v12656_v4 = vpop.eup %12655  ;;  %v5975_v46 = vpop.xlane.xlu0 %5974  ;;  %v6235_v31 = vmul.f32 %v12654_v15, %v15696_v14  ;;  %v972_v14 = vld [vmem:[%s14465_s7 + $0x3a0] sm:$0xff]  ;;  %v16993_v15 = vld [vmem:[#allocation39_spill] sm:$0xff] }
 0x3ba   : > { %v5987_v58 = vpop.xlane.xlu1 %5986  ;;  %v6243_v61 = vmul.f32 %v12656_v4, %v15707_v42  ;;  %12665 = vrcp.f32 %v5975_v46  ;;  %v12123_v40 = vpack.c.bf16 %v973_v34, %v972_v14  ;;  %v16994_v4 = vld [vmem:[#allocation38_spill] sm:$0xff] }
 0x3bb   : > { %11403 = vmatprep.mubr.msk.f32.mxu0 %vm4889_vm2, %v6235_v31  ;;  %12667 = vrcp.f32 %v5987_v58  ;;  %v12127_v31 = vpack.c.bf16 %v975_v52, %v974_v27  ;;  %v977_v58 = vld [vmem:[%s14465_s7 + $0x3c8] sm:$0xff] }
 0x3bc   : > { %11404 = vmatmul.mubr.msk.f32.vlgmr.msra.gmra.mrb[112].mxu0 %vm4889_vm2, %v6237_v24  ;;  %11417 = vmatprep.mubr.msk.f32.mxu1 %vm4889_vm2, %v6243_v61  ;;  %v12658_v8 = vpop.eup %12657  ;;  %v976_v24 = vld [vmem:[%s14465_s7 + $0x3c0] sm:$0xff] }
 0x3bd   : > { %11418 = vmatmul.mubr.msk.f32.vlgmr.msra.gmra.mrb[112].mxu1 %vm4889_vm2, %v6245_v51  ;;  %v5972_v1 = vpop.xlane.xlu0 %5971  ;;  %12102 = vmatpush3.bf16.msra.mxu0 %v12099_v21  ;;  %v11128_v19 = vpop.f32.mrb[74].mxu0  ;;  %v6241_v35 = vmul.f32 %v12658_v8, %v15720_v11  ;;  %v980_v61 = vld [vmem:[%s14465_s7 + $0x3e0] sm:$0xff] }
 0x3be   : > { %12669 = vrcp.f32 %v5972_v1  ;;  %v5984_v42 = vpop.xlane.xlu1 %5983  ;;  %12110 = vmatpush3.bf16.msra.mxu1 %v12107_v16  ;;  %12104 = vmatprep.subr.bf16.mxu0 %v12103_v43  ;;  %v12660_v53 = vpop.eup %12659  ;;  %9421 = vst.msk [vmem:[%s15957_s27 + $0x98] sm:$0xff] %vm984_vm0, %v11128_v19 }
 0x3bf   : > { %12671 = vrcp.f32 %v5984_v42  ;;  %v6774_v39 = vpop.f32.mrb[75].mxu0  ;;  %12112 = vmatprep.subr.bf16.mxu1 %v12111_v62  ;;  %v11142_v21 = vpop.f32.mrb[74].mxu1  ;;  %v6249_v28 = vmul.f32 %v12660_v53, %v15728_v9  ;;  %v971_v9 = vld [vmem:[%s14465_s7 + $0x398] sm:$0xff] }
 0x3c0   : > { %v12662_v0 = vpop.eup %12661  ;;  %9420 = vst.msk [vmem:[%s15957_s27 + $0x90] sm:$0xff] %vm984_vm0, %v6774_v39  ;;  %9425 = vst.msk [vmem:[%s15957_s27 + $0xb8] sm:$0xff] %vm984_vm0, %v11142_v21  ;;  %v6871_v50 = vpop.f32.mrb[75].mxu1  ;;  %v12119_v2 = vpack.c.bf16 %v971_v9, %v970_v13  ;;  %v983_v13 = vld [vmem:[%s14465_s7 + $0x3f8] sm:$0xff] }
 0x3c1   : > { %v12664_v10 = vpop.eup %12663  ;;  %v5981_v32 = vpop.xlane.xlu0 %5980  ;;  %v6239_v16 = vmul.f32 %v12662_v0, %v15734_v33  ;;  %12106 = vmatpush3.bf16.msra.mxu0 %v12103_v43  ;;  %9424 = vst.msk [vmem:[%s15957_s27 + $0xb0] sm:$0xff] %vm984_vm0, %v6871_v50  ;;  %v16996_v0 = vld [vmem:[#allocation41_spill] sm:$0xff] }
 0x3c2   : > { %v5993_v37 = vpop.xlane.xlu1 %5992  ;;  %v6247_v30 = vmul.f32 %v12664_v10, %v15740_v29  ;;  %12114 = vmatpush3.bf16.msra.mxu1 %v12111_v62  ;;  %12116 = vmatprep.subr.bf16.mxu0 %v12115_v36  ;;  %12673 = vrcp.f32 %v5981_v32  ;;  %v12131_v62 = vpack.c.bf16 %v977_v58, %v976_v24  ;;  %v16997_v10 = vld [vmem:[#allocation43_spill] sm:$0xff]  ;;  %v16998_v32 = vld [vmem:[#allocation40_spill] sm:$0xff] }
 0x3c3   : > { %11406 = vmatprep.mubr.msk.f32.mxu0 %vm4889_vm2, %v6239_v16  ;;  %12124 = vmatprep.subr.bf16.mxu1 %v12123_v40  ;;  %12675 = vrcp.f32 %v5993_v37 }
 0x3c4   : > { %11407 = vmatmul.mubr.msk.f32.gmra.mrb[114].mxu0 %vm4889_vm2, %v6241_v35  ;;  %11420 = vmatprep.mubr.msk.f32.mxu1 %vm4889_vm2, %v6247_v30  ;;  %v12666_v33 = vpop.eup %12665 }
 0x3c5   : > { %11421 = vmatmul.mubr.msk.f32.gmra.mrb[114].mxu1 %vm4889_vm2, %v6249_v28  ;;  %v5978_v11 = vpop.xlane.xlu0 %5977  ;;  %v12668_v49 = vpop.eup %12667  ;;  %v6253_v17 = vmul.f32 %v12666_v33, %v15745_v55  ;;  %v979_v33 = vld [vmem:[%s14465_s7 + $0x3d8] sm:$0xff] }
 0x3c6   : > { %12677 = vrcp.f32 %v5978_v11  ;;  %v5990_v29 = vpop.xlane.xlu1 %5989  ;;  %v6261_v46 = vmul.f32 %v12668_v49, %v16994_v4  ;;  %v978_v11 = vld [vmem:[%s14465_s7 + $0x3d0] sm:$0xff] }
 0x3c7   : > { %12679 = vrcp.f32 %v5990_v29  ;;  %v982_v49 = vld [vmem:[%s14465_s7 + $0x3f0] sm:$0xff] }
 0x3c8   : > { %v12670_v59 = vpop.eup %12669 }
 0x3c9   : > { %v12672_v54 = vpop.eup %12671  ;;  %v6251_v60 = vmul.f32 %v12670_v59, %v15772_v23  ;;  %v5999_v41 = vpop.xlane.xlu0 %5998  ;;  %v981_v23 = vld [vmem:[%s14465_s7 + $0x3e8] sm:$0xff] }
 0x3ca   : > { %v6011_v5 = vpop.xlane.xlu1 %6010  ;;  %v6259_v6 = vmul.f32 %v12672_v54, %v16993_v15  ;;  %12681 = vrcp.f32 %v5999_v41  ;;  %v12139_v14 = vpack.c.bf16 %v981_v23, %v980_v61 }
 0x3cb   : > { %11431 = vmatprep.mubr.msk.f32.mxu0 %vm4889_vm2, %v6251_v60  ;;  %12683 = vrcp.f32 %v6011_v5  ;;  %v12143_v5 = vpack.c.bf16 %v983_v13, %v982_v49 }
 0x3cc   : > { %11432 = vmatmul.mubr.msk.f32.vlgmr.msra.gmra.mrb[116].mxu0 %vm4889_vm2, %v6253_v17  ;;  %11445 = vmatprep.mubr.msk.f32.mxu1 %vm4889_vm2, %v6259_v6  ;;  %v12674_v55 = vpop.eup %12673  ;;  %v12135_v17 = vpack.c.bf16 %v979_v33, %v978_v11 }
 0x3cd   : > { %11446 = vmatmul.mubr.msk.f32.vlgmr.msra.gmra.mrb[116].mxu1 %vm4889_vm2, %v6261_v46  ;;  %12118 = vmatpush3.bf16.msra.mxu0 %v12115_v36  ;;  %v5996_v43 = vpop.xlane.xlu0 %5995  ;;  %v12676_v12 = vpop.eup %12675  ;;  %v16995_v36 = vld [vmem:[#allocation82_spill] sm:$0xff]  ;;  %v6257_v21 = vmul.f32 %v12674_v55, %v16996_v0 }
 0x3ce   : > { %v6008_v51 = vpop.xlane.xlu1 %6007  ;;  %12126 = vmatpush3.bf16.msra.mxu1 %v12123_v40  ;;  %12120 = vmatprep.subr.bf16.mxu0 %v12119_v2  ;;  %12685 = vrcp.f32 %v5996_v43  ;;  %v11153_v18 = vpop.f32.mrb[76].mxu0  ;;  %v6265_v16 = vmul.f32 %v12676_v12, %v16998_v32 }
 0x3cf   : > { %12128 = vmatprep.subr.bf16.mxu1 %v12127_v31  ;;  %12687 = vrcp.f32 %v6008_v51  ;;  %9427 = vst.msk [vmem:[%s15957_s27 + $0xc8] sm:$0xff] %vm984_vm0, %v11153_v18  ;;  %v6958_v1 = vpop.f32.mrb[77].mxu0  ;;  %v11167_v8 = vpop.f32.mrb[76].mxu1 }
 0x3d0   : > { %v12678_v34 = vpop.eup %12677  ;;  %9426 = vst.msk [vmem:[%s15957_s27 + $0xc0] sm:$0xff] %vm984_vm0, %v6958_v1  ;;  %9431 = vst.msk [vmem:[%s15957_s27 + $0xe8] sm:$0xff] %vm984_vm0, %v11167_v8  ;;  %v7055_v19 = vpop.f32.mrb[77].mxu1 }
 0x3d1   : > { %v12680_v42 = vpop.eup %12679  ;;  %v6255_v53 = vmul.f32 %v12678_v34, %v16995_v36  ;;  %12122 = vmatpush3.bf16.msra.mxu0 %v12119_v2  ;;  %9430 = vst.msk [vmem:[%s15957_s27 + $0xe0] sm:$0xff] %vm984_vm0, %v7055_v19  ;;  %v6005_v39 = vpop.xlane.xlu0 %6004 }
 0x3d2   : > { %v6017_v40 = vpop.xlane.xlu1 %6016  ;;  %v6263_v50 = vmul.f32 %v12680_v42, %v16997_v10  ;;  %12130 = vmatpush3.bf16.msra.mxu1 %v12127_v31  ;;  %12132 = vmatprep.subr.bf16.mxu0 %v12131_v62  ;;  %12689 = vrcp.f32 %v6005_v39  ;;  %v17000_v39 = vld [vmem:[#allocation80_spill] sm:$0xff] }
 0x3d3   : > { %11434 = vmatprep.mubr.msk.f32.mxu0 %vm4889_vm2, %v6255_v53  ;;  %12140 = vmatprep.subr.bf16.mxu1 %v12139_v14  ;;  %12691 = vrcp.f32 %v6017_v40 }
 0x3d4   : > { %11435 = vmatmul.mubr.msk.f32.gmra.mrb[118].mxu0 %vm4889_vm2, %v6257_v21  ;;  %11448 = vmatprep.mubr.msk.f32.mxu1 %vm4889_vm2, %v6263_v50  ;;  %v12682_v30 = vpop.eup %12681 }
 0x3d5   : > { %11449 = vmatmul.mubr.msk.f32.gmra.mrb[118].mxu1 %vm4889_vm2, %v6265_v16  ;;  %v6002_v37 = vpop.xlane.xlu0 %6001  ;;  %v12684_v28 = vpop.eup %12683  ;;  %v6269_v54 = vmul.f32 %v12682_v30, %v15810_v3 }
 0x3d6   : > { %v6014_v35 = vpop.xlane.xlu1 %6013  ;;  %12693 = vrcp.f32 %v6002_v37  ;;  %v6277_v41 = vmul.f32 %v12684_v28, %v15812_v57 }
 0x3d7   : > { %12695 = vrcp.f32 %v6014_v35 }
 0x3d8   : > { %v12686_v29 = vpop.eup %12685 }
 0x3d9   : > { %v12688_v9 = vpop.eup %12687  ;;  %v6023_v59 = vpop.xlane.xlu0 %6022  ;;  %v6267_v52 = vmul.f32 %v12686_v29, %v15828_v56 }
 0x3da   : > { %v6035_v27 = vpop.xlane.xlu1 %6034  ;;  %v6275_v60 = vmul.f32 %v12688_v9, %v15839_v48  ;;  %12697 = vrcp.f32 %v6023_v59 }
 0x3db   : > { %11459 = vmatprep.mubr.msk.f32.mxu0 %vm4889_vm2, %v6267_v52  ;;  %12699 = vrcp.f32 %v6035_v27 }
 0x3dc   : > { %11460 = vmatmul.mubr.msk.f32.vlgmr.msra.gmra.mrb[120].mxu0 %vm4889_vm2, %v6269_v54  ;;  %11473 = vmatprep.mubr.msk.f32.mxu1 %vm4889_vm2, %v6275_v60  ;;  %v12690_v48 = vpop.eup %12689 }
 0x3dd   : > { %11474 = vmatmul.mubr.msk.f32.vlgmr.msra.gmra.mrb[120].mxu1 %vm4889_vm2, %v6277_v41  ;;  %v6020_v56 = vpop.xlane.xlu0 %6019  ;;  %12134 = vmatpush3.bf16.msra.mxu0 %v12131_v62  ;;  %v11156_v57 = vpop.f32.mrb[78].mxu0  ;;  %v6273_v23 = vmul.f32 %v12690_v48, %v15848_v45 }
 0x3de   : > { %v6032_v3 = vpop.xlane.xlu1 %6031  ;;  %12701 = vrcp.f32 %v6020_v56  ;;  %12142 = vmatpush3.bf16.msra.mxu1 %v12139_v14  ;;  %12136 = vmatprep.subr.bf16.mxu0 %v12135_v17  ;;  %v12692_v15 = vpop.eup %12691  ;;  %9429 = vst.msk [vmem:[%s15957_s27 + $0xd8] sm:$0xff] %vm984_vm0, %v11156_v57 }
 0x3df   : > { %12703 = vrcp.f32 %v6032_v3  ;;  %v6968_v6 = vpop.f32.mrb[79].mxu0  ;;  %v11170_v2 = vpop.f32.mrb[78].mxu1  ;;  %12144 = vmatprep.subr.bf16.mxu1 %v12143_v5  ;;  %v6281_v43 = vmul.f32 %v12692_v15, %v15856_v22 }
 0x3e0   : > { %v12694_v4 = vpop.eup %12693  ;;  %9428 = vst.msk [vmem:[%s15957_s27 + $0xd0] sm:$0xff] %vm984_vm0, %v6968_v6  ;;  %9433 = vst.msk [vmem:[%s15957_s27 + $0xf8] sm:$0xff] %vm984_vm0, %v11170_v2  ;;  %v7065_v46 = vpop.f32.mrb[79].mxu1 }
 0x3e1   : > { %v12696_v31 = vpop.eup %12695  ;;  %9432 = vst.msk [vmem:[%s15957_s27 + $0xf0] sm:$0xff] %vm984_vm0, %v7065_v46  ;;  %v6271_v24 = vmul.f32 %v12694_v4, %v15858_v38  ;;  %12138 = vmatpush3.bf16.msra.mxu0 %v12135_v17 }
 0x3e2   : > { %v6026_v58 = vpop.xlane.xlu0 %6025  ;;  %v6279_v61 = vmul.f32 %v12696_v31, %v15862_v25  ;;  %12146 = vmatpush3.bf16.msra.mxu1 %v12143_v5 }
 0x3e3   : > { %11462 = vmatprep.mubr.msk.f32.mxu0 %vm4889_vm2, %v6271_v24  ;;  %12705 = vrcp.f32 %v6026_v58  ;;  %v6038_v55 = vpop.xlane.xlu1 %6037 }
 0x3e4   : > { %11476 = vmatprep.mubr.msk.f32.mxu1 %vm4889_vm2, %v6279_v61  ;;  %12707 = vrcp.f32 %v6038_v55  ;;  %11463 = vmatmul.mubr.msk.f32.gmra.mrb[122].mxu0 %vm4889_vm2, %v6273_v23  ;;  %v12698_v38 = vpop.eup %12697 }
 0x3e5   : > { %11477 = vmatmul.mubr.msk.f32.gmra.mrb[122].mxu1 %vm4889_vm2, %v6281_v43  ;;  %v12700_v62 = vpop.eup %12699  ;;  %v6285_v22 = vmul.f32 %v12698_v38, %v15865_v47 }
 0x3e6   : > { %v6029_v51 = vpop.xlane.xlu0 %6028  ;;  %v6293_v34 = vmul.f32 %v12700_v62, %v15872_v44 }
 0x3e7   : > { %12709 = vrcp.f32 %v6029_v51  ;;  %v6041_v45 = vpop.xlane.xlu1 %6040 }
 0x3e8   : > { %v12702_v25 = vpop.eup %12701  ;;  %12711 = vrcp.f32 %v6041_v45 }
 0x3e9   : > { %v12704_v12 = vpop.eup %12703  ;;  %v6283_v18 = vmul.f32 %v12702_v25, %v15884_v20 }
 0x3ea   : > { %v6291_v14 = vmul.f32 %v12704_v12, %v15893_v26  ;;  %v16999_v26 = vld [vmem:[#allocation83_spill] sm:$0xff] }
 0x3eb   : > { %11487 = vmatprep.mubr.msk.f32.mxu0 %vm4889_vm2, %v6283_v18 }
 0x3ec   : > { %11488 = vmatmul.mubr.msk.f32.vlgmr.msra.gmra.mrb[124].mxu0 %vm4889_vm2, %v6285_v22  ;;  %11501 = vmatprep.mubr.msk.f32.mxu1 %vm4889_vm2, %v6291_v14 }
 0x3ed   : > { %v12706_v1 = vpop.eup %12705  ;;  %11502 = vmatmul.mubr.msk.f32.vlgmr.msra.gmra.mrb[124].mxu1 %vm4889_vm2, %v6293_v34  ;;  %v11181_v8 = vpop.f32.mrb[80].mxu0 }
 0x3ee   : > { %v12708_v42 = vpop.eup %12707  ;;  %9435 = vst.msk [vmem:[%s15957_s27 + $0x108] sm:$0xff] %vm984_vm0, %v11181_v8  ;;  %v7152_v47 = vpop.f32.mrb[81].mxu0  ;;  %v6287_v20 = vmul.f32 %v12706_v1, %v15904_v7 }
 0x3ef   : > { %9434 = vst.msk [vmem:[%s15957_s27 + $0x100] sm:$0xff] %vm984_vm0, %v7152_v47  ;;  %v11195_v44 = vpop.f32.mrb[80].mxu1  ;;  %v6295_v19 = vmul.f32 %v12708_v42, %v16999_v26 }
 0x3f0   : > { %9439 = vst.msk [vmem:[%s15957_s27 + $0x128] sm:$0xff] %vm984_vm0, %v11195_v44  ;;  %v7249_v36 = vpop.f32.mrb[81].mxu1  ;;  %11490 = vmatprep.mubr.msk.f32.mxu0 %vm4889_vm2, %v6287_v20 }
 0x3f1   : > { %v12710_v53 = vpop.eup %12709  ;;  %9438 = vst.msk [vmem:[%s15957_s27 + $0x120] sm:$0xff] %vm984_vm0, %v7249_v36  ;;  %11504 = vmatprep.mubr.msk.f32.mxu1 %vm4889_vm2, %v6295_v19 }
 0x3f2   : > { %v12712_v7 = vpop.eup %12711  ;;  %v6289_v40 = vmul.f32 %v12710_v53, %v17000_v39 }
 0x3f3   : > { %v6297_v0 = vmul.f32 %v12712_v7, %v15902_v63 }
 0x3f4   : > { %11491 = vmatmul.mubr.msk.f32.gmra.mrb[126].mxu0 %vm4889_vm2, %v6289_v40 }
 0x3f5   : > { %11505 = vmatmul.mubr.msk.f32.gmra.mrb[126].mxu1 %vm4889_vm2, %v6297_v0 }
 0x3fd   : > { %v11184_v21 = vpop.f32.mrb[82].mxu0 }
 0x3fe   : > { %9437 = vst.msk [vmem:[%s15957_s27 + $0x118] sm:$0xff] %vm984_vm0, %v11184_v21  ;;  %v7162_v10 = vpop.f32.mrb[83].mxu0 }
 0x3ff   : > { %9436 = vst.msk [vmem:[%s15957_s27 + $0x110] sm:$0xff] %vm984_vm0, %v7162_v10  ;;  %v11198_v50 = vpop.f32.mrb[82].mxu1 }
 0x400   : > { %9441 = vst.msk [vmem:[%s15957_s27 + $0x138] sm:$0xff] %vm984_vm0, %v11198_v50  ;;  %v7259_v32 = vpop.f32.mrb[83].mxu1 }
 0x401   : > { %9440 = vst.msk [vmem:[%s15957_s27 + $0x130] sm:$0xff] %vm984_vm0, %v7259_v32 }
 0x40d   : > { %v11209_v63 = vpop.f32.mrb[84].mxu0 }
 0x40e   : > { %9443 = vst.msk [vmem:[%s15957_s27 + $0x148] sm:$0xff] %vm984_vm0, %v11209_v63  ;;  %v7346_v16 = vpop.f32.mrb[85].mxu0 }
 0x40f   : > { %9442 = vst.msk [vmem:[%s15957_s27 + $0x140] sm:$0xff] %vm984_vm0, %v7346_v16  ;;  %v11223_v37 = vpop.f32.mrb[84].mxu1 }
 0x410   : > { %9447 = vst.msk [vmem:[%s15957_s27 + $0x168] sm:$0xff] %vm984_vm0, %v11223_v37  ;;  %v7443_v35 = vpop.f32.mrb[85].mxu1 }
 0x411   : > { %9446 = vst.msk [vmem:[%s15957_s27 + $0x160] sm:$0xff] %vm984_vm0, %v7443_v35 }
 0x41e   : > { %v11212_v30 = vpop.f32.mrb[86].mxu0 }
 0x41f   : > { %9445 = vst.msk [vmem:[%s15957_s27 + $0x158] sm:$0xff] %vm984_vm0, %v11212_v30  ;;  %v7356_v28 = vpop.f32.mrb[87].mxu0 }
 0x420   : > { %9444 = vst.msk [vmem:[%s15957_s27 + $0x150] sm:$0xff] %vm984_vm0, %v7356_v28  ;;  %v11226_v11 = vpop.f32.mrb[86].mxu1 }
 0x421   : > { %9449 = vst.msk [vmem:[%s15957_s27 + $0x178] sm:$0xff] %vm984_vm0, %v11226_v11  ;;  %v7453_v33 = vpop.f32.mrb[87].mxu1 }
 0x422   : > { %9448 = vst.msk [vmem:[%s15957_s27 + $0x170] sm:$0xff] %vm984_vm0, %v7453_v33 }
 0x42e   : > { %v11237_v29 = vpop.f32.mrb[88].mxu0 }
 0x42f   : > { %9451 = vst.msk [vmem:[%s15957_s27 + $0x188] sm:$0xff] %vm984_vm0, %v11237_v29  ;;  %v7540_v49 = vpop.f32.mrb[89].mxu0  ;;  %v11251_v13 = vpop.f32.mrb[88].mxu1 }
 0x430   : > { %9450 = vst.msk [vmem:[%s15957_s27 + $0x180] sm:$0xff] %vm984_vm0, %v7540_v49  ;;  %9455 = vst.msk [vmem:[%s15957_s27 + $0x1a8] sm:$0xff] %vm984_vm0, %v11251_v13  ;;  %v7637_v9 = vpop.f32.mrb[89].mxu1 }
 0x431   : > { %9454 = vst.msk [vmem:[%s15957_s27 + $0x1a0] sm:$0xff] %vm984_vm0, %v7637_v9 }
 0x436   : > { %v11240_v59 = vpop.f32.mrb[90].mxu0 }
 0x437   : > { %9453 = vst.msk [vmem:[%s15957_s27 + $0x198] sm:$0xff] %vm984_vm0, %v11240_v59  ;;  %v7550_v27 = vpop.f32.mrb[91].mxu0  ;;  %v11254_v52 = vpop.f32.mrb[90].mxu1 }
 0x438   : > { %9452 = vst.msk [vmem:[%s15957_s27 + $0x190] sm:$0xff] %vm984_vm0, %v7550_v27  ;;  %9457 = vst.msk [vmem:[%s15957_s27 + $0x1b8] sm:$0xff] %vm984_vm0, %v11254_v52  ;;  %v7647_v54 = vpop.f32.mrb[91].mxu1 }
 0x439   : > { %9456 = vst.msk [vmem:[%s15957_s27 + $0x1b0] sm:$0xff] %vm984_vm0, %v7647_v54 }
 0x43e   : > { %v11265_v60 = vpop.f32.mrb[92].mxu0 }
 0x43f   : > { %9459 = vst.msk [vmem:[%s15957_s27 + $0x1c8] sm:$0xff] %vm984_vm0, %v11265_v60  ;;  %v7734_v17 = vpop.f32.mrb[93].mxu0  ;;  %v11279_v41 = vpop.f32.mrb[92].mxu1 }
 0x440   : > { %9458 = vst.msk [vmem:[%s15957_s27 + $0x1c0] sm:$0xff] %vm984_vm0, %v7734_v17  ;;  %9463 = vst.msk [vmem:[%s15957_s27 + $0x1e8] sm:$0xff] %vm984_vm0, %v11279_v41  ;;  %v7831_v5 = vpop.f32.mrb[93].mxu1 }
 0x441   : > { %9462 = vst.msk [vmem:[%s15957_s27 + $0x1e0] sm:$0xff] %vm984_vm0, %v7831_v5 }
 0x446   : > { %v11268_v56 = vpop.f32.mrb[94].mxu0 }
 0x447   : > { %9461 = vst.msk [vmem:[%s15957_s27 + $0x1d8] sm:$0xff] %vm984_vm0, %v11268_v56  ;;  %v7744_v3 = vpop.f32.mrb[95].mxu0  ;;  %v11282_v48 = vpop.f32.mrb[94].mxu1 }
 0x448   : > { %9460 = vst.msk [vmem:[%s15957_s27 + $0x1d0] sm:$0xff] %vm984_vm0, %v7744_v3  ;;  %9465 = vst.msk [vmem:[%s15957_s27 + $0x1f8] sm:$0xff] %vm984_vm0, %v11282_v48  ;;  %v7841_v57 = vpop.f32.mrb[95].mxu1 }
 0x449   : > { %9464 = vst.msk [vmem:[%s15957_s27 + $0x1f0] sm:$0xff] %vm984_vm0, %v7841_v57 }
 0x44e   : > { %v11293_v15 = vpop.f32.mrb[96].mxu0 }
 0x44f   : > { %9467 = vst.msk [vmem:[%s15957_s27 + $0x208] sm:$0xff] %vm984_vm0, %v11293_v15  ;;  %v7928_v6 = vpop.f32.mrb[97].mxu0  ;;  %v11307_v2 = vpop.f32.mrb[96].mxu1 }
 0x450   : > { %9466 = vst.msk [vmem:[%s15957_s27 + $0x200] sm:$0xff] %vm984_vm0, %v7928_v6  ;;  %9471 = vst.msk [vmem:[%s15957_s27 + $0x228] sm:$0xff] %vm984_vm0, %v11307_v2  ;;  %v8025_v4 = vpop.f32.mrb[97].mxu1 }
 0x451   : > { %9470 = vst.msk [vmem:[%s15957_s27 + $0x220] sm:$0xff] %vm984_vm0, %v8025_v4 }
 0x456   : > { %v11296_v46 = vpop.f32.mrb[98].mxu0 }
 0x457   : > { %9469 = vst.msk [vmem:[%s15957_s27 + $0x218] sm:$0xff] %vm984_vm0, %v11296_v46  ;;  %v7938_v31 = vpop.f32.mrb[99].mxu0  ;;  %v11310_v24 = vpop.f32.mrb[98].mxu1 }
 0x458   : > { %9468 = vst.msk [vmem:[%s15957_s27 + $0x210] sm:$0xff] %vm984_vm0, %v7938_v31  ;;  %9473 = vst.msk [vmem:[%s15957_s27 + $0x238] sm:$0xff] %vm984_vm0, %v11310_v24  ;;  %v8035_v58 = vpop.f32.mrb[99].mxu1 }
 0x459   : > { %9472 = vst.msk [vmem:[%s15957_s27 + $0x230] sm:$0xff] %vm984_vm0, %v8035_v58 }
 0x45e   : > { %v11321_v61 = vpop.f32.mrb[100].mxu0 }
 0x45f   : > { %9475 = vst.msk [vmem:[%s15957_s27 + $0x248] sm:$0xff] %vm984_vm0, %v11321_v61  ;;  %v8122_v23 = vpop.f32.mrb[101].mxu0  ;;  %v11335_v55 = vpop.f32.mrb[100].mxu1 }
 0x460   : > { %9474 = vst.msk [vmem:[%s15957_s27 + $0x240] sm:$0xff] %vm984_vm0, %v8122_v23  ;;  %9479 = vst.msk [vmem:[%s15957_s27 + $0x268] sm:$0xff] %vm984_vm0, %v11335_v55  ;;  %v8219_v43 = vpop.f32.mrb[101].mxu1 }
 0x461   : > { %9478 = vst.msk [vmem:[%s15957_s27 + $0x260] sm:$0xff] %vm984_vm0, %v8219_v43 }
 0x467   : > { %v11324_v38 = vpop.f32.mrb[102].mxu0 }
 0x468   : > { %9477 = vst.msk [vmem:[%s15957_s27 + $0x258] sm:$0xff] %vm984_vm0, %v11324_v38  ;;  %v8132_v51 = vpop.f32.mrb[103].mxu0  ;;  %v11338_v62 = vpop.f32.mrb[102].mxu1 }
 0x469   : > { %9476 = vst.msk [vmem:[%s15957_s27 + $0x250] sm:$0xff] %vm984_vm0, %v8132_v51  ;;  %9481 = vst.msk [vmem:[%s15957_s27 + $0x278] sm:$0xff] %vm984_vm0, %v11338_v62  ;;  %v8229_v45 = vpop.f32.mrb[103].mxu1 }
 0x46a   : > { %9480 = vst.msk [vmem:[%s15957_s27 + $0x270] sm:$0xff] %vm984_vm0, %v8229_v45 }
 0x46f   : > { %v11349_v25 = vpop.f32.mrb[104].mxu0 }
 0x470   : > { %9483 = vst.msk [vmem:[%s15957_s27 + $0x288] sm:$0xff] %vm984_vm0, %v11349_v25  ;;  %v8316_v12 = vpop.f32.mrb[105].mxu0  ;;  %v11363_v18 = vpop.f32.mrb[104].mxu1 }
 0x471   : > { %9482 = vst.msk [vmem:[%s15957_s27 + $0x280] sm:$0xff] %vm984_vm0, %v8316_v12  ;;  %9487 = vst.msk [vmem:[%s15957_s27 + $0x2a8] sm:$0xff] %vm984_vm0, %v11363_v18  ;;  %v8413_v22 = vpop.f32.mrb[105].mxu1 }
 0x472   : > { %9486 = vst.msk [vmem:[%s15957_s27 + $0x2a0] sm:$0xff] %vm984_vm0, %v8413_v22 }
 0x477   : > { %v11352_v14 = vpop.f32.mrb[106].mxu0 }
 0x478   : > { %9485 = vst.msk [vmem:[%s15957_s27 + $0x298] sm:$0xff] %vm984_vm0, %v11352_v14  ;;  %v8326_v34 = vpop.f32.mrb[107].mxu0  ;;  %v11366_v1 = vpop.f32.mrb[106].mxu1 }
 0x479   : > { %9484 = vst.msk [vmem:[%s15957_s27 + $0x290] sm:$0xff] %vm984_vm0, %v8326_v34  ;;  %9489 = vst.msk [vmem:[%s15957_s27 + $0x2b8] sm:$0xff] %vm984_vm0, %v11366_v1  ;;  %v8423_v8 = vpop.f32.mrb[107].mxu1 }
 0x47a   : > { %9488 = vst.msk [vmem:[%s15957_s27 + $0x2b0] sm:$0xff] %vm984_vm0, %v8423_v8 }
 0x47f   : > { %v11377_v42 = vpop.f32.mrb[108].mxu0 }
 0x480   : > { %9491 = vst.msk [vmem:[%s15957_s27 + $0x2c8] sm:$0xff] %vm984_vm0, %v11377_v42  ;;  %v8510_v47 = vpop.f32.mrb[109].mxu0  ;;  %v11391_v20 = vpop.f32.mrb[108].mxu1 }
 0x481   : > { %9490 = vst.msk [vmem:[%s15957_s27 + $0x2c0] sm:$0xff] %vm984_vm0, %v8510_v47  ;;  %9495 = vst.msk [vmem:[%s15957_s27 + $0x2e8] sm:$0xff] %vm984_vm0, %v11391_v20  ;;  %v8607_v44 = vpop.f32.mrb[109].mxu1 }
 0x482   : > { %9494 = vst.msk [vmem:[%s15957_s27 + $0x2e0] sm:$0xff] %vm984_vm0, %v8607_v44 }
 0x487   : > { %v11380_v26 = vpop.f32.mrb[110].mxu0 }
 0x488   : > { %9493 = vst.msk [vmem:[%s15957_s27 + $0x2d8] sm:$0xff] %vm984_vm0, %v11380_v26  ;;  %v8520_v19 = vpop.f32.mrb[111].mxu0  ;;  %v11394_v36 = vpop.f32.mrb[110].mxu1 }
 0x489   : > { %9492 = vst.msk [vmem:[%s15957_s27 + $0x2d0] sm:$0xff] %vm984_vm0, %v8520_v19  ;;  %9497 = vst.msk [vmem:[%s15957_s27 + $0x2f8] sm:$0xff] %vm984_vm0, %v11394_v36  ;;  %v8617_v53 = vpop.f32.mrb[111].mxu1 }
 0x48a   : > { %9496 = vst.msk [vmem:[%s15957_s27 + $0x2f0] sm:$0xff] %vm984_vm0, %v8617_v53 }
 0x48f   : > { %v11405_v7 = vpop.f32.mrb[112].mxu0 }
 0x490   : > { %9499 = vst.msk [vmem:[%s15957_s27 + $0x308] sm:$0xff] %vm984_vm0, %v11405_v7  ;;  %v8704_v39 = vpop.f32.mrb[113].mxu0  ;;  %v11419_v40 = vpop.f32.mrb[112].mxu1 }
 0x491   : > { %9498 = vst.msk [vmem:[%s15957_s27 + $0x300] sm:$0xff] %vm984_vm0, %v8704_v39  ;;  %9503 = vst.msk [vmem:[%s15957_s27 + $0x328] sm:$0xff] %vm984_vm0, %v11419_v40  ;;  %v8801_v0 = vpop.f32.mrb[113].mxu1 }
 0x492   : > { %9502 = vst.msk [vmem:[%s15957_s27 + $0x320] sm:$0xff] %vm984_vm0, %v8801_v0 }
 0x497   : > { %v11408_v21 = vpop.f32.mrb[114].mxu0 }
 0x498   : > { %9501 = vst.msk [vmem:[%s15957_s27 + $0x318] sm:$0xff] %vm984_vm0, %v11408_v21  ;;  %v8714_v10 = vpop.f32.mrb[115].mxu0  ;;  %v11422_v50 = vpop.f32.mrb[114].mxu1 }
 0x499   : > { %9500 = vst.msk [vmem:[%s15957_s27 + $0x310] sm:$0xff] %vm984_vm0, %v8714_v10  ;;  %9505 = vst.msk [vmem:[%s15957_s27 + $0x338] sm:$0xff] %vm984_vm0, %v11422_v50  ;;  %v8811_v32 = vpop.f32.mrb[115].mxu1 }
 0x49a   : > { %9504 = vst.msk [vmem:[%s15957_s27 + $0x330] sm:$0xff] %vm984_vm0, %v8811_v32 }
 0x49f   : > { %v11433_v63 = vpop.f32.mrb[116].mxu0 }
 0x4a0   : > { %9507 = vst.msk [vmem:[%s15957_s27 + $0x348] sm:$0xff] %vm984_vm0, %v11433_v63  ;;  %v8898_v16 = vpop.f32.mrb[117].mxu0  ;;  %v11447_v37 = vpop.f32.mrb[116].mxu1 }
 0x4a1   : > { %9506 = vst.msk [vmem:[%s15957_s27 + $0x340] sm:$0xff] %vm984_vm0, %v8898_v16  ;;  %9511 = vst.msk [vmem:[%s15957_s27 + $0x368] sm:$0xff] %vm984_vm0, %v11447_v37  ;;  %v8995_v35 = vpop.f32.mrb[117].mxu1 }
 0x4a2   : > { %9510 = vst.msk [vmem:[%s15957_s27 + $0x360] sm:$0xff] %vm984_vm0, %v8995_v35 }
 0x4a7   : > { %v11436_v30 = vpop.f32.mrb[118].mxu0 }
 0x4a8   : > { %9509 = vst.msk [vmem:[%s15957_s27 + $0x358] sm:$0xff] %vm984_vm0, %v11436_v30  ;;  %v8908_v28 = vpop.f32.mrb[119].mxu0  ;;  %v11450_v11 = vpop.f32.mrb[118].mxu1 }
 0x4a9   : > { %9508 = vst.msk [vmem:[%s15957_s27 + $0x350] sm:$0xff] %vm984_vm0, %v8908_v28  ;;  %9513 = vst.msk [vmem:[%s15957_s27 + $0x378] sm:$0xff] %vm984_vm0, %v11450_v11  ;;  %v9005_v33 = vpop.f32.mrb[119].mxu1 }
 0x4aa   : > { %9512 = vst.msk [vmem:[%s15957_s27 + $0x370] sm:$0xff] %vm984_vm0, %v9005_v33 }
 0x4af   : > { %v11461_v29 = vpop.f32.mrb[120].mxu0 }
 0x4b0   : > { %9515 = vst.msk [vmem:[%s15957_s27 + $0x388] sm:$0xff] %vm984_vm0, %v11461_v29  ;;  %v9092_v49 = vpop.f32.mrb[121].mxu0  ;;  %v11475_v13 = vpop.f32.mrb[120].mxu1 }
 0x4b1   : > { %9514 = vst.msk [vmem:[%s15957_s27 + $0x380] sm:$0xff] %vm984_vm0, %v9092_v49  ;;  %9519 = vst.msk [vmem:[%s15957_s27 + $0x3a8] sm:$0xff] %vm984_vm0, %v11475_v13  ;;  %v9189_v9 = vpop.f32.mrb[121].mxu1 }
 0x4b2   : > { %9518 = vst.msk [vmem:[%s15957_s27 + $0x3a0] sm:$0xff] %vm984_vm0, %v9189_v9 }
 0x4b7   : > { %v11464_v59 = vpop.f32.mrb[122].mxu0 }
 0x4b8   : > { %9517 = vst.msk [vmem:[%s15957_s27 + $0x398] sm:$0xff] %vm984_vm0, %v11464_v59  ;;  %v9102_v27 = vpop.f32.mrb[123].mxu0  ;;  %v11478_v52 = vpop.f32.mrb[122].mxu1 }
 0x4b9   : > { %9516 = vst.msk [vmem:[%s15957_s27 + $0x390] sm:$0xff] %vm984_vm0, %v9102_v27  ;;  %9521 = vst.msk [vmem:[%s15957_s27 + $0x3b8] sm:$0xff] %vm984_vm0, %v11478_v52  ;;  %v9199_v54 = vpop.f32.mrb[123].mxu1 }
 0x4ba   : > { %9520 = vst.msk [vmem:[%s15957_s27 + $0x3b0] sm:$0xff] %vm984_vm0, %v9199_v54 }
 0x4bf   : > { %v11489_v60 = vpop.f32.mrb[124].mxu0 }
 0x4c0   : > { %9523 = vst.msk [vmem:[%s15957_s27 + $0x3c8] sm:$0xff] %vm984_vm0, %v11489_v60  ;;  %v9286_v17 = vpop.f32.mrb[125].mxu0  ;;  %v11503_v41 = vpop.f32.mrb[124].mxu1 }
 0x4c1   : > { %9522 = vst.msk [vmem:[%s15957_s27 + $0x3c0] sm:$0xff] %vm984_vm0, %v9286_v17  ;;  %9527 = vst.msk [vmem:[%s15957_s27 + $0x3e8] sm:$0xff] %vm984_vm0, %v11503_v41  ;;  %v9383_v5 = vpop.f32.mrb[125].mxu1 }
 0x4c2   : > { %9526 = vst.msk [vmem:[%s15957_s27 + $0x3e0] sm:$0xff] %vm984_vm0, %v9383_v5 }
 0x4c7   : > { %v11492_v56 = vpop.f32.mrb[126].mxu0 }
 0x4c8   : > { %9525 = vst.msk [vmem:[%s15957_s27 + $0x3d8] sm:$0xff] %vm984_vm0, %v11492_v56  ;;  %v9296_v3 = vpop.f32.mrb[127].mxu0  ;;  %v11506_v48 = vpop.f32.mrb[126].mxu1 }
 0x4c9   : > { %9524 = vst.msk [vmem:[%s15957_s27 + $0x3d0] sm:$0xff] %vm984_vm0, %v9296_v3  ;;  %9529 = vst.msk [vmem:[%s15957_s27 + $0x3f8] sm:$0xff] %vm984_vm0, %v11506_v48  ;;  %v9393_v57 = vpop.f32.mrb[127].mxu1 }
 0x4ca   : > { %9528 = vst.msk [vmem:[%s15957_s27 + $0x3f0] sm:$0xff] %vm984_vm0, %v9393_v57 }
 0x4cb PF: > { %p18_p0 = scmp.ge.s32.totalorder %s12900_s23, 6   ;;  %s17001_s18 = smov %s12833_s19 }
 0x4cc   : > { %s17002_s19 = smov %s12837_s20  ;;  %s17003_s20 = smov %s12910_s26 }
 0x4cd   : > { %s17004_s21 = smov %s12900_s23  ;;  %20 = sbr.rel (!%p18_p0) target bundleno = 5 (0x5), region = 110 }
 0x4d4   :  { %9554 = vsyncpa [#allocation3], 1 }
 0x4d5   :  { %9556 = vsyncpa [#allocation3 + $0x1], 1 }
 0x4d6   :  { %9557 = vsyncpa [#allocation5], 1 }
 0x4d7   :  { %9559 = vsyncpa [#allocation5 + $0x1], 1 }

// kernel: earth_attention_3d_forward.5
= control target key start
LH: loop header
LB: loop body
LE: loop exit
PB: predicated region body
PF: predicated region fallthrough
CT: control target
= control target key end

     0   :  { %8 = vsyncpa [#allocation3], 0  ;;  %s1739_s0 = inlined_call_operand.vmem [shape: f32[1024,32], index: 0, kind: input, shape index: {}]   ;;  %s1740_s1 = inlined_call_operand.vmem [shape: f32[32,128], index: 1, kind: input, shape index: {}]   ;;  %s1741_s2 = inlined_call_operand.vmem [shape: f32[1,128], index: 2, kind: input, shape index: {}]   ;;  %s1742_s3 = inlined_call_operand.hbm [shape: f32[1024,128], index: 3, kind: output, shape index: {}]  }
   0x1   :  { %10 = vsyncpa [#allocation3 + $0x1], 0  ;;  %s1355_s12 = smov 0   ;;  %s1357_s13 = smov 0  }
   0x2   :  { %s1359_s14 = smov 0   ;;  %s1361_s15 = smov 0  }
   0x3 LB: > { %s1376_s16 = sadd.s32 4294967295, %s1330_s15   ;;  %s965_s17 = sadd.s32 4294967294, %s1330_s15   ;;  %s1330_s15 = sphi %s1361_s15, %s1748_s15   ;;  %s1326_s14 = sphi %s1359_s14, %s1747_s14   ;;  %s1322_s13 = sphi %s1357_s13, %s1746_s13   ;;  %s1318_s12 = sphi %s1355_s12, %s1745_s12  }
   0x4   : > { %s1380_s18 = sadd.s32 1, %s1330_s15   ;;  %s91_s19 = sadd.s32 1, %s1326_s14 }
   0x5   : > { %s88_s20 = ssub.s32 %s1330_s15, %s1380_s18  ;;  %p101_p0 = scmp.ne.s32.totalorder %s1326_s14, %s1322_s13 }
   0x6   : > { %p89_p1 = scmp.eq.s32.totalorder %s88_s20, 0  ;;  %p102_p2 = scmp.eq.s32.totalorder %s1376_s16, 1 }
   0x7   : > { %p107_p3 = scmp.ne.s32.totalorder %s1322_s13, %s1318_s12  ;;  %p108_p4 = scmp.eq.s32.totalorder %s965_s17, 1 }
   0x8   : > { %s1391_s21 = scalar_select %p89_p1, %s1326_s14, %s91_s19  }
   0x9   : > { %p1393_p5 = por %p102_p2, %p101_p0  ;;  %p1397_p6 = por %p108_p4, %p107_p3 }
   0xa   : > { %p968_p7 = scmp.ge.s32.totalorder %s1330_s15, 1  ;;  %p141_p8 = scmp.lt.s32.totalorder %s1330_s15, 3 }
   0xc   : > { %p142_p9 = pnand %p968_p7, %p141_p8 }
   0xd   : > { %v236_v0 = vld [vmem:[%s1740_s1] sm:$0xff] (!%p142_p9)  ;;  %v237_v1 = vld [vmem:[%s1740_s1 + $0x8] sm:$0xff] (!%p142_p9)  ;;  %v238_v2 = vld [vmem:[%s1740_s1 + $0x10] sm:$0xff] (!%p142_p9)  ;;  %s970_s30 = sshll.u32 (!%p142_p9), %s1376_s16, 6  ;;  %vm247_vm0 = vcmask (!%p142_p9), 261120   ;;  %s162_s10 = sand.u32 (!%p142_p9), 1, %s1322_s13  }
   0xe   : > { %145 = sbr.rel (%p142_p9) target bundleno = 317 (0x13d), region = 32  ;;  %v1215_v3 = vpack.c.bf16 (!%p142_p9), %v237_v1, %v236_v0  ;;  %v239_v4 = vld [vmem:[%s1740_s1 + $0x18] sm:$0xff] (!%p142_p9)  ;;  %p166_p10 = scmp.lt.s32.totalorder (!%p142_p9), %s970_s30, 127 }
   0xf   : > { %v1219_v5 = vpack.c.bf16 (!%p142_p9), %v239_v4, %v238_v2  ;;  %s969_s11 = sshll.u32 (!%p142_p9), %s162_s10, 9  ;;  %s1042_s24 = sshll.u32 (!%p142_p9), %s1376_s16, 13 }
  0x10   : > { %1216 = vmatprep.subr.bf16.mxu0 (!%p142_p9), %v1215_v3  ;;  %1223 = vmatprep.subr.bf16.mxu1 (!%p142_p9), %v1215_v3  ;;  %s1561_s20 = scalar_lea.vmem (!%p142_p9), [#allocation2], %s969_s11  ;;  %s1686_s27 = scalar_lea.hbm (!%p142_p9), %s1742_s3, %s1042_s24 }
  0x11   : > { %1218 = vmatpush3.bf16.msra.mxu0 (!%p142_p9), %v1215_v3  ;;  %1225 = vmatpush3.bf16.msra.mxu1 (!%p142_p9), %v1215_v3  ;;  %s903_s25 = sshll.u32 (!%p142_p9), %s1561_s20, 4  ;;  %s1698_s28 = scalar_lea.sflag (!%p142_p9), [#allocation3], %s162_s10  ;;  %s1688_s25 = int_to_ptr.vmem [resolvable:$true] %s903_s25 }
  0x12   : > { %1220 = vmatprep.subr.bf16.mxu0 (!%p142_p9), %v1219_v5  ;;  %1224 = vmatprep.subr.bf16.mxu1 (!%p142_p9), %v1219_v5  ;;  %s1268_s29 = scalar_lea.vmem (!%p142_p9), %s1688_s25, 8192 }
  0x13   : > { %p1269_p11 = scmp.ne.s32.totalorder (!%p142_p9), %s1688_s25, %s1268_s29 }
  0x15   : > { %s1750_s30 = smov (!%p166_p10, %s970_s30), 127  ;;  %1222 = vmatpush3.bf16.msra.mxu0 %v1219_v5  ;;  %1226 = vmatpush3.bf16.msra.mxu1 %v1219_v5  ;;  %p1270_p12 = pnand %p1269_p11, %p1393_p5 }
  0x16   : > { %s971_s6 = sshll.u32 %s1750_s30, 3  ;;  %s1332_s30 = smov [#allocation2]  }
  0x17   : > { %s1419_s9 = scalar_lea.vmem %s1739_s0, %s971_s6  ;;  %p1271_p13 = pneg %p1270_p12 }
  0x18   : > { %v172_v6 = vld [vmem:[%s1419_s9] sm:$0xff]  ;;  %v173_v8 = vld [vmem:[%s1419_s9 + $0x8] sm:$0xff]  ;;  %v174_v10 = vld [vmem:[%s1419_s9 + $0x10] sm:$0xff]  ;;  %s1272_s4 = sshll.u32 %s1332_s30, 4  ;;  %s1273_s4 = int_to_ptr.vmem [resolvable:$false] %s1272_s4 }
  0x19   : > { %v204_v7 = vld [vmem:[%s1419_s9 + $0x100] sm:$0xff]  ;;  %v205_v9 = vld [vmem:[%s1419_s9 + $0x108] sm:$0xff]  ;;  %1119 = vmatprep.mubr.msk.f32.mxu0 %vm247_vm0, %v172_v6  ;;  %v206_v11 = vld [vmem:[%s1419_s9 + $0x110] sm:$0xff]  ;;  %s1274_s5 = scalar_lea.vmem %s1273_s4, 16384  ;;  %p1275_p0 = scmp.lt.s32.totalorder %s1688_s25, %s1273_s4 }
  0x1a   : > { %1167 = vmatprep.mubr.msk.f32.mxu1 %vm247_vm0, %v204_v7  ;;  %1120 = vmatmul.mubr.msk.f32.vlgmr.msra.gmra.mrb[0].mxu0 %vm247_vm0, %v173_v8  ;;  %v175_v12 = vld [vmem:[%s1419_s9 + $0x18] sm:$0xff]  ;;  %v176_v14 = vld [vmem:[%s1419_s9 + $0x20] sm:$0xff]  ;;  %v177_v16 = vld [vmem:[%s1419_s9 + $0x28] sm:$0xff]  ;;  %p1276_p1 = scmp.lt.s32.totalorder %s1274_s5, %s1268_s29 }
  0x1b   : > { %1168 = vmatmul.mubr.msk.f32.vlgmr.msra.gmra.mrb[0].mxu1 %vm247_vm0, %v205_v9  ;;  %1122 = vmatprep.mubr.msk.f32.mxu0 %vm247_vm0, %v174_v10  ;;  %v207_v13 = vld [vmem:[%s1419_s9 + $0x118] sm:$0xff]  ;;  %v208_v15 = vld [vmem:[%s1419_s9 + $0x120] sm:$0xff]  ;;  %v209_v17 = vld [vmem:[%s1419_s9 + $0x128] sm:$0xff] }
  0x1c   : > { %1170 = vmatprep.mubr.msk.f32.mxu1 %vm247_vm0, %v206_v11  ;;  %v178_v18 = vld [vmem:[%s1419_s9 + $0x30] sm:$0xff]  ;;  %v179_v20 = vld [vmem:[%s1419_s9 + $0x38] sm:$0xff]  ;;  %v180_v22 = vld [vmem:[%s1419_s9 + $0x40] sm:$0xff]  ;;  %p1277_p2 = por %p1276_p1, %p1275_p0 }
  0x1d   : > { %v210_v19 = vld [vmem:[%s1419_s9 + $0x130] sm:$0xff]  ;;  %v211_v21 = vld [vmem:[%s1419_s9 + $0x138] sm:$0xff]  ;;  %v212_v23 = vld [vmem:[%s1419_s9 + $0x140] sm:$0xff] }
  0x1e   : > { %1123 = vmatmul.mubr.msk.f32.gmra.mrb[2].mxu0 %vm247_vm0, %v175_v12  ;;  %v181_v24 = vld [vmem:[%s1419_s9 + $0x48] sm:$0xff]  ;;  %v182_v26 = vld [vmem:[%s1419_s9 + $0x50] sm:$0xff]  ;;  %v183_v28 = vld [vmem:[%s1419_s9 + $0x58] sm:$0xff]  ;;  %p1278_p3 = pnand %p1277_p2, %p1271_p13 }
  0x1f   : > { %1171 = vmatmul.mubr.msk.f32.gmra.mrb[2].mxu1 %vm247_vm0, %v207_v13  ;;  %1125 = vmatprep.mubr.msk.f32.mxu0 %vm247_vm0, %v176_v14  ;;  %v213_v25 = vld [vmem:[%s1419_s9 + $0x148] sm:$0xff]  ;;  %v214_v27 = vld [vmem:[%s1419_s9 + $0x150] sm:$0xff]  ;;  %v215_v29 = vld [vmem:[%s1419_s9 + $0x158] sm:$0xff] }
  0x20   : > { %1173 = vmatprep.mubr.msk.f32.mxu1 %vm247_vm0, %v208_v15  ;;  %v184_v30 = vld [vmem:[%s1419_s9 + $0x60] sm:$0xff]  ;;  %v185_v32 = vld [vmem:[%s1419_s9 + $0x68] sm:$0xff]  ;;  %v186_v34 = vld [vmem:[%s1419_s9 + $0x70] sm:$0xff] }
  0x21   : > { %v216_v31 = vld [vmem:[%s1419_s9 + $0x160] sm:$0xff]  ;;  %v217_v33 = vld [vmem:[%s1419_s9 + $0x168] sm:$0xff]  ;;  %v218_v35 = vld [vmem:[%s1419_s9 + $0x170] sm:$0xff] }
  0x22   : > { %1126 = vmatmul.mubr.msk.f32.gmra.mrb[4].mxu0 %vm247_vm0, %v177_v16  ;;  %v187_v36 = vld [vmem:[%s1419_s9 + $0x78] sm:$0xff]  ;;  %v188_v38 = vld [vmem:[%s1419_s9 + $0x80] sm:$0xff]  ;;  %v189_v40 = vld [vmem:[%s1419_s9 + $0x88] sm:$0xff] }
  0x23   : > { %1174 = vmatmul.mubr.msk.f32.gmra.mrb[4].mxu1 %vm247_vm0, %v209_v17  ;;  %1128 = vmatprep.mubr.msk.f32.mxu0 %vm247_vm0, %v178_v18  ;;  %v219_v37 = vld [vmem:[%s1419_s9 + $0x178] sm:$0xff]  ;;  %v220_v39 = vld [vmem:[%s1419_s9 + $0x180] sm:$0xff]  ;;  %v221_v41 = vld [vmem:[%s1419_s9 + $0x188] sm:$0xff] }
  0x24   : > { %1176 = vmatprep.mubr.msk.f32.mxu1 %vm247_vm0, %v210_v19  ;;  %v190_v42 = vld [vmem:[%s1419_s9 + $0x90] sm:$0xff]  ;;  %v191_v44 = vld [vmem:[%s1419_s9 + $0x98] sm:$0xff]  ;;  %v192_v46 = vld [vmem:[%s1419_s9 + $0xa0] sm:$0xff] }
  0x25   : > { %v222_v43 = vld [vmem:[%s1419_s9 + $0x190] sm:$0xff]  ;;  %v223_v45 = vld [vmem:[%s1419_s9 + $0x198] sm:$0xff]  ;;  %v224_v47 = vld [vmem:[%s1419_s9 + $0x1a0] sm:$0xff] }
  0x26   : > { %1129 = vmatmul.mubr.msk.f32.gmra.mrb[6].mxu0 %vm247_vm0, %v179_v20  ;;  %v193_v48 = vld [vmem:[%s1419_s9 + $0xa8] sm:$0xff]  ;;  %v194_v50 = vld [vmem:[%s1419_s9 + $0xb0] sm:$0xff]  ;;  %v195_v52 = vld [vmem:[%s1419_s9 + $0xb8] sm:$0xff] }
  0x27   : > { %1177 = vmatmul.mubr.msk.f32.gmra.mrb[6].mxu1 %vm247_vm0, %v211_v21  ;;  %1131 = vmatprep.mubr.msk.f32.mxu0 %vm247_vm0, %v180_v22  ;;  %v225_v49 = vld [vmem:[%s1419_s9 + $0x1a8] sm:$0xff]  ;;  %v226_v51 = vld [vmem:[%s1419_s9 + $0x1b0] sm:$0xff]  ;;  %v227_v53 = vld [vmem:[%s1419_s9 + $0x1b8] sm:$0xff] }
  0x28   : > { %1179 = vmatprep.mubr.msk.f32.mxu1 %vm247_vm0, %v212_v23  ;;  %v196_v54 = vld [vmem:[%s1419_s9 + $0xc0] sm:$0xff]  ;;  %v197_v56 = vld [vmem:[%s1419_s9 + $0xc8] sm:$0xff]  ;;  %v198_v58 = vld [vmem:[%s1419_s9 + $0xd0] sm:$0xff] }
  0x29   : > { %v228_v55 = vld [vmem:[%s1419_s9 + $0x1c0] sm:$0xff]  ;;  %v229_v57 = vld [vmem:[%s1419_s9 + $0x1c8] sm:$0xff]  ;;  %v230_v59 = vld [vmem:[%s1419_s9 + $0x1d0] sm:$0xff] }
  0x2a   : > { %1132 = vmatmul.mubr.msk.f32.gmra.mrb[8].mxu0 %vm247_vm0, %v181_v24  ;;  %v199_v60 = vld [vmem:[%s1419_s9 + $0xd8] sm:$0xff]  ;;  %v200_v62 = vld [vmem:[%s1419_s9 + $0xe0] sm:$0xff]  ;;  %v201_v0 = vld [vmem:[%s1419_s9 + $0xe8] sm:$0xff] }
  0x2b   : > { %1180 = vmatmul.mubr.msk.f32.gmra.mrb[8].mxu1 %vm247_vm0, %v213_v25  ;;  %1134 = vmatprep.mubr.msk.f32.mxu0 %vm247_vm0, %v182_v26  ;;  %v231_v61 = vld [vmem:[%s1419_s9 + $0x1d8] sm:$0xff]  ;;  %v232_v63 = vld [vmem:[%s1419_s9 + $0x1e0] sm:$0xff]  ;;  %v233_v1 = vld [vmem:[%s1419_s9 + $0x1e8] sm:$0xff] }
  0x2c   : > { %1182 = vmatprep.mubr.msk.f32.mxu1 %vm247_vm0, %v214_v27  ;;  %v202_v2 = vld [vmem:[%s1419_s9 + $0xf0] sm:$0xff]  ;;  %v203_v4 = vld [vmem:[%s1419_s9 + $0xf8] sm:$0xff]  ;;  %v1555_v6 = vld [vmem:[%s1741_s2] ss:$0 sm:$0xff] }
  0x2d   : > { %v234_v3 = vld [vmem:[%s1419_s9 + $0x1f0] sm:$0xff]  ;;  %v235_v5 = vld [vmem:[%s1419_s9 + $0x1f8] sm:$0xff] }
  0x2e   : > { %1135 = vmatmul.mubr.msk.f32.gmra.mrb[10].mxu0 %vm247_vm0, %v183_v28 }
  0x2f   : > { %1183 = vmatmul.mubr.msk.f32.gmra.mrb[10].mxu1 %vm247_vm0, %v215_v29  ;;  %1137 = vmatprep.mubr.msk.f32.mxu0 %vm247_vm0, %v184_v30 }
  0x30   : > { %1185 = vmatprep.mubr.msk.f32.mxu1 %vm247_vm0, %v216_v31 }
  0x32   : > { %1138 = vmatmul.mubr.msk.f32.gmra.mrb[12].mxu0 %vm247_vm0, %v185_v32 }
  0x33   : > { %1186 = vmatmul.mubr.msk.f32.gmra.mrb[12].mxu1 %vm247_vm0, %v217_v33  ;;  %1140 = vmatprep.mubr.msk.f32.mxu0 %vm247_vm0, %v186_v34 }
  0x34   : > { %1188 = vmatprep.mubr.msk.f32.mxu1 %vm247_vm0, %v218_v35 }
  0x36   : > { %1141 = vmatmul.mubr.msk.f32.gmra.mrb[14].mxu0 %vm247_vm0, %v187_v36 }
  0x37   : > { %1189 = vmatmul.mubr.msk.f32.gmra.mrb[14].mxu1 %vm247_vm0, %v219_v37  ;;  %1143 = vmatprep.mubr.msk.f32.mxu0 %vm247_vm0, %v188_v38 }
  0x38   : > { %1191 = vmatprep.mubr.msk.f32.mxu1 %vm247_vm0, %v220_v39 }
  0x3a   : > { %1144 = vmatmul.mubr.msk.f32.gmra.mrb[16].mxu0 %vm247_vm0, %v189_v40 }
  0x3b   : > { %1192 = vmatmul.mubr.msk.f32.gmra.mrb[16].mxu1 %vm247_vm0, %v221_v41  ;;  %1146 = vmatprep.mubr.msk.f32.mxu0 %vm247_vm0, %v190_v42 }
  0x3c   : > { %1194 = vmatprep.mubr.msk.f32.mxu1 %vm247_vm0, %v222_v43 }
  0x3e   : > { %1147 = vmatmul.mubr.msk.f32.gmra.mrb[18].mxu0 %vm247_vm0, %v191_v44 }
  0x3f   : > { %1195 = vmatmul.mubr.msk.f32.gmra.mrb[18].mxu1 %vm247_vm0, %v223_v45  ;;  %1149 = vmatprep.mubr.msk.f32.mxu0 %vm247_vm0, %v192_v46 }
  0x40   : > { %1197 = vmatprep.mubr.msk.f32.mxu1 %vm247_vm0, %v224_v47 }
  0x42   : > { %1150 = vmatmul.mubr.msk.f32.gmra.mrb[20].mxu0 %vm247_vm0, %v193_v48 }
  0x43   : > { %1198 = vmatmul.mubr.msk.f32.gmra.mrb[20].mxu1 %vm247_vm0, %v225_v49  ;;  %1152 = vmatprep.mubr.msk.f32.mxu0 %vm247_vm0, %v194_v50 }
  0x44   : > { %1200 = vmatprep.mubr.msk.f32.mxu1 %vm247_vm0, %v226_v51 }
  0x46   : > { %1153 = vmatmul.mubr.msk.f32.gmra.mrb[22].mxu0 %vm247_vm0, %v195_v52 }
  0x47   : > { %1201 = vmatmul.mubr.msk.f32.gmra.mrb[22].mxu1 %vm247_vm0, %v227_v53  ;;  %1155 = vmatprep.mubr.msk.f32.mxu0 %vm247_vm0, %v196_v54 }
  0x48   : > { %1203 = vmatprep.mubr.msk.f32.mxu1 %vm247_vm0, %v228_v55 }
  0x4a   : > { %1156 = vmatmul.mubr.msk.f32.gmra.mrb[24].mxu0 %vm247_vm0, %v197_v56 }
  0x4b   : > { %1204 = vmatmul.mubr.msk.f32.gmra.mrb[24].mxu1 %vm247_vm0, %v229_v57  ;;  %1158 = vmatprep.mubr.msk.f32.mxu0 %vm247_vm0, %v198_v58 }
  0x4c   : > { %1206 = vmatprep.mubr.msk.f32.mxu1 %vm247_vm0, %v230_v59 }
  0x4e   : > { %1159 = vmatmul.mubr.msk.f32.gmra.mrb[26].mxu0 %vm247_vm0, %v199_v60 }
  0x4f   : > { %1207 = vmatmul.mubr.msk.f32.gmra.mrb[26].mxu1 %vm247_vm0, %v231_v61  ;;  %1161 = vmatprep.mubr.msk.f32.mxu0 %vm247_vm0, %v200_v62 }
  0x50   : > { %1209 = vmatprep.mubr.msk.f32.mxu1 %vm247_vm0, %v232_v63 }
  0x52   : > { %1162 = vmatmul.mubr.msk.f32.gmra.mrb[28].mxu0 %vm247_vm0, %v201_v0 }
  0x53   : > { %1210 = vmatmul.mubr.msk.f32.gmra.mrb[28].mxu1 %vm247_vm0, %v233_v1  ;;  %1164 = vmatprep.mubr.msk.f32.mxu0 %vm247_vm0, %v202_v2 }
  0x54   : > { %1212 = vmatprep.mubr.msk.f32.mxu1 %vm247_vm0, %v234_v3 }
  0x56   : > { %1165 = vmatmul.mubr.msk.f32.gmra.mrb[30].mxu0 %vm247_vm0, %v203_v4 }
  0x57   : > { %1213 = vmatmul.mubr.msk.f32.gmra.mrb[30].mxu1 %vm247_vm0, %v235_v5 }
  0xed   : > { %v1121_v7 = vpop.f32.mrb[0].mxu0 }
  0xee   : > { %v1169_v8 = vpop.f32.mrb[0].mxu1  ;;  %v512_v9 = vadd.f32 %v1121_v7, %v1555_v6  ;;  %v506_v11 = vpop.f32.mrb[1].mxu0 }
  0xef   : > { %v672_v10 = vadd.f32 %v1169_v8, %v1555_v6  ;;  %v666_v12 = vpop.f32.mrb[1].mxu1  ;;  %v507_v13 = vadd.f32 %v1555_v6, %v506_v11 }
  0xf0   : > { %v667_v14 = vadd.f32 %v1555_v6, %v666_v12  ;;  %826 = vst [vmem:[%s1561_s20 + $0x8] sm:$0xff] %v512_v9 }
  0xf1   : > { %858 = vst [vmem:[%s1561_s20 + $0x108] sm:$0xff] %v672_v10  ;;  %825 = vst [vmem:[%s1561_s20] sm:$0xff] %v507_v13  ;;  %v1124_v15 = vpop.f32.mrb[2].mxu0 }
  0xf2   : > { %857 = vst [vmem:[%s1561_s20 + $0x100] sm:$0xff] %v667_v14  ;;  %v1172_v16 = vpop.f32.mrb[2].mxu1  ;;  %v522_v17 = vadd.f32 %v1124_v15, %v1555_v6  ;;  %v516_v19 = vpop.f32.mrb[3].mxu0 }
  0xf3   : > { %v682_v18 = vadd.f32 %v1172_v16, %v1555_v6  ;;  %v676_v20 = vpop.f32.mrb[3].mxu1  ;;  %v517_v21 = vadd.f32 %v1555_v6, %v516_v19 }
  0xf4   : > { %v677_v22 = vadd.f32 %v1555_v6, %v676_v20  ;;  %828 = vst [vmem:[%s1561_s20 + $0x18] sm:$0xff] %v522_v17 }
  0xf5   : > { %860 = vst [vmem:[%s1561_s20 + $0x118] sm:$0xff] %v682_v18  ;;  %827 = vst [vmem:[%s1561_s20 + $0x10] sm:$0xff] %v517_v21  ;;  %v1127_v23 = vpop.f32.mrb[4].mxu0 }
  0xf6   : > { %859 = vst [vmem:[%s1561_s20 + $0x110] sm:$0xff] %v677_v22  ;;  %v1175_v24 = vpop.f32.mrb[4].mxu1  ;;  %v532_v25 = vadd.f32 %v1127_v23, %v1555_v6  ;;  %v526_v27 = vpop.f32.mrb[5].mxu0 }
  0xf7   : > { %v692_v26 = vadd.f32 %v1175_v24, %v1555_v6  ;;  %v686_v28 = vpop.f32.mrb[5].mxu1  ;;  %v527_v29 = vadd.f32 %v1555_v6, %v526_v27 }
  0xf8   : > { %v687_v30 = vadd.f32 %v1555_v6, %v686_v28  ;;  %830 = vst [vmem:[%s1561_s20 + $0x28] sm:$0xff] %v532_v25 }
  0xf9   : > { %862 = vst [vmem:[%s1561_s20 + $0x128] sm:$0xff] %v692_v26  ;;  %829 = vst [vmem:[%s1561_s20 + $0x20] sm:$0xff] %v527_v29  ;;  %v1130_v31 = vpop.f32.mrb[6].mxu0 }
  0xfa   : > { %861 = vst [vmem:[%s1561_s20 + $0x120] sm:$0xff] %v687_v30  ;;  %v1178_v32 = vpop.f32.mrb[6].mxu1  ;;  %v542_v33 = vadd.f32 %v1130_v31, %v1555_v6  ;;  %v536_v35 = vpop.f32.mrb[7].mxu0 }
  0xfb   : > { %v702_v34 = vadd.f32 %v1178_v32, %v1555_v6  ;;  %v696_v36 = vpop.f32.mrb[7].mxu1  ;;  %v537_v37 = vadd.f32 %v1555_v6, %v536_v35 }
  0xfc   : > { %v697_v38 = vadd.f32 %v1555_v6, %v696_v36  ;;  %832 = vst [vmem:[%s1561_s20 + $0x38] sm:$0xff] %v542_v33 }
  0xfd   : > { %864 = vst [vmem:[%s1561_s20 + $0x138] sm:$0xff] %v702_v34  ;;  %831 = vst [vmem:[%s1561_s20 + $0x30] sm:$0xff] %v537_v37  ;;  %v1133_v39 = vpop.f32.mrb[8].mxu0 }
  0xfe   : > { %863 = vst [vmem:[%s1561_s20 + $0x130] sm:$0xff] %v697_v38  ;;  %v1181_v40 = vpop.f32.mrb[8].mxu1  ;;  %v552_v41 = vadd.f32 %v1133_v39, %v1555_v6  ;;  %v546_v43 = vpop.f32.mrb[9].mxu0 }
  0xff   : > { %v712_v42 = vadd.f32 %v1181_v40, %v1555_v6  ;;  %v706_v44 = vpop.f32.mrb[9].mxu1  ;;  %v547_v45 = vadd.f32 %v1555_v6, %v546_v43 }
 0x100   : > { %v707_v46 = vadd.f32 %v1555_v6, %v706_v44  ;;  %834 = vst [vmem:[%s1561_s20 + $0x48] sm:$0xff] %v552_v41 }
 0x101   : > { %866 = vst [vmem:[%s1561_s20 + $0x148] sm:$0xff] %v712_v42  ;;  %833 = vst [vmem:[%s1561_s20 + $0x40] sm:$0xff] %v547_v45  ;;  %v1136_v47 = vpop.f32.mrb[10].mxu0 }
 0x102   : > { %865 = vst [vmem:[%s1561_s20 + $0x140] sm:$0xff] %v707_v46  ;;  %v1184_v48 = vpop.f32.mrb[10].mxu1  ;;  %v562_v49 = vadd.f32 %v1136_v47, %v1555_v6  ;;  %v556_v51 = vpop.f32.mrb[11].mxu0 }
 0x103   : > { %v722_v50 = vadd.f32 %v1184_v48, %v1555_v6  ;;  %v716_v52 = vpop.f32.mrb[11].mxu1  ;;  %v557_v53 = vadd.f32 %v1555_v6, %v556_v51 }
 0x104   : > { %v717_v54 = vadd.f32 %v1555_v6, %v716_v52  ;;  %836 = vst [vmem:[%s1561_s20 + $0x58] sm:$0xff] %v562_v49 }
 0x105   : > { %868 = vst [vmem:[%s1561_s20 + $0x158] sm:$0xff] %v722_v50  ;;  %835 = vst [vmem:[%s1561_s20 + $0x50] sm:$0xff] %v557_v53  ;;  %v1139_v55 = vpop.f32.mrb[12].mxu0 }
 0x106   : > { %867 = vst [vmem:[%s1561_s20 + $0x150] sm:$0xff] %v717_v54  ;;  %v1187_v56 = vpop.f32.mrb[12].mxu1  ;;  %v572_v57 = vadd.f32 %v1139_v55, %v1555_v6  ;;  %v566_v59 = vpop.f32.mrb[13].mxu0 }
 0x107   : > { %v732_v58 = vadd.f32 %v1187_v56, %v1555_v6  ;;  %v726_v60 = vpop.f32.mrb[13].mxu1  ;;  %v567_v61 = vadd.f32 %v1555_v6, %v566_v59 }
 0x108   : > { %v727_v62 = vadd.f32 %v1555_v6, %v726_v60  ;;  %838 = vst [vmem:[%s1561_s20 + $0x68] sm:$0xff] %v572_v57 }
 0x109   : > { %870 = vst [vmem:[%s1561_s20 + $0x168] sm:$0xff] %v732_v58  ;;  %837 = vst [vmem:[%s1561_s20 + $0x60] sm:$0xff] %v567_v61  ;;  %v1142_v63 = vpop.f32.mrb[14].mxu0 }
 0x10a   : > { %869 = vst [vmem:[%s1561_s20 + $0x160] sm:$0xff] %v727_v62  ;;  %v1190_v0 = vpop.f32.mrb[14].mxu1  ;;  %v582_v1 = vadd.f32 %v1142_v63, %v1555_v6  ;;  %v576_v3 = vpop.f32.mrb[15].mxu0 }
 0x10b   : > { %v742_v2 = vadd.f32 %v1190_v0, %v1555_v6  ;;  %v736_v4 = vpop.f32.mrb[15].mxu1  ;;  %v577_v5 = vadd.f32 %v1555_v6, %v576_v3 }
 0x10c   : > { %v737_v7 = vadd.f32 %v1555_v6, %v736_v4  ;;  %840 = vst [vmem:[%s1561_s20 + $0x78] sm:$0xff] %v582_v1 }
 0x10d   : > { %872 = vst [vmem:[%s1561_s20 + $0x178] sm:$0xff] %v742_v2  ;;  %839 = vst [vmem:[%s1561_s20 + $0x70] sm:$0xff] %v577_v5  ;;  %v1145_v8 = vpop.f32.mrb[16].mxu0 }
 0x10e   : > { %871 = vst [vmem:[%s1561_s20 + $0x170] sm:$0xff] %v737_v7  ;;  %v1193_v9 = vpop.f32.mrb[16].mxu1  ;;  %v592_v10 = vadd.f32 %v1145_v8, %v1555_v6  ;;  %v586_v12 = vpop.f32.mrb[17].mxu0 }
 0x10f   : > { %v752_v11 = vadd.f32 %v1193_v9, %v1555_v6  ;;  %v746_v13 = vpop.f32.mrb[17].mxu1  ;;  %v587_v14 = vadd.f32 %v1555_v6, %v586_v12 }
 0x110   : > { %v747_v15 = vadd.f32 %v1555_v6, %v746_v13  ;;  %842 = vst [vmem:[%s1561_s20 + $0x88] sm:$0xff] %v592_v10 }
 0x111   : > { %874 = vst [vmem:[%s1561_s20 + $0x188] sm:$0xff] %v752_v11  ;;  %841 = vst [vmem:[%s1561_s20 + $0x80] sm:$0xff] %v587_v14  ;;  %v1148_v16 = vpop.f32.mrb[18].mxu0 }
 0x112   : > { %873 = vst [vmem:[%s1561_s20 + $0x180] sm:$0xff] %v747_v15  ;;  %v1196_v17 = vpop.f32.mrb[18].mxu1  ;;  %v602_v18 = vadd.f32 %v1148_v16, %v1555_v6  ;;  %v596_v20 = vpop.f32.mrb[19].mxu0 }
 0x113   : > { %v762_v19 = vadd.f32 %v1196_v17, %v1555_v6  ;;  %v756_v21 = vpop.f32.mrb[19].mxu1  ;;  %v597_v22 = vadd.f32 %v1555_v6, %v596_v20 }
 0x114   : > { %v757_v23 = vadd.f32 %v1555_v6, %v756_v21  ;;  %844 = vst [vmem:[%s1561_s20 + $0x98] sm:$0xff] %v602_v18 }
 0x115   : > { %876 = vst [vmem:[%s1561_s20 + $0x198] sm:$0xff] %v762_v19  ;;  %843 = vst [vmem:[%s1561_s20 + $0x90] sm:$0xff] %v597_v22  ;;  %v1151_v24 = vpop.f32.mrb[20].mxu0 }
 0x116   : > { %875 = vst [vmem:[%s1561_s20 + $0x190] sm:$0xff] %v757_v23  ;;  %v1199_v25 = vpop.f32.mrb[20].mxu1  ;;  %v612_v26 = vadd.f32 %v1151_v24, %v1555_v6  ;;  %v606_v28 = vpop.f32.mrb[21].mxu0 }
 0x117   : > { %v772_v27 = vadd.f32 %v1199_v25, %v1555_v6  ;;  %v766_v29 = vpop.f32.mrb[21].mxu1  ;;  %v607_v30 = vadd.f32 %v1555_v6, %v606_v28 }
 0x118   : > { %v767_v31 = vadd.f32 %v1555_v6, %v766_v29  ;;  %846 = vst [vmem:[%s1561_s20 + $0xa8] sm:$0xff] %v612_v26 }
 0x119   : > { %878 = vst [vmem:[%s1561_s20 + $0x1a8] sm:$0xff] %v772_v27  ;;  %845 = vst [vmem:[%s1561_s20 + $0xa0] sm:$0xff] %v607_v30  ;;  %v1154_v32 = vpop.f32.mrb[22].mxu0 }
 0x11a   : > { %877 = vst [vmem:[%s1561_s20 + $0x1a0] sm:$0xff] %v767_v31  ;;  %v1202_v33 = vpop.f32.mrb[22].mxu1  ;;  %v622_v34 = vadd.f32 %v1154_v32, %v1555_v6  ;;  %v616_v36 = vpop.f32.mrb[23].mxu0 }
 0x11b   : > { %v782_v35 = vadd.f32 %v1202_v33, %v1555_v6  ;;  %v776_v37 = vpop.f32.mrb[23].mxu1  ;;  %v617_v38 = vadd.f32 %v1555_v6, %v616_v36 }
 0x11c   : > { %v777_v39 = vadd.f32 %v1555_v6, %v776_v37  ;;  %848 = vst [vmem:[%s1561_s20 + $0xb8] sm:$0xff] %v622_v34 }
 0x11d   : > { %880 = vst [vmem:[%s1561_s20 + $0x1b8] sm:$0xff] %v782_v35  ;;  %847 = vst [vmem:[%s1561_s20 + $0xb0] sm:$0xff] %v617_v38  ;;  %v1157_v40 = vpop.f32.mrb[24].mxu0 }
 0x11e   : > { %879 = vst [vmem:[%s1561_s20 + $0x1b0] sm:$0xff] %v777_v39  ;;  %v1205_v41 = vpop.f32.mrb[24].mxu1  ;;  %v632_v42 = vadd.f32 %v1157_v40, %v1555_v6  ;;  %v626_v44 = vpop.f32.mrb[25].mxu0 }
 0x11f   : > { %v792_v43 = vadd.f32 %v1205_v41, %v1555_v6  ;;  %v786_v45 = vpop.f32.mrb[25].mxu1  ;;  %v627_v46 = vadd.f32 %v1555_v6, %v626_v44 }
 0x120   : > { %v787_v47 = vadd.f32 %v1555_v6, %v786_v45  ;;  %850 = vst [vmem:[%s1561_s20 + $0xc8] sm:$0xff] %v632_v42 }
 0x121   : > { %882 = vst [vmem:[%s1561_s20 + $0x1c8] sm:$0xff] %v792_v43  ;;  %849 = vst [vmem:[%s1561_s20 + $0xc0] sm:$0xff] %v627_v46  ;;  %v1160_v48 = vpop.f32.mrb[26].mxu0 }
 0x122   : > { %881 = vst [vmem:[%s1561_s20 + $0x1c0] sm:$0xff] %v787_v47  ;;  %v1208_v49 = vpop.f32.mrb[26].mxu1  ;;  %v642_v50 = vadd.f32 %v1160_v48, %v1555_v6  ;;  %v636_v52 = vpop.f32.mrb[27].mxu0 }
 0x123   : > { %v802_v51 = vadd.f32 %v1208_v49, %v1555_v6  ;;  %v796_v53 = vpop.f32.mrb[27].mxu1  ;;  %v637_v54 = vadd.f32 %v1555_v6, %v636_v52 }
 0x124   : > { %v797_v55 = vadd.f32 %v1555_v6, %v796_v53  ;;  %852 = vst [vmem:[%s1561_s20 + $0xd8] sm:$0xff] %v642_v50 }
 0x125   : > { %884 = vst [vmem:[%s1561_s20 + $0x1d8] sm:$0xff] %v802_v51  ;;  %851 = vst [vmem:[%s1561_s20 + $0xd0] sm:$0xff] %v637_v54  ;;  %v1163_v56 = vpop.f32.mrb[28].mxu0 }
 0x126   : > { %883 = vst [vmem:[%s1561_s20 + $0x1d0] sm:$0xff] %v797_v55  ;;  %v1211_v57 = vpop.f32.mrb[28].mxu1  ;;  %v652_v58 = vadd.f32 %v1163_v56, %v1555_v6  ;;  %v646_v60 = vpop.f32.mrb[29].mxu0 }
 0x127   : > { %v812_v59 = vadd.f32 %v1211_v57, %v1555_v6  ;;  %v806_v61 = vpop.f32.mrb[29].mxu1  ;;  %v647_v62 = vadd.f32 %v1555_v6, %v646_v60 }
 0x128   : > { %v807_v63 = vadd.f32 %v1555_v6, %v806_v61  ;;  %854 = vst [vmem:[%s1561_s20 + $0xe8] sm:$0xff] %v652_v58 }
 0x129   : > { %886 = vst [vmem:[%s1561_s20 + $0x1e8] sm:$0xff] %v812_v59  ;;  %853 = vst [vmem:[%s1561_s20 + $0xe0] sm:$0xff] %v647_v62  ;;  %v1166_v0 = vpop.f32.mrb[30].mxu0 }
 0x12a   : > { %885 = vst [vmem:[%s1561_s20 + $0x1e0] sm:$0xff] %v807_v63  ;;  %v1214_v1 = vpop.f32.mrb[30].mxu1  ;;  %v662_v2 = vadd.f32 %v1166_v0, %v1555_v6  ;;  %v656_v4 = vpop.f32.mrb[31].mxu0 }
 0x12b   : > { %v822_v3 = vadd.f32 %v1214_v1, %v1555_v6  ;;  %v816_v5 = vpop.f32.mrb[31].mxu1  ;;  %v657_v7 = vadd.f32 %v1555_v6, %v656_v4 }
 0x12c   : > { %v817_v8 = vadd.f32 %v1555_v6, %v816_v5  ;;  %856 = vst [vmem:[%s1561_s20 + $0xf8] sm:$0xff] %v662_v2 }
 0x12d   : > { %888 = vst [vmem:[%s1561_s20 + $0x1f8] sm:$0xff] %v822_v3  ;;  %855 = vst [vmem:[%s1561_s20 + $0xf0] sm:$0xff] %v657_v7 }
 0x12e   : > { %887 = vst [vmem:[%s1561_s20 + $0x1f0] sm:$0xff] %v817_v8 }
 0x12f   : > { %1281 = shalt.err (!%p1278_p3)
}
 0x130   : > { %s1282_s6 = scalar_lea.hbm %s1686_s27, 8192  ;;  %s1286_s9 = scalar_lea.hbm %s1742_s3, 16384 }
 0x131   : > { %p1283_p4 = scmp.ne.s32.totalorder %s1686_s27, %s1282_s6  ;;  %p1287_p9 = scmp.lt.u32.totalorder %s1686_s27, %s1742_s3 }
 0x132   : > { %p1288_p10 = scmp.lt.u32.totalorder %s1286_s9, %s1282_s6  ;;  %p1290_p12 = scmp.lt.u32.totalorder %s1282_s6, %s1686_s27 }
 0x133   : > { %p1284_p7 = pnand %p1283_p4, %p1393_p5 }
 0x134   : > { %p1289_p11 = por %p1288_p10, %p1287_p9 }
 0x135   : > { %p1285_p8 = pneg %p1284_p7 }
 0x136   : > { %p1291_p13 = por %p1290_p12, %p1289_p11 }
 0x138   : > { %p1292_p0 = pnand %p1291_p13, %p1285_p8 }
 0x13a   : > { %1295 = shalt.err (!%p1292_p0)
}
 0x13b   : > { %s1333_s17 = smov 128   ;;  %s1334_s19 = smov 8  }
 0x13c   : > { %1227 = dma.vmem_to_hbm [thread:$0]  (%p1393_p5), %s1688_s25, 8192, %s1686_s27, %s1698_s28, %s1333_s17, %s1333_s17, %s1334_s19  }
 0x13d PF: > { %p1233_p1 = scmp.ge.s32.totalorder %s1330_s15, 2  ;;  %s918_s20 = sand.u32 1, %s1318_s12  }
 0x13e   : > { %s919_s24 = scalar_lea.sflag [#allocation3], %s918_s20 }
 0x13f   : > { %p1230_p2 = pnand %p1233_p1, %p1397_p6 }
 0x141   : > { %1313 = dma.done.wait (!%p1230_p2), %s919_s24, 8192  }
 0x142   : > { %1315 = vsyncadd (!%p1230_p2), %s919_s24, 4294959104  ;;  %p13_p3 = scmp.ge.s32.totalorder %s1380_s18, 4   ;;  %s1745_s12 = smov %s1322_s13 }
 0x143   : > { %s1746_s13 = smov %s1326_s14  ;;  %s1747_s14 = smov %s1391_s21 }
 0x144   : > { %s1748_s15 = smov %s1380_s18  ;;  %15 = sbr.rel (!%p13_p3) target bundleno = 3 (0x3), region = 67 }
 0x14b   :  { %924 = vsyncpa [#allocation3], 1 }
 0x14c   :  { %926 = vsyncpa [#allocation3 + $0x1], 1 }

</bundles_post_ra>
